<compile_context>
chip_gen: v7x
topology: tpu7x:2x2x1
jax: 0.10.0
libtpu: 0.0.40
codegen_flags: <defaults>
</compile_context>

<pallas_src>
import functools

import jax
import jax.numpy as jnp
from jax.experimental import pallas as pl
from jax.experimental.pallas import tpu as pltpu


# ------------------------------ device helpers ------------------------------

def _device_kind():
    try:
        return jax.devices()[0].device_kind.lower()
    except Exception:
        return ""


def _is_v5e():
    k = _device_kind()
    return ("v5 lite" in k) or ("v5e" in k) or ("v5lite" in k)


def _vmem_limit_bytes():
    k = _device_kind()
    if ("v5" in k) or ("v6" in k):
        return 64 * 1024 * 1024          # 128 MiB physical VMEM on v5e / v6e
    return 40 * 1024 * 1024              # conservative on v7x (64 MiB physical)


def _pick_divisor(n, target, align=1):
    """Largest t <= target with n % t == 0 and t % align == 0 (fallback: n)."""
    if n <= target:
        return n
    for t in range(target, 0, -1):
        if n % t == 0 and t % align == 0:
            return t
    return n


# ----------------------------- Pallas kernels ------------------------------

def _regress_head_kernel(x_ref, halo_ref, w1_ref, b1_ref, w2_ref, b2_ref,
                         w3_ref, b3_ref, o_ref, z1p_ref, *, pad, wide_k):
    """Fused regress head on one row-tile of one image.

    x_ref   : (th, wr, Cin)      bf16  main rows of the resized feature map
    halo_ref: (2, wr, Cin)       bf16  row above / row below the tile
    w1      : (Cin, 256) bf16, b1: (1, 256) f32     -- 1x1 conv + ReLU
    w2      : (3, 768, 128) bf16, b2: (1, 128) f32  -- 3x3 conv pad=1 + ReLU
                                                       (w2[dh] = concat_dw w2[dh,dw])
    w3      : (128, 128) bf16, b3: (1, 128) f32     -- 1x1 conv
    o_ref   : (th, wr, 128)      bf16
    z1p_ref : (th+2, wr+2, 256)  f32 VMEM scratch (height/width padded intermediate)
    """
    th, wr, cin = x_ref.shape
    c2 = w1_ref.shape[1]
    c3 = w3_ref.shape[1]
    bf16 = jnp.bfloat16
    t = pl.program_id(1)
    nt = pl.num_programs(1)

    # --- 1x1 conv (cin -> c2) + bias + ReLU on the main rows -> padded scratch
    x = x_ref[...].reshape(th * wr, cin)
    z1 = jnp.dot(x, w1_ref[...], preferred_element_type=jnp.float32)
    z1 = jnp.maximum(z1 + b1_ref[...], 0.0)
    z1p_ref[1:th + 1, 1:wr + 1, :] = z1.reshape(th, wr, c2)

    # --- same conv on the two halo rows; rows outside the image are zeroed
    xh = halo_ref[...].reshape(2 * wr, cin)
    zh = jnp.dot(xh, w1_ref[...], preferred_element_type=jnp.float32)
    zh = jnp.maximum(zh + b1_ref[...], 0.0).reshape(2, wr, c2)
    top_ok = (t > 0).astype(jnp.float32)
    bot_ok = (t < nt - 1).astype(jnp.float32)
    z1p_ref[0:1, 1:wr + 1, :] = zh[0:1] * top_ok
    z1p_ref[th + 1:th + 2, 1:wr + 1, :] = zh[1:2] * bot_ok

    # --- zero the width-padding columns (tiny; keeps the scratch carry-free)
    zcol = jnp.zeros((th + 2, 1, c2), jnp.float32)
    z1p_ref[:, 0:1, :] = zcol
    z1p_ref[:, wr + 1:wr + 2, :] = zcol

    # --- rows past the true image extent exist only on the last (padded) tile
    if pad > 0:
        @pl.when(t == nt - 1)
        def _():
            z1p_ref[th - pad + 1:th + 1, 1:wr + 1, :] = jnp.zeros(
                (pad, wr, c2), jnp.float32)

    # --- 3x3 conv (c2 -> c3, pad=1) as shifted MXU dots on the resident scratch
    acc = jnp.zeros((th * wr, c3), jnp.float32)
    for dh in range(3):
        band = z1p_ref[dh:dh + th, :, :].astype(bf16)        # (th, wr+2, c2)
        if wide_k:
            # K=768: concat the 3 width shifts along channels (fills 256-wide MXU).
            patch = jnp.concatenate(
                [band[:, 0:wr, :], band[:, 1:wr + 1, :], band[:, 2:wr + 2, :]],
                axis=-1).reshape(th * wr, 3 * c2)
            acc = acc + jnp.dot(patch, w2_ref[dh],
                                preferred_element_type=jnp.float32)
        else:
            # 9 x K=256 taps (matches v5e's 4x128x128 MXU; skips im2col copies).
            w2d = w2_ref[dh]
            for dw in range(3):
                patch = band[:, dw:dw + wr, :].reshape(th * wr, c2)
                acc = acc + jnp.dot(patch, w2d[dw * c2:(dw + 1) * c2, :],
                                    preferred_element_type=jnp.float32)
    z2 = jnp.maximum(acc + b2_ref[...], 0.0).astype(bf16)

    # --- final 1x1 conv (c3 -> c3) + bias
    out = jnp.dot(z2, w3_ref[...], preferred_element_type=jnp.float32) + b3_ref[...]
    o_ref[...] = out.reshape(th, wr, c3).astype(o_ref.dtype)


def _norm_sum_kernel(*refs):
    """Per-scale L2 normalize -> sum over scales -> final L2 normalize.

    refs[:-1] : S tensors of shape (tile_L, C) (bf16 or f32), one per scale
    refs[-1]  : (tile_L, C) f32 output
    """
    o_ref = refs[-1]
    acc = None
    for r in refs[:-1]:
        x = r[...].astype(jnp.float32)
        ss = jnp.sum(x * x, axis=-1, keepdims=True)
        xn = x * jax.lax.rsqrt(jnp.maximum(ss, 1e-24))   # == x / max(||x||, 1e-12)
        acc = xn if acc is None else acc + xn
    ss = jnp.sum(acc * acc, axis=-1, keepdims=True)
    o_ref[...] = acc * jax.lax.rsqrt(jnp.maximum(ss, 1e-24))


# ----------------------------- Pallas wrappers ------------------------------

def regress_head(fr, params, *, target_pixels=4096, wide_k=None,
                 out_dtype=jnp.bfloat16):
    """Fused regress head. fr: (B, hr, wr, Cin) -> (B, hr, wr, 128) out_dtype."""
    if wide_k is None:
        wide_k = not _is_v5e()
    B, hr, wr, cin = fr.shape
    c2 = params["w1"].shape[1]
    c3 = params["w3"].shape[1]

    # Row tile from a pixel budget; cdiv + last-tile masking avoids the th=1 cliff.
    th = max(1, min(hr, target_pixels // max(wr, 1)))
    nt = pl.cdiv(hr, th)
    hr_pad = nt * th
    pad = hr_pad - hr

    fr = fr.astype(jnp.bfloat16)
    if pad:
        fr = jnp.pad(fr, ((0, 0), (0, pad), (0, 0), (0, 0)))

    # Per-tile halo rows (1 above, 1 below): only 2 rows/tile are duplicated;
    # out-of-image halos are zero and additionally masked in-kernel.
    if nt > 1:
        zrow = jnp.zeros((B, 1, wr, cin), jnp.bfloat16)
        tops = jnp.concatenate(
            [zrow, fr[:, th - 1:(nt - 1) * th:th]], axis=1)        # (B, nt, wr, cin)
        bots = jnp.concatenate(
            [fr[:, th:(nt - 1) * th + 1:th], zrow], axis=1)        # (B, nt, wr, cin)
        halos = jnp.stack([tops, bots], axis=2)                    # (B, nt, 2, wr, cin)
    else:
        halos = jnp.zeros((B, 1, 2, wr, cin), jnp.bfloat16)

    w1 = params["w1"].astype(jnp.bfloat16)                         # (cin, c2)
    b1 = params["b1"].astype(jnp.float32)                          # (1, c2)
    w2 = params["w2"].reshape(3, 3 * c2, c3).astype(jnp.bfloat16)  # (3, 3*c2, c3)
    b2 = params["b2"].astype(jnp.float32)                          # (1, c3)
    w3 = params["w3"].astype(jnp.bfloat16)                         # (c3, c3)
    b3 = params["b3"].astype(jnp.float32)                          # (1, c3)

    flops = 2 * B * hr_pad * wr * (cin * c2 + 9 * c2 * c3 + c3 * c3)
    bytes_accessed = int(
        fr.size * 2 + halos.size * 2
        + B * hr_pad * wr * c3 * jnp.dtype(out_dtype).itemsize
        + (w1.size + w2.size + w3.size) * 2
        + (b1.size + b2.size + b3.size) * 4)

    kernel = functools.partial(_regress_head_kernel, pad=pad, wide_k=wide_k)
    out = pl.pallas_call(
        kernel,
        out_shape=jax.ShapeDtypeStruct((B, hr_pad, wr, c3), out_dtype),
        grid=(B, nt),
        in_specs=[
            pl.BlockSpec((None, th, wr, cin), lambda b, t: (b, t, 0, 0)),
            pl.BlockSpec((None, None, 2, wr, cin), lambda b, t: (b, t, 0, 0, 0)),
            pl.BlockSpec((cin, c2), lambda b, t: (0, 0)),
            pl.BlockSpec((1, c2), lambda b, t: (0, 0)),
            pl.BlockSpec((3, 3 * c2, c3), lambda b, t: (0, 0, 0)),
            pl.BlockSpec((1, c3), lambda b, t: (0, 0)),
            pl.BlockSpec((c3, c3), lambda b, t: (0, 0)),
            pl.BlockSpec((1, c3), lambda b, t: (0, 0)),
        ],
        out_specs=pl.BlockSpec((None, th, wr, c3), lambda b, t: (b, t, 0, 0)),
        scratch_shapes=[pltpu.VMEM((th + 2, wr + 2, c2), jnp.float32)],
        compiler_params=pltpu.CompilerParams(
            dimension_semantics=("parallel", "parallel"),
            vmem_limit_bytes=_vmem_limit_bytes()),
        cost_estimate=pl.CostEstimate(flops=flops, transcendentals=0,
                                      bytes_accessed=bytes_accessed),
    )(fr, halos, w1, b1, w2, b2, w3, b3)
    return out[:, :hr] if pad else out


def norm_sum(descs):
    """descs: list of S tensors (B, L, C) -> (B, L, C) f32."""
    B, L, C = descs[0].shape
    tl = _pick_divisor(L, 2048, align=8)
    return pl.pallas_call(
        _norm_sum_kernel,
        out_shape=jax.ShapeDtypeStruct((B, L, C), jnp.float32),
        grid=(B, L // tl),
        in_specs=[pl.BlockSpec((None, tl, C), lambda b, l: (b, l, 0))
                  for _ in descs],
        out_specs=pl.BlockSpec((None, tl, C), lambda b, l: (b, l, 0)),
        compiler_params=pltpu.CompilerParams(
            dimension_semantics=("parallel", "parallel")),
    )(*descs)


# ------------------------------- JAX glue -----------------------------------

def _interp_matrix(out_size, in_size):
    """Row-interp matrix matching F.interpolate(bilinear, align_corners=False)."""
    if out_size == in_size:
        return jnp.eye(out_size, dtype=jnp.float32)
    scale = in_size / out_size
    src = (jnp.arange(out_size, dtype=jnp.float32) + 0.5) * scale - 0.5
    src = jnp.maximum(src, 0.0)
    i0 = jnp.minimum(jnp.floor(src).astype(jnp.int32), in_size - 1)
    i1 = jnp.minimum(i0 + 1, in_size - 1)
    w1 = src - i0.astype(jnp.float32)
    return (jax.nn.one_hot(i0, in_size, dtype=jnp.float32) * (1.0 - w1)[:, None]
            + jax.nn.one_hot(i1, in_size, dtype=jnp.float32) * w1[:, None])


def bilinear_resize_nhwc(x, out_h, out_w):
    """Separable bilinear resize as two dense matmuls (MXU-friendly, no gathers).

    Runs in x.dtype so bf16 activations never take an f32 HBM round trip.
    """
    B, H, W, C = x.shape
    if out_h == H and out_w == W:
        return x
    mh = _interp_matrix(out_h, H).astype(x.dtype)
    mw = _interp_matrix(out_w, W).astype(x.dtype)
    y = jnp.einsum("oh,bhwc->bowc", mh, x)
    return jnp.einsum("pw,bowc->bopc", mw, y)


def backbone(x_nhwc, params):
    # TODO(synk): build_backbone(cfg) is external/unspecified; substituted with a
    # deterministic stride-4 3x3 conv (+ReLU) producing the 128-channel 'C3' map.
    y = jax.lax.conv_general_dilated(
        x_nhwc, params["bb_w"], window_strides=(4, 4),
        padding=((1, 1), (1, 1)),
        dimension_numbers=("NHWC", "HWIO", "NHWC"))
    return jnp.maximum(y + params["bb_b"], 0.0)


def desc_extractor_forward(images_nchw, params, scales=(0.5, 1.0, 2.0)):
    """DescExtractor.forward: images [B,3,H,W] -> descriptors [B,128,Hc,Wc]."""
    x = jnp.transpose(images_nchw, (0, 2, 3, 1)).astype(jnp.float32)  # NHWC
    feats = backbone(x, params)                                       # (B,Hc,Wc,128)
    B, Hc, Wc, C = feats.shape
    feats_bf16 = feats.astype(jnp.bfloat16)

    descs = []
    for s in scales:
        hr, wr = int(Hc * s), int(Wc * s)
        # TODO(synk): the pre-head resize could be fused into the regress-head kernel
        # as two extra interp-matrix dots; kept as a bf16 XLA matmul here.
        fr = bilinear_resize_nhwc(feats_bf16, hr, wr)                 # bf16
        z = regress_head(fr, params)                                  # bf16, Pallas
        d = bilinear_resize_nhwc(z, Hc, Wc)                           # bf16
        descs.append(d.reshape(B, Hc * Wc, C))

    out = norm_sum(descs).reshape(B, Hc, Wc, C)                       # f32, Pallas
    return jnp.transpose(out, (0, 3, 1, 2))                           # NCHW out


def multiscale_net_v4_forward(images0, images1, params):
    """MultiScaleNetV4.forward descriptor path (results dict)."""
    descs0 = desc_extractor_forward(images0, params)
    descs1 = desc_extractor_forward(images1, params)
    # TODO(synk): MultiDescEvaluator (make_evaluator) loss/distance/similarity and
    # logger updates rely on external code not provided; only `results` computed.
    return dict(descs0=descs0, descs1=descs1)


# --------------------------- pure-JAX f32 reference --------------------------

def reference_desc_extractor(images_nchw, params, scales=(0.5, 1.0, 2.0)):
    """Pure-JAX f32 reference of DescExtractor.forward (tolerance check only)."""
    x = jnp.transpose(images_nchw, (0, 2, 3, 1)).astype(jnp.float32)
    feats = backbone(x, params)
    B, Hc, Wc, C = feats.shape
    descs = []
    for s in scales:
        hr, wr = int(Hc * s), int(Wc * s)
        fr = bilinear_resize_nhwc(feats, hr, wr)
        z1 = jnp.maximum(jnp.einsum("bhwc,cd->bhwd", fr, params["w1"])
                         + params["b1"][0], 0.0)
        z2 = jax.lax.conv_general_dilated(
            z1, params["w2"], (1, 1), ((1, 1), (1, 1)),
            dimension_numbers=("NHWC", "HWIO", "NHWC"))
        z2 = jnp.maximum(z2 + params["b2"][0], 0.0)
        z3 = jnp.einsum("bhwc,cd->bhwd", z2, params["w3"]) + params["b3"][0]
        d = bilinear_resize_nhwc(z3, Hc, Wc)
        d = d / jnp.maximum(
            jnp.sqrt(jnp.sum(d * d, axis=-1, keepdims=True)), 1e-12)
        descs.append(d)
    out = sum(descs)
    out = out / jnp.maximum(
        jnp.sqrt(jnp.sum(out * out, axis=-1, keepdims=True)), 1e-12)
    return jnp.transpose(out, (0, 3, 1, 2))


# ------------------------------ parameters ----------------------------------

def init_params(key):
    ks = jax.random.split(key, 8)
    f32 = jnp.float32
    return {
        # substitute backbone: 3x3 conv, 3->128, stride 4 (HWIO)
        "bb_w": jax.random.normal(ks[0], (3, 3, 3, 128), f32) * 0.2,
        "bb_b": jax.random.normal(ks[1], (128,), f32) * 0.01,
        # regress: Conv2d(128,256,1x1)
        "w1": jax.random.normal(ks[2], (128, 256), f32) / jnp.sqrt(128.0),
        "b1": jax.random.normal(ks[3], (1, 256), f32) * 0.01,
        # regress: Conv2d(256,128,3x3) — HWIO (kh, kw, cin, cout)
        "w2": jax.random.normal(ks[4], (3, 3, 256, 128), f32) / jnp.sqrt(9.0 * 256.0),
        "b2": jax.random.normal(ks[5], (1, 128), f32) * 0.01,
        # regress: Conv2d(128,128,1x1)
        "w3": jax.random.normal(ks[6], (128, 128), f32) / jnp.sqrt(128.0),
        "b3": jax.random.normal(ks[7], (1, 128), f32) * 0.01,
    }


# --------------------------------- main --------------------------------------

if __name__ == "__main__":
    key = jax.random.PRNGKey(0)
    k_img0, k_img1, k_par = jax.random.split(key, 3)

    # images [B, 3, H, W] -> C3 feats [B, 128, 8, 8]; scales (0.5, 1, 2) -> 4/8/16.
    images0 = jax.random.normal(k_img0, (2, 3, 32, 32), jnp.float32)
    images1 = jax.random.normal(k_img1, (2, 3, 32, 32), jnp.float32)
    params = init_params(k_par)

    fwd = jax.jit(lambda a, b: multiscale_net_v4_forward(a, b, params))
    out = fwd(images0, images1)
    jax.block_until_ready(out)

    d0, d1 = out["descs0"], out["descs1"]
    assert d0.shape == (2, 128, 8, 8) and d1.shape == (2, 128, 8, 8)
    assert bool(jnp.all(jnp.isfinite(d0))) and bool(jnp.all(jnp.isfinite(d1)))

    # bf16-vs-f32 tolerance check against a pure-JAX reference (unit-norm outputs).
    ref0 = reference_desc_extractor(images0, params)
    err = float(jnp.max(jnp.abs(d0.astype(jnp.float32) - ref0)))
    assert err < 5e-2, f"max abs err vs f32 reference: {err}"

    print("KERNEL_OK")
</pallas_src>

<mosaic_0001>
module attributes {stable_mosaic.version = 11 : i64} {
  func.func @_regress_head_kernel(%arg0: i32, %arg1: i32, %arg2: memref<1x16x16x128xbf16, #tpu.memory_space<vmem>>, %arg3: memref<1x1x2x16x128xbf16, #tpu.memory_space<vmem>>, %arg4: memref<128x256xbf16, #tpu.memory_space<vmem>>, %arg5: memref<1x256xf32, #tpu.memory_space<vmem>>, %arg6: memref<3x768x128xbf16, #tpu.memory_space<vmem>>, %arg7: memref<1x128xf32, #tpu.memory_space<vmem>>, %arg8: memref<128x128xbf16, #tpu.memory_space<vmem>>, %arg9: memref<1x128xf32, #tpu.memory_space<vmem>>, %arg10: memref<1x16x16x128xbf16, #tpu.memory_space<vmem>>, %arg11: memref<18x18x256xf32, #tpu.memory_space<vmem>>) attributes {dimension_semantics = [#tpu.dimension_semantics<parallel>, #tpu.dimension_semantics<parallel>], iteration_bounds = array<i64: 2, 1>, scalar_prefetch = 0 : i64, scratch_operands = 1 : i64, tpu.core_type = #tpu.core_type<tc>, window_params = [{transform_indices = @transform_0, window_bounds = array<i64: 1, 16, 16, 128>}, {transform_indices = @transform_1, window_bounds = array<i64: 1, 1, 2, 16, 128>}, {pipeline_mode = #tpu.pipeline_mode<synchronous>, transform_indices = @transform_2, window_bounds = array<i64: 128, 256>}, {pipeline_mode = #tpu.pipeline_mode<synchronous>, transform_indices = @transform_3, window_bounds = array<i64: 1, 256>}, {pipeline_mode = #tpu.pipeline_mode<synchronous>, transform_indices = @transform_4, window_bounds = array<i64: 3, 768, 128>}, {pipeline_mode = #tpu.pipeline_mode<synchronous>, transform_indices = @transform_5, window_bounds = array<i64: 1, 128>}, {pipeline_mode = #tpu.pipeline_mode<synchronous>, transform_indices = @transform_6, window_bounds = array<i64: 128, 128>}, {pipeline_mode = #tpu.pipeline_mode<synchronous>, transform_indices = @transform_7, window_bounds = array<i64: 1, 128>}, {transform_indices = @transform_8, window_bounds = array<i64: 1, 16, 16, 128>}]} {
    %c0 = arith.constant 0 : index
    %c0_0 = arith.constant 0 : index
    %c0_1 = arith.constant 0 : index
    %c0_2 = arith.constant 0 : index
    %0 = vector.load %arg2[%c0, %c0_0, %c0_1, %c0_2] : memref<1x16x16x128xbf16, #tpu.memory_space<vmem>>, vector<1x16x16x128xbf16>
    %1 = vector.shape_cast %0 : vector<1x16x16x128xbf16> to vector<16x16x128xbf16>
    %2 = vector.shape_cast %1 : vector<16x16x128xbf16> to vector<256x128xbf16>
    %c0_3 = arith.constant 0 : index
    %c0_4 = arith.constant 0 : index
    %3 = vector.load %arg4[%c0_3, %c0_4] : memref<128x256xbf16, #tpu.memory_space<vmem>>, vector<128x256xbf16>
    %cst = arith.constant dense<0.000000e+00> : vector<256x256xf32>
    %4 = tpu.matmul %2, %3, %cst {dimension_numbers = #tpu.dot_dimension_numbers<[1], [0], [0], [1], [0, 0, 1, 1], [], []>} : vector<256x128xbf16>, vector<128x256xbf16>, vector<256x256xf32> -> vector<256x256xf32>
    %c0_5 = arith.constant 0 : index
    %c0_6 = arith.constant 0 : index
    %5 = vector.load %arg5[%c0_5, %c0_6] : memref<1x256xf32, #tpu.memory_space<vmem>>, vector<1x256xf32>
    %6 = vector.broadcast %5 : vector<1x256xf32> to vector<256x256xf32>
    %7 = arith.addf %4, %6 : vector<256x256xf32>
    %cst_7 = arith.constant 0.000000e+00 : f32
    %8 = vector.broadcast %cst_7 : f32 to vector<256x256xf32>
    %9 = arith.maximumf %7, %8 : vector<256x256xf32>
    %10 = vector.shape_cast %9 : vector<256x256xf32> to vector<16x16x256xf32>
    %c1 = arith.constant 1 : index
    %c1_8 = arith.constant 1 : index
    %c0_9 = arith.constant 0 : index
    %11 = vector.load %arg11[%c1, %c1_8, %c0_9] : memref<18x18x256xf32, #tpu.memory_space<vmem>>, vector<16x16x256xf32>
    tpu.vector_store %arg11[%c1, %c1_8, %c0_9], %10 {strides = array<i32>} : memref<18x18x256xf32, #tpu.memory_space<vmem>>, vector<16x16x256xf32>,
    %c0_10 = arith.constant 0 : index
    %c0_11 = arith.constant 0 : index
    %c0_12 = arith.constant 0 : index
    %c0_13 = arith.constant 0 : index
    %c0_14 = arith.constant 0 : index
    %12 = vector.load %arg3[%c0_10, %c0_11, %c0_12, %c0_13, %c0_14] : memref<1x1x2x16x128xbf16, #tpu.memory_space<vmem>>, vector<1x1x2x16x128xbf16>
    %13 = vector.shape_cast %12 : vector<1x1x2x16x128xbf16> to vector<2x16x128xbf16>
    %14 = vector.shape_cast %13 : vector<2x16x128xbf16> to vector<32x128xbf16>
    %c0_15 = arith.constant 0 : index
    %c0_16 = arith.constant 0 : index
    %15 = vector.load %arg4[%c0_15, %c0_16] : memref<128x256xbf16, #tpu.memory_space<vmem>>, vector<128x256xbf16>
    %cst_17 = arith.constant dense<0.000000e+00> : vector<32x256xf32>
    %16 = tpu.matmul %14, %15, %cst_17 {dimension_numbers = #tpu.dot_dimension_numbers<[1], [0], [0], [1], [0, 0, 1, 1], [], []>} : vector<32x128xbf16>, vector<128x256xbf16>, vector<32x256xf32> -> vector<32x256xf32>
    %c0_18 = arith.constant 0 : index
    %c0_19 = arith.constant 0 : index
    %17 = vector.load %arg5[%c0_18, %c0_19] : memref<1x256xf32, #tpu.memory_space<vmem>>, vector<1x256xf32>
    %18 = vector.broadcast %17 : vector<1x256xf32> to vector<32x256xf32>
    %19 = arith.addf %16, %18 : vector<32x256xf32>
    %cst_20 = arith.constant 0.000000e+00 : f32
    %20 = vector.broadcast %cst_20 : f32 to vector<32x256xf32>
    %21 = arith.maximumf %19, %20 : vector<32x256xf32>
    %22 = vector.shape_cast %21 : vector<32x256xf32> to vector<2x16x256xf32>
    %c0_i32 = arith.constant 0 : i32
    %23 = arith.cmpi sgt, %arg1, %c0_i32 : i32
    %24 = arith.extui %23 : i1 to i32
    %25 = arith.sitofp %24 : i32 to f32
    %c0_i32_21 = arith.constant 0 : i32
    %26 = arith.cmpi slt, %arg1, %c0_i32_21 : i32
    %27 = arith.extui %26 : i1 to i32
    %28 = arith.sitofp %27 : i32 to f32
    %29 = vector.extract_strided_slice %22 {offsets = [0, 0, 0], sizes = [1, 16, 256], strides = [1, 1, 1]} : vector<2x16x256xf32> to vector<1x16x256xf32>
    %30 = vector.broadcast %25 : f32 to vector<1x16x256xf32>
    %31 = arith.mulf %29, %30 : vector<1x16x256xf32>
    %c0_22 = arith.constant 0 : index
    %c1_23 = arith.constant 1 : index
    %c0_24 = arith.constant 0 : index
    %32 = vector.load %arg11[%c0_22, %c1_23, %c0_24] : memref<18x18x256xf32, #tpu.memory_space<vmem>>, vector<1x16x256xf32>
    tpu.vector_store %arg11[%c0_22, %c1_23, %c0_24], %31 {strides = array<i32>} : memref<18x18x256xf32, #tpu.memory_space<vmem>>, vector<1x16x256xf32>,
    %33 = vector.extract_strided_slice %22 {offsets = [1, 0, 0], sizes = [1, 16, 256], strides = [1, 1, 1]} : vector<2x16x256xf32> to vector<1x16x256xf32>
    %34 = vector.broadcast %28 : f32 to vector<1x16x256xf32>
    %35 = arith.mulf %33, %34 : vector<1x16x256xf32>
    %c17 = arith.constant 17 : index
    %c1_25 = arith.constant 1 : index
    %c0_26 = arith.constant 0 : index
    %36 = vector.load %arg11[%c17, %c1_25, %c0_26] : memref<18x18x256xf32, #tpu.memory_space<vmem>>, vector<1x16x256xf32>
    tpu.vector_store %arg11[%c17, %c1_25, %c0_26], %35 {strides = array<i32>} : memref<18x18x256xf32, #tpu.memory_space<vmem>>, vector<1x16x256xf32>,
    %cst_27 = arith.constant 0.000000e+00 : f32
    %37 = vector.broadcast %cst_27 : f32 to vector<18x1x256xf32>
    %c0_28 = arith.constant 0 : index
    %c0_29 = arith.constant 0 : index
    %c0_30 = arith.constant 0 : index
    %38 = vector.load %arg11[%c0_28, %c0_29, %c0_30] : memref<18x18x256xf32, #tpu.memory_space<vmem>>, vector<18x1x256xf32>
    tpu.vector_store %arg11[%c0_28, %c0_29, %c0_30], %37 {strides = array<i32>} : memref<18x18x256xf32, #tpu.memory_space<vmem>>, vector<18x1x256xf32>,
    %c0_31 = arith.constant 0 : index
    %c17_32 = arith.constant 17 : index
    %c0_33 = arith.constant 0 : index
    %39 = vector.load %arg11[%c0_31, %c17_32, %c0_33] : memref<18x18x256xf32, #tpu.memory_space<vmem>>, vector<18x1x256xf32>
    tpu.vector_store %arg11[%c0_31, %c17_32, %c0_33], %37 {strides = array<i32>} : memref<18x18x256xf32, #tpu.memory_space<vmem>>, vector<18x1x256xf32>,
    %cst_34 = arith.constant 0.000000e+00 : f32
    %40 = vector.broadcast %cst_34 : f32 to vector<256x128xf32>
    %c0_35 = arith.constant 0 : index
    %c0_36 = arith.constant 0 : index
    %c0_37 = arith.constant 0 : index
    %41 = vector.load %arg11[%c0_35, %c0_36, %c0_37] : memref<18x18x256xf32, #tpu.memory_space<vmem>>, vector<16x18x256xf32>
    %42 = arith.truncf %41 : vector<16x18x256xf32> to vector<16x18x256xbf16>
    %43 = vector.extract_strided_slice %42 {offsets = [0, 0, 0], sizes = [16, 16, 256], strides = [1, 1, 1]} : vector<16x18x256xbf16> to vector<16x16x256xbf16>
    %44 = vector.extract_strided_slice %42 {offsets = [0, 1, 0], sizes = [16, 16, 256], strides = [1, 1, 1]} : vector<16x18x256xbf16> to vector<16x16x256xbf16>
    %45 = vector.extract_strided_slice %42 {offsets = [0, 2, 0], sizes = [16, 16, 256], strides = [1, 1, 1]} : vector<16x18x256xbf16> to vector<16x16x256xbf16>
    %46 = tpu.concatenate %43, %44, %45 in 2 : vector<16x16x256xbf16>, vector<16x16x256xbf16>, vector<16x16x256xbf16> -> vector<16x16x768xbf16>
    %47 = vector.shape_cast %46 : vector<16x16x768xbf16> to vector<256x768xbf16>
    %c0_38 = arith.constant 0 : index
    %c0_39 = arith.constant 0 : index
    %c0_40 = arith.constant 0 : index
    %48 = vector.load %arg6[%c0_38, %c0_39, %c0_40] : memref<3x768x128xbf16, #tpu.memory_space<vmem>>, vector<1x768x128xbf16>
    %49 = vector.shape_cast %48 : vector<1x768x128xbf16> to vector<768x128xbf16>
    %cst_41 = arith.constant dense<0.000000e+00> : vector<256x128xf32>
    %50 = tpu.matmul %47, %49, %cst_41 {dimension_numbers = #tpu.dot_dimension_numbers<[1], [0], [0], [1], [0, 0, 1, 1], [], []>} : vector<256x768xbf16>, vector<768x128xbf16>, vector<256x128xf32> -> vector<256x128xf32>
    %51 = arith.addf %40, %50 : vector<256x128xf32>
    %c1_42 = arith.constant 1 : index
    %c0_43 = arith.constant 0 : index
    %c0_44 = arith.constant 0 : index
    %52 = vector.load %arg11[%c1_42, %c0_43, %c0_44] : memref<18x18x256xf32, #tpu.memory_space<vmem>>, vector<16x18x256xf32>
    %53 = arith.truncf %52 : vector<16x18x256xf32> to vector<16x18x256xbf16>
    %54 = vector.extract_strided_slice %53 {offsets = [0, 0, 0], sizes = [16, 16, 256], strides = [1, 1, 1]} : vector<16x18x256xbf16> to vector<16x16x256xbf16>
    %55 = vector.extract_strided_slice %53 {offsets = [0, 1, 0], sizes = [16, 16, 256], strides = [1, 1, 1]} : vector<16x18x256xbf16> to vector<16x16x256xbf16>
    %56 = vector.extract_strided_slice %53 {offsets = [0, 2, 0], sizes = [16, 16, 256], strides = [1, 1, 1]} : vector<16x18x256xbf16> to vector<16x16x256xbf16>
    %57 = tpu.concatenate %54, %55, %56 in 2 : vector<16x16x256xbf16>, vector<16x16x256xbf16>, vector<16x16x256xbf16> -> vector<16x16x768xbf16>
    %58 = vector.shape_cast %57 : vector<16x16x768xbf16> to vector<256x768xbf16>
    %c1_45 = arith.constant 1 : index
    %c0_46 = arith.constant 0 : index
    %c0_47 = arith.constant 0 : index
    %59 = vector.load %arg6[%c1_45, %c0_46, %c0_47] : memref<3x768x128xbf16, #tpu.memory_space<vmem>>, vector<1x768x128xbf16>
    %60 = vector.shape_cast %59 : vector<1x768x128xbf16> to vector<768x128xbf16>
    %cst_48 = arith.constant dense<0.000000e+00> : vector<256x128xf32>
    %61 = tpu.matmul %58, %60, %cst_48 {dimension_numbers = #tpu.dot_dimension_numbers<[1], [0], [0], [1], [0, 0, 1, 1], [], []>} : vector<256x768xbf16>, vector<768x128xbf16>, vector<256x128xf32> -> vector<256x128xf32>
    %62 = arith.addf %51, %61 : vector<256x128xf32>
    %c2 = arith.constant 2 : index
    %c0_49 = arith.constant 0 : index
    %c0_50 = arith.constant 0 : index
    %63 = vector.load %arg11[%c2, %c0_49, %c0_50] : memref<18x18x256xf32, #tpu.memory_space<vmem>>, vector<16x18x256xf32>
    %64 = arith.truncf %63 : vector<16x18x256xf32> to vector<16x18x256xbf16>
    %65 = vector.extract_strided_slice %64 {offsets = [0, 0, 0], sizes = [16, 16, 256], strides = [1, 1, 1]} : vector<16x18x256xbf16> to vector<16x16x256xbf16>
    %66 = vector.extract_strided_slice %64 {offsets = [0, 1, 0], sizes = [16, 16, 256], strides = [1, 1, 1]} : vector<16x18x256xbf16> to vector<16x16x256xbf16>
    %67 = vector.extract_strided_slice %64 {offsets = [0, 2, 0], sizes = [16, 16, 256], strides = [1, 1, 1]} : vector<16x18x256xbf16> to vector<16x16x256xbf16>
    %68 = tpu.concatenate %65, %66, %67 in 2 : vector<16x16x256xbf16>, vector<16x16x256xbf16>, vector<16x16x256xbf16> -> vector<16x16x768xbf16>
    %69 = vector.shape_cast %68 : vector<16x16x768xbf16> to vector<256x768xbf16>
    %c2_51 = arith.constant 2 : index
    %c0_52 = arith.constant 0 : index
    %c0_53 = arith.constant 0 : index
    %70 = vector.load %arg6[%c2_51, %c0_52, %c0_53] : memref<3x768x128xbf16, #tpu.memory_space<vmem>>, vector<1x768x128xbf16>
    %71 = vector.shape_cast %70 : vector<1x768x128xbf16> to vector<768x128xbf16>
    %cst_54 = arith.constant dense<0.000000e+00> : vector<256x128xf32>
    %72 = tpu.matmul %69, %71, %cst_54 {dimension_numbers = #tpu.dot_dimension_numbers<[1], [0], [0], [1], [0, 0, 1, 1], [], []>} : vector<256x768xbf16>, vector<768x128xbf16>, vector<256x128xf32> -> vector<256x128xf32>
    %73 = arith.addf %62, %72 : vector<256x128xf32>
    %c0_55 = arith.constant 0 : index
    %c0_56 = arith.constant 0 : index
    %74 = vector.load %arg7[%c0_55, %c0_56] : memref<1x128xf32, #tpu.memory_space<vmem>>, vector<1x128xf32>
    %75 = vector.broadcast %74 : vector<1x128xf32> to vector<256x128xf32>
    %76 = arith.addf %73, %75 : vector<256x128xf32>
    %cst_57 = arith.constant 0.000000e+00 : f32
    %77 = vector.broadcast %cst_57 : f32 to vector<256x128xf32>
    %78 = arith.maximumf %76, %77 : vector<256x128xf32>
    %79 = arith.truncf %78 : vector<256x128xf32> to vector<256x128xbf16>
    %c0_58 = arith.constant 0 : index
    %c0_59 = arith.constant 0 : index
    %80 = vector.load %arg8[%c0_58, %c0_59] : memref<128x128xbf16, #tpu.memory_space<vmem>>, vector<128x128xbf16>
    %cst_60 = arith.constant dense<0.000000e+00> : vector<256x128xf32>
    %81 = tpu.matmul %79, %80, %cst_60 {dimension_numbers = #tpu.dot_dimension_numbers<[1], [0], [0], [1], [0, 0, 1, 1], [], []>} : vector<256x128xbf16>, vector<128x128xbf16>, vector<256x128xf32> -> vector<256x128xf32>
    %c0_61 = arith.constant 0 : index
    %c0_62 = arith.constant 0 : index
    %82 = vector.load %arg9[%c0_61, %c0_62] : memref<1x128xf32, #tpu.memory_space<vmem>>, vector<1x128xf32>
    %83 = vector.broadcast %82 : vector<1x128xf32> to vector<256x128xf32>
    %84 = arith.addf %81, %83 : vector<256x128xf32>
    %85 = vector.shape_cast %84 : vector<256x128xf32> to vector<16x16x128xf32>
    %86 = arith.truncf %85 : vector<16x16x128xf32> to vector<16x16x128xbf16>
    %c0_63 = arith.constant 0 : index
    %c0_64 = arith.constant 0 : index
    %c0_65 = arith.constant 0 : index
    %c0_66 = arith.constant 0 : index
    %87 = vector.load %arg10[%c0_63, %c0_64, %c0_65, %c0_66] : memref<1x16x16x128xbf16, #tpu.memory_space<vmem>>, vector<1x16x16x128xbf16>
    %88 = vector.shape_cast %87 : vector<1x16x16x128xbf16> to vector<16x16x128xbf16>
    %89 = vector.shape_cast %86 : vector<16x16x128xbf16> to vector<1x16x16x128xbf16>
    tpu.vector_store %arg10[%c0_63, %c0_64, %c0_65, %c0_66], %89 {strides = array<i32>} : memref<1x16x16x128xbf16, #tpu.memory_space<vmem>>, vector<1x16x16x128xbf16>,
    return
  }
  func.func @transform_0(%arg0: i32, %arg1: i32) -> (i32, i32, i32, i32) {
    %c0_i32 = arith.constant 0 : i32
    %c0_i32_0 = arith.constant 0 : i32
    %c0_i32_1 = arith.constant 0 : i32
    return %arg0, %arg1, %c0_i32, %c0_i32_0 : i32, i32, i32, i32
  }
  func.func @transform_1(%arg0: i32, %arg1: i32) -> (i32, i32, i32, i32, i32) {
    %c0_i32 = arith.constant 0 : i32
    %c0_i32_0 = arith.constant 0 : i32
    %c0_i32_1 = arith.constant 0 : i32
    %c0_i32_2 = arith.constant 0 : i32
    return %arg0, %arg1, %c0_i32, %c0_i32_0, %c0_i32_1 : i32, i32, i32, i32, i32
  }
  func.func @transform_2(%arg0: i32, %arg1: i32) -> (i32, i32) {
    %c0_i32 = arith.constant 0 : i32
    %c0_i32_0 = arith.constant 0 : i32
    %c0_i32_1 = arith.constant 0 : i32
    return %c0_i32, %c0_i32_0 : i32, i32
  }
  func.func @transform_3(%arg0: i32, %arg1: i32) -> (i32, i32) {
    %c0_i32 = arith.constant 0 : i32
    %c0_i32_0 = arith.constant 0 : i32
    %c0_i32_1 = arith.constant 0 : i32
    return %c0_i32, %c0_i32_0 : i32, i32
  }
  func.func @transform_4(%arg0: i32, %arg1: i32) -> (i32, i32, i32) {
    %c0_i32 = arith.constant 0 : i32
    %c0_i32_0 = arith.constant 0 : i32
    %c0_i32_1 = arith.constant 0 : i32
    %c0_i32_2 = arith.constant 0 : i32
    return %c0_i32, %c0_i32_0, %c0_i32_1 : i32, i32, i32
  }
  func.func @transform_5(%arg0: i32, %arg1: i32) -> (i32, i32) {
    %c0_i32 = arith.constant 0 : i32
    %c0_i32_0 = arith.constant 0 : i32
    %c0_i32_1 = arith.constant 0 : i32
    return %c0_i32, %c0_i32_0 : i32, i32
  }
  func.func @transform_6(%arg0: i32, %arg1: i32) -> (i32, i32) {
    %c0_i32 = arith.constant 0 : i32
    %c0_i32_0 = arith.constant 0 : i32
    %c0_i32_1 = arith.constant 0 : i32
    return %c0_i32, %c0_i32_0 : i32, i32
  }
  func.func @transform_7(%arg0: i32, %arg1: i32) -> (i32, i32) {
    %c0_i32 = arith.constant 0 : i32
    %c0_i32_0 = arith.constant 0 : i32
    %c0_i32_1 = arith.constant 0 : i32
    return %c0_i32, %c0_i32_0 : i32, i32
  }
  func.func @transform_8(%arg0: i32, %arg1: i32) -> (i32, i32, i32, i32) {
    %c0_i32 = arith.constant 0 : i32
    %c0_i32_0 = arith.constant 0 : i32
    %c0_i32_1 = arith.constant 0 : i32
    return %arg0, %arg1, %c0_i32, %c0_i32_0 : i32, i32, i32, i32
  }
}

module attributes {stable_mosaic.version = 11 : i64} {
  func.func @_regress_head_kernel(%arg0: i32, %arg1: i32, %arg2: memref<1x4x4x128xbf16, #tpu.memory_space<vmem>>, %arg3: memref<1x1x2x4x128xbf16, #tpu.memory_space<vmem>>, %arg4: memref<128x256xbf16, #tpu.memory_space<vmem>>, %arg5: memref<1x256xf32, #tpu.memory_space<vmem>>, %arg6: memref<3x768x128xbf16, #tpu.memory_space<vmem>>, %arg7: memref<1x128xf32, #tpu.memory_space<vmem>>, %arg8: memref<128x128xbf16, #tpu.memory_space<vmem>>, %arg9: memref<1x128xf32, #tpu.memory_space<vmem>>, %arg10: memref<1x4x4x128xbf16, #tpu.memory_space<vmem>>, %arg11: memref<6x6x256xf32, #tpu.memory_space<vmem>>) attributes {dimension_semantics = [#tpu.dimension_semantics<parallel>, #tpu.dimension_semantics<parallel>], iteration_bounds = array<i64: 2, 1>, scalar_prefetch = 0 : i64, scratch_operands = 1 : i64, tpu.core_type = #tpu.core_type<tc>, window_params = [{transform_indices = @transform_0, window_bounds = array<i64: 1, 4, 4, 128>}, {transform_indices = @transform_1, window_bounds = array<i64: 1, 1, 2, 4, 128>}, {pipeline_mode = #tpu.pipeline_mode<synchronous>, transform_indices = @transform_2, window_bounds = array<i64: 128, 256>}, {pipeline_mode = #tpu.pipeline_mode<synchronous>, transform_indices = @transform_3, window_bounds = array<i64: 1, 256>}, {pipeline_mode = #tpu.pipeline_mode<synchronous>, transform_indices = @transform_4, window_bounds = array<i64: 3, 768, 128>}, {pipeline_mode = #tpu.pipeline_mode<synchronous>, transform_indices = @transform_5, window_bounds = array<i64: 1, 128>}, {pipeline_mode = #tpu.pipeline_mode<synchronous>, transform_indices = @transform_6, window_bounds = array<i64: 128, 128>}, {pipeline_mode = #tpu.pipeline_mode<synchronous>, transform_indices = @transform_7, window_bounds = array<i64: 1, 128>}, {transform_indices = @transform_8, window_bounds = array<i64: 1, 4, 4, 128>}]} {
    %c0 = arith.constant 0 : index
    %c0_0 = arith.constant 0 : index
    %c0_1 = arith.constant 0 : index
    %c0_2 = arith.constant 0 : index
    %0 = vector.load %arg2[%c0, %c0_0, %c0_1, %c0_2] : memref<1x4x4x128xbf16, #tpu.memory_space<vmem>>, vector<1x4x4x128xbf16>
    %1 = vector.shape_cast %0 : vector<1x4x4x128xbf16> to vector<4x4x128xbf16>
    %2 = vector.shape_cast %1 : vector<4x4x128xbf16> to vector<16x128xbf16>
    %c0_3 = arith.constant 0 : index
    %c0_4 = arith.constant 0 : index
    %3 = vector.load %arg4[%c0_3, %c0_4] : memref<128x256xbf16, #tpu.memory_space<vmem>>, vector<128x256xbf16>
    %cst = arith.constant dense<0.000000e+00> : vector<16x256xf32>
    %4 = tpu.matmul %2, %3, %cst {dimension_numbers = #tpu.dot_dimension_numbers<[1], [0], [0], [1], [0, 0, 1, 1], [], []>} : vector<16x128xbf16>, vector<128x256xbf16>, vector<16x256xf32> -> vector<16x256xf32>
    %c0_5 = arith.constant 0 : index
    %c0_6 = arith.constant 0 : index
    %5 = vector.load %arg5[%c0_5, %c0_6] : memref<1x256xf32, #tpu.memory_space<vmem>>, vector<1x256xf32>
    %6 = vector.broadcast %5 : vector<1x256xf32> to vector<16x256xf32>
    %7 = arith.addf %4, %6 : vector<16x256xf32>
    %cst_7 = arith.constant 0.000000e+00 : f32
    %8 = vector.broadcast %cst_7 : f32 to vector<16x256xf32>
    %9 = arith.maximumf %7, %8 : vector<16x256xf32>
    %10 = vector.shape_cast %9 : vector<16x256xf32> to vector<4x4x256xf32>
    %c1 = arith.constant 1 : index
    %c1_8 = arith.constant 1 : index
    %c0_9 = arith.constant 0 : index
    %11 = vector.load %arg11[%c1, %c1_8, %c0_9] : memref<6x6x256xf32, #tpu.memory_space<vmem>>, vector<4x4x256xf32>
    tpu.vector_store %arg11[%c1, %c1_8, %c0_9], %10 {strides = array<i32>} : memref<6x6x256xf32, #tpu.memory_space<vmem>>, vector<4x4x256xf32>,
    %c0_10 = arith.constant 0 : index
    %c0_11 = arith.constant 0 : index
    %c0_12 = arith.constant 0 : index
    %c0_13 = arith.constant 0 : index
    %c0_14 = arith.constant 0 : index
    %12 = vector.load %arg3[%c0_10, %c0_11, %c0_12, %c0_13, %c0_14] : memref<1x1x2x4x128xbf16, #tpu.memory_space<vmem>>, vector<1x1x2x4x128xbf16>
    %13 = vector.shape_cast %12 : vector<1x1x2x4x128xbf16> to vector<2x4x128xbf16>
    %14 = vector.shape_cast %13 : vector<2x4x128xbf16> to vector<8x128xbf16>
    %c0_15 = arith.constant 0 : index
    %c0_16 = arith.constant 0 : index
    %15 = vector.load %arg4[%c0_15, %c0_16] : memref<128x256xbf16, #tpu.memory_space<vmem>>, vector<128x256xbf16>
    %cst_17 = arith.constant dense<0.000000e+00> : vector<8x256xf32>
    %16 = tpu.matmul %14, %15, %cst_17 {dimension_numbers = #tpu.dot_dimension_numbers<[1], [0], [0], [1], [0, 0, 1, 1], [], []>} : vector<8x128xbf16>, vector<128x256xbf16>, vector<8x256xf32> -> vector<8x256xf32>
    %c0_18 = arith.constant 0 : index
    %c0_19 = arith.constant 0 : index
    %17 = vector.load %arg5[%c0_18, %c0_19] : memref<1x256xf32, #tpu.memory_space<vmem>>, vector<1x256xf32>
    %18 = vector.broadcast %17 : vector<1x256xf32> to vector<8x256xf32>
    %19 = arith.addf %16, %18 : vector<8x256xf32>
    %cst_20 = arith.constant 0.000000e+00 : f32
    %20 = vector.broadcast %cst_20 : f32 to vector<8x256xf32>
    %21 = arith.maximumf %19, %20 : vector<8x256xf32>
    %22 = vector.shape_cast %21 : vector<8x256xf32> to vector<2x4x256xf32>
    %c0_i32 = arith.constant 0 : i32
    %23 = arith.cmpi sgt, %arg1, %c0_i32 : i32
    %24 = arith.extui %23 : i1 to i32
    %25 = arith.sitofp %24 : i32 to f32
    %c0_i32_21 = arith.constant 0 : i32
    %26 = arith.cmpi slt, %arg1, %c0_i32_21 : i32
    %27 = arith.extui %26 : i1 to i32
    %28 = arith.sitofp %27 : i32 to f32
    %29 = vector.extract_strided_slice %22 {offsets = [0, 0, 0], sizes = [1, 4, 256], strides = [1, 1, 1]} : vector<2x4x256xf32> to vector<1x4x256xf32>
    %30 = vector.broadcast %25 : f32 to vector<1x4x256xf32>
    %31 = arith.mulf %29, %30 : vector<1x4x256xf32>
    %c0_22 = arith.constant 0 : index
    %c1_23 = arith.constant 1 : index
    %c0_24 = arith.constant 0 : index
    %32 = vector.load %arg11[%c0_22, %c1_23, %c0_24] : memref<6x6x256xf32, #tpu.memory_space<vmem>>, vector<1x4x256xf32>
    tpu.vector_store %arg11[%c0_22, %c1_23, %c0_24], %31 {strides = array<i32>} : memref<6x6x256xf32, #tpu.memory_space<vmem>>, vector<1x4x256xf32>,
    %33 = vector.extract_strided_slice %22 {offsets = [1, 0, 0], sizes = [1, 4, 256], strides = [1, 1, 1]} : vector<2x4x256xf32> to vector<1x4x256xf32>
    %34 = vector.broadcast %28 : f32 to vector<1x4x256xf32>
    %35 = arith.mulf %33, %34 : vector<1x4x256xf32>
    %c5 = arith.constant 5 : index
    %c1_25 = arith.constant 1 : index
    %c0_26 = arith.constant 0 : index
    %36 = vector.load %arg11[%c5, %c1_25, %c0_26] : memref<6x6x256xf32, #tpu.memory_space<vmem>>, vector<1x4x256xf32>
    tpu.vector_store %arg11[%c5, %c1_25, %c0_26], %35 {strides = array<i32>} : memref<6x6x256xf32, #tpu.memory_space<vmem>>, vector<1x4x256xf32>,
    %cst_27 = arith.constant 0.000000e+00 : f32
    %37 = vector.broadcast %cst_27 : f32 to vector<6x1x256xf32>
    %c0_28 = arith.constant 0 : index
    %c0_29 = arith.constant 0 : index
    %c0_30 = arith.constant 0 : index
    %38 = vector.load %arg11[%c0_28, %c0_29, %c0_30] : memref<6x6x256xf32, #tpu.memory_space<vmem>>, vector<6x1x256xf32>
    tpu.vector_store %arg11[%c0_28, %c0_29, %c0_30], %37 {strides = array<i32>} : memref<6x6x256xf32, #tpu.memory_space<vmem>>, vector<6x1x256xf32>,
    %c0_31 = arith.constant 0 : index
    %c5_32 = arith.constant 5 : index
    %c0_33 = arith.constant 0 : index
    %39 = vector.load %arg11[%c0_31, %c5_32, %c0_33] : memref<6x6x256xf32, #tpu.memory_space<vmem>>, vector<6x1x256xf32>
    tpu.vector_store %arg11[%c0_31, %c5_32, %c0_33], %37 {strides = array<i32>} : memref<6x6x256xf32, #tpu.memory_space<vmem>>, vector<6x1x256xf32>,
    %cst_34 = arith.constant 0.000000e+00 : f32
    %40 = vector.broadcast %cst_34 : f32 to vector<16x128xf32>
    %c0_35 = arith.constant 0 : index
    %c0_36 = arith.constant 0 : index
    %c0_37 = arith.constant 0 : index
    %41 = vector.load %arg11[%c0_35, %c0_36, %c0_37] : memref<6x6x256xf32, #tpu.memory_space<vmem>>, vector<4x6x256xf32>
    %42 = arith.truncf %41 : vector<4x6x256xf32> to vector<4x6x256xbf16>
    %43 = vector.extract_strided_slice %42 {offsets = [0, 0, 0], sizes = [4, 4, 256], strides = [1, 1, 1]} : vector<4x6x256xbf16> to vector<4x4x256xbf16>
    %44 = vector.extract_strided_slice %42 {offsets = [0, 1, 0], sizes = [4, 4, 256], strides = [1, 1, 1]} : vector<4x6x256xbf16> to vector<4x4x256xbf16>
    %45 = vector.extract_strided_slice %42 {offsets = [0, 2, 0], sizes = [4, 4, 256], strides = [1, 1, 1]} : vector<4x6x256xbf16> to vector<4x4x256xbf16>
    %46 = tpu.concatenate %43, %44, %45 in 2 : vector<4x4x256xbf16>, vector<4x4x256xbf16>, vector<4x4x256xbf16> -> vector<4x4x768xbf16>
    %47 = vector.shape_cast %46 : vector<4x4x768xbf16> to vector<16x768xbf16>
    %c0_38 = arith.constant 0 : index
    %c0_39 = arith.constant 0 : index
    %c0_40 = arith.constant 0 : index
    %48 = vector.load %arg6[%c0_38, %c0_39, %c0_40] : memref<3x768x128xbf16, #tpu.memory_space<vmem>>, vector<1x768x128xbf16>
    %49 = vector.shape_cast %48 : vector<1x768x128xbf16> to vector<768x128xbf16>
    %cst_41 = arith.constant dense<0.000000e+00> : vector<16x128xf32>
    %50 = tpu.matmul %47, %49, %cst_41 {dimension_numbers = #tpu.dot_dimension_numbers<[1], [0], [0], [1], [0, 0, 1, 1], [], []>} : vector<16x768xbf16>, vector<768x128xbf16>, vector<16x128xf32> -> vector<16x128xf32>
    %51 = arith.addf %40, %50 : vector<16x128xf32>
    %c1_42 = arith.constant 1 : index
    %c0_43 = arith.constant 0 : index
    %c0_44 = arith.constant 0 : index
    %52 = vector.load %arg11[%c1_42, %c0_43, %c0_44] : memref<6x6x256xf32, #tpu.memory_space<vmem>>, vector<4x6x256xf32>
    %53 = arith.truncf %52 : vector<4x6x256xf32> to vector<4x6x256xbf16>
    %54 = vector.extract_strided_slice %53 {offsets = [0, 0, 0], sizes = [4, 4, 256], strides = [1, 1, 1]} : vector<4x6x256xbf16> to vector<4x4x256xbf16>
    %55 = vector.extract_strided_slice %53 {offsets = [0, 1, 0], sizes = [4, 4, 256], strides = [1, 1, 1]} : vector<4x6x256xbf16> to vector<4x4x256xbf16>
    %56 = vector.extract_strided_slice %53 {offsets = [0, 2, 0], sizes = [4, 4, 256], strides = [1, 1, 1]} : vector<4x6x256xbf16> to vector<4x4x256xbf16>
    %57 = tpu.concatenate %54, %55, %56 in 2 : vector<4x4x256xbf16>, vector<4x4x256xbf16>, vector<4x4x256xbf16> -> vector<4x4x768xbf16>
    %58 = vector.shape_cast %57 : vector<4x4x768xbf16> to vector<16x768xbf16>
    %c1_45 = arith.constant 1 : index
    %c0_46 = arith.constant 0 : index
    %c0_47 = arith.constant 0 : index
    %59 = vector.load %arg6[%c1_45, %c0_46, %c0_47] : memref<3x768x128xbf16, #tpu.memory_space<vmem>>, vector<1x768x128xbf16>
    %60 = vector.shape_cast %59 : vector<1x768x128xbf16> to vector<768x128xbf16>
    %cst_48 = arith.constant dense<0.000000e+00> : vector<16x128xf32>
    %61 = tpu.matmul %58, %60, %cst_48 {dimension_numbers = #tpu.dot_dimension_numbers<[1], [0], [0], [1], [0, 0, 1, 1], [], []>} : vector<16x768xbf16>, vector<768x128xbf16>, vector<16x128xf32> -> vector<16x128xf32>
    %62 = arith.addf %51, %61 : vector<16x128xf32>
    %c2 = arith.constant 2 : index
    %c0_49 = arith.constant 0 : index
    %c0_50 = arith.constant 0 : index
    %63 = vector.load %arg11[%c2, %c0_49, %c0_50] : memref<6x6x256xf32, #tpu.memory_space<vmem>>, vector<4x6x256xf32>
    %64 = arith.truncf %63 : vector<4x6x256xf32> to vector<4x6x256xbf16>
    %65 = vector.extract_strided_slice %64 {offsets = [0, 0, 0], sizes = [4, 4, 256], strides = [1, 1, 1]} : vector<4x6x256xbf16> to vector<4x4x256xbf16>
    %66 = vector.extract_strided_slice %64 {offsets = [0, 1, 0], sizes = [4, 4, 256], strides = [1, 1, 1]} : vector<4x6x256xbf16> to vector<4x4x256xbf16>
    %67 = vector.extract_strided_slice %64 {offsets = [0, 2, 0], sizes = [4, 4, 256], strides = [1, 1, 1]} : vector<4x6x256xbf16> to vector<4x4x256xbf16>
    %68 = tpu.concatenate %65, %66, %67 in 2 : vector<4x4x256xbf16>, vector<4x4x256xbf16>, vector<4x4x256xbf16> -> vector<4x4x768xbf16>
    %69 = vector.shape_cast %68 : vector<4x4x768xbf16> to vector<16x768xbf16>
    %c2_51 = arith.constant 2 : index
    %c0_52 = arith.constant 0 : index
    %c0_53 = arith.constant 0 : index
    %70 = vector.load %arg6[%c2_51, %c0_52, %c0_53] : memref<3x768x128xbf16, #tpu.memory_space<vmem>>, vector<1x768x128xbf16>
    %71 = vector.shape_cast %70 : vector<1x768x128xbf16> to vector<768x128xbf16>
    %cst_54 = arith.constant dense<0.000000e+00> : vector<16x128xf32>
    %72 = tpu.matmul %69, %71, %cst_54 {dimension_numbers = #tpu.dot_dimension_numbers<[1], [0], [0], [1], [0, 0, 1, 1], [], []>} : vector<16x768xbf16>, vector<768x128xbf16>, vector<16x128xf32> -> vector<16x128xf32>
    %73 = arith.addf %62, %72 : vector<16x128xf32>
    %c0_55 = arith.constant 0 : index
    %c0_56 = arith.constant 0 : index
    %74 = vector.load %arg7[%c0_55, %c0_56] : memref<1x128xf32, #tpu.memory_space<vmem>>, vector<1x128xf32>
    %75 = vector.broadcast %74 : vector<1x128xf32> to vector<16x128xf32>
    %76 = arith.addf %73, %75 : vector<16x128xf32>
    %cst_57 = arith.constant 0.000000e+00 : f32
    %77 = vector.broadcast %cst_57 : f32 to vector<16x128xf32>
    %78 = arith.maximumf %76, %77 : vector<16x128xf32>
    %79 = arith.truncf %78 : vector<16x128xf32> to vector<16x128xbf16>
    %c0_58 = arith.constant 0 : index
    %c0_59 = arith.constant 0 : index
    %80 = vector.load %arg8[%c0_58, %c0_59] : memref<128x128xbf16, #tpu.memory_space<vmem>>, vector<128x128xbf16>
    %cst_60 = arith.constant dense<0.000000e+00> : vector<16x128xf32>
    %81 = tpu.matmul %79, %80, %cst_60 {dimension_numbers = #tpu.dot_dimension_numbers<[1], [0], [0], [1], [0, 0, 1, 1], [], []>} : vector<16x128xbf16>, vector<128x128xbf16>, vector<16x128xf32> -> vector<16x128xf32>
    %c0_61 = arith.constant 0 : index
    %c0_62 = arith.constant 0 : index
    %82 = vector.load %arg9[%c0_61, %c0_62] : memref<1x128xf32, #tpu.memory_space<vmem>>, vector<1x128xf32>
    %83 = vector.broadcast %82 : vector<1x128xf32> to vector<16x128xf32>
    %84 = arith.addf %81, %83 : vector<16x128xf32>
    %85 = vector.shape_cast %84 : vector<16x128xf32> to vector<4x4x128xf32>
    %86 = arith.truncf %85 : vector<4x4x128xf32> to vector<4x4x128xbf16>
    %c0_63 = arith.constant 0 : index
    %c0_64 = arith.constant 0 : index
    %c0_65 = arith.constant 0 : index
    %c0_66 = arith.constant 0 : index
    %87 = vector.load %arg10[%c0_63, %c0_64, %c0_65, %c0_66] : memref<1x4x4x128xbf16, #tpu.memory_space<vmem>>, vector<1x4x4x128xbf16>
    %88 = vector.shape_cast %87 : vector<1x4x4x128xbf16> to vector<4x4x128xbf16>
    %89 = vector.shape_cast %86 : vector<4x4x128xbf16> to vector<1x4x4x128xbf16>
    tpu.vector_store %arg10[%c0_63, %c0_64, %c0_65, %c0_66], %89 {strides = array<i32>} : memref<1x4x4x128xbf16, #tpu.memory_space<vmem>>, vector<1x4x4x128xbf16>,
    return
  }
  func.func @transform_0(%arg0: i32, %arg1: i32) -> (i32, i32, i32, i32) {
    %c0_i32 = arith.constant 0 : i32
    %c0_i32_0 = arith.constant 0 : i32
    %c0_i32_1 = arith.constant 0 : i32
    return %arg0, %arg1, %c0_i32, %c0_i32_0 : i32, i32, i32, i32
  }
  func.func @transform_1(%arg0: i32, %arg1: i32) -> (i32, i32, i32, i32, i32) {
    %c0_i32 = arith.constant 0 : i32
    %c0_i32_0 = arith.constant 0 : i32
    %c0_i32_1 = arith.constant 0 : i32
    %c0_i32_2 = arith.constant 0 : i32
    return %arg0, %arg1, %c0_i32, %c0_i32_0, %c0_i32_1 : i32, i32, i32, i32, i32
  }
  func.func @transform_2(%arg0: i32, %arg1: i32) -> (i32, i32) {
    %c0_i32 = arith.constant 0 : i32
    %c0_i32_0 = arith.constant 0 : i32
    %c0_i32_1 = arith.constant 0 : i32
    return %c0_i32, %c0_i32_0 : i32, i32
  }
  func.func @transform_3(%arg0: i32, %arg1: i32) -> (i32, i32) {
    %c0_i32 = arith.constant 0 : i32
    %c0_i32_0 = arith.constant 0 : i32
    %c0_i32_1 = arith.constant 0 : i32
    return %c0_i32, %c0_i32_0 : i32, i32
  }
  func.func @transform_4(%arg0: i32, %arg1: i32) -> (i32, i32, i32) {
    %c0_i32 = arith.constant 0 : i32
    %c0_i32_0 = arith.constant 0 : i32
    %c0_i32_1 = arith.constant 0 : i32
    %c0_i32_2 = arith.constant 0 : i32
    return %c0_i32, %c0_i32_0, %c0_i32_1 : i32, i32, i32
  }
  func.func @transform_5(%arg0: i32, %arg1: i32) -> (i32, i32) {
    %c0_i32 = arith.constant 0 : i32
    %c0_i32_0 = arith.constant 0 : i32
    %c0_i32_1 = arith.constant 0 : i32
    return %c0_i32, %c0_i32_0 : i32, i32
  }
  func.func @transform_6(%arg0: i32, %arg1: i32) -> (i32, i32) {
    %c0_i32 = arith.constant 0 : i32
    %c0_i32_0 = arith.constant 0 : i32
    %c0_i32_1 = arith.constant 0 : i32
    return %c0_i32, %c0_i32_0 : i32, i32
  }
  func.func @transform_7(%arg0: i32, %arg1: i32) -> (i32, i32) {
    %c0_i32 = arith.constant 0 : i32
    %c0_i32_0 = arith.constant 0 : i32
    %c0_i32_1 = arith.constant 0 : i32
    return %c0_i32, %c0_i32_0 : i32, i32
  }
  func.func @transform_8(%arg0: i32, %arg1: i32) -> (i32, i32, i32, i32) {
    %c0_i32 = arith.constant 0 : i32
    %c0_i32_0 = arith.constant 0 : i32
    %c0_i32_1 = arith.constant 0 : i32
    return %arg0, %arg1, %c0_i32, %c0_i32_0 : i32, i32, i32, i32
  }
}

module attributes {stable_mosaic.version = 11 : i64} {
  func.func @_regress_head_kernel(%arg0: i32, %arg1: i32, %arg2: memref<1x8x8x128xbf16, #tpu.memory_space<vmem>>, %arg3: memref<1x1x2x8x128xbf16, #tpu.memory_space<vmem>>, %arg4: memref<128x256xbf16, #tpu.memory_space<vmem>>, %arg5: memref<1x256xf32, #tpu.memory_space<vmem>>, %arg6: memref<3x768x128xbf16, #tpu.memory_space<vmem>>, %arg7: memref<1x128xf32, #tpu.memory_space<vmem>>, %arg8: memref<128x128xbf16, #tpu.memory_space<vmem>>, %arg9: memref<1x128xf32, #tpu.memory_space<vmem>>, %arg10: memref<1x8x8x128xbf16, #tpu.memory_space<vmem>>, %arg11: memref<10x10x256xf32, #tpu.memory_space<vmem>>) attributes {dimension_semantics = [#tpu.dimension_semantics<parallel>, #tpu.dimension_semantics<parallel>], iteration_bounds = array<i64: 2, 1>, scalar_prefetch = 0 : i64, scratch_operands = 1 : i64, tpu.core_type = #tpu.core_type<tc>, window_params = [{transform_indices = @transform_0, window_bounds = array<i64: 1, 8, 8, 128>}, {transform_indices = @transform_1, window_bounds = array<i64: 1, 1, 2, 8, 128>}, {pipeline_mode = #tpu.pipeline_mode<synchronous>, transform_indices = @transform_2, window_bounds = array<i64: 128, 256>}, {pipeline_mode = #tpu.pipeline_mode<synchronous>, transform_indices = @transform_3, window_bounds = array<i64: 1, 256>}, {pipeline_mode = #tpu.pipeline_mode<synchronous>, transform_indices = @transform_4, window_bounds = array<i64: 3, 768, 128>}, {pipeline_mode = #tpu.pipeline_mode<synchronous>, transform_indices = @transform_5, window_bounds = array<i64: 1, 128>}, {pipeline_mode = #tpu.pipeline_mode<synchronous>, transform_indices = @transform_6, window_bounds = array<i64: 128, 128>}, {pipeline_mode = #tpu.pipeline_mode<synchronous>, transform_indices = @transform_7, window_bounds = array<i64: 1, 128>}, {transform_indices = @transform_8, window_bounds = array<i64: 1, 8, 8, 128>}]} {
    %c0 = arith.constant 0 : index
    %c0_0 = arith.constant 0 : index
    %c0_1 = arith.constant 0 : index
    %c0_2 = arith.constant 0 : index
    %0 = vector.load %arg2[%c0, %c0_0, %c0_1, %c0_2] : memref<1x8x8x128xbf16, #tpu.memory_space<vmem>>, vector<1x8x8x128xbf16>
    %1 = vector.shape_cast %0 : vector<1x8x8x128xbf16> to vector<8x8x128xbf16>
    %2 = vector.shape_cast %1 : vector<8x8x128xbf16> to vector<64x128xbf16>
    %c0_3 = arith.constant 0 : index
    %c0_4 = arith.constant 0 : index
    %3 = vector.load %arg4[%c0_3, %c0_4] : memref<128x256xbf16, #tpu.memory_space<vmem>>, vector<128x256xbf16>
    %cst = arith.constant dense<0.000000e+00> : vector<64x256xf32>
    %4 = tpu.matmul %2, %3, %cst {dimension_numbers = #tpu.dot_dimension_numbers<[1], [0], [0], [1], [0, 0, 1, 1], [], []>} : vector<64x128xbf16>, vector<128x256xbf16>, vector<64x256xf32> -> vector<64x256xf32>
    %c0_5 = arith.constant 0 : index
    %c0_6 = arith.constant 0 : index
    %5 = vector.load %arg5[%c0_5, %c0_6] : memref<1x256xf32, #tpu.memory_space<vmem>>, vector<1x256xf32>
    %6 = vector.broadcast %5 : vector<1x256xf32> to vector<64x256xf32>
    %7 = arith.addf %4, %6 : vector<64x256xf32>
    %cst_7 = arith.constant 0.000000e+00 : f32
    %8 = vector.broadcast %cst_7 : f32 to vector<64x256xf32>
    %9 = arith.maximumf %7, %8 : vector<64x256xf32>
    %10 = vector.shape_cast %9 : vector<64x256xf32> to vector<8x8x256xf32>
    %c1 = arith.constant 1 : index
    %c1_8 = arith.constant 1 : index
    %c0_9 = arith.constant 0 : index
    %11 = vector.load %arg11[%c1, %c1_8, %c0_9] : memref<10x10x256xf32, #tpu.memory_space<vmem>>, vector<8x8x256xf32>
    tpu.vector_store %arg11[%c1, %c1_8, %c0_9], %10 {strides = array<i32>} : memref<10x10x256xf32, #tpu.memory_space<vmem>>, vector<8x8x256xf32>,
    %c0_10 = arith.constant 0 : index
    %c0_11 = arith.constant 0 : index
    %c0_12 = arith.constant 0 : index
    %c0_13 = arith.constant 0 : index
    %c0_14 = arith.constant 0 : index
    %12 = vector.load %arg3[%c0_10, %c0_11, %c0_12, %c0_13, %c0_14] : memref<1x1x2x8x128xbf16, #tpu.memory_space<vmem>>, vector<1x1x2x8x128xbf16>
    %13 = vector.shape_cast %12 : vector<1x1x2x8x128xbf16> to vector<2x8x128xbf16>
    %14 = vector.shape_cast %13 : vector<2x8x128xbf16> to vector<16x128xbf16>
    %c0_15 = arith.constant 0 : index
    %c0_16 = arith.constant 0 : index
    %15 = vector.load %arg4[%c0_15, %c0_16] : memref<128x256xbf16, #tpu.memory_space<vmem>>, vector<128x256xbf16>
    %cst_17 = arith.constant dense<0.000000e+00> : vector<16x256xf32>
    %16 = tpu.matmul %14, %15, %cst_17 {dimension_numbers = #tpu.dot_dimension_numbers<[1], [0], [0], [1], [0, 0, 1, 1], [], []>} : vector<16x128xbf16>, vector<128x256xbf16>, vector<16x256xf32> -> vector<16x256xf32>
    %c0_18 = arith.constant 0 : index
    %c0_19 = arith.constant 0 : index
    %17 = vector.load %arg5[%c0_18, %c0_19] : memref<1x256xf32, #tpu.memory_space<vmem>>, vector<1x256xf32>
    %18 = vector.broadcast %17 : vector<1x256xf32> to vector<16x256xf32>
    %19 = arith.addf %16, %18 : vector<16x256xf32>
    %cst_20 = arith.constant 0.000000e+00 : f32
    %20 = vector.broadcast %cst_20 : f32 to vector<16x256xf32>
    %21 = arith.maximumf %19, %20 : vector<16x256xf32>
    %22 = vector.shape_cast %21 : vector<16x256xf32> to vector<2x8x256xf32>
    %c0_i32 = arith.constant 0 : i32
    %23 = arith.cmpi sgt, %arg1, %c0_i32 : i32
    %24 = arith.extui %23 : i1 to i32
    %25 = arith.sitofp %24 : i32 to f32
    %c0_i32_21 = arith.constant 0 : i32
    %26 = arith.cmpi slt, %arg1, %c0_i32_21 : i32
    %27 = arith.extui %26 : i1 to i32
    %28 = arith.sitofp %27 : i32 to f32
    %29 = vector.extract_strided_slice %22 {offsets = [0, 0, 0], sizes = [1, 8, 256], strides = [1, 1, 1]} : vector<2x8x256xf32> to vector<1x8x256xf32>
    %30 = vector.broadcast %25 : f32 to vector<1x8x256xf32>
    %31 = arith.mulf %29, %30 : vector<1x8x256xf32>
    %c0_22 = arith.constant 0 : index
    %c1_23 = arith.constant 1 : index
    %c0_24 = arith.constant 0 : index
    %32 = vector.load %arg11[%c0_22, %c1_23, %c0_24] : memref<10x10x256xf32, #tpu.memory_space<vmem>>, vector<1x8x256xf32>
    tpu.vector_store %arg11[%c0_22, %c1_23, %c0_24], %31 {strides = array<i32>} : memref<10x10x256xf32, #tpu.memory_space<vmem>>, vector<1x8x256xf32>,
    %33 = vector.extract_strided_slice %22 {offsets = [1, 0, 0], sizes = [1, 8, 256], strides = [1, 1, 1]} : vector<2x8x256xf32> to vector<1x8x256xf32>
    %34 = vector.broadcast %28 : f32 to vector<1x8x256xf32>
    %35 = arith.mulf %33, %34 : vector<1x8x256xf32>
    %c9 = arith.constant 9 : index
    %c1_25 = arith.constant 1 : index
    %c0_26 = arith.constant 0 : index
    %36 = vector.load %arg11[%c9, %c1_25, %c0_26] : memref<10x10x256xf32, #tpu.memory_space<vmem>>, vector<1x8x256xf32>
    tpu.vector_store %arg11[%c9, %c1_25, %c0_26], %35 {strides = array<i32>} : memref<10x10x256xf32, #tpu.memory_space<vmem>>, vector<1x8x256xf32>,
    %cst_27 = arith.constant 0.000000e+00 : f32
    %37 = vector.broadcast %cst_27 : f32 to vector<10x1x256xf32>
    %c0_28 = arith.constant 0 : index
    %c0_29 = arith.constant 0 : index
    %c0_30 = arith.constant 0 : index
    %38 = vector.load %arg11[%c0_28, %c0_29, %c0_30] : memref<10x10x256xf32, #tpu.memory_space<vmem>>, vector<10x1x256xf32>
    tpu.vector_store %arg11[%c0_28, %c0_29, %c0_30], %37 {strides = array<i32>} : memref<10x10x256xf32, #tpu.memory_space<vmem>>, vector<10x1x256xf32>,
    %c0_31 = arith.constant 0 : index
    %c9_32 = arith.constant 9 : index
    %c0_33 = arith.constant 0 : index
    %39 = vector.load %arg11[%c0_31, %c9_32, %c0_33] : memref<10x10x256xf32, #tpu.memory_space<vmem>>, vector<10x1x256xf32>
    tpu.vector_store %arg11[%c0_31, %c9_32, %c0_33], %37 {strides = array<i32>} : memref<10x10x256xf32, #tpu.memory_space<vmem>>, vector<10x1x256xf32>,
    %cst_34 = arith.constant 0.000000e+00 : f32
    %40 = vector.broadcast %cst_34 : f32 to vector<64x128xf32>
    %c0_35 = arith.constant 0 : index
    %c0_36 = arith.constant 0 : index
    %c0_37 = arith.constant 0 : index
    %41 = vector.load %arg11[%c0_35, %c0_36, %c0_37] : memref<10x10x256xf32, #tpu.memory_space<vmem>>, vector<8x10x256xf32>
    %42 = arith.truncf %41 : vector<8x10x256xf32> to vector<8x10x256xbf16>
    %43 = vector.extract_strided_slice %42 {offsets = [0, 0, 0], sizes = [8, 8, 256], strides = [1, 1, 1]} : vector<8x10x256xbf16> to vector<8x8x256xbf16>
    %44 = vector.extract_strided_slice %42 {offsets = [0, 1, 0], sizes = [8, 8, 256], strides = [1, 1, 1]} : vector<8x10x256xbf16> to vector<8x8x256xbf16>
    %45 = vector.extract_strided_slice %42 {offsets = [0, 2, 0], sizes = [8, 8, 256], strides = [1, 1, 1]} : vector<8x10x256xbf16> to vector<8x8x256xbf16>
    %46 = tpu.concatenate %43, %44, %45 in 2 : vector<8x8x256xbf16>, vector<8x8x256xbf16>, vector<8x8x256xbf16> -> vector<8x8x768xbf16>
    %47 = vector.shape_cast %46 : vector<8x8x768xbf16> to vector<64x768xbf16>
    %c0_38 = arith.constant 0 : index
    %c0_39 = arith.constant 0 : index
    %c0_40 = arith.constant 0 : index
    %48 = vector.load %arg6[%c0_38, %c0_39, %c0_40] : memref<3x768x128xbf16, #tpu.memory_space<vmem>>, vector<1x768x128xbf16>
    %49 = vector.shape_cast %48 : vector<1x768x128xbf16> to vector<768x128xbf16>
    %cst_41 = arith.constant dense<0.000000e+00> : vector<64x128xf32>
    %50 = tpu.matmul %47, %49, %cst_41 {dimension_numbers = #tpu.dot_dimension_numbers<[1], [0], [0], [1], [0, 0, 1, 1], [], []>} : vector<64x768xbf16>, vector<768x128xbf16>, vector<64x128xf32> -> vector<64x128xf32>
    %51 = arith.addf %40, %50 : vector<64x128xf32>
    %c1_42 = arith.constant 1 : index
    %c0_43 = arith.constant 0 : index
    %c0_44 = arith.constant 0 : index
    %52 = vector.load %arg11[%c1_42, %c0_43, %c0_44] : memref<10x10x256xf32, #tpu.memory_space<vmem>>, vector<8x10x256xf32>
    %53 = arith.truncf %52 : vector<8x10x256xf32> to vector<8x10x256xbf16>
    %54 = vector.extract_strided_slice %53 {offsets = [0, 0, 0], sizes = [8, 8, 256], strides = [1, 1, 1]} : vector<8x10x256xbf16> to vector<8x8x256xbf16>
    %55 = vector.extract_strided_slice %53 {offsets = [0, 1, 0], sizes = [8, 8, 256], strides = [1, 1, 1]} : vector<8x10x256xbf16> to vector<8x8x256xbf16>
    %56 = vector.extract_strided_slice %53 {offsets = [0, 2, 0], sizes = [8, 8, 256], strides = [1, 1, 1]} : vector<8x10x256xbf16> to vector<8x8x256xbf16>
    %57 = tpu.concatenate %54, %55, %56 in 2 : vector<8x8x256xbf16>, vector<8x8x256xbf16>, vector<8x8x256xbf16> -> vector<8x8x768xbf16>
    %58 = vector.shape_cast %57 : vector<8x8x768xbf16> to vector<64x768xbf16>
    %c1_45 = arith.constant 1 : index
    %c0_46 = arith.constant 0 : index
    %c0_47 = arith.constant 0 : index
    %59 = vector.load %arg6[%c1_45, %c0_46, %c0_47] : memref<3x768x128xbf16, #tpu.memory_space<vmem>>, vector<1x768x128xbf16>
    %60 = vector.shape_cast %59 : vector<1x768x128xbf16> to vector<768x128xbf16>
    %cst_48 = arith.constant dense<0.000000e+00> : vector<64x128xf32>
    %61 = tpu.matmul %58, %60, %cst_48 {dimension_numbers = #tpu.dot_dimension_numbers<[1], [0], [0], [1], [0, 0, 1, 1], [], []>} : vector<64x768xbf16>, vector<768x128xbf16>, vector<64x128xf32> -> vector<64x128xf32>
    %62 = arith.addf %51, %61 : vector<64x128xf32>
    %c2 = arith.constant 2 : index
    %c0_49 = arith.constant 0 : index
    %c0_50 = arith.constant 0 : index
    %63 = vector.load %arg11[%c2, %c0_49, %c0_50] : memref<10x10x256xf32, #tpu.memory_space<vmem>>, vector<8x10x256xf32>
    %64 = arith.truncf %63 : vector<8x10x256xf32> to vector<8x10x256xbf16>
    %65 = vector.extract_strided_slice %64 {offsets = [0, 0, 0], sizes = [8, 8, 256], strides = [1, 1, 1]} : vector<8x10x256xbf16> to vector<8x8x256xbf16>
    %66 = vector.extract_strided_slice %64 {offsets = [0, 1, 0], sizes = [8, 8, 256], strides = [1, 1, 1]} : vector<8x10x256xbf16> to vector<8x8x256xbf16>
    %67 = vector.extract_strided_slice %64 {offsets = [0, 2, 0], sizes = [8, 8, 256], strides = [1, 1, 1]} : vector<8x10x256xbf16> to vector<8x8x256xbf16>
    %68 = tpu.concatenate %65, %66, %67 in 2 : vector<8x8x256xbf16>, vector<8x8x256xbf16>, vector<8x8x256xbf16> -> vector<8x8x768xbf16>
    %69 = vector.shape_cast %68 : vector<8x8x768xbf16> to vector<64x768xbf16>
    %c2_51 = arith.constant 2 : index
    %c0_52 = arith.constant 0 : index
    %c0_53 = arith.constant 0 : index
    %70 = vector.load %arg6[%c2_51, %c0_52, %c0_53] : memref<3x768x128xbf16, #tpu.memory_space<vmem>>, vector<1x768x128xbf16>
    %71 = vector.shape_cast %70 : vector<1x768x128xbf16> to vector<768x128xbf16>
    %cst_54 = arith.constant dense<0.000000e+00> : vector<64x128xf32>
    %72 = tpu.matmul %69, %71, %cst_54 {dimension_numbers = #tpu.dot_dimension_numbers<[1], [0], [0], [1], [0, 0, 1, 1], [], []>} : vector<64x768xbf16>, vector<768x128xbf16>, vector<64x128xf32> -> vector<64x128xf32>
    %73 = arith.addf %62, %72 : vector<64x128xf32>
    %c0_55 = arith.constant 0 : index
    %c0_56 = arith.constant 0 : index
    %74 = vector.load %arg7[%c0_55, %c0_56] : memref<1x128xf32, #tpu.memory_space<vmem>>, vector<1x128xf32>
    %75 = vector.broadcast %74 : vector<1x128xf32> to vector<64x128xf32>
    %76 = arith.addf %73, %75 : vector<64x128xf32>
    %cst_57 = arith.constant 0.000000e+00 : f32
    %77 = vector.broadcast %cst_57 : f32 to vector<64x128xf32>
    %78 = arith.maximumf %76, %77 : vector<64x128xf32>
    %79 = arith.truncf %78 : vector<64x128xf32> to vector<64x128xbf16>
    %c0_58 = arith.constant 0 : index
    %c0_59 = arith.constant 0 : index
    %80 = vector.load %arg8[%c0_58, %c0_59] : memref<128x128xbf16, #tpu.memory_space<vmem>>, vector<128x128xbf16>
    %cst_60 = arith.constant dense<0.000000e+00> : vector<64x128xf32>
    %81 = tpu.matmul %79, %80, %cst_60 {dimension_numbers = #tpu.dot_dimension_numbers<[1], [0], [0], [1], [0, 0, 1, 1], [], []>} : vector<64x128xbf16>, vector<128x128xbf16>, vector<64x128xf32> -> vector<64x128xf32>
    %c0_61 = arith.constant 0 : index
    %c0_62 = arith.constant 0 : index
    %82 = vector.load %arg9[%c0_61, %c0_62] : memref<1x128xf32, #tpu.memory_space<vmem>>, vector<1x128xf32>
    %83 = vector.broadcast %82 : vector<1x128xf32> to vector<64x128xf32>
    %84 = arith.addf %81, %83 : vector<64x128xf32>
    %85 = vector.shape_cast %84 : vector<64x128xf32> to vector<8x8x128xf32>
    %86 = arith.truncf %85 : vector<8x8x128xf32> to vector<8x8x128xbf16>
    %c0_63 = arith.constant 0 : index
    %c0_64 = arith.constant 0 : index
    %c0_65 = arith.constant 0 : index
    %c0_66 = arith.constant 0 : index
    %87 = vector.load %arg10[%c0_63, %c0_64, %c0_65, %c0_66] : memref<1x8x8x128xbf16, #tpu.memory_space<vmem>>, vector<1x8x8x128xbf16>
    %88 = vector.shape_cast %87 : vector<1x8x8x128xbf16> to vector<8x8x128xbf16>
    %89 = vector.shape_cast %86 : vector<8x8x128xbf16> to vector<1x8x8x128xbf16>
    tpu.vector_store %arg10[%c0_63, %c0_64, %c0_65, %c0_66], %89 {strides = array<i32>} : memref<1x8x8x128xbf16, #tpu.memory_space<vmem>>, vector<1x8x8x128xbf16>,
    return
  }
  func.func @transform_0(%arg0: i32, %arg1: i32) -> (i32, i32, i32, i32) {
    %c0_i32 = arith.constant 0 : i32
    %c0_i32_0 = arith.constant 0 : i32
    %c0_i32_1 = arith.constant 0 : i32
    return %arg0, %arg1, %c0_i32, %c0_i32_0 : i32, i32, i32, i32
  }
  func.func @transform_1(%arg0: i32, %arg1: i32) -> (i32, i32, i32, i32, i32) {
    %c0_i32 = arith.constant 0 : i32
    %c0_i32_0 = arith.constant 0 : i32
    %c0_i32_1 = arith.constant 0 : i32
    %c0_i32_2 = arith.constant 0 : i32
    return %arg0, %arg1, %c0_i32, %c0_i32_0, %c0_i32_1 : i32, i32, i32, i32, i32
  }
  func.func @transform_2(%arg0: i32, %arg1: i32) -> (i32, i32) {
    %c0_i32 = arith.constant 0 : i32
    %c0_i32_0 = arith.constant 0 : i32
    %c0_i32_1 = arith.constant 0 : i32
    return %c0_i32, %c0_i32_0 : i32, i32
  }
  func.func @transform_3(%arg0: i32, %arg1: i32) -> (i32, i32) {
    %c0_i32 = arith.constant 0 : i32
    %c0_i32_0 = arith.constant 0 : i32
    %c0_i32_1 = arith.constant 0 : i32
    return %c0_i32, %c0_i32_0 : i32, i32
  }
  func.func @transform_4(%arg0: i32, %arg1: i32) -> (i32, i32, i32) {
    %c0_i32 = arith.constant 0 : i32
    %c0_i32_0 = arith.constant 0 : i32
    %c0_i32_1 = arith.constant 0 : i32
    %c0_i32_2 = arith.constant 0 : i32
    return %c0_i32, %c0_i32_0, %c0_i32_1 : i32, i32, i32
  }
  func.func @transform_5(%arg0: i32, %arg1: i32) -> (i32, i32) {
    %c0_i32 = arith.constant 0 : i32
    %c0_i32_0 = arith.constant 0 : i32
    %c0_i32_1 = arith.constant 0 : i32
    return %c0_i32, %c0_i32_0 : i32, i32
  }
  func.func @transform_6(%arg0: i32, %arg1: i32) -> (i32, i32) {
    %c0_i32 = arith.constant 0 : i32
    %c0_i32_0 = arith.constant 0 : i32
    %c0_i32_1 = arith.constant 0 : i32
    return %c0_i32, %c0_i32_0 : i32, i32
  }
  func.func @transform_7(%arg0: i32, %arg1: i32) -> (i32, i32) {
    %c0_i32 = arith.constant 0 : i32
    %c0_i32_0 = arith.constant 0 : i32
    %c0_i32_1 = arith.constant 0 : i32
    return %c0_i32, %c0_i32_0 : i32, i32
  }
  func.func @transform_8(%arg0: i32, %arg1: i32) -> (i32, i32, i32, i32) {
    %c0_i32 = arith.constant 0 : i32
    %c0_i32_0 = arith.constant 0 : i32
    %c0_i32_1 = arith.constant 0 : i32
    return %arg0, %arg1, %c0_i32, %c0_i32_0 : i32, i32, i32, i32
  }
}

module attributes {stable_mosaic.version = 11 : i64} {
  func.func @_norm_sum_kernel(%arg0: i32, %arg1: i32, %arg2: memref<1x64x128xbf16, #tpu.memory_space<vmem>>, %arg3: memref<1x64x128xbf16, #tpu.memory_space<vmem>>, %arg4: memref<1x64x128xbf16, #tpu.memory_space<vmem>>, %arg5: memref<1x64x128xf32, #tpu.memory_space<vmem>>) attributes {dimension_semantics = [#tpu.dimension_semantics<parallel>, #tpu.dimension_semantics<parallel>], iteration_bounds = array<i64: 2, 1>, scalar_prefetch = 0 : i64, scratch_operands = 0 : i64, tpu.core_type = #tpu.core_type<tc>, window_params = [{transform_indices = @transform_0, window_bounds = array<i64: 1, 64, 128>}, {transform_indices = @transform_1, window_bounds = array<i64: 1, 64, 128>}, {transform_indices = @transform_2, window_bounds = array<i64: 1, 64, 128>}, {transform_indices = @transform_3, window_bounds = array<i64: 1, 64, 128>}]} {
    %c0 = arith.constant 0 : index
    %c0_0 = arith.constant 0 : index
    %c0_1 = arith.constant 0 : index
    %0 = vector.load %arg2[%c0, %c0_0, %c0_1] : memref<1x64x128xbf16, #tpu.memory_space<vmem>>, vector<1x64x128xbf16>
    %1 = vector.shape_cast %0 : vector<1x64x128xbf16> to vector<64x128xbf16>
    %2 = arith.extf %1 : vector<64x128xbf16> to vector<64x128xf32>
    %3 = arith.mulf %2, %2 : vector<64x128xf32>
    %cst = arith.constant dense<0.000000e+00> : vector<64xf32>
    %4 = vector.multi_reduction <add>, %3, %cst [1] : vector<64x128xf32> to vector<64xf32>
    %5 = vector.shape_cast %4 : vector<64xf32> to vector<64x1xf32>
    %cst_2 = arith.constant 1.000000e-24 : f32
    %6 = vector.broadcast %cst_2 : f32 to vector<64x1xf32>
    %7 = arith.maximumf %5, %6 : vector<64x1xf32>
    %8 = math.rsqrt %7 : vector<64x1xf32>
    %9 = vector.broadcast %8 : vector<64x1xf32> to vector<64x128xf32>
    %10 = arith.mulf %2, %9 : vector<64x128xf32>
    %c0_3 = arith.constant 0 : index
    %c0_4 = arith.constant 0 : index
    %c0_5 = arith.constant 0 : index
    %11 = vector.load %arg3[%c0_3, %c0_4, %c0_5] : memref<1x64x128xbf16, #tpu.memory_space<vmem>>, vector<1x64x128xbf16>
    %12 = vector.shape_cast %11 : vector<1x64x128xbf16> to vector<64x128xbf16>
    %13 = arith.extf %12 : vector<64x128xbf16> to vector<64x128xf32>
    %14 = arith.mulf %13, %13 : vector<64x128xf32>
    %cst_6 = arith.constant dense<0.000000e+00> : vector<64xf32>
    %15 = vector.multi_reduction <add>, %14, %cst_6 [1] : vector<64x128xf32> to vector<64xf32>
    %16 = vector.shape_cast %15 : vector<64xf32> to vector<64x1xf32>
    %cst_7 = arith.constant 1.000000e-24 : f32
    %17 = vector.broadcast %cst_7 : f32 to vector<64x1xf32>
    %18 = arith.maximumf %16, %17 : vector<64x1xf32>
    %19 = math.rsqrt %18 : vector<64x1xf32>
    %20 = vector.broadcast %19 : vector<64x1xf32> to vector<64x128xf32>
    %21 = arith.mulf %13, %20 : vector<64x128xf32>
    %22 = arith.addf %10, %21 : vector<64x128xf32>
    %c0_8 = arith.constant 0 : index
    %c0_9 = arith.constant 0 : index
    %c0_10 = arith.constant 0 : index
    %23 = vector.load %arg4[%c0_8, %c0_9, %c0_10] : memref<1x64x128xbf16, #tpu.memory_space<vmem>>, vector<1x64x128xbf16>
    %24 = vector.shape_cast %23 : vector<1x64x128xbf16> to vector<64x128xbf16>
    %25 = arith.extf %24 : vector<64x128xbf16> to vector<64x128xf32>
    %26 = arith.mulf %25, %25 : vector<64x128xf32>
    %cst_11 = arith.constant dense<0.000000e+00> : vector<64xf32>
    %27 = vector.multi_reduction <add>, %26, %cst_11 [1] : vector<64x128xf32> to vector<64xf32>
    %28 = vector.shape_cast %27 : vector<64xf32> to vector<64x1xf32>
    %cst_12 = arith.constant 1.000000e-24 : f32
    %29 = vector.broadcast %cst_12 : f32 to vector<64x1xf32>
    %30 = arith.maximumf %28, %29 : vector<64x1xf32>
    %31 = math.rsqrt %30 : vector<64x1xf32>
    %32 = vector.broadcast %31 : vector<64x1xf32> to vector<64x128xf32>
    %33 = arith.mulf %25, %32 : vector<64x128xf32>
    %34 = arith.addf %22, %33 : vector<64x128xf32>
    %35 = arith.mulf %34, %34 : vector<64x128xf32>
    %cst_13 = arith.constant dense<0.000000e+00> : vector<64xf32>
    %36 = vector.multi_reduction <add>, %35, %cst_13 [1] : vector<64x128xf32> to vector<64xf32>
    %37 = vector.shape_cast %36 : vector<64xf32> to vector<64x1xf32>
    %cst_14 = arith.constant 1.000000e-24 : f32
    %38 = vector.broadcast %cst_14 : f32 to vector<64x1xf32>
    %39 = arith.maximumf %37, %38 : vector<64x1xf32>
    %40 = math.rsqrt %39 : vector<64x1xf32>
    %41 = vector.broadcast %40 : vector<64x1xf32> to vector<64x128xf32>
    %42 = arith.mulf %34, %41 : vector<64x128xf32>
    %c0_15 = arith.constant 0 : index
    %c0_16 = arith.constant 0 : index
    %c0_17 = arith.constant 0 : index
    %43 = vector.load %arg5[%c0_15, %c0_16, %c0_17] : memref<1x64x128xf32, #tpu.memory_space<vmem>>, vector<1x64x128xf32>
    %44 = vector.shape_cast %43 : vector<1x64x128xf32> to vector<64x128xf32>
    %45 = vector.shape_cast %42 : vector<64x128xf32> to vector<1x64x128xf32>
    tpu.vector_store %arg5[%c0_15, %c0_16, %c0_17], %45 {strides = array<i32>} : memref<1x64x128xf32, #tpu.memory_space<vmem>>, vector<1x64x128xf32>,
    return
  }
  func.func @transform_0(%arg0: i32, %arg1: i32) -> (i32, i32, i32) {
    %c0_i32 = arith.constant 0 : i32
    %c0_i32_0 = arith.constant 0 : i32
    return %arg0, %arg1, %c0_i32 : i32, i32, i32
  }
  func.func @transform_1(%arg0: i32, %arg1: i32) -> (i32, i32, i32) {
    %c0_i32 = arith.constant 0 : i32
    %c0_i32_0 = arith.constant 0 : i32
    return %arg0, %arg1, %c0_i32 : i32, i32, i32
  }
  func.func @transform_2(%arg0: i32, %arg1: i32) -> (i32, i32, i32) {
    %c0_i32 = arith.constant 0 : i32
    %c0_i32_0 = arith.constant 0 : i32
    return %arg0, %arg1, %c0_i32 : i32, i32, i32
  }
  func.func @transform_3(%arg0: i32, %arg1: i32) -> (i32, i32, i32) {
    %c0_i32 = arith.constant 0 : i32
    %c0_i32_0 = arith.constant 0 : i32
    return %arg0, %arg1, %c0_i32 : i32, i32, i32
  }
}

</mosaic_0001>

<bundles_post_ra>
// kernel: _lambda_.12
= control target key start
LH: loop header
LB: loop body
LE: loop exit
PB: predicated region body
PF: predicated region fallthrough
CT: control target
= control target key end

     0   :  { %s4276_s27 = smov 0   ;;  %s4278_s28 = smov 0   ;;  %s5101_s0 = inlined_call_operand.vmem [shape: bf16[2,4,4,128], index: 0, kind: input, shape index: {}]   ;;  %s5102_s1 = inlined_call_operand.vmem [shape: bf16[2,1,2,4,128], index: 1, kind: input, shape index: {}]   ;;  %s5103_s2 = inlined_call_operand.vmem [shape: bf16[128,256], index: 2, kind: input, shape index: {}]   ;;  %s5104_s3 = inlined_call_operand.vmem [shape: f32[1,256], index: 3, kind: input, shape index: {}]   ;;  %s5105_s4 = inlined_call_operand.vmem [shape: bf16[3,768,128], index: 4, kind: input, shape index: {}]   ;;  %s5106_s5 = inlined_call_operand.vmem [shape: f32[1,128], index: 5, kind: input, shape index: {}]   ;;  %s5107_s6 = inlined_call_operand.vmem [shape: bf16[128,128], index: 6, kind: input, shape index: {}]   ;;  %s5108_s7 = inlined_call_operand.vmem [shape: f32[1,128], index: 7, kind: input, shape index: {}]   ;;  %s5109_s8 = inlined_call_operand.vmem [shape: bf16[2,4,4,128], index: 8, kind: output, shape index: {}]  }
   0x1   :  { %s4280_s29 = smov 0  }
   0x2 LB: > { %s30_s30 = sadd.s32 1, %s4221_s28  ;;  %p3354_p0 = scmp.ge.s32.totalorder %s4225_s29, 1  ;;  %s4225_s29 = sphi %s4280_s29, %s18_s29   ;;  %s4221_s28 = sphi %s4278_s28, %s5111_s28   ;;  %s4217_s27 = sphi %s4276_s27, %s5110_s27  }
   0x3   : > { %p32_p1 = scmp.ge.s32.totalorder %s30_s30, 2  ;;  %p299_p2 = scmp.lt.s32.totalorder %s4225_s29, 3 }
   0x5   : > { %s5113_s30 = smov (%p32_p1, %s30_s30), 0  ;;  %p300_p3 = pnand %p3354_p0, %p299_p2 }
   0x6   : > { %v4027_v0 = vld [vmem:[%s5103_s2 + $0x4] ss:$8 sps:$4 sm:$0xff] (!%p300_p3)   ;;  %v4029_v1 = vld [vmem:[%s5103_s2] ss:$8 sps:$4 sm:$0xff] (!%p300_p3)   ;;  %v4227_v2 = vmov (!%p300_p3), 0   ;;  %p351_p4 = scmp.lt.s32.totalorder (!%p300_p3), %s4217_s27, 1  ;;  %v402_v8 = vlaneseq (!%p300_p3) }
   0x7   : > { %303 = sbr.rel (%p300_p3) target bundleno = 861 (0x35d), region = 52  ;;  %546 = vmatprep.mubr.bf16.mxu0 (!%p300_p3), %v4227_v2  ;;  %751 = vmatprep.mubr.bf16.mxu1 (!%p300_p3), %v4227_v2  ;;  %v4030_v3 = vld [vmem:[%s5103_s2 + $0x14] ss:$8 sps:$4 sm:$0xff] (!%p300_p3)   ;;  %v4032_v4 = vld [vmem:[%s5103_s2 + $0x10] ss:$8 sps:$4 sm:$0xff] (!%p300_p3)   ;;  %v4051_v34 = vld [vmem:[%s5105_s4 + $0x1c0] sm:$0xff] (!%p300_p3)  }
   0x8   : > { %514 = vmatprep.subr.bf16.mxu0 (!%p300_p3), %v4027_v0  ;;  %719 = vmatprep.subr.bf16.mxu1 (!%p300_p3), %v4027_v0  ;;  %v4033_v5 = vld [vmem:[%s5103_s2 + $0x24] ss:$8 sps:$4 sm:$0xff] (!%p300_p3)   ;;  %v4035_v6 = vld [vmem:[%s5103_s2 + $0x20] ss:$8 sps:$4 sm:$0xff] (!%p300_p3)   ;;  %v4036_v7 = vld [vmem:[%s5103_s2 + $0x34] ss:$8 sps:$4 sm:$0xff] (!%p300_p3)  }
   0x9   : > { %515 = vmatpush1.bf16.msra.mxu0 (!%p300_p3), %v4029_v1  ;;  %720 = vmatpush1.bf16.msra.mxu1 (!%p300_p3), %v4029_v1  ;;  %v4038_v9 = vld [vmem:[%s5103_s2 + $0x30] ss:$8 sps:$4 sm:$0xff] (!%p300_p3)   ;;  %v4039_v10 = vld [vmem:[%s5103_s2 + $0x44] ss:$8 sps:$4 sm:$0xff] (!%p300_p3)   ;;  %v4325_v11 = vshrl.u32 (!%p300_p3), %v402_v8, 7  ;;  %vm797_vm0 = vcmp.lt.s32.totalorder (!%p300_p3), %v402_v8, 256 }
   0xa   : > { %516 = vmatprep.subr.bf16.mxu0 (!%p300_p3), %v4030_v3  ;;  %721 = vmatprep.subr.bf16.mxu1 (!%p300_p3), %v4030_v3  ;;  %v4041_v12 = vld [vmem:[%s5103_s2 + $0x40] ss:$8 sps:$4 sm:$0xff] (!%p300_p3)   ;;  %v4042_v13 = vld [vmem:[%s5103_s2 + $0x54] ss:$8 sps:$4 sm:$0xff] (!%p300_p3)   ;;  %v4228_v14 = vmov (!%p300_p3), 1983009808  }
   0xb   : > { %v419_v15 = vunpack.c.l.s4 (!%p300_p3), %v4228_v14  ;;  %v4044_v16 = vld [vmem:[%s5103_s2 + $0x50] ss:$8 sps:$4 sm:$0xff] (!%p300_p3)   ;;  %v4045_v21 = vld [vmem:[%s5103_s2 + $0x64] ss:$8 sps:$4 sm:$0xff] (!%p300_p3)   ;;  %v4047_v23 = vld [vmem:[%s5103_s2 + $0x60] ss:$8 sps:$4 sm:$0xff] (!%p300_p3)  }
   0xc   : > { %v4048_v26 = vld [vmem:[%s5103_s2 + $0x74] ss:$8 sps:$4 sm:$0xff] (!%p300_p3)   ;;  %v4050_v30 = vld [vmem:[%s5103_s2 + $0x70] ss:$8 sps:$4 sm:$0xff] (!%p300_p3)   ;;  %v4052_v35 = vld [vmem:[%s5105_s4 + $0x180] sm:$0xff] (!%p300_p3)   ;;  %v4229_v48 = vmov (!%p300_p3), 0.0  }
   0xd   : > { %517 = vmatpush1.bf16.msra.mxu0 (!%p300_p3), %v4032_v4  ;;  %722 = vmatpush1.bf16.msra.mxu1 (!%p300_p3), %v4032_v4  ;;  %v420_v22 = vunpack.c.0.s8 (!%p300_p3), %v419_v15  ;;  %v4053_v38 = vld [vmem:[%s5105_s4 + $0x1c8] sm:$0xff] (!%p300_p3)   ;;  %v4055_v40 = vld [vmem:[%s5105_s4 + $0x1d0] sm:$0xff] (!%p300_p3)   ;;  %v4056_v41 = vld [vmem:[%s5105_s4 + $0x240] sm:$0xff] (!%p300_p3)   ;;  %802 = vst.msk [vmem:[#allocation2 + $0x10] ss:$8 sm:$0x3] (!%p300_p3), %vm797_vm0, %v4229_v48 }
   0xe   : > { %s5115_s27 = smov (!%p351_p4, %s4217_s27), 1  ;;  %518 = vmatprep.subr.bf16.mxu0 %v4033_v5  ;;  %723 = vmatprep.subr.bf16.mxu1 %v4033_v5  ;;  %v4054_v39 = vld [vmem:[%s5105_s4 + $0x188] sm:$0xff]   ;;  %v4057_v42 = vld [vmem:[%s5105_s4 + $0x190] sm:$0xff]   ;;  %v4058_v43 = vld [vmem:[%s5105_s4 + $0x200] sm:$0xff]   ;;  %vm4230_vm1 = vmmov 0  }
   0xf   : > { %s3769_s25 = sshll.u32 %s5115_s27, 3  ;;  %s3770_s10 = sshll.u32 %s5115_s27, 2  ;;  %v4355_v29 = vsub.s32 %v420_v22, %v4325_v11  ;;  %v4059_v44 = vld [vmem:[%s5105_s4 + $0x1d8] sm:$0xff]   ;;  %v4060_v45 = vld [vmem:[%s5105_s4 + $0x248] sm:$0xff]   ;;  %v4063_v49 = vld [vmem:[%s5105_s4 + $0x1e0] sm:$0xff]  }
  0x10   : > { %s358_s17 = scalar_lea.vmem %s5101_s0, %s3769_s25  ;;  %s368_s24 = scalar_lea.vmem %s5102_s1, %s3770_s10  ;;  %v4061_v46 = vld [vmem:[%s5105_s4 + $0x198] sm:$0xff]   ;;  %v4062_v47 = vld [vmem:[%s5105_s4 + $0x208] sm:$0xff]   ;;  %805 = vst.msk [vmem:[#allocation2 + $0x20] ss:$8 sm:$0x3] %vm797_vm0, %v4229_v48  ;;  %v4064_v50 = vld [vmem:[%s5105_s4 + $0x250] sm:$0xff]  }
  0x11   : > { %519 = vmatpush1.bf16.msra.mxu0 %v4035_v6  ;;  %724 = vmatpush1.bf16.msra.mxu1 %v4035_v6  ;;  %v380_v17 = vld [vmem:[%s358_s17] sm:$0x3]  ;;  %v381_v18 = vld [vmem:[%s358_s17 + $0x2] sm:$0x3]  ;;  %v382_v19 = vld [vmem:[%s358_s17 + $0x4] sm:$0x3]  ;;  %s377_s22 = scalar_lea.vmem %s5109_s8, %s3769_s25 }
  0x12   : > { %520 = vmatprep.subr.bf16.mxu0 %v4036_v7  ;;  %725 = vmatprep.subr.bf16.mxu1 %v4036_v7  ;;  %v383_v20 = vld [vmem:[%s358_s17 + $0x6] sm:$0x3]  ;;  %v598_v24 = vld [vmem:[%s368_s24] sm:$0x3]  ;;  %v599_v25 = vld [vmem:[%s368_s24 + $0x2] sm:$0x3]  ;;  %v416_v27 = vcombine.low %v380_v17, %v381_v18 }
  0x13   : > { %v417_v28 = vcombine.low %v382_v19, %v383_v20  ;;  %v630_v33 = vcombine.low %v598_v24, %v599_v25  ;;  %808 = vst.msk [vmem:[#allocation2 + $0x30] ss:$8 sm:$0x3] %vm797_vm0, %v4229_v48  ;;  %811 = vst.msk [vmem:[#allocation2 + $0x40] ss:$8 sm:$0x3] %vm797_vm0, %v4229_v48 }
  0x14   : > { %v424_v31 = vrot.slane %v416_v27, %v4355_v29  ;;  %820 = vst.msk [vmem:[#allocation2 + $0x15] ss:$8 sm:$0x3] %vm797_vm0, %v4229_v48  ;;  %823 = vst.msk [vmem:[#allocation2 + $0x25] ss:$8 sm:$0x3] %vm797_vm0, %v4229_v48 }
  0x15   : > { %521 = vmatpush1.bf16.msra.mxu0 %v4038_v9  ;;  %726 = vmatpush1.bf16.msra.mxu1 %v4038_v9  ;;  %v431_v32 = vrot.slane %v417_v28, %v4355_v29  ;;  %v637_v37 = vrot.slane %v630_v33, %v4355_v29  ;;  %826 = vst.msk [vmem:[#allocation2 + $0x35] ss:$8 sm:$0x3] %vm797_vm0, %v4229_v48  ;;  %829 = vst.msk [vmem:[#allocation2 + $0x45] ss:$8 sm:$0x3] %vm797_vm0, %v4229_v48 }
  0x16   : > { %522 = vmatprep.subr.bf16.mxu0 %v4039_v10  ;;  %727 = vmatprep.subr.bf16.mxu1 %v4039_v10  ;;  %799 = vst.msk [vmem:[#allocation2] ss:$8 sm:$0x3] %vm797_vm0, %v4229_v48  ;;  %814 = vst.msk [vmem:[#allocation2 + $0x50] ss:$8 sm:$0x3] %vm797_vm0, %v4229_v48 }
  0x17   : > { %v432_v36 = vcombine.low %v424_v31, %v431_v32  ;;  %817 = vst.msk [vmem:[#allocation2 + $0x5] ss:$8 sm:$0x3] %vm797_vm0, %v4229_v48  ;;  %832 = vst.msk [vmem:[#allocation2 + $0x55] ss:$8 sm:$0x3] %vm797_vm0, %v4229_v48 }
  0x18   : > { %v4065_v51 = vld [vmem:[%s5105_s4 + $0x1a0] sm:$0xff]   ;;  %v4066_v52 = vld [vmem:[%s5105_s4 + $0x210] sm:$0xff]   ;;  %v4067_v53 = vld [vmem:[%s5105_s4 + $0x1e8] sm:$0xff]   ;;  %v404_v7 = vsub.s32 0, %v4325_v11  ;;  %v408_v10 = vsub.s32 1, %v4325_v11 }
  0x19   : > { %523 = vmatpush1.bf16.msra.mxu0 %v4041_v12  ;;  %728 = vmatpush1.bf16.msra.mxu1 %v4041_v12  ;;  %v4068_v54 = vld [vmem:[%s5105_s4 + $0x258] sm:$0xff]   ;;  %v4069_v55 = vld [vmem:[%s5105_s4 + $0x1a8] sm:$0xff]   ;;  %v4071_v57 = vld [vmem:[%s5105_s4 + $0x1f0] sm:$0xff]  }
  0x1a   : > { %524 = vmatprep.subr.bf16.mxu0 %v4042_v13  ;;  %729 = vmatprep.subr.bf16.mxu1 %v4042_v13  ;;  %v4070_v56 = vld [vmem:[%s5105_s4 + $0x218] sm:$0xff]   ;;  %v4072_v58 = vld [vmem:[%s5105_s4 + $0x260] sm:$0xff]   ;;  %v4073_v59 = vld [vmem:[%s5105_s4 + $0x1b0] sm:$0xff]  }
  0x1b   : > { %v4074_v60 = vld [vmem:[%s5105_s4 + $0x220] sm:$0xff]   ;;  %v4075_v61 = vld [vmem:[%s5105_s4 + $0x1f8] sm:$0xff]   ;;  %v4076_v62 = vld [vmem:[%s5105_s4 + $0x268] sm:$0xff]  }
  0x1c   : > { %v4077_v63 = vld [vmem:[%s5105_s4 + $0x1b8] sm:$0xff]   ;;  %v4078_v0 = vld [vmem:[%s5105_s4 + $0x228] sm:$0xff]   ;;  %v4079_v1 = vld [vmem:[%s5105_s4 + $0x270] sm:$0xff]  }
  0x1d   : > { %525 = vmatpush1.bf16.msra.mxu0 %v4044_v16  ;;  %730 = vmatpush1.bf16.msra.mxu1 %v4044_v16  ;;  %v4080_v2 = vld [vmem:[%s5105_s4 + $0x2c0] sm:$0xff]   ;;  %v4081_v3 = vld [vmem:[%s5105_s4 + $0x230] sm:$0xff]   ;;  %v4083_v4 = vld [vmem:[%s5105_s4 + $0x278] sm:$0xff]  }
  0x1e   : > { %526 = vmatprep.subr.bf16.mxu0 %v4045_v21  ;;  %731 = vmatprep.subr.bf16.mxu1 %v4045_v21  ;;  %v4085_v5 = vld [vmem:[%s5105_s4 + $0x238] sm:$0xff]   ;;  %v4088_v6 = vld [vmem:[%s5105_s4 + $0x40] sm:$0xff]  }
  0x1f   : > { %v400_v8 = vld [vmem:[%s5104_s3] sm:$0x3] }
  0x20   : > { %v616_v9 = vld [vmem:[%s5104_s3] sm:$0x3]  ;;  %v405_v12 = vrot.slane %v400_v8, %v404_v7  ;;  %v409_v14 = vrot.slane %v400_v8, %v408_v10 }
  0x21   : > { %527 = vmatpush1.bf16.msra.mxu0 %v4047_v23  ;;  %732 = vmatpush1.bf16.msra.mxu1 %v4047_v23  ;;  %v621_v13 = vrot.slane %v616_v9, %v404_v7  ;;  %v625_v15 = vrot.slane %v616_v9, %v408_v10 }
  0x22   : > { %528 = vmatprep.subr.bf16.mxu0 %v4048_v26  ;;  %733 = vmatprep.subr.bf16.mxu1 %v4048_v26 }
  0x25   : > { %529 = vmatpush1.bf16.msra.mxu0 %v4050_v30  ;;  %734 = vmatpush1.bf16.msra.mxu1 %v4050_v30 }
  0x26   : > { %3772 = vmatprep.subr.bf16.mxu0 %v4051_v34  ;;  %3794 = vmatprep.subr.bf16.mxu1 %v4056_v41 }
  0x28   : > { %547 = vmatmul.mubr.bf16.vlgmr.msra.gmra.mrb[0].mxu0 %v432_v36  ;;  %752 = vmatmul.mubr.bf16.vlgmr.msra.gmra.mrb[0].mxu1 %v637_v37 }
  0x29   : > { %3773 = vmatpush3.bf16.msra.mxu0 %v4052_v35  ;;  %3795 = vmatpush3.bf16.msra.mxu1 %v4058_v43 }
  0x2a   : > { %3774 = vmatprep.subr.bf16.mxu0 %v4053_v38  ;;  %3796 = vmatprep.subr.bf16.mxu1 %v4060_v45 }
  0x2d   : > { %3775 = vmatpush3.bf16.msra.mxu0 %v4054_v39  ;;  %3797 = vmatpush3.bf16.msra.mxu1 %v4062_v47 }
  0x2e   : > { %3776 = vmatprep.subr.bf16.mxu0 %v4055_v40  ;;  %3798 = vmatprep.subr.bf16.mxu1 %v4064_v50 }
  0x31   : > { %3777 = vmatpush3.bf16.msra.mxu0 %v4057_v42  ;;  %3799 = vmatpush3.bf16.msra.mxu1 %v4066_v52 }
  0x32   : > { %3778 = vmatprep.subr.bf16.mxu0 %v4059_v44  ;;  %3800 = vmatprep.subr.bf16.mxu1 %v4068_v54 }
  0x35   : > { %3779 = vmatpush3.bf16.msra.mxu0 %v4061_v46  ;;  %3801 = vmatpush3.bf16.msra.mxu1 %v4070_v56 }
  0x36   : > { %3780 = vmatprep.subr.bf16.mxu0 %v4063_v49  ;;  %3802 = vmatprep.subr.bf16.mxu1 %v4072_v58 }
  0x39   : > { %3781 = vmatpush3.bf16.msra.mxu0 %v4065_v51  ;;  %3803 = vmatpush3.bf16.msra.mxu1 %v4074_v60 }
  0x3a   : > { %3782 = vmatprep.subr.bf16.mxu0 %v4067_v53  ;;  %3804 = vmatprep.subr.bf16.mxu1 %v4076_v62 }
  0x3d   : > { %3783 = vmatpush3.bf16.msra.mxu0 %v4069_v55  ;;  %3805 = vmatpush3.bf16.msra.mxu1 %v4078_v0 }
  0x3e   : > { %3784 = vmatprep.subr.bf16.mxu0 %v4071_v57  ;;  %3806 = vmatprep.subr.bf16.mxu1 %v4079_v1 }
  0x41   : > { %3785 = vmatpush3.bf16.msra.mxu0 %v4073_v59  ;;  %3807 = vmatpush3.bf16.msra.mxu1 %v4081_v3 }
  0x42   : > { %3786 = vmatprep.subr.bf16.mxu0 %v4075_v61  ;;  %3808 = vmatprep.subr.bf16.mxu1 %v4083_v4 }
  0x45   : > { %3787 = vmatpush3.bf16.msra.mxu0 %v4077_v63  ;;  %3809 = vmatpush3.bf16.msra.mxu1 %v4085_v5 }
  0x46   : > { %3816 = vmatprep.subr.bf16.mxu0 %v4080_v2  ;;  %3838 = vmatprep.subr.bf16.mxu1 %v4088_v6 }
  0xfb   : > { %v548_v16 = vpop.f32.mrb[0].mxu0  ;;  %v753_v17 = vpop.f32.mrb[0].mxu1 }
  0xfc   : > { %v549_v18 = vadd.f32 %v548_v16, %v405_v12  ;;  %v754_v19 = vadd.f32 %v753_v17, %v621_v13  ;;  %v550_v20 = vpop.f32.mrb[1].mxu0  ;;  %v755_v21 = vpop.f32.mrb[1].mxu1 }
  0xfd   : > { %v551_v22 = vadd.f32 %v550_v20, %v409_v14  ;;  %v756_v23 = vadd.f32 %v755_v21, %v625_v15  ;;  %v552_v24 = vpop.f32.mrb[2].mxu0  ;;  %v757_v25 = vpop.f32.mrb[2].mxu1 }
  0xfe   : > { %v557_v26 = vmax.f32 %v549_v18, 0.0  ;;  %v760_v27 = vmax.f32 %v754_v19, 0.0  ;;  %v553_v28 = vadd.f32 %v552_v24, %v405_v12  ;;  %v554_v30 = vpop.f32.mrb[3].mxu0  ;;  %v758_v31 = vpop.f32.mrb[3].mxu1 }
  0xff   : > { %v558_v11 = vmax.f32 %v551_v22, 0.0  ;;  %v761_v32 = vmax.f32 %v756_v23, 0.0  ;;  %v555_v33 = vadd.f32 %v554_v30, %v409_v14 }
 0x100   : > { %v559_v34 = vmax.f32 %v553_v28, 0.0 }
 0x101   : > { %v565_v35 = vcombine.low %v557_v26, %v558_v11  ;;  %v566_v36 = vcombine.high %v557_v26, %v558_v11  ;;  %v3377_v37 = vcombine.low %v558_v11, %v558_v11  ;;  %v3378_v38 = vcombine.high %v558_v11, %v558_v11 }
 0x102   : > { %v764_v39 = vcombine.low %v760_v27, %v761_v32  ;;  %v765_v40 = vcombine.high %v760_v27, %v761_v32  ;;  %v560_v41 = vmax.f32 %v555_v33, 0.0 }
 0x103   : > { %v573_v42 = vrot.slane %v565_v35, 7  ;;  %v574_v43 = vrot.slane %v3377_v37, 7  ;;  %v575_v44 = vrot.slane %v566_v36, 7  ;;  %v576_v45 = vrot.slane %v3378_v38, 7 }
 0x104   : > { %v775_v46 = vmul.f32 0.0, %v764_v39  ;;  %v785_v47 = vmul.f32 0.0, %v765_v40  ;;  %v567_v49 = vcombine.low %v559_v34, %v560_v41  ;;  %v568_v50 = vcombine.high %v559_v34, %v560_v41 }
 0x105   : > { %590 = vst [vmem:[#allocation2 + $0x10] sm:$0x1e] %v573_v42  ;;  %591 = vst [vmem:[#allocation2 + $0x18] sm:$0x1e] %v574_v43  ;;  %v3379_v51 = vcombine.low %v560_v41, %v560_v41  ;;  %v3380_v52 = vcombine.high %v560_v41, %v560_v41 }
 0x106   : > { %592 = vst [vmem:[#allocation2 + $0x20] sm:$0x1e] %v575_v44  ;;  %593 = vst [vmem:[#allocation2 + $0x28] sm:$0x1e] %v576_v45  ;;  %v777_v53 = vcombine.high %v775_v46, %v775_v46  ;;  %v778_v54 = vrot.slane %v775_v46, 7  ;;  %v787_v55 = vcombine.high %v785_v47, %v785_v47  ;;  %v788_v56 = vrot.slane %v785_v47, 7 }
 0x107   : > { %v577_v57 = vrot.slane %v567_v49, 7  ;;  %v578_v58 = vrot.slane %v3379_v51, 7  ;;  %v579_v59 = vrot.slane %v568_v50, 7  ;;  %v580_v60 = vrot.slane %v3380_v52, 7 }
 0x108   : > { %v779_v61 = vrot.slane %v777_v53, 7  ;;  %782 = vst [vmem:[#allocation2] sm:$0x1e] %v778_v54  ;;  %v789_v62 = vrot.slane %v787_v55, 7  ;;  %793 = vst [vmem:[#allocation2 + $0x50] sm:$0x1e] %v788_v56 }
 0x109   : > { %594 = vst [vmem:[#allocation2 + $0x30] sm:$0x1e] %v577_v57  ;;  %595 = vst [vmem:[#allocation2 + $0x38] sm:$0x1e] %v578_v58 }
 0x10a   : > { %596 = vst [vmem:[#allocation2 + $0x40] sm:$0x1e] %v579_v59  ;;  %597 = vst [vmem:[#allocation2 + $0x48] sm:$0x1e] %v580_v60 }
 0x10b   : > { %783 = vst [vmem:[#allocation2 + $0x8] sm:$0x1e] %v779_v61  ;;  %794 = vst [vmem:[#allocation2 + $0x58] sm:$0x1e] %v789_v62 }
 0x10c   : > { %v1118_v63 = vld [vmem:[#allocation2 + $0x10] sm:$0x3f]  ;;  %v1119_v0 = vld [vmem:[#allocation2 + $0x18] sm:$0x3f] }
 0x10d   : > { %v1120_v1 = vld [vmem:[#allocation2 + $0x20] sm:$0x3f]  ;;  %v1121_v2 = vld [vmem:[#allocation2 + $0x28] sm:$0x3f]  ;;  %v1126_v3 = vpack.c.bf16 %v1118_v63, %v1118_v63  ;;  %v4486_v4 = vpack.c.bf16 %v1119_v0, %v1119_v0  ;;  %v3401_v6 = vpack.c.bf16 %v1119_v0, %v1118_v63  ;;  %v4490_v7 = vld [vmem:[#allocation2 + $0x10] sm:$0x3f] }
 0x10e   : > { %v4488_v5 = vpack.c.bf16 %v1120_v1, %v1120_v1  ;;  %v4492_v8 = vld [vmem:[#allocation2 + $0x18] sm:$0x3f]  ;;  %v4494_v9 = vpack.c.bf16 %v1121_v2, %v1121_v2  ;;  %v3402_v10 = vpack.c.bf16 %v1121_v2, %v1120_v1  ;;  %v4502_v20 = vpack.c.bf16 %v4490_v7, %v4490_v7  ;;  %v4082_v63 = vld [vmem:[%s5105_s4 + $0x280] sm:$0xff]   ;;  %v4084_v2 = vld [vmem:[%s5105_s4 + $0x2c8] sm:$0xff]  }
 0x10f   : > { %v1214_v12 = vrot.slane %v3401_v6, %v4355_v29  ;;  %v1198_v13 = vrot.slane %v1126_v3, 1  ;;  %v1199_v14 = vrot.slane %v4486_v4, 1  ;;  %v4506_v21 = vpack.c.bf16 %v4492_v8, %v4492_v8  ;;  %v4514_v27 = vld [vmem:[#allocation2] sm:$0x3f] }
 0x110   : > { %v1200_v15 = vrot.slane %v4488_v5, 1  ;;  %v1122_v16 = vld [vmem:[#allocation2 + $0x30] sm:$0x3f]  ;;  %v1123_v17 = vld [vmem:[#allocation2 + $0x38] sm:$0x3f]  ;;  %v1239_v19 = vrot.slane %v3402_v10, %v4355_v29  ;;  %v1201_v11 = vrot.slane %v4494_v9, 1  ;;  %v4527_v39 = vpack.c.bf16 %v4514_v27, %v4514_v27 }
 0x111   : > { %v1124_v18 = vld [vmem:[#allocation2 + $0x40] sm:$0x3f]  ;;  %v1125_v22 = vld [vmem:[#allocation2 + $0x48] sm:$0x3f]  ;;  %v4508_v23 = vpack.c.bf16 %v1122_v16, %v1122_v16  ;;  %v4510_v24 = vpack.c.bf16 %v1123_v17, %v1123_v17  ;;  %v3403_v26 = vpack.c.bf16 %v1123_v17, %v1122_v16  ;;  %v1223_v38 = vcombine.low %v1198_v13, %v1199_v14 }
 0x112   : > { %v4512_v25 = vpack.c.bf16 %v1124_v18, %v1124_v18  ;;  %v4516_v28 = vpack.c.bf16 %v1125_v22, %v1125_v22  ;;  %v3404_v30 = vpack.c.bf16 %v1125_v22, %v1124_v18  ;;  %v3501_v31 = vcombine.low %v1214_v12, %v1239_v19  ;;  %v838_v19 = vld [vmem:[#allocation2 + $0x20] sm:$0x3f]  ;;  %v4086_v22 = vld [vmem:[%s5105_s4 + $0x288] sm:$0xff]  }
 0x113   : > { %v1264_v32 = vrot.slane %v3403_v26, %v4355_v29  ;;  %v1202_v33 = vrot.slane %v4508_v23, 1  ;;  %v1203_v34 = vrot.slane %v4510_v24, 1  ;;  %v1248_v41 = vcombine.low %v1200_v15, %v1201_v11 }
 0x114   : > { %v1204_v35 = vrot.slane %v4512_v25, 1  ;;  %v1289_v36 = vrot.slane %v3404_v30, %v4355_v29  ;;  %v1205_v37 = vrot.slane %v4516_v28, 1  ;;  %v1413_v40 = vrot.slane %v3501_v31, %v4355_v29 }
 0x115   : > { %v1273_v42 = vcombine.low %v1202_v33, %v1203_v34  ;;  %v1137_v43 = vshll.u32 %v1126_v3, 16  ;;  %v1230_v45 = vrot.slane %v1223_v38, %v4355_v29  ;;  %v1135_v47 = vshrl.u32 %v1126_v3, 16  ;;  %v835_v34 = vld [vmem:[#allocation2 + $0x8] sm:$0x3f] }
 0x116   : > { %v3503_v44 = vcombine.low %v1264_v32, %v1289_v36  ;;  %v1298_v46 = vcombine.low %v1204_v35, %v1205_v37  ;;  %v1255_v49 = vrot.slane %v1248_v41, %v4355_v29  ;;  %v1144_v52 = vshll.u32 %v4486_v4, 16  ;;  %v839_v35 = vld [vmem:[#allocation2 + $0x28] sm:$0x3f] }
 0x117   : > { %v1280_v50 = vrot.slane %v1273_v42, %v4355_v29  ;;  %v1139_v51 = vrot.slane %v1137_v43, 1  ;;  %v1142_v55 = vshrl.u32 %v4486_v4, 16  ;;  %v1151_v56 = vshll.u32 %v4488_v5, 16 }
 0x118   : > { %v1427_v53 = vrot.slane %v3503_v44, %v4355_v29  ;;  %v1305_v54 = vrot.slane %v1298_v46, %v4355_v29  ;;  %v1439_v57 = vcombine.low %v1230_v45, %v1255_v49  ;;  %v1146_v59 = vrot.slane %v1144_v52, 1 }
 0x119   : > { %v1140_v58 = vor.u32 %v1139_v51, %v1135_v47  ;;  %v1149_v60 = vshrl.u32 %v4488_v5, 16  ;;  %v1153_v1 = vrot.slane %v1151_v56, 1  ;;  %v1156_v6 = vshrl.u32 %v4494_v9, 16  ;;  %v4089_v47 = vld [vmem:[%s5105_s4 + $0x290] sm:$0xff]  }
 0x11a   : > { %v1436_v61 = vcombine.high %v1413_v40, %v1427_v53  ;;  %v1435_v62 = vcombine.low %v1413_v40, %v1427_v53  ;;  %v1440_v0 = vcombine.low %v1280_v50, %v1305_v54  ;;  %v4546_v3 = vrot.slane %v1439_v57, %v4355_v29  ;;  %v840_v40 = vld [vmem:[#allocation2 + $0x30] sm:$0x3f] }
 0x11b   : > { %v1147_v4 = vor.u32 %v1146_v59, %v1142_v55  ;;  %v1158_v5 = vshll.u32 %v4494_v9, 16  ;;  %v1154_v12 = vor.u32 %v1153_v1, %v1149_v60  ;;  %v1163_v13 = vshrl.u32 %v4508_v23, 16  ;;  %v4091_v55 = vld [vmem:[%s5105_s4 + $0x2d8] sm:$0xff]  }
 0x11c   : > { %1783 = vmatprep.mubr.bf16.mxu0 %v1436_v61  ;;  %v4551_v10 = vrot.slane %v1440_v0, %v4355_v29  ;;  %v1165_v14 = vshll.u32 %v4508_v23, 16  ;;  %v1170_v16 = vshrl.u32 %v4510_v24, 16  ;;  %v1172_v17 = vshll.u32 %v4510_v24, 16  ;;  %v4087_v24 = vld [vmem:[%s5105_s4 + $0x2d0] sm:$0xff]   ;;  %v4093_v0 = vld [vmem:[%s5105_s4 + $0x298] sm:$0xff]  }
 0x11d   : > { %1784 = vmatmul.mubr.bf16.vlgmr.msra.gmra.mrb[4].mxu0 %v1435_v62  ;;  %v1160_v15 = vrot.slane %v1158_v5, 1  ;;  %v1179_v18 = vshll.u32 %v4512_v25, 16  ;;  %v1177_v23 = vshrl.u32 %v4512_v25, 16  ;;  %v1186_v30 = vshll.u32 %v4516_v28, 16  ;;  %v841_v25 = vld [vmem:[#allocation2 + $0x38] sm:$0x3f] }
 0x11e   : > { %3817 = vmatpush3.bf16.msra.mxu0 %v4082_v63  ;;  %v1456_v9 = vcombine.high %v4546_v3, %v4551_v10  ;;  %v1167_v26 = vrot.slane %v1165_v14, 1  ;;  %v1174_v11 = vrot.slane %v1172_v17, 1  ;;  %v1207_v33 = vcombine.low %v1140_v58, %v1147_v4  ;;  %v4095_v4 = vld [vmem:[%s5105_s4 + $0x2e0] sm:$0xff]  }
 0x11f   : > { %3818 = vmatprep.subr.bf16.mxu0 %v4084_v2  ;;  %v1161_v31 = vor.u32 %v1160_v15, %v1156_v6  ;;  %v1181_v32 = vrot.slane %v1179_v18, 1  ;;  %v1184_v37 = vshrl.u32 %v4516_v28, 16  ;;  %v1188_v38 = vrot.slane %v1186_v30, 1 }
 0x120   : > { %1865 = vmatprep.mubr.bf16.mxu0 %v1456_v9  ;;  %v1168_v36 = vor.u32 %v1167_v26, %v1163_v13  ;;  %v4569_v41 = vpack.c.bf16 %v838_v19, %v838_v19  ;;  %v1175_v42 = vor.u32 %v1174_v11, %v1170_v16  ;;  %v1221_v44 = vrot.slane %v1207_v33, %v4355_v29 }
 0x121   : > { %v1182_v43 = vor.u32 %v1181_v32, %v1177_v23  ;;  %v1232_v45 = vcombine.low %v1154_v12, %v1161_v31  ;;  %v1189_v46 = vor.u32 %v1188_v38, %v1184_v37  ;;  %v4575_v49 = vpack.c.bf16 %v835_v34, %v835_v34  ;;  %v4097_v23 = vld [vmem:[%s5105_s4 + $0x2a0] sm:$0xff]   ;;  %v4099_v31 = vld [vmem:[%s5105_s4 + $0x2e8] sm:$0xff]  }
 0x122   : > { %3819 = vmatpush3.bf16.msra.mxu0 %v4086_v22  ;;  %v3397_v28 = vpack.c.bf16 %v835_v34, %v4514_v27  ;;  %v3398_v50 = vpack.c.bf16 %v4492_v8, %v4490_v7  ;;  %v1257_v52 = vcombine.low %v1168_v36, %v1175_v42  ;;  %v3399_v53 = vpack.c.bf16 %v839_v35, %v838_v19  ;;  %v4090_v37 = vld [vmem:[%s5105_s4] sm:$0xff]   ;;  %v4092_v42 = vld [vmem:[%s5105_s4 + $0x48] sm:$0xff]  }
 0x123   : > { %v1246_v51 = vrot.slane %v1232_v45, %v4355_v29  ;;  %3820 = vmatprep.subr.bf16.mxu0 %v4087_v24  ;;  %v3400_v54 = vpack.c.bf16 %v841_v25, %v840_v40  ;;  %v1282_v56 = vcombine.low %v1182_v43, %v1189_v46  ;;  %v4584_v57 = vpack.c.bf16 %v839_v35, %v839_v35  ;;  %v4101_v46 = vld [vmem:[%s5105_s4 + $0x2a8] sm:$0xff]  }
 0x124   : > { %v930_v58 = vrot.slane %v3397_v28, %v4355_v29  ;;  %v955_v27 = vrot.slane %v3398_v50, %v4355_v29  ;;  %v1271_v59 = vrot.slane %v1257_v52, %v4355_v29  ;;  %v980_v8 = vrot.slane %v3399_v53, %v4355_v29  ;;  %v4103_v52 = vld [vmem:[%s5105_s4 + $0x2f0] sm:$0xff]  }
 0x125   : > { %v3502_v7 = vcombine.low %v1221_v44, %v1246_v51  ;;  %v1005_v60 = vrot.slane %v3400_v54, %v4355_v29  ;;  %v1296_v61 = vrot.slane %v1282_v56, %v4355_v29  ;;  %v4592_v62 = vpack.c.bf16 %v840_v40, %v840_v40 }
 0x126   : > { %3821 = vmatpush3.bf16.msra.mxu0 %v4089_v47  ;;  %v3553_v63 = vcombine.low %v930_v58, %v955_v27  ;;  %v853_v1 = vshll.u32 %v4527_v39, 16  ;;  %v851_v6 = vshrl.u32 %v4527_v39, 16  ;;  %v858_v5 = vshrl.u32 %v4575_v49, 16  ;;  %v4094_v58 = vld [vmem:[%s5105_s4 + $0x8] sm:$0xff]  }
 0x127   : > { %v3555_v2 = vcombine.low %v980_v8, %v1005_v60  ;;  %3822 = vmatprep.subr.bf16.mxu0 %v4091_v55  ;;  %v860_v12 = vshll.u32 %v4575_v49, 16  ;;  %v3504_v13 = vcombine.low %v1271_v59, %v1296_v61  ;;  %v1420_v14 = vrot.slane %v3502_v7, %v4355_v29  ;;  %v4096_v60 = vld [vmem:[%s5105_s4 + $0x50] sm:$0xff]  }
 0x128   : > { %v4605_v15 = vpack.c.bf16 %v841_v25, %v841_v25  ;;  %v855_v16 = vrot.slane %v853_v1, 1  ;;  %v4608_v17 = vrot.slane %v3553_v63, %v4355_v29  ;;  %v865_v19 = vshrl.u32 %v4502_v20, 16 }
 0x129   : > { %v862_v18 = vrot.slane %v860_v12, 1  ;;  %v867_v9 = vshll.u32 %v4502_v20, 16  ;;  %v1434_v22 = vrot.slane %v3504_v13, %v4355_v29  ;;  %v4614_v26 = vrot.slane %v3555_v2, %v4355_v29  ;;  %v4098_v12 = vld [vmem:[%s5105_s4 + $0x10] sm:$0xff]  }
 0x12a   : > { %3823 = vmatpush3.bf16.msra.mxu0 %v4093_v0  ;;  %v872_v30 = vshrl.u32 %v4506_v21, 16  ;;  %v874_v24 = vshll.u32 %v4506_v21, 16  ;;  %v856_v11 = vor.u32 %v855_v16, %v851_v6  ;;  %v881_v34 = vshll.u32 %v4569_v41, 16  ;;  %v4105_v0 = vld [vmem:[%s5105_s4 + $0x2b0] sm:$0xff]   ;;  %v4107_v6 = vld [vmem:[%s5105_s4 + $0x2f8] sm:$0xff]  }
 0x12b   : > { %3824 = vmatprep.subr.bf16.mxu0 %v4095_v4  ;;  %v863_v32 = vor.u32 %v862_v18, %v858_v5  ;;  %v869_v33 = vrot.slane %v867_v9, 1  ;;  %v1438_v35 = vcombine.high %v1420_v14, %v1434_v22  ;;  %v1437_v36 = vcombine.low %v1420_v14, %v1434_v22  ;;  %v4100_v16 = vld [vmem:[%s5105_s4 + $0x58] sm:$0xff]   ;;  %v4112_v22 = vld [vmem:[%s5105_s4 + $0xc0] sm:$0xff]  }
 0x12c   : > { %v876_v38 = vrot.slane %v874_v24, 1  ;;  %v879_v40 = vshrl.u32 %v4569_v41, 16  ;;  %v1907_v25 = vcombine.high %v4608_v17, %v4614_v26  ;;  %v883_v44 = vrot.slane %v881_v34, 1  ;;  %v4109_v18 = vld [vmem:[%s5105_s4 + $0x2b8] sm:$0xff]  }
 0x12d   : > { %v870_v43 = vor.u32 %v869_v33, %v865_v19  ;;  %v888_v45 = vshll.u32 %v4584_v57, 16  ;;  %1824 = vmatprep.mubr.bf16.mxu1 %v1438_v35  ;;  %v886_v28 = vshrl.u32 %v4584_v57, 16  ;;  %v895_v50 = vshll.u32 %v4592_v62, 16 }
 0x12e   : > { %3825 = vmatpush3.bf16.msra.mxu0 %v4097_v23  ;;  %v877_v47 = vor.u32 %v876_v38, %v872_v30  ;;  %v902_v51 = vshll.u32 %v4605_v15, 16  ;;  %1825 = vmatmul.mubr.bf16.vlgmr.msra.gmra.mrb[4].mxu1 %v1437_v36  ;;  %v884_v53 = vor.u32 %v883_v44, %v879_v40  ;;  %v893_v55 = vshrl.u32 %v4592_v62, 16  ;;  %v4102_v23 = vld [vmem:[%s5105_s4 + $0x18] sm:$0xff]   ;;  %v4116_v36 = vld [vmem:[%s5105_s4 + $0xc8] sm:$0xff]   ;;  %v4106_v38 = vld [vmem:[%s5105_s4 + $0x20] sm:$0xff]  }
 0x12f   : > { %3826 = vmatprep.subr.bf16.mxu0 %v4099_v31  ;;  %v890_v54 = vrot.slane %v888_v45, 1  ;;  %v923_v56 = vcombine.low %v856_v11, %v863_v32  ;;  %3839 = vmatpush3.bf16.msra.mxu1 %v4090_v37  ;;  %v897_v27 = vrot.slane %v895_v50, 1  ;;  %v900_v59 = vshrl.u32 %v4605_v15, 16  ;;  %v4104_v31 = vld [vmem:[%s5105_s4 + $0x60] sm:$0xff]  }
 0x130   : > { %2254 = vmatprep.mubr.bf16.mxu1 %v1907_v25  ;;  %v904_v7 = vrot.slane %v902_v51, 1  ;;  %v948_v8 = vcombine.low %v870_v43, %v877_v47  ;;  %3840 = vmatprep.subr.bf16.mxu1 %v4092_v42  ;;  %v4114_v11 = vld [vmem:[%s5105_s4 + $0x80] sm:$0xff]   ;;  %v914_v33 = vrot.slane %v4527_v39, 1  ;;  %v915_v34 = vrot.slane %v4575_v49, 1  ;;  %v4123_v47 = vld [vmem:[%s5105_s4 + $0xd8] sm:$0xff]  }
 0x131   : > { %v891_v61 = vor.u32 %v890_v54, %v886_v28  ;;  %v937_v63 = vrot.slane %v923_v56, %v4355_v29  ;;  %v898_v1 = vor.u32 %v897_v27, %v893_v55  ;;  %v1455_v35 = vcombine.low %v4546_v3, %v4551_v10  ;;  %v4108_v10 = vld [vmem:[%s5105_s4 + $0x68] sm:$0xff]   ;;  %v4113_v28 = vld [vmem:[%s5105_s4 + $0x30] sm:$0xff]   ;;  %v4125_v55 = vld [vmem:[%s5105_s4 + $0x98] sm:$0xff]  }
 0x132   : > { %3827 = vmatpush3.bf16.msra.mxu0 %v4101_v46  ;;  %v905_v2 = vor.u32 %v904_v7, %v900_v59  ;;  %v962_v4 = vrot.slane %v948_v8, %v4355_v29  ;;  %v916_v37 = vrot.slane %v4502_v20, 1  ;;  %v917_v49 = vrot.slane %v4506_v21, 1  ;;  %v4118_v20 = vld [vmem:[%s5105_s4 + $0x88] sm:$0xff]   ;;  %v4127_v56 = vld [vmem:[%s5105_s4 + $0xe0] sm:$0xff]   ;;  %v2352_v59 = vld [vmem:[#allocation2 + $0x50] sm:$0x3f] }
 0x133   : > { %3828 = vmatprep.subr.bf16.mxu0 %v4103_v52  ;;  %v973_v5 = vcombine.low %v884_v53, %v891_v61  ;;  %3841 = vmatpush3.bf16.msra.mxu1 %v4094_v58  ;;  %v920_v40 = vrot.slane %v4592_v62, 1  ;;  %v921_v3 = vrot.slane %v4605_v15, 1  ;;  %v918_v25 = vrot.slane %v4569_v41, 1  ;;  %v4119_v62 = vld [vmem:[%s5105_s4 + $0xd0] sm:$0xff]   ;;  %v4110_v15 = vld [vmem:[%s5105_s4 + $0x28] sm:$0xff]   ;;  %v4115_v52 = vld [vmem:[%s5105_s4 + $0x78] sm:$0xff]  }
 0x134   : > { %v998_v13 = vcombine.low %v898_v1, %v905_v2  ;;  %v3554_v14 = vcombine.low %v937_v63, %v962_v4  ;;  %3842 = vmatprep.subr.bf16.mxu1 %v4096_v60  ;;  %v919_v21 = vrot.slane %v4584_v57, 1  ;;  %v939_v42 = vcombine.low %v914_v33, %v915_v34  ;;  %v4111_v41 = vld [vmem:[%s5105_s4 + $0x70] sm:$0xff]   ;;  %v4117_v58 = vld [vmem:[%s5105_s4 + $0x38] sm:$0xff]   ;;  %v4120_v8 = vld [vmem:[%s5105_s4 + $0x140] sm:$0xff]  }
 0x135   : > { %v987_v19 = vrot.slane %v973_v5, %v4355_v29  ;;  %v964_v43 = vcombine.low %v916_v37, %v917_v49  ;;  %v1014_v44 = vcombine.low %v920_v40, %v921_v3  ;;  %v4121_v57 = vld [vmem:[%s5105_s4 + $0x90] sm:$0xff]   ;;  %v2353_v7 = vld [vmem:[#allocation2 + $0x58] sm:$0x3f]  ;;  %v4129_v60 = vld [vmem:[%s5105_s4 + $0xa0] sm:$0xff]  }
 0x136   : > { %3829 = vmatpush3.bf16.msra.mxu0 %v4105_v0  ;;  %v1012_v9 = vrot.slane %v998_v13, %v4355_v29  ;;  %v4678_v24 = vrot.slane %v3554_v14, %v4355_v29  ;;  %v946_v45 = vrot.slane %v939_v42, %v4355_v29  ;;  %v989_v46 = vcombine.low %v918_v25, %v919_v21  ;;  %v2348_v61 = vld [vmem:[#allocation2 + $0x30] sm:$0x3f]  ;;  %v2349_v0 = vld [vmem:[#allocation2 + $0x38] sm:$0x3f]  ;;  %v2350_v1 = vld [vmem:[#allocation2 + $0x40] sm:$0x3f] }
 0x137   : > { %3830 = vmatprep.subr.bf16.mxu0 %v4107_v6  ;;  %3843 = vmatpush3.bf16.msra.mxu1 %v4098_v12  ;;  %v971_v50 = vrot.slane %v964_v43, %v4355_v29  ;;  %v1021_v51 = vrot.slane %v1014_v44, %v4355_v29  ;;  %v2351_v2 = vld [vmem:[#allocation2 + $0x48] sm:$0x3f]  ;;  %v2346_v6 = vld [vmem:[#allocation2 + $0x20] sm:$0x3f]  ;;  %v3608_v5 = vpack.c.bf16 %v2353_v7, %v2352_v59  ;;  %v4139_v21 = vld [vmem:[%s5105_s4 + $0xf8] sm:$0xff]  }
 0x138   : > { %v3556_v30 = vcombine.low %v987_v19, %v1012_v9  ;;  %3844 = vmatprep.subr.bf16.mxu1 %v4100_v16  ;;  %v996_v53 = vrot.slane %v989_v46, %v4355_v29  ;;  %v4131_v4 = vld [vmem:[%s5105_s4 + $0xe8] sm:$0xff]   ;;  %v4122_v12 = vld [vmem:[%s5105_s4 + $0x100] sm:$0xff]   ;;  %v1906_v16 = vcombine.low %v4608_v17, %v4614_v26  ;;  %v3606_v19 = vpack.c.bf16 %v2349_v0, %v2348_v61  ;;  %v4135_v26 = vld [vmem:[%s5105_s4 + $0xf0] sm:$0xff]  }
 0x139   : > { %v1910_v54 = vcombine.low %v946_v45, %v971_v50  ;;  %v2347_v14 = vld [vmem:[#allocation2 + $0x28] sm:$0x3f]  ;;  %v3607_v9 = vpack.c.bf16 %v2351_v2, %v2350_v1  ;;  %v4779_v17 = vpack.c.bf16 %v2353_v7, %v2353_v7  ;;  %v2517_v34 = vrot.slane %v3608_v5, %v4355_v29  ;;  %v4130_v43 = vld [vmem:[%s5105_s4 + $0x110] sm:$0xff]   ;;  %v4132_v46 = vld [vmem:[%s5105_s4 + $0x158] sm:$0xff]  }
 0x13a   : > { %3831 = vmatpush3.bf16.msra.mxu0 %v4109_v18  ;;  %v4687_v32 = vrot.slane %v3556_v30, %v4355_v29  ;;  %v1911_v27 = vcombine.low %v996_v53, %v1021_v51  ;;  %v4124_v18 = vld [vmem:[%s5105_s4 + $0x148] sm:$0xff]   ;;  %v4775_v30 = vpack.c.bf16 %v2346_v6, %v2346_v6  ;;  %v3605_v33 = vpack.c.bf16 %v2347_v14, %v2346_v6  ;;  %v4141_v50 = vld [vmem:[%s5105_s4 + $0xb8] sm:$0xff]   ;;  %v4146_v6 = vld [vmem:[%s5105_s4 + $0x300] sm:$0xff]  }
 0x13b   : > { %3860 = vmatprep.subr.bf16.mxu0 %v4112_v22  ;;  %3845 = vmatpush3.bf16.msra.mxu1 %v4102_v23  ;;  %v4754_v63 = vrot.slane %v1910_v54, %v4355_v29  ;;  %v4133_v23 = vld [vmem:[%s5105_s4 + $0xa8] sm:$0xff]   ;;  %v4792_v37 = vpack.c.bf16 %v2350_v1, %v2350_v1  ;;  %v4799_v49 = vpack.c.bf16 %v2347_v14, %v2347_v14  ;;  %v2414_v25 = vshll.u32 %v4779_v17, 16 }
 0x13c   : > { %v1909_v39 = vcombine.high %v4678_v24, %v4687_v32  ;;  %3846 = vmatprep.subr.bf16.mxu1 %v4104_v31  ;;  %v4763_v13 = vrot.slane %v1911_v27, %v4355_v29  ;;  %v4777_v31 = vpack.c.bf16 %v2352_v59, %v2352_v59  ;;  %v2467_v40 = vrot.slane %v3606_v19, %v4355_v29  ;;  %v4134_v27 = vld [vmem:[%s5105_s4 + $0x118] sm:$0xff]  }
 0x13d   : > { %1866 = vmatmul.mubr.bf16.vlgmr.msra.gmra.mrb[8].mxu0 %v1455_v35  ;;  %v4126_v35 = vld [vmem:[%s5105_s4 + $0x108] sm:$0xff]   ;;  %v2492_v3 = vrot.slane %v3607_v9, %v4355_v29  ;;  %v2442_v42 = vrot.slane %v3605_v33, %v4355_v29  ;;  %v2412_v53 = vshrl.u32 %v4779_v17, 16  ;;  %v2416_v54 = vrot.slane %v2414_v25, 1 }
 0x13e   : > { %3861 = vmatpush3.bf16.msra.mxu0 %v4114_v11  ;;  %2295 = vmatprep.mubr.bf16.mxu0 %v1909_v39  ;;  %v1927_v22 = vcombine.high %v4754_v63, %v4763_v13  ;;  %v4784_v11 = vpack.c.bf16 %v2348_v61, %v2348_v61  ;;  %v4128_v39 = vld [vmem:[%s5105_s4 + $0x150] sm:$0xff]   ;;  %v2405_v51 = vshrl.u32 %v4777_v31, 16  ;;  %v4136_v61 = vld [vmem:[%s5105_s4 + $0x160] sm:$0xff]   ;;  %v2391_v5 = vshrl.u32 %v4792_v37, 16  ;;  %v4148_v9 = vld [vmem:[%s5105_s4 + $0x348] sm:$0xff]  }
 0x13f   : > { %3862 = vmatprep.subr.bf16.mxu0 %v4116_v36  ;;  %3847 = vmatpush3.bf16.msra.mxu1 %v4106_v38  ;;  %v4790_v36 = vpack.c.bf16 %v2349_v0, %v2349_v0  ;;  %v4794_v38 = vpack.c.bf16 %v2351_v2, %v2351_v2  ;;  %v4142_v25 = vld [vmem:[%s5105_s4 + $0x128] sm:$0xff]  }
 0x140   : > { %3848 = vmatprep.subr.bf16.mxu1 %v4108_v10  ;;  %v4137_v10 = vld [vmem:[%s5105_s4 + $0xb0] sm:$0xff]   ;;  %v2379_v44 = vshll.u32 %v4784_v11, 16  ;;  %v2377_v2 = vshrl.u32 %v4784_v11, 16 }
 0x141   : > { %v2400_v45 = vshll.u32 %v4794_v38, 16 }
 0x142   : > { %3863 = vmatpush3.bf16.msra.mxu0 %v4118_v20  ;;  %v2407_v20 = vshll.u32 %v4777_v31, 16  ;;  %v2381_v59 = vrot.slane %v2379_v44, 1 }
 0x143   : > { %3864 = vmatprep.subr.bf16.mxu0 %v4119_v62  ;;  %3849 = vmatpush3.bf16.msra.mxu1 %v4110_v15  ;;  %v3707_v62 = vcombine.low %v2492_v3, %v2517_v34  ;;  %v2365_v15 = vshll.u32 %v4775_v30, 16 }
 0x144   : > { %3850 = vmatprep.subr.bf16.mxu1 %v4111_v41  ;;  %v2386_v41 = vshll.u32 %v4790_v36, 16  ;;  %v2382_v33 = vor.u32 %v2381_v59, %v2377_v2  ;;  %v2428_v59 = vrot.slane %v4784_v11, 1  ;;  %v4154_v11 = vld [vmem:[%s5105_s4 + $0x380] sm:$0xff]   ;;  %v2426_v2 = vrot.slane %v4775_v30, 1 }
 0x146   : > { %3865 = vmatpush3.bf16.msra.mxu0 %v4121_v57  ;;  %v2393_v57 = vshll.u32 %v4792_v37, 16  ;;  %v2388_v7 = vrot.slane %v2386_v41, 1  ;;  %v4155_v41 = vld [vmem:[%s5105_s4 + $0x358] sm:$0xff]  }
 0x147   : > { %3866 = vmatprep.subr.bf16.mxu0 %v4123_v47  ;;  %3851 = vmatpush3.bf16.msra.mxu1 %v4113_v28  ;;  %v3705_v47 = vcombine.low %v2442_v42, %v2467_v40  ;;  %v2372_v28 = vshll.u32 %v4799_v49, 16 }
 0x148   : > { %3852 = vmatprep.subr.bf16.mxu1 %v4115_v52  ;;  %v2409_v52 = vrot.slane %v2407_v20, 1  ;;  %v4151_v20 = vld [vmem:[%s5105_s4 + $0x350] sm:$0xff]  }
 0x149   : > { %v4842_v0 = vrot.slane %v3705_v47, %v4355_v29  ;;  %v2374_v1 = vrot.slane %v2372_v28, 1  ;;  %v4147_v47 = vld [vmem:[%s5105_s4 + $0x178] sm:$0xff]  }
 0x14a   : > { %3867 = vmatpush3.bf16.msra.mxu0 %v4125_v55  ;;  %v4144_v55 = vld [vmem:[%s5105_s4 + $0x340] sm:$0xff]   ;;  %v2410_v14 = vor.u32 %v2409_v52, %v2405_v51  ;;  %v4157_v51 = vld [vmem:[%s5105_s4 + $0x318] sm:$0xff]  }
 0x14b   : > { %3868 = vmatprep.subr.bf16.mxu0 %v4127_v56  ;;  %3853 = vmatpush3.bf16.msra.mxu1 %v4117_v58  ;;  %v4833_v56 = vrot.slane %v3707_v62, %v4355_v29  ;;  %v2367_v58 = vrot.slane %v2365_v15, 1  ;;  %v4143_v62 = vld [vmem:[%s5105_s4 + $0x170] sm:$0xff]   ;;  %v4159_v52 = vld [vmem:[%s5105_s4 + $0x360] sm:$0xff]  }
 0x14c   : > { %3882 = vmatprep.subr.bf16.mxu1 %v4120_v8  ;;  %v2395_v8 = vrot.slane %v2393_v57, 1  ;;  %v4153_v15 = vld [vmem:[%s5105_s4 + $0x310] sm:$0xff]  }
 0x14d   : > { %v2664_v19 = vcombine.high %v4842_v0, %v4833_v56  ;;  %v4145_v57 = vld [vmem:[%s5105_s4 + $0x130] sm:$0xff]  }
 0x14e   : > { %3869 = vmatpush3.bf16.msra.mxu0 %v4129_v60  ;;  %2255 = vmatmul.mubr.bf16.vlgmr.msra.gmra.mrb[8].mxu1 %v1906_v16  ;;  %v2402_v60 = vrot.slane %v2400_v45, 1  ;;  %v2417_v16 = vor.u32 %v2416_v54, %v2412_v53  ;;  %v4149_v53 = vld [vmem:[%s5105_s4 + $0x138] sm:$0xff]  }
 0x14f   : > { %3870 = vmatprep.subr.bf16.mxu0 %v4131_v4  ;;  %3883 = vmatpush3.bf16.msra.mxu1 %v4122_v12  ;;  %v2384_v4 = vshrl.u32 %v4790_v36, 16  ;;  %v2398_v12 = vshrl.u32 %v4794_v38, 16 }
 0x150   : > { %2336 = vmatprep.mubr.bf16.mxu1 %v1927_v22  ;;  %3884 = vmatprep.subr.bf16.mxu1 %v4124_v18  ;;  %v1908_v18 = vcombine.low %v4678_v24, %v4687_v32  ;;  %v2363_v22 = vshrl.u32 %v4775_v30, 16  ;;  %v2396_v24 = vor.u32 %v2395_v8, %v2391_v5  ;;  %v4161_v8 = vld [vmem:[%s5105_s4 + $0x320] sm:$0xff]   ;;  %v4165_v5 = vld [vmem:[%s5105_s4 + $0x328] sm:$0xff]  }
 0x151   : > { %v2389_v34 = vor.u32 %v2388_v7, %v2384_v4  ;;  %v2403_v32 = vor.u32 %v2402_v60, %v2398_v12  ;;  %v2429_v60 = vrot.slane %v4790_v36, 1  ;;  %v2427_v36 = vrot.slane %v4799_v49, 1  ;;  %v4156_v4 = vld [vmem:[%s5105_s4 + $0x3c8] sm:$0xff]  }
 0x152   : > { %3871 = vmatpush3.bf16.msra.mxu0 %v4133_v23  ;;  %v2370_v23 = vshrl.u32 %v4799_v49, 16  ;;  %v2368_v40 = vor.u32 %v2367_v58, %v2363_v22  ;;  %v2433_v58 = vrot.slane %v4779_v17, 1  ;;  %v2431_v17 = vrot.slane %v4794_v38, 1  ;;  %v4171_v22 = vld [vmem:[%s5105_s4 + $0x378] sm:$0xff]  }
 0x153   : > { %3872 = vmatprep.subr.bf16.mxu0 %v4135_v26  ;;  %3885 = vmatpush3.bf16.msra.mxu1 %v4126_v35  ;;  %v4138_v26 = vld [vmem:[%s5105_s4 + $0x120] sm:$0xff]   ;;  %v4140_v35 = vld [vmem:[%s5105_s4 + $0x168] sm:$0xff]   ;;  %v2485_v42 = vcombine.low %v2396_v24, %v2403_v32  ;;  %v1926_v38 = vcombine.low %v4754_v63, %v4763_v13  ;;  %v2476_v30 = vcombine.low %v2428_v59, %v2429_v60  ;;  %v4167_v63 = vld [vmem:[%s5105_s4 + $0x370] sm:$0xff]  }
 0x154   : > { %3886 = vmatprep.subr.bf16.mxu1 %v4128_v39  ;;  %v4150_v39 = vld [vmem:[%s5105_s4 + $0x308] sm:$0xff]   ;;  %v2375_v3 = vor.u32 %v2374_v1, %v2370_v23  ;;  %v2451_v49 = vcombine.low %v2426_v2, %v2427_v36  ;;  %v4162_v23 = vld [vmem:[%s5105_s4 + $0x390] sm:$0xff]   ;;  %v4173_v24 = vld [vmem:[%s5105_s4 + $0x338] sm:$0xff]  }
 0x155   : > { %v4158_v13 = vld [vmem:[%s5105_s4 + $0x388] sm:$0xff]   ;;  %v4197_v60 = vld [vmem:[%s5107_s6 + $0x10] sm:$0xff]  }
 0x156   : > { %3873 = vmatpush3.bf16.msra.mxu0 %v4137_v10  ;;  %v2510_v10 = vcombine.low %v2410_v14, %v2417_v16  ;;  %v4160_v16 = vld [vmem:[%s5105_s4 + $0x3d0] sm:$0xff]  }
 0x157   : > { %3874 = vmatprep.subr.bf16.mxu0 %v4139_v21  ;;  %3887 = vmatpush3.bf16.msra.mxu1 %v4130_v43  ;;  %v2460_v21 = vcombine.low %v2382_v33, %v2389_v34  ;;  %v2435_v43 = vcombine.low %v2368_v40, %v2375_v3  ;;  %v4164_v34 = vld [vmem:[%s5105_s4 + $0x3d8] sm:$0xff]   ;;  %v4168_v3 = vld [vmem:[%s5105_s4 + $0x3e0] sm:$0xff]  }
 0x158   : > { %3888 = vmatprep.subr.bf16.mxu1 %v4132_v46  ;;  %v2524_v44 = vrot.slane %v2510_v10, %v4355_v29  ;;  %v2499_v46 = vrot.slane %v2485_v42, %v4355_v29  ;;  %v4178_v10 = vld [vmem:[%s5105_s4 + $0x400] sm:$0xff]  }
 0x159   : > { %v2474_v45 = vrot.slane %v2460_v21, %v4355_v29  ;;  %v2449_v28 = vrot.slane %v2435_v43, %v4355_v29  ;;  %v4180_v21 = vld [vmem:[%s5105_s4 + $0x448] sm:$0xff]   ;;  %v4170_v42 = vld [vmem:[%s5105_s4 + $0x3a0] sm:$0xff]   ;;  %v4175_v43 = vld [vmem:[%s5105_s4 + $0x3f0] sm:$0xff]  }
 0x15a   : > { %3875 = vmatpush3.bf16.msra.mxu0 %v4141_v50  ;;  %v3708_v50 = vcombine.low %v2499_v46, %v2524_v44  ;;  %v4184_v44 = vld [vmem:[%s5105_s4 + $0x410] sm:$0xff]   ;;  %v4186_v46 = vld [vmem:[%s5105_s4 + $0x418] sm:$0xff]  }
 0x15b   : > { %3904 = vmatprep.subr.bf16.mxu0 %v4144_v55  ;;  %3889 = vmatpush3.bf16.msra.mxu1 %v4134_v27  ;;  %v3706_v54 = vcombine.low %v2449_v28, %v2474_v45  ;;  %v2432_v55 = vrot.slane %v4777_v31, 1  ;;  %v4152_v27 = vld [vmem:[%s5105_s4 + $0x3c0] sm:$0xff]   ;;  %v2430_v31 = vrot.slane %v4792_v37, 1  ;;  %v4179_v45 = vld [vmem:[%s5105_s4 + $0x3f8] sm:$0xff]  }
 0x15c   : > { %3890 = vmatprep.subr.bf16.mxu1 %v4136_v61  ;;  %v4910_v7 = vrot.slane %v3708_v50, %v4355_v29  ;;  %v4163_v61 = vld [vmem:[%s5105_s4 + $0x368] sm:$0xff]   ;;  %v4181_v28 = vld [vmem:[%s5105_s4 + $0x3b8] sm:$0xff]   ;;  %v4188_v50 = vld [vmem:[%s5105_s4 + $0x420] sm:$0xff]  }
 0x15d   : > { %2296 = vmatmul.mubr.bf16.vlgmr.msra.gmra.mrb[12].mxu0 %v1908_v18  ;;  %v4925_v1 = vrot.slane %v3706_v54, %v4355_v29  ;;  %v2526_v37 = vcombine.low %v2432_v55, %v2433_v58  ;;  %v2501_v12 = vcombine.low %v2430_v31, %v2431_v17  ;;  %v4169_v18 = vld [vmem:[%s5105_s4 + $0x330] sm:$0xff]   ;;  %v4193_v58 = vld [vmem:[%s5105_s4 + $0x478] sm:$0xff]  }
 0x15e   : > { %3905 = vmatpush3.bf16.msra.mxu0 %v4146_v6  ;;  %3011 = vmatprep.mubr.bf16.mxu0 %v2664_v19  ;;  %v2483_v19 = vrot.slane %v2476_v30, %v4355_v29  ;;  %v4191_v54 = vld [vmem:[%s5105_s4 + $0x470] sm:$0xff]  }
 0x15f   : > { %3906 = vmatprep.subr.bf16.mxu0 %v4148_v9  ;;  %3891 = vmatpush3.bf16.msra.mxu1 %v4138_v26  ;;  %v2666_v6 = vcombine.high %v4925_v1, %v4910_v7  ;;  %v2533_v14 = vrot.slane %v2526_v37, %v4355_v29  ;;  %v2508_v9 = vrot.slane %v2501_v12, %v4355_v29  ;;  %v4192_v55 = vld [vmem:[%s5105_s4 + $0x430] sm:$0xff]   ;;  %v4199_v37 = vld [vmem:[%s5107_s6 + $0x20] sm:$0xff]  }
 0x160   : > { %3892 = vmatprep.subr.bf16.mxu1 %v4140_v35  ;;  %v2458_v26 = vrot.slane %v2451_v49, %v4355_v29  ;;  %v4176_v35 = vld [vmem:[%s5105_s4 + $0x440] sm:$0xff]  }
 0x161   : > { %v2668_v33 = vcombine.low %v2508_v9, %v2533_v14 }
 0x162   : > { %3907 = vmatpush3.bf16.msra.mxu0 %v4150_v39  ;;  %v2667_v32 = vcombine.low %v2458_v26, %v2483_v19  ;;  %v4166_v39 = vld [vmem:[%s5105_s4 + $0x398] sm:$0xff]  }
 0x163   : > { %3908 = vmatprep.subr.bf16.mxu0 %v4151_v20  ;;  %3893 = vmatpush3.bf16.msra.mxu1 %v4142_v25  ;;  %v2682_v40 = vrot.slane %v2668_v33, %v4355_v29  ;;  %v2663_v25 = vcombine.low %v4842_v0, %v4833_v56  ;;  %v4183_v56 = vld [vmem:[%s5105_s4 + $0x450] sm:$0xff]   ;;  %v4174_v0 = vld [vmem:[%s5105_s4 + $0x3a8] sm:$0xff]  }
 0x164   : > { %3894 = vmatprep.subr.bf16.mxu1 %v4143_v62  ;;  %v2675_v20 = vrot.slane %v2667_v32, %v4355_v29  ;;  %v4182_v29 = vld [vmem:[%s5105_s4 + $0x408] sm:$0xff]  }
 0x166   : > { %3909 = vmatpush3.bf16.msra.mxu0 %v4153_v15  ;;  %v2684_v62 = vcombine.high %v2675_v20, %v2682_v40  ;;  %v4172_v15 = vld [vmem:[%s5105_s4 + $0x3e8] sm:$0xff]   ;;  %v2683_v59 = vcombine.low %v2675_v20, %v2682_v40 }
 0x167   : > { %3910 = vmatprep.subr.bf16.mxu0 %v4155_v41  ;;  %3895 = vmatpush3.bf16.msra.mxu1 %v4145_v57  ;;  %v4185_v41 = vld [vmem:[%s5105_s4 + $0x458] sm:$0xff]   ;;  %v4177_v57 = vld [vmem:[%s5105_s4 + $0x3b0] sm:$0xff]  }
 0x168   : > { %3896 = vmatprep.subr.bf16.mxu1 %v4147_v47  ;;  %v4187_v47 = vld [vmem:[%s5105_s4 + $0x460] sm:$0xff]  }
 0x16a   : > { %3911 = vmatpush3.bf16.msra.mxu0 %v4157_v51  ;;  %v4189_v51 = vld [vmem:[%s5105_s4 + $0x468] sm:$0xff]  }
 0x16b   : > { %3912 = vmatprep.subr.bf16.mxu0 %v4159_v52  ;;  %3897 = vmatpush3.bf16.msra.mxu1 %v4149_v53  ;;  %v2665_v52 = vcombine.low %v4925_v1, %v4910_v7  ;;  %v4190_v53 = vld [vmem:[%s5105_s4 + $0x428] sm:$0xff]   ;;  %v4195_v7 = vld [vmem:[%s5107_s6] sm:$0xff]   ;;  %v4198_v1 = vld [vmem:[%s5107_s6 + $0x18] sm:$0xff]  }
 0x16c   : > { %3926 = vmatprep.subr.bf16.mxu1 %v4152_v27  ;;  %v4194_v27 = vld [vmem:[%s5105_s4 + $0x438] sm:$0xff]  }
 0x16e   : > { %3913 = vmatpush3.bf16.msra.mxu0 %v4161_v8  ;;  %2337 = vmatmul.mubr.bf16.vlgmr.msra.gmra.mrb[12].mxu1 %v1926_v38  ;;  %v4196_v8 = vld [vmem:[%s5107_s6 + $0x8] sm:$0xff]  }
 0x16f   : > { %3914 = vmatprep.subr.bf16.mxu0 %v4163_v61  ;;  %3927 = vmatpush3.bf16.msra.mxu1 %v4154_v11  ;;  %v4200_v38 = vld [vmem:[%s5107_s6 + $0x28] sm:$0xff]  }
 0x170   : > { %3052 = vmatprep.mubr.bf16.mxu1 %v2666_v6  ;;  %3928 = vmatprep.subr.bf16.mxu1 %v4156_v4  ;;  %v4201_v4 = vld [vmem:[%s5107_s6 + $0x30] sm:$0xff]  }
 0x172   : > { %3915 = vmatpush3.bf16.msra.mxu0 %v4165_v5 }
 0x173   : > { %3916 = vmatprep.subr.bf16.mxu0 %v4167_v63  ;;  %3929 = vmatpush3.bf16.msra.mxu1 %v4158_v13  ;;  %v4202_v63 = vld [vmem:[%s5107_s6 + $0x38] sm:$0xff]  }
 0x174   : > { %3930 = vmatprep.subr.bf16.mxu1 %v4160_v16 }
 0x176   : > { %3917 = vmatpush3.bf16.msra.mxu0 %v4169_v18 }
 0x177   : > { %3918 = vmatprep.subr.bf16.mxu0 %v4171_v22  ;;  %3931 = vmatpush3.bf16.msra.mxu1 %v4162_v23 }
 0x178   : > { %3932 = vmatprep.subr.bf16.mxu1 %v4164_v34 }
 0x17a   : > { %3919 = vmatpush3.bf16.msra.mxu0 %v4173_v24 }
 0x17b   : > { %3948 = vmatprep.subr.bf16.mxu0 %v4176_v35  ;;  %3933 = vmatpush3.bf16.msra.mxu1 %v4166_v39 }
 0x17c   : > { %3934 = vmatprep.subr.bf16.mxu1 %v4168_v3 }
 0x17d   : > { %3012 = vmatmul.mubr.bf16.vlgmr.msra.gmra.mrb[16].mxu0 %v2663_v25 }
 0x17e   : > { %3949 = vmatpush3.bf16.msra.mxu0 %v4178_v10  ;;  %3093 = vmatprep.mubr.bf16.mxu0 %v2684_v62 }
 0x17f   : > { %3950 = vmatprep.subr.bf16.mxu0 %v4180_v21  ;;  %3935 = vmatpush3.bf16.msra.mxu1 %v4170_v42 }
 0x180   : > { %3936 = vmatprep.subr.bf16.mxu1 %v4172_v15 }
 0x182   : > { %3951 = vmatpush3.bf16.msra.mxu0 %v4182_v29 }
 0x183   : > { %3952 = vmatprep.subr.bf16.mxu0 %v4183_v56  ;;  %3937 = vmatpush3.bf16.msra.mxu1 %v4174_v0 }
 0x184   : > { %3938 = vmatprep.subr.bf16.mxu1 %v4175_v43 }
 0x186   : > { %3953 = vmatpush3.bf16.msra.mxu0 %v4184_v44 }
 0x187   : > { %3954 = vmatprep.subr.bf16.mxu0 %v4185_v41  ;;  %3939 = vmatpush3.bf16.msra.mxu1 %v4177_v57 }
 0x188   : > { %3940 = vmatprep.subr.bf16.mxu1 %v4179_v45 }
 0x18a   : > { %3955 = vmatpush3.bf16.msra.mxu0 %v4186_v46 }
 0x18b   : > { %3956 = vmatprep.subr.bf16.mxu0 %v4187_v47  ;;  %3941 = vmatpush3.bf16.msra.mxu1 %v4181_v28 }
 0x18c   : > { %3979 = vmatprep.subr.bf16.mxu1 %v4229_v48 }
 0x18e   : > { %3957 = vmatpush3.bf16.msra.mxu0 %v4188_v50  ;;  %3053 = vmatmul.mubr.bf16.vlgmr.msra.gmra.mrb[16].mxu1 %v2665_v52 }
 0x18f   : > { %3958 = vmatprep.subr.bf16.mxu0 %v4189_v51  ;;  %3980 = vmatpush3.bf16.msra.mxu1 %v4195_v7 }
 0x190   : > { %3981 = vmatprep.subr.bf16.mxu1 %v4229_v48  ;;  %3995 = vmatprep.mubr.msk.bf16.mxu1 %vm4230_vm1, %v4229_v48 }
 0x192   : > { %3959 = vmatpush3.bf16.msra.mxu0 %v4190_v53 }
 0x193   : > { %3960 = vmatprep.subr.bf16.mxu0 %v4191_v54  ;;  %3982 = vmatpush3.bf16.msra.mxu1 %v4196_v8 }
 0x194   : > { %3983 = vmatprep.subr.bf16.mxu1 %v4229_v48 }
 0x196   : > { %3961 = vmatpush3.bf16.msra.mxu0 %v4192_v55 }
 0x197   : > { %3962 = vmatprep.subr.bf16.mxu0 %v4193_v58  ;;  %3984 = vmatpush3.bf16.msra.mxu1 %v4197_v60 }
 0x198   : > { %3985 = vmatprep.subr.bf16.mxu1 %v4229_v48 }
 0x19a   : > { %3963 = vmatpush3.bf16.msra.mxu0 %v4194_v27 }
 0x19b   : > { %3986 = vmatpush3.bf16.msra.mxu1 %v4198_v1 }
 0x19c   : > { %3987 = vmatprep.subr.bf16.mxu1 %v4229_v48 }
 0x19d   : > { %3094 = vmatmul.mubr.bf16.vlgmr.msra.gmra.mrb[20].mxu0 %v2683_v59 }
 0x19f   : > { %3988 = vmatpush3.bf16.msra.mxu1 %v4199_v37 }
 0x1a0   : > { %3989 = vmatprep.subr.bf16.mxu1 %v4229_v48 }
 0x1a3   : > { %3990 = vmatpush3.bf16.msra.mxu1 %v4200_v38  ;;  %v3757_v38 = vld [vmem:[%s5106_s5] ss:$0 sm:$0xff] }
 0x1a4   : > { %3991 = vmatprep.subr.bf16.mxu1 %v4229_v48 }
 0x1a7   : > { %3992 = vmatpush3.bf16.msra.mxu1 %v4201_v4 }
 0x1a8   : > { %3993 = vmatprep.subr.bf16.mxu1 %v4229_v48 }
 0x1ab   : > { %3994 = vmatpush3.bf16.msra.mxu1 %v4202_v63 }
 0x1f0   : > { %v3788_v31 = vpop.f32.mrb[4].mxu0 }
 0x1f1   : > { %v3789_v17 = vpop.f32.mrb[5].mxu0 }
 0x1f2   : > { %v3790_v61 = vadd.f32 %v3789_v17, %v3788_v31  ;;  %v3791_v11 = vpop.f32.mrb[6].mxu0 }
 0x1f3   : > { %v3792_v2 = vpop.f32.mrb[7].mxu0 }
 0x1f4   : > { %v3793_v36 = vadd.f32 %v3792_v2, %v3791_v11 }
 0x201   : > { %v3810_v6 = vpop.f32.mrb[4].mxu1 }
 0x202   : > { %v3811_v5 = vpop.f32.mrb[5].mxu1 }
 0x203   : > { %v3812_v30 = vadd.f32 %v3811_v5, %v3810_v6  ;;  %v3813_v12 = vpop.f32.mrb[6].mxu1 }
 0x204   : > { %v3814_v13 = vpop.f32.mrb[7].mxu1 }
 0x205   : > { %v1827_v49 = vadd.f32 %v3812_v30, %v3790_v61  ;;  %v3815_v14 = vadd.f32 %v3814_v13, %v3813_v12 }
 0x207   : > { %v1830_v16 = vadd.f32 %v3815_v14, %v3793_v36  ;;  %v3758_v14 = vld [vmem:[%s5108_s7] ss:$0 sm:$0xff] }
 0x210   : > { %v3832_v18 = vpop.f32.mrb[8].mxu0 }
 0x211   : > { %v3833_v19 = vpop.f32.mrb[9].mxu0 }
 0x212   : > { %v3834_v9 = vadd.f32 %v3833_v19, %v3832_v18  ;;  %v3835_v22 = vpop.f32.mrb[10].mxu0 }
 0x213   : > { %v3836_v23 = vpop.f32.mrb[11].mxu0 }
 0x214   : > { %v1868_v26 = vadd.f32 %v3834_v9, %v1827_v49  ;;  %v3837_v33 = vadd.f32 %v3836_v23, %v3835_v22 }
 0x216   : > { %v1871_v34 = vadd.f32 %v3837_v33, %v1830_v16 }
 0x221   : > { %v3854_v24 = vpop.f32.mrb[8].mxu1 }
 0x222   : > { %v3855_v32 = vpop.f32.mrb[9].mxu1 }
 0x223   : > { %v3856_v35 = vadd.f32 %v3855_v32, %v3854_v24  ;;  %v3857_v39 = vpop.f32.mrb[10].mxu1 }
 0x224   : > { %v3858_v40 = vpop.f32.mrb[11].mxu1 }
 0x225   : > { %v2257_v3 = vadd.f32 %v3856_v35, %v1868_v26  ;;  %v3859_v10 = vadd.f32 %v3858_v40, %v3857_v39 }
 0x227   : > { %v2260_v48 = vadd.f32 %v3859_v10, %v1871_v34 }
 0x230   : > { %v3876_v20 = vpop.f32.mrb[12].mxu0 }
 0x231   : > { %v3877_v25 = vpop.f32.mrb[13].mxu0 }
 0x232   : > { %v3878_v21 = vadd.f32 %v3877_v25, %v3876_v20  ;;  %v3879_v42 = vpop.f32.mrb[14].mxu0 }
 0x233   : > { %v3880_v62 = vpop.f32.mrb[15].mxu0 }
 0x234   : > { %v2298_v15 = vadd.f32 %v3878_v21, %v2257_v3  ;;  %v3881_v29 = vadd.f32 %v3880_v62, %v3879_v42 }
 0x236   : > { %v2301_v56 = vadd.f32 %v3881_v29, %v2260_v48 }
 0x241   : > { %v3898_v0 = vpop.f32.mrb[12].mxu1 }
 0x242   : > { %v3899_v43 = vpop.f32.mrb[13].mxu1 }
 0x243   : > { %v3900_v44 = vadd.f32 %v3899_v43, %v3898_v0  ;;  %v3901_v41 = vpop.f32.mrb[14].mxu1 }
 0x244   : > { %v3902_v57 = vpop.f32.mrb[15].mxu1 }
 0x245   : > { %v2339_v45 = vadd.f32 %v3900_v44, %v2298_v15  ;;  %v3903_v46 = vadd.f32 %v3902_v57, %v3901_v41 }
 0x247   : > { %v2342_v47 = vadd.f32 %v3903_v46, %v2301_v56 }
 0x250   : > { %v3920_v28 = vpop.f32.mrb[16].mxu0 }
 0x251   : > { %v3921_v50 = vpop.f32.mrb[17].mxu0 }
 0x252   : > { %v3922_v51 = vadd.f32 %v3921_v50, %v3920_v28  ;;  %v3923_v52 = vpop.f32.mrb[18].mxu0 }
 0x253   : > { %v3924_v53 = vpop.f32.mrb[19].mxu0 }
 0x254   : > { %v3925_v54 = vadd.f32 %v3924_v53, %v3923_v52 }
 0x261   : > { %v3942_v55 = vpop.f32.mrb[16].mxu1 }
 0x262   : > { %v3943_v58 = vpop.f32.mrb[17].mxu1 }
 0x263   : > { %v3944_v27 = vadd.f32 %v3943_v58, %v3942_v55  ;;  %v3945_v59 = vpop.f32.mrb[18].mxu1 }
 0x264   : > { %v3946_v7 = vpop.f32.mrb[19].mxu1 }
 0x265   : > { %v3055_v8 = vadd.f32 %v3944_v27, %v3922_v51  ;;  %v3947_v60 = vadd.f32 %v3946_v7, %v3945_v59 }
 0x267   : > { %v3058_v31 = vadd.f32 %v3947_v60, %v3925_v54 }
 0x270   : > { %v3964_v17 = vpop.f32.mrb[20].mxu0 }
 0x271   : > { %v3965_v61 = vpop.f32.mrb[21].mxu0 }
 0x272   : > { %v3966_v11 = vadd.f32 %v3965_v61, %v3964_v17  ;;  %v3967_v1 = vpop.f32.mrb[22].mxu0 }
 0x273   : > { %v3968_v2 = vpop.f32.mrb[23].mxu0 }
 0x274   : > { %v3096_v36 = vadd.f32 %v3966_v11, %v3055_v8  ;;  %v3969_v37 = vadd.f32 %v3968_v2, %v3967_v1 }
 0x276   : > { %v3102_v4 = vadd.f32 %v3096_v36, %v2339_v45  ;;  %v3099_v6 = vadd.f32 %v3969_v37, %v3058_v31 }
 0x278   : > { %v3111_v5 = vadd.f32 %v3757_v38, %v3102_v4  ;;  %v3103_v30 = vadd.f32 %v3099_v6, %v2342_v47 }
 0x27a   : > { %v3112_v12 = vadd.f32 %v3757_v38, %v3103_v30  ;;  %v3113_v63 = vmax.f32 %v3111_v5, 0.0 }
 0x27c   : > { %v3114_v13 = vmax.f32 %v3112_v12, 0.0 }
 0x27e   : > { %v3115_v49 = vpack.c.bf16 %v3114_v13, %v3113_v63 }
 0x280   : > { %3996 = vmatmul.mubr.bf16.vlgmr.msra.gmra.mrb[20].mxu1 %v3115_v49 }
 0x353   : > { %v3221_v16 = vpop.f32.mrb[20].mxu1 }
 0x354   : > { %v3222_v18 = vadd.f32 %v3758_v14, %v3221_v16  ;;  %v3997_v19 = vpop.f32.mrb[21].mxu1 }
 0x355   : > { %v3224_v9 = vpop.f32.mrb[22].mxu1 }
 0x356   : > { %v3230_v22 = vcombine.high %v3222_v18, %v3222_v18  ;;  %v3234_v23 = vpack.c.bf16 %v3222_v18, %v3222_v18  ;;  %v3225_v26 = vadd.f32 %v3758_v14, %v3224_v9  ;;  %v3998_v33 = vpop.f32.mrb[23].mxu1 }
 0x358   : > { %v3235_v34 = vpack.c.bf16 %v3230_v22, %v3230_v22  ;;  %3238 = vst [vmem:[%s377_s22] sm:$0x3] %v3234_v23  ;;  %v3231_v24 = vcombine.high %v3225_v26, %v3225_v26  ;;  %v3236_v32 = vpack.c.bf16 %v3225_v26, %v3225_v26 }
 0x35a   : > { %3239 = vst [vmem:[%s377_s22 + $0x2] sm:$0x3] %v3235_v34  ;;  %v3237_v35 = vpack.c.bf16 %v3231_v24, %v3231_v24  ;;  %3240 = vst [vmem:[%s377_s22 + $0x4] sm:$0x3] %v3236_v32 }
 0x35c   : > { %3241 = vst [vmem:[%s377_s22 + $0x6] sm:$0x3] %v3237_v35 }
 0x35d PF: > { %s18_s29 = sadd.s32 1, %s4225_s29   ;;  %s5110_s27 = smov %s4221_s28 }
 0x35e   : > { %p15_p5 = scmp.ge.s32.totalorder %s18_s29, 4   ;;  %s5111_s28 = smov %s5113_s30 }
 0x360   :  { %17 = sbr.rel (!%p15_p5) target bundleno = 2 (0x2), region = 101 }

// kernel: _lambda_.14
= control target key start
LH: loop header
LB: loop body
LE: loop exit
PB: predicated region body
PF: predicated region fallthrough
CT: control target
= control target key end

     0   :  { %s9087_s27 = smov 0   ;;  %s9089_s28 = smov 0   ;;  %s11618_s0 = inlined_call_operand.vmem [shape: bf16[2,16,16,128], index: 0, kind: input, shape index: {}]   ;;  %s11619_s1 = inlined_call_operand.vmem [shape: bf16[2,1,2,16,128], index: 1, kind: input, shape index: {}]   ;;  %s11620_s2 = inlined_call_operand.vmem [shape: bf16[128,256], index: 2, kind: input, shape index: {}]   ;;  %s11621_s3 = inlined_call_operand.vmem [shape: f32[1,256], index: 3, kind: input, shape index: {}]   ;;  %s11622_s4 = inlined_call_operand.vmem [shape: bf16[3,768,128], index: 4, kind: input, shape index: {}]   ;;  %s11623_s5 = inlined_call_operand.vmem [shape: f32[1,128], index: 5, kind: input, shape index: {}]   ;;  %s11624_s6 = inlined_call_operand.vmem [shape: bf16[128,128], index: 6, kind: input, shape index: {}]   ;;  %s11625_s7 = inlined_call_operand.vmem [shape: f32[1,128], index: 7, kind: input, shape index: {}]   ;;  %s11626_s8 = inlined_call_operand.vmem [shape: bf16[2,16,16,128], index: 8, kind: output, shape index: {}]  }
   0x1   :  { %s9091_s29 = smov 0  }
   0x2 LB: > { %s30_s30 = sadd.s32 1, %s9034_s28  ;;  %p7131_p0 = scmp.ge.s32.totalorder %s9038_s29, 1  ;;  %s9038_s29 = sphi %s9091_s29, %s18_s29   ;;  %s9034_s28 = sphi %s9089_s28, %s11921_s28   ;;  %s9030_s27 = sphi %s9087_s27, %s11920_s27  }
   0x3   : > { %p32_p1 = scmp.ge.s32.totalorder %s30_s30, 2  ;;  %p300_p2 = scmp.lt.s32.totalorder %s9038_s29, 3 }
   0x5   : > { %s11923_s30 = smov (%p32_p1, %s30_s30), 0  ;;  %p301_p3 = pnand %p7131_p0, %p300_p2 }
   0x7   : > { %304 = sbr.rel (%p301_p3) target bundleno = 1362 (0x552), region = 52 }
   0xe   : > { %v8820_v0 = vld [vmem:[%s11620_s2 + $0x4] ss:$8 sps:$4 sm:$0xff]   ;;  %p354_p4 = scmp.lt.s32.totalorder %s9030_s27, 1  ;;  %v8822_v1 = vld [vmem:[%s11620_s2] ss:$8 sps:$4 sm:$0xff]   ;;  %v9040_v2 = vmov 0   ;;  %v435_v47 = vlaneseq }
   0xf   : > { %653 = vmatprep.mubr.bf16.mxu0 %v9040_v2  ;;  %1388 = vmatprep.mubr.bf16.mxu1 %v9040_v2  ;;  %v8823_v3 = vld [vmem:[%s11620_s2 + $0x14] ss:$8 sps:$4 sm:$0xff]   ;;  %v8825_v4 = vld [vmem:[%s11620_s2 + $0x10] ss:$8 sps:$4 sm:$0xff]   ;;  %v8826_v5 = vld [vmem:[%s11620_s2 + $0x24] ss:$8 sps:$4 sm:$0xff]  }
  0x10   : > { %621 = vmatprep.subr.bf16.mxu0 %v8820_v0  ;;  %s11925_s27 = smov (!%p354_p4, %s9030_s27), 1  ;;  %1356 = vmatprep.subr.bf16.mxu1 %v8820_v0  ;;  %v8828_v6 = vld [vmem:[%s11620_s2 + $0x20] ss:$8 sps:$4 sm:$0xff]   ;;  %v8829_v7 = vld [vmem:[%s11620_s2 + $0x34] ss:$8 sps:$4 sm:$0xff]   ;;  %vm9259_vm0 = vcmp.lt.s32.totalorder %v435_v47, 256 }
  0x11   : > { %622 = vmatpush1.bf16.msra.mxu0 %v8822_v1  ;;  %1357 = vmatpush1.bf16.msra.mxu1 %v8822_v1  ;;  %s7568_s19 = sshll.u32 %s11925_s27, 7  ;;  %v8831_v8 = vld [vmem:[%s11620_s2 + $0x30] ss:$8 sps:$4 sm:$0xff]   ;;  %v8832_v9 = vld [vmem:[%s11620_s2 + $0x44] ss:$8 sps:$4 sm:$0xff]   ;;  %s7569_s9 = sshll.u32 %s11925_s27, 4 }
  0x12   : > { %623 = vmatprep.subr.bf16.mxu0 %v8823_v3  ;;  %1358 = vmatprep.subr.bf16.mxu1 %v8823_v3  ;;  %s9136_s26 = scalar_lea.vmem %s11618_s0, %s7568_s19  ;;  %v8834_v10 = vld [vmem:[%s11620_s2 + $0x40] ss:$8 sps:$4 sm:$0xff]   ;;  %v8835_v11 = vld [vmem:[%s11620_s2 + $0x54] ss:$8 sps:$4 sm:$0xff]   ;;  %v8837_v12 = vld [vmem:[%s11620_s2 + $0x50] ss:$8 sps:$4 sm:$0xff]   ;;  %s9169_s14 = scalar_lea.vmem %s11619_s1, %s7569_s9 }
  0x13   : > { %v8838_v13 = vld [vmem:[%s11620_s2 + $0x64] ss:$8 sps:$4 sm:$0xff]   ;;  %v8840_v14 = vld [vmem:[%s11620_s2 + $0x60] ss:$8 sps:$4 sm:$0xff]   ;;  %v8841_v15 = vld [vmem:[%s11620_s2 + $0x74] ss:$8 sps:$4 sm:$0xff]   ;;  %s11562_s11 = scalar_lea.vmem %s11626_s8, %s7568_s19 }
  0x14   : > { %v8843_v16 = vld [vmem:[%s11620_s2 + $0x70] ss:$8 sps:$4 sm:$0xff]   ;;  %v8861_v17 = vld [vmem:[%s11622_s4 + $0x1c0] sm:$0xff]   ;;  %v8863_v21 = vld [vmem:[%s11622_s4 + $0x1c8] sm:$0xff]   ;;  %v9041_v54 = vmov 0.0   ;;  %vm942_vm1 = vcmask 1040384  }
  0x15   : > { %624 = vmatpush1.bf16.msra.mxu0 %v8825_v4  ;;  %1359 = vmatpush1.bf16.msra.mxu1 %v8825_v4  ;;  %v8844_v18 = vld [vmem:[%s9136_s26] sm:$0xff]   ;;  %v8864_v23 = vld [vmem:[%s11622_s4 + $0x188] sm:$0xff]   ;;  %v8865_v24 = vld [vmem:[%s11622_s4 + $0x1d0] sm:$0xff]   ;;  %1485 = vst.msk [vmem:[#allocation2 + $0x30] ss:$8 sm:$0x3] %vm9259_vm0, %v9041_v54 }
  0x16   : > { %625 = vmatprep.subr.bf16.mxu0 %v8826_v5  ;;  %1360 = vmatprep.subr.bf16.mxu1 %v8826_v5  ;;  %v8860_v19 = vld [vmem:[%s9169_s14] sm:$0xff]   ;;  %v8845_v26 = vld [vmem:[%s9136_s26 + $0x8] sm:$0xff]   ;;  %v8867_v27 = vld [vmem:[%s11622_s4 + $0x190] sm:$0xff]   ;;  %1482 = vst.msk [vmem:[#allocation2] ss:$8 sm:$0x3] %vm9259_vm0, %v9041_v54 }
  0x17   : > { %v8862_v20 = vld [vmem:[%s11622_s4 + $0x180] sm:$0xff]   ;;  %v8846_v28 = vld [vmem:[%s9136_s26 + $0x10] sm:$0xff]   ;;  %v8847_v29 = vld [vmem:[%s9136_s26 + $0x18] sm:$0xff]   ;;  %1488 = vst.msk [vmem:[#allocation2 + $0x60] ss:$8 sm:$0x3] %vm9259_vm0, %v9041_v54 }
  0x18   : > { %v8866_v22 = vld [vmem:[%s11622_s4 + $0x240] sm:$0xff]   ;;  %v8849_v31 = vld [vmem:[%s9136_s26 + $0x28] sm:$0xff]   ;;  %v8850_v32 = vld [vmem:[%s9136_s26 + $0x30] sm:$0xff]   ;;  %1491 = vst.msk [vmem:[#allocation2 + $0x90] ss:$8 sm:$0x3] %vm9259_vm0, %v9041_v54 }
  0x19   : > { %626 = vmatpush1.bf16.msra.mxu0 %v8828_v6  ;;  %1361 = vmatpush1.bf16.msra.mxu1 %v8828_v6  ;;  %v8868_v25 = vld [vmem:[%s11622_s4 + $0x200] sm:$0xff]   ;;  %v8851_v33 = vld [vmem:[%s9136_s26 + $0x38] sm:$0xff]   ;;  %v8853_v35 = vld [vmem:[%s9136_s26 + $0x48] sm:$0xff]   ;;  %1494 = vst.msk [vmem:[#allocation2 + $0xc0] ss:$8 sm:$0x3] %vm9259_vm0, %v9041_v54 }
  0x1a   : > { %627 = vmatprep.subr.bf16.mxu0 %v8829_v7  ;;  %1362 = vmatprep.subr.bf16.mxu1 %v8829_v7  ;;  %v8848_v30 = vld [vmem:[%s9136_s26 + $0x20] sm:$0xff]   ;;  %v8854_v36 = vld [vmem:[%s9136_s26 + $0x50] sm:$0xff]   ;;  %v8870_v37 = vld [vmem:[%s11622_s4 + $0x248] sm:$0xff]   ;;  %1497 = vst.msk [vmem:[#allocation2 + $0xf0] ss:$8 sm:$0x3] %vm9259_vm0, %v9041_v54 }
  0x1b   : > { %v8852_v34 = vld [vmem:[%s9136_s26 + $0x40] sm:$0xff]   ;;  %v8869_v38 = vld [vmem:[%s11622_s4 + $0x1d8] sm:$0xff]   ;;  %v8872_v39 = vld [vmem:[%s11622_s4 + $0x208] sm:$0xff]   ;;  %1500 = vst.msk [vmem:[#allocation2 + $0x120] ss:$8 sm:$0x3] %vm9259_vm0, %v9041_v54 }
  0x1c   : > { %v8871_v40 = vld [vmem:[%s11622_s4 + $0x198] sm:$0xff]   ;;  %v8874_v42 = vld [vmem:[%s11622_s4 + $0x250] sm:$0xff]   ;;  %v8873_v43 = vld [vmem:[%s11622_s4 + $0x1e0] sm:$0xff]   ;;  %1503 = vst.msk [vmem:[#allocation2 + $0x150] ss:$8 sm:$0x3] %vm9259_vm0, %v9041_v54 }
  0x1d   : > { %628 = vmatpush1.bf16.msra.mxu0 %v8831_v8  ;;  %1363 = vmatpush1.bf16.msra.mxu1 %v8831_v8  ;;  %v8855_v41 = vld [vmem:[%s9136_s26 + $0x58] sm:$0xff]   ;;  %v8876_v44 = vld [vmem:[%s11622_s4 + $0x210] sm:$0xff]   ;;  %v8875_v45 = vld [vmem:[%s11622_s4 + $0x1a0] sm:$0xff]   ;;  %1506 = vst.msk [vmem:[#allocation2 + $0x180] ss:$8 sm:$0x3] %vm9259_vm0, %v9041_v54 }
  0x1e   : > { %629 = vmatprep.subr.bf16.mxu0 %v8832_v9  ;;  %1364 = vmatprep.subr.bf16.mxu1 %v8832_v9  ;;  %v8877_v46 = vld [vmem:[%s9169_s14 + $0x8] sm:$0xff]   ;;  %v8879_v48 = vld [vmem:[%s11622_s4 + $0x258] sm:$0xff]   ;;  %v8856_v53 = vld [vmem:[%s9136_s26 + $0x60] sm:$0xff]   ;;  %1509 = vst.msk [vmem:[#allocation2 + $0x1b0] ss:$8 sm:$0x3] %vm9259_vm0, %v9041_v54 }
  0x1f   : > { %v8878_v49 = vld [vmem:[%s11622_s4 + $0x1e8] sm:$0xff]   ;;  %v8881_v50 = vld [vmem:[%s11622_s4 + $0x218] sm:$0xff]   ;;  %1512 = vst.msk [vmem:[#allocation2 + $0x1e0] ss:$8 sm:$0x3] %vm9259_vm0, %v9041_v54  ;;  %v8883_v55 = vld [vmem:[%s11622_s4 + $0x260] sm:$0xff]  }
  0x20   : > { %v8880_v51 = vld [vmem:[%s11622_s4 + $0x1a8] sm:$0xff]   ;;  %1515 = vst.msk [vmem:[#allocation2 + $0x210] ss:$8 sm:$0x3] %vm9259_vm0, %v9041_v54  ;;  %v8882_v56 = vld [vmem:[%s11622_s4 + $0x1f0] sm:$0xff]   ;;  %v8885_v57 = vld [vmem:[%s11622_s4 + $0x220] sm:$0xff]  }
  0x21   : > { %630 = vmatpush1.bf16.msra.mxu0 %v8834_v10  ;;  %1365 = vmatpush1.bf16.msra.mxu1 %v8834_v10  ;;  %1518 = vst.msk [vmem:[#allocation2 + $0x240] ss:$8 sm:$0x3] %vm9259_vm0, %v9041_v54  ;;  %1521 = vst.msk [vmem:[#allocation2 + $0x270] ss:$8 sm:$0x3] %vm9259_vm0, %v9041_v54 }
  0x22   : > { %631 = vmatprep.subr.bf16.mxu0 %v8835_v11  ;;  %1366 = vmatprep.subr.bf16.mxu1 %v8835_v11  ;;  %1524 = vst.msk [vmem:[#allocation2 + $0x2a0] ss:$8 sm:$0x3] %vm9259_vm0, %v9041_v54  ;;  %1527 = vst.msk [vmem:[#allocation2 + $0x2d0] ss:$8 sm:$0x3] %vm9259_vm0, %v9041_v54 }
  0x23   : > { %1530 = vst.msk [vmem:[#allocation2 + $0x300] ss:$8 sm:$0x3] %vm9259_vm0, %v9041_v54  ;;  %1533 = vst.msk [vmem:[#allocation2 + $0x330] ss:$8 sm:$0x3] %vm9259_vm0, %v9041_v54 }
  0x24   : > { %1536 = vst.msk [vmem:[#allocation2 + $0x21] ss:$8 sm:$0x3] %vm9259_vm0, %v9041_v54  ;;  %1539 = vst.msk [vmem:[#allocation2 + $0x51] ss:$8 sm:$0x3] %vm9259_vm0, %v9041_v54 }
  0x25   : > { %632 = vmatpush1.bf16.msra.mxu0 %v8837_v12  ;;  %1367 = vmatpush1.bf16.msra.mxu1 %v8837_v12  ;;  %1542 = vst.msk [vmem:[#allocation2 + $0x81] ss:$8 sm:$0x3] %vm9259_vm0, %v9041_v54  ;;  %1545 = vst.msk [vmem:[#allocation2 + $0xb1] ss:$8 sm:$0x3] %vm9259_vm0, %v9041_v54 }
  0x26   : > { %633 = vmatprep.subr.bf16.mxu0 %v8838_v13  ;;  %1368 = vmatprep.subr.bf16.mxu1 %v8838_v13  ;;  %1548 = vst.msk [vmem:[#allocation2 + $0xe1] ss:$8 sm:$0x3] %vm9259_vm0, %v9041_v54  ;;  %1551 = vst.msk [vmem:[#allocation2 + $0x111] ss:$8 sm:$0x3] %vm9259_vm0, %v9041_v54 }
  0x27   : > { %1554 = vst.msk [vmem:[#allocation2 + $0x141] ss:$8 sm:$0x3] %vm9259_vm0, %v9041_v54  ;;  %1557 = vst.msk [vmem:[#allocation2 + $0x171] ss:$8 sm:$0x3] %vm9259_vm0, %v9041_v54 }
  0x28   : > { %1560 = vst.msk [vmem:[#allocation2 + $0x1a1] ss:$8 sm:$0x3] %vm9259_vm0, %v9041_v54  ;;  %1563 = vst.msk [vmem:[#allocation2 + $0x1d1] ss:$8 sm:$0x3] %vm9259_vm0, %v9041_v54 }
  0x29   : > { %634 = vmatpush1.bf16.msra.mxu0 %v8840_v14  ;;  %1369 = vmatpush1.bf16.msra.mxu1 %v8840_v14  ;;  %1566 = vst.msk [vmem:[#allocation2 + $0x201] ss:$8 sm:$0x3] %vm9259_vm0, %v9041_v54  ;;  %1569 = vst.msk [vmem:[#allocation2 + $0x231] ss:$8 sm:$0x3] %vm9259_vm0, %v9041_v54 }
  0x2a   : > { %635 = vmatprep.subr.bf16.mxu0 %v8841_v15  ;;  %1370 = vmatprep.subr.bf16.mxu1 %v8841_v15  ;;  %1572 = vst.msk [vmem:[#allocation2 + $0x261] ss:$8 sm:$0x3] %vm9259_vm0, %v9041_v54  ;;  %1575 = vst.msk [vmem:[#allocation2 + $0x291] ss:$8 sm:$0x3] %vm9259_vm0, %v9041_v54 }
  0x2b   : > { %1578 = vst.msk [vmem:[#allocation2 + $0x2c1] ss:$8 sm:$0x3] %vm9259_vm0, %v9041_v54  ;;  %1581 = vst.msk [vmem:[#allocation2 + $0x2f1] ss:$8 sm:$0x3] %vm9259_vm0, %v9041_v54 }
  0x2c   : > { %1584 = vst.msk [vmem:[#allocation2 + $0x321] ss:$8 sm:$0x3] %vm9259_vm0, %v9041_v54  ;;  %1587 = vst.msk [vmem:[#allocation2 + $0x351] ss:$8 sm:$0x3] %vm9259_vm0, %v9041_v54 }
  0x2d   : > { %636 = vmatpush1.bf16.msra.mxu0 %v8843_v16  ;;  %1371 = vmatpush1.bf16.msra.mxu1 %v8843_v16  ;;  %v8884_v58 = vld [vmem:[%s11622_s4 + $0x1b0] sm:$0xff]   ;;  %v8887_v59 = vld [vmem:[%s11622_s4 + $0x268] sm:$0xff]   ;;  %v8886_v60 = vld [vmem:[%s11622_s4 + $0x1f8] sm:$0xff]   ;;  %v436_v8 = vshrl.u32 %v435_v47, 7  ;;  %vm1749_vm2 = vsmask.f32 7424 }
  0x2e   : > { %7698 = vmatprep.subr.bf16.mxu1 %v8861_v17  ;;  %7810 = vmatprep.subr.bf16.mxu0 %v8866_v22  ;;  %v8889_v61 = vld [vmem:[%s11622_s4 + $0x228] sm:$0xff]   ;;  %v8888_v62 = vld [vmem:[%s11622_s4 + $0x1b8] sm:$0xff]   ;;  %v8890_v0 = vld [vmem:[%s11622_s4 + $0x270] sm:$0xff]   ;;  %vm2230_vm3 = vcmask 1046528  }
  0x2f   : > { %v8857_v63 = vld [vmem:[%s9136_s26 + $0x68] sm:$0xff]   ;;  %v8892_v1 = vld [vmem:[%s11622_s4 + $0x230] sm:$0xff]   ;;  %v8894_v3 = vld [vmem:[%s11622_s4 + $0x278] sm:$0xff]   ;;  %v437_v9 = vsub.s32 0, %v436_v8  ;;  %v441_v11 = vsub.s32 1, %v436_v8 }
  0x30   : > { %654 = vmatmul.mubr.bf16.vlgmr.msra.gmra.mrb[0].mxu0 %v8844_v18  ;;  %1389 = vmatmul.mubr.bf16.vlgmr.msra.gmra.mrb[0].mxu1 %v8860_v19  ;;  %v8895_v4 = vld [vmem:[%s11622_s4 + $0x238] sm:$0xff]   ;;  %v8858_v5 = vld [vmem:[%s9136_s26 + $0x70] sm:$0xff]   ;;  %v8891_v6 = vld [vmem:[%s11622_s4 + $0x2c0] sm:$0xff]  }
  0x31   : > { %663 = vmatprep.mubr.bf16.mxu0 %v9040_v2  ;;  %7699 = vmatpush3.bf16.msra.mxu1 %v8862_v20  ;;  %v8859_v7 = vld [vmem:[%s9136_s26 + $0x78] sm:$0xff]   ;;  %v433_v10 = vld [vmem:[%s11621_s3] sm:$0x3] }
  0x32   : > { %7700 = vmatprep.subr.bf16.mxu1 %v8863_v21  ;;  %7811 = vmatpush3.bf16.msra.mxu0 %v8868_v25  ;;  %v9385_v12 = vrot.slane %v433_v10, %v437_v9  ;;  %v8908_v13 = vld [vmem:[%s11622_s4 + $0x40] sm:$0xff]   ;;  %v9390_v14 = vrot.slane %v433_v10, %v441_v11 }
  0x33   : > { %1398 = vmatprep.mubr.bf16.mxu1 %v9040_v2  ;;  %7812 = vmatprep.subr.bf16.mxu0 %v8870_v37  ;;  %v1252_v22 = vld [vmem:[%s11621_s3] sm:$0x3] }
  0x35   : > { %7701 = vmatpush3.bf16.msra.mxu1 %v8864_v23 }
  0x36   : > { %7702 = vmatprep.subr.bf16.mxu1 %v8865_v24  ;;  %7813 = vmatpush3.bf16.msra.mxu0 %v8872_v39 }
  0x37   : > { %7814 = vmatprep.subr.bf16.mxu0 %v8874_v42 }
  0x38   : > { %664 = vmatmul.mubr.bf16.gmra.mrb[4].mxu0 %v8845_v26  ;;  %1399 = vmatmul.mubr.bf16.gmra.mrb[4].mxu1 %v8877_v46  ;;  %v9399_v26 = vrot.slane %v1252_v22, %v437_v9 }
  0x39   : > { %673 = vmatprep.mubr.bf16.mxu0 %v9040_v2  ;;  %7703 = vmatpush3.bf16.msra.mxu1 %v8867_v27 }
  0x3a   : > { %7704 = vmatprep.subr.bf16.mxu1 %v8869_v38  ;;  %7815 = vmatpush3.bf16.msra.mxu0 %v8876_v44 }
  0x3b   : > { %7816 = vmatprep.subr.bf16.mxu0 %v8879_v48 }
  0x3d   : > { %7705 = vmatpush3.bf16.msra.mxu1 %v8871_v40 }
  0x3e   : > { %7706 = vmatprep.subr.bf16.mxu1 %v8873_v43  ;;  %7817 = vmatpush3.bf16.msra.mxu0 %v8881_v50 }
  0x3f   : > { %7818 = vmatprep.subr.bf16.mxu0 %v8883_v55 }
  0x40   : > { %674 = vmatmul.mubr.bf16.gmra.mrb[8].mxu0 %v8846_v28 }
  0x41   : > { %683 = vmatprep.mubr.bf16.mxu0 %v9040_v2  ;;  %7707 = vmatpush3.bf16.msra.mxu1 %v8875_v45 }
  0x42   : > { %7708 = vmatprep.subr.bf16.mxu1 %v8878_v49  ;;  %7819 = vmatpush3.bf16.msra.mxu0 %v8885_v57 }
  0x43   : > { %7820 = vmatprep.subr.bf16.mxu0 %v8887_v59 }
  0x45   : > { %7709 = vmatpush3.bf16.msra.mxu1 %v8880_v51 }
  0x46   : > { %7710 = vmatprep.subr.bf16.mxu1 %v8882_v56  ;;  %7821 = vmatpush3.bf16.msra.mxu0 %v8889_v61 }
  0x47   : > { %7822 = vmatprep.subr.bf16.mxu0 %v8890_v0 }
  0x48   : > { %684 = vmatmul.mubr.bf16.gmra.mrb[12].mxu0 %v8847_v29  ;;  %v9401_v29 = vrot.slane %v1252_v22, %v441_v11 }
  0x49   : > { %693 = vmatprep.mubr.bf16.mxu0 %v9040_v2  ;;  %7711 = vmatpush3.bf16.msra.mxu1 %v8884_v58 }
  0x4a   : > { %7712 = vmatprep.subr.bf16.mxu1 %v8886_v60  ;;  %7823 = vmatpush3.bf16.msra.mxu0 %v8892_v1 }
  0x4b   : > { %7824 = vmatprep.subr.bf16.mxu0 %v8894_v3 }
  0x4d   : > { %7713 = vmatpush3.bf16.msra.mxu1 %v8888_v62 }
  0x4e   : > { %7825 = vmatpush3.bf16.msra.mxu0 %v8895_v4  ;;  %7922 = vmatprep.subr.bf16.mxu1 %v8891_v6 }
  0x4f   : > { %8034 = vmatprep.subr.bf16.mxu0 %v8908_v13 }
  0x50   : > { %694 = vmatmul.mubr.bf16.gmra.mrb[16].mxu0 %v8848_v30 }
  0x51   : > { %703 = vmatprep.mubr.bf16.mxu0 %v9040_v2 }
  0x58   : > { %704 = vmatmul.mubr.bf16.gmra.mrb[20].mxu0 %v8849_v31 }
  0x59   : > { %713 = vmatprep.mubr.bf16.mxu0 %v9040_v2 }
  0x60   : > { %714 = vmatmul.mubr.bf16.gmra.mrb[24].mxu0 %v8850_v32 }
  0x61   : > { %723 = vmatprep.mubr.bf16.mxu0 %v9040_v2 }
  0x68   : > { %724 = vmatmul.mubr.bf16.gmra.mrb[28].mxu0 %v8851_v33 }
  0x69   : > { %733 = vmatprep.mubr.bf16.mxu0 %v9040_v2 }
  0x70   : > { %734 = vmatmul.mubr.bf16.gmra.mrb[32].mxu0 %v8852_v34 }
  0x71   : > { %743 = vmatprep.mubr.bf16.mxu0 %v9040_v2 }
  0x78   : > { %744 = vmatmul.mubr.bf16.gmra.mrb[36].mxu0 %v8853_v35 }
  0x79   : > { %753 = vmatprep.mubr.bf16.mxu0 %v9040_v2 }
  0x80   : > { %754 = vmatmul.mubr.bf16.gmra.mrb[40].mxu0 %v8854_v36 }
  0x81   : > { %763 = vmatprep.mubr.bf16.mxu0 %v9040_v2 }
  0x88   : > { %764 = vmatmul.mubr.bf16.gmra.mrb[44].mxu0 %v8855_v41 }
  0x89   : > { %773 = vmatprep.mubr.bf16.mxu0 %v9040_v2 }
  0x90   : > { %774 = vmatmul.mubr.bf16.gmra.mrb[48].mxu0 %v8856_v53 }
  0x91   : > { %783 = vmatprep.mubr.bf16.mxu0 %v9040_v2 }
  0x98   : > { %784 = vmatmul.mubr.bf16.gmra.mrb[52].mxu0 %v8857_v63 }
  0x99   : > { %793 = vmatprep.mubr.bf16.mxu0 %v9040_v2 }
  0xa0   : > { %794 = vmatmul.mubr.bf16.gmra.mrb[56].mxu0 %v8858_v5 }
  0xa1   : > { %803 = vmatprep.mubr.bf16.mxu0 %v9040_v2 }
  0xa8   : > { %804 = vmatmul.mubr.bf16.gmra.mrb[60].mxu0 %v8859_v7 }
 0x103   : > { %v655_v2 = vpop.f32.mrb[0].mxu0  ;;  %v1390_v23 = vpop.f32.mrb[0].mxu1 }
 0x104   : > { %v656_v15 = vadd.f32 %v655_v2, %v9385_v12  ;;  %v657_v16 = vpop.f32.mrb[1].mxu0  ;;  %v1392_v30 = vpop.f32.mrb[1].mxu1  ;;  %v1391_v33 = vadd.f32 %v1390_v23, %v9399_v26 }
 0x105   : > { %v658_v17 = vadd.f32 %v657_v16, %v9390_v14  ;;  %v659_v18 = vpop.f32.mrb[2].mxu0  ;;  %v1394_v34 = vpop.f32.mrb[2].mxu1  ;;  %v1393_v36 = vadd.f32 %v1392_v30, %v9401_v29 }
 0x106   : > { %v814_v19 = vmax.f32 %v656_v15, 0.0  ;;  %v660_v20 = vadd.f32 %v659_v18, %v9385_v12  ;;  %v661_v21 = vpop.f32.mrb[3].mxu0  ;;  %v1395_v37 = vadd.f32 %v1394_v34, %v9399_v26  ;;  %v1396_v38 = vpop.f32.mrb[3].mxu1  ;;  %v1409_v41 = vmax.f32 %v1391_v33, 0.0  ;;  %v8893_v15 = vld [vmem:[%s11622_s4 + $0x280] sm:$0xff]  }
 0x107   : > { %v815_v24 = vmax.f32 %v658_v17, 0.0  ;;  %v662_v25 = vadd.f32 %v661_v21, %v9390_v14  ;;  %v1397_v42 = vadd.f32 %v1396_v38, %v9401_v29  ;;  %v1410_v46 = vmax.f32 %v1393_v36, 0.0 }
 0x108   : > { %v943_v27 = vrot.slane %v814_v19, 7  ;;  %v816_v28 = vmax.f32 %v660_v20, 0.0  ;;  %v1411_v47 = vmax.f32 %v1395_v37, 0.0  ;;  %v1424_v51 = vmul.f32 0.0, %v1409_v41  ;;  %v8897_v41 = vld [vmem:[%s11622_s4 + $0x288] sm:$0xff]  }
 0x109   : > { %v944_v31 = vrot.slane %v815_v24, 7  ;;  %v817_v32 = vmax.f32 %v662_v25, 0.0  ;;  %v1412_v52 = vmax.f32 %v1397_v42, 0.0  ;;  %v1425_v56 = vmul.f32 0.0, %v1410_v46  ;;  %v8896_v24 = vld [vmem:[%s11622_s4 + $0x2c8] sm:$0xff]   ;;  %v8898_v46 = vld [vmem:[%s11622_s4 + $0x2d0] sm:$0xff]  }
 0x10a   : > { %1136 = vst [vmem:[#allocation2 + $0x30] sm:$0xfe] %v943_v27  ;;  %v945_v35 = vrot.slane %v816_v28, 7  ;;  %v1426_v57 = vmul.f32 0.0, %v1411_v47  ;;  %v1432_v60 = vrot.slane %v1424_v51, 7 }
 0x10b   : > { %1137 = vst [vmem:[#allocation2 + $0x38] sm:$0xfe] %v944_v31  ;;  %v947_v39 = vrot.slane %v817_v32, 7  ;;  %v665_v40 = vpop.f32.mrb[4].mxu0  ;;  %v1427_v61 = vmul.f32 0.0, %v1412_v52  ;;  %v1433_v0 = vrot.slane %v1425_v56, 7 }
 0x10c   : > { %v946_v43 = vsel %vm942_vm1, %v943_v27, %v945_v35  ;;  %1140 = vst [vmem:[#allocation2 + $0x50] sm:$0x1] %v945_v35  ;;  %v666_v44 = vadd.f32 %v665_v40, %v9385_v12  ;;  %v667_v45 = vpop.f32.mrb[5].mxu0  ;;  %v1434_v1 = vrot.slane %v1426_v57, 7  ;;  %1444 = vst [vmem:[#allocation2] sm:$0xfe] %v1432_v60 }
 0x10d   : > { %1138 = vst [vmem:[#allocation2 + $0x40] sm:$0xff] %v946_v43  ;;  %v948_v48 = vsel %vm942_vm1, %v944_v31, %v947_v39  ;;  %1141 = vst [vmem:[#allocation2 + $0x58] sm:$0x1] %v947_v39  ;;  %v668_v49 = vadd.f32 %v667_v45, %v9390_v14  ;;  %v669_v50 = vpop.f32.mrb[6].mxu0  ;;  %v1436_v6 = vrot.slane %v1427_v61, 7  ;;  %v8899_v57 = vld [vmem:[%s11622_s4 + $0x290] sm:$0xff]  }
 0x10e   : > { %1139 = vst [vmem:[#allocation2 + $0x48] sm:$0xff] %v948_v48  ;;  %v818_v53 = vmax.f32 %v666_v44, 0.0  ;;  %v670_v54 = vadd.f32 %v669_v50, %v9385_v12  ;;  %v671_v55 = vpop.f32.mrb[7].mxu0  ;;  %1445 = vst [vmem:[#allocation2 + $0x8] sm:$0xfe] %v1433_v0  ;;  %v1435_v10 = vsel %vm942_vm1, %v1432_v60, %v1434_v1 }
 0x10f   : > { %v819_v58 = vmax.f32 %v668_v49, 0.0  ;;  %v672_v59 = vadd.f32 %v671_v55, %v9390_v14  ;;  %1448 = vst [vmem:[#allocation2 + $0x20] sm:$0x1] %v1434_v1  ;;  %1446 = vst [vmem:[#allocation2 + $0x10] sm:$0xff] %v1435_v10  ;;  %v1437_v17 = vsel %vm942_vm1, %v1433_v0, %v1436_v6  ;;  %v8910_v10 = vld [vmem:[%s11622_s4 + $0x48] sm:$0xff]  }
 0x110   : > { %v949_v62 = vrot.slane %v818_v53, 7  ;;  %v820_v63 = vmax.f32 %v670_v54, 0.0  ;;  %1449 = vst [vmem:[#allocation2 + $0x28] sm:$0x1] %v1436_v6  ;;  %1447 = vst [vmem:[#allocation2 + $0x18] sm:$0xff] %v1437_v17 }
 0x111   : > { %v950_v3 = vrot.slane %v819_v58, 7  ;;  %v821_v4 = vmax.f32 %v672_v59, 0.0  ;;  %v2455_v5 = vld [vmem:[#allocation2 + $0x30] sm:$0xff]  ;;  %v8909_v58 = vld [vmem:[%s11622_s4] sm:$0xff]  }
 0x112   : > { %1142 = vst [vmem:[#allocation2 + $0x60] sm:$0xfe] %v949_v62  ;;  %v951_v7 = vrot.slane %v820_v63, 7  ;;  %v2456_v8 = vld [vmem:[#allocation2 + $0x38] sm:$0xff]  ;;  %v9413_v9 = vpack.c.bf16 %v946_v43, %v2455_v5 }
 0x113   : > { %1143 = vst [vmem:[#allocation2 + $0x68] sm:$0xfe] %v950_v3  ;;  %v953_v11 = vrot.slane %v821_v4, 7  ;;  %v675_v13 = vpop.f32.mrb[8].mxu0  ;;  %v9416_v2 = vpack.c.bf16 %v948_v48, %v2456_v8  ;;  %v2459_v16 = vld [vmem:[#allocation2 + $0x50] sm:$0x3] }
 0x114   : > { %v952_v18 = vsel %vm942_vm1, %v949_v62, %v951_v7  ;;  %1146 = vst [vmem:[#allocation2 + $0x80] sm:$0x1] %v951_v7  ;;  %v676_v19 = vadd.f32 %v675_v13, %v9385_v12  ;;  %v677_v20 = vpop.f32.mrb[9].mxu0  ;;  %v2460_v21 = vld [vmem:[#allocation2 + $0x58] sm:$0x3]  ;;  %v9424_v22 = vpack.c.bf16 %v2459_v16, %v2459_v16  ;;  %v2616_v23 = vshrl.u32 %v9413_v9, 16 }
 0x115   : > { %1144 = vst [vmem:[#allocation2 + $0x70] sm:$0xff] %v952_v18  ;;  %v954_v25 = vsel %vm942_vm1, %v950_v3, %v953_v11  ;;  %1147 = vst [vmem:[#allocation2 + $0x88] sm:$0x1] %v953_v11  ;;  %v678_v27 = vadd.f32 %v677_v20, %v9390_v14  ;;  %v679_v28 = vpop.f32.mrb[10].mxu0  ;;  %3640 = vmatprep.mubr.bf16.mxu1 %v9416_v2  ;;  %v9433_v30 = vpack.c.bf16 %v2460_v21, %v2460_v21  ;;  %v8900_v8 = vld [vmem:[%s11622_s4 + $0x2d8] sm:$0xff]  }
 0x116   : > { %v2628_v31 = vshrl.u32 %v9416_v2, 16  ;;  %1145 = vst [vmem:[#allocation2 + $0x78] sm:$0xff] %v954_v25  ;;  %v822_v32 = vmax.f32 %v676_v19, 0.0  ;;  %v680_v33 = vadd.f32 %v679_v28, %v9385_v12  ;;  %v681_v34 = vpop.f32.mrb[11].mxu0  ;;  %3641 = vmatmul.mubr.bf16.vlgmr.msra.gmra.mrb[8].mxu1 %v9413_v9  ;;  %v2630_v35 = vshll.u32 %v9416_v2, 16 }
 0x117   : > { %v2618_v36 = vshll.u32 %v9413_v9, 16  ;;  %v823_v37 = vmax.f32 %v678_v27, 0.0  ;;  %v682_v38 = vadd.f32 %v681_v34, %v9390_v14  ;;  %7923 = vmatpush3.bf16.msra.mxu1 %v8893_v15  ;;  %v2635_v39 = vshll.u32 %v9433_v30, 16 }
 0x118   : > { %v2623_v40 = vshll.u32 %v9424_v22, 16  ;;  %v955_v42 = vrot.slane %v822_v32, 7  ;;  %v824_v43 = vmax.f32 %v680_v33, 0.0  ;;  %v2632_v44 = vrot.slane %v2630_v35, 1  ;;  %7924 = vmatprep.subr.bf16.mxu1 %v8896_v24  ;;  %v8911_v32 = vld [vmem:[%s11622_s4 + $0x8] sm:$0xff]  }
 0x119   : > { %v2620_v45 = vrot.slane %v2618_v36, 1  ;;  %v956_v47 = vrot.slane %v823_v37, 7  ;;  %v825_v48 = vmax.f32 %v682_v38, 0.0  ;;  %v2637_v49 = vrot.slane %v2635_v39, 1  ;;  %v2461_v51 = vld [vmem:[#allocation2 + $0x60] sm:$0xff] }
 0x11a   : > { %v2625_v50 = vrot.slane %v2623_v40, 1  ;;  %1148 = vst [vmem:[#allocation2 + $0x90] sm:$0xfe] %v955_v42  ;;  %v957_v52 = vrot.slane %v824_v43, 7  ;;  %v2633_v53 = vor.u32 %v2632_v44, %v2628_v31  ;;  %v2462_v54 = vld [vmem:[#allocation2 + $0x68] sm:$0xff]  ;;  %v9449_v56 = vpack.c.bf16 %v952_v18, %v2461_v51  ;;  %v8901_v31 = vld [vmem:[%s11622_s4 + $0x298] sm:$0xff]  }
 0x11b   : > { %v2621_v55 = vor.u32 %v2620_v45, %v2616_v23  ;;  %1149 = vst [vmem:[#allocation2 + $0x98] sm:$0xfe] %v956_v47  ;;  %v959_v59 = vrot.slane %v825_v48, 7  ;;  %v685_v60 = vpop.f32.mrb[12].mxu0  ;;  %v9457_v61 = vpack.c.bf16 %v954_v25, %v2462_v54  ;;  %v2465_v62 = vld [vmem:[#allocation2 + $0x80] sm:$0x3]  ;;  %7925 = vmatpush3.bf16.msra.mxu1 %v8897_v41 }
 0x11c   : > { %v3098_v63 = vrot.slane %v9416_v2, 1  ;;  %v3099_v0 = vrot.slane %v9433_v30, 1  ;;  %v958_v1 = vsel %vm942_vm1, %v955_v42, %v957_v52  ;;  %1152 = vst [vmem:[#allocation2 + $0xb0] sm:$0x1] %v957_v52  ;;  %v686_v3 = vadd.f32 %v685_v60, %v9385_v12  ;;  %v687_v4 = vpop.f32.mrb[13].mxu0  ;;  %7926 = vmatprep.subr.bf16.mxu1 %v8898_v46  ;;  %v8902_v37 = vld [vmem:[%s11622_s4 + $0x2e0] sm:$0xff]  }
 0x11d   : > { %v2638_v5 = vsel %vm1749_vm2, %v2633_v53, %v2637_v49  ;;  %v2626_v6 = vsel %vm1749_vm2, %v2621_v55, %v2625_v50  ;;  %v2466_v7 = vld [vmem:[#allocation2 + $0x88] sm:$0x3]  ;;  %1150 = vst [vmem:[#allocation2 + $0xa0] sm:$0xff] %v958_v1  ;;  %v960_v11 = vsel %vm942_vm1, %v956_v47, %v959_v59  ;;  %1153 = vst [vmem:[#allocation2 + $0xb8] sm:$0x1] %v959_v59  ;;  %v689_v15 = vpop.f32.mrb[14].mxu0  ;;  %3648 = vmatprep.mubr.bf16.mxu1 %v9457_v61 }
 0x11e   : > { %v688_v13 = vadd.f32 %v687_v4, %v9390_v14  ;;  %3801 = vmatprep.mubr.bf16.mxu0 %v2638_v5  ;;  %v9474_v16 = vpack.c.bf16 %v2466_v7, %v2466_v7  ;;  %v2652_v17 = vshrl.u32 %v9457_v61, 16  ;;  %1151 = vst [vmem:[#allocation2 + $0xa8] sm:$0xff] %v960_v11  ;;  %v826_v18 = vmax.f32 %v686_v3, 0.0  ;;  %v691_v20 = vpop.f32.mrb[15].mxu0  ;;  %3649 = vmatmul.mubr.bf16.gmra.mrb[12].mxu1 %v9449_v56  ;;  %v8913_v48 = vld [vmem:[%s11622_s4 + $0x50] sm:$0xff]   ;;  %v8903_v53 = vld [vmem:[%s11622_s4 + $0x2a0] sm:$0xff]  }
 0x11f   : > { %v690_v19 = vadd.f32 %v689_v15, %v9385_v12  ;;  %3802 = vmatmul.mubr.bf16.vlgmr.msra.gmra.mrb[64].mxu0 %v2626_v6  ;;  %v2654_v21 = vshll.u32 %v9457_v61, 16  ;;  %v9480_v23 = vpack.c.bf16 %v2465_v62, %v2465_v62  ;;  %v692_v25 = vadd.f32 %v691_v20, %v9390_v14  ;;  %7927 = vmatpush3.bf16.msra.mxu1 %v8899_v57  ;;  %v8904_v54 = vld [vmem:[%s11622_s4 + $0x2e8] sm:$0xff]   ;;  %v8915_v30 = vld [vmem:[%s11622_s4 + $0x10] sm:$0xff]   ;;  %v8916_v5 = vld [vmem:[%s11622_s4 + $0x58] sm:$0xff]  }
 0x120   : > { %v827_v24 = vmax.f32 %v688_v13, 0.0  ;;  %v2659_v27 = vshll.u32 %v9474_v16, 16  ;;  %v2640_v28 = vshrl.u32 %v9449_v56, 16  ;;  %8035 = vmatpush3.bf16.msra.mxu0 %v8909_v58  ;;  %v961_v33 = vrot.slane %v826_v18, 7  ;;  %7928 = vmatprep.subr.bf16.mxu1 %v8900_v8 }
 0x121   : > { %v828_v34 = vmax.f32 %v690_v19, 0.0  ;;  %v2656_v35 = vrot.slane %v2654_v21, 1  ;;  %v2642_v36 = vshll.u32 %v9449_v56, 16  ;;  %8036 = vmatprep.subr.bf16.mxu0 %v8910_v10  ;;  %v829_v39 = vmax.f32 %v692_v25, 0.0  ;;  %v2467_v42 = vld [vmem:[#allocation2 + $0x90] sm:$0xff]  ;;  %v8905_v19 = vld [vmem:[%s11622_s4 + $0x2a8] sm:$0xff]  }
 0x122   : > { %v962_v38 = vrot.slane %v827_v24, 7  ;;  %v2661_v40 = vrot.slane %v2659_v27, 1  ;;  %v2647_v41 = vshll.u32 %v9480_v23, 16  ;;  %1154 = vst [vmem:[#allocation2 + $0xc0] sm:$0xfe] %v961_v33  ;;  %v2468_v45 = vld [vmem:[#allocation2 + $0x98] sm:$0xff]  ;;  %v9496_v47 = vpack.c.bf16 %v958_v1, %v2467_v42 }
 0x123   : > { %v963_v43 = vrot.slane %v828_v34, 7  ;;  %v2657_v44 = vor.u32 %v2656_v35, %v2652_v17  ;;  %v2644_v46 = vrot.slane %v2642_v36, 1  ;;  %v965_v49 = vrot.slane %v829_v39, 7  ;;  %v695_v50 = vpop.f32.mrb[16].mxu0  ;;  %7929 = vmatpush3.bf16.msra.mxu1 %v8901_v31  ;;  %v2471_v3 = vld [vmem:[#allocation2 + $0xb0] sm:$0x3] }
 0x124   : > { %1155 = vst [vmem:[#allocation2 + $0xc8] sm:$0xfe] %v962_v38  ;;  %v9501_v51 = vpack.c.bf16 %v960_v11, %v2468_v45  ;;  %v2649_v52 = vrot.slane %v2647_v41, 1  ;;  %8037 = vmatpush3.bf16.msra.mxu0 %v8911_v32  ;;  %v9514_v55 = vsel %vm2230_vm3, %v3098_v63, %v3099_v0  ;;  %v696_v58 = vadd.f32 %v695_v50, %v9385_v12  ;;  %v697_v59 = vpop.f32.mrb[17].mxu0  ;;  %v2472_v1 = vld [vmem:[#allocation2 + $0xb8] sm:$0x3] }
 0x125   : > { %v964_v57 = vsel %vm942_vm1, %v961_v33, %v963_v43  ;;  %1158 = vst [vmem:[#allocation2 + $0xe0] sm:$0x1] %v963_v43  ;;  %v2662_v60 = vsel %vm1749_vm2, %v2657_v44, %v2661_v40  ;;  %v2645_v62 = vor.u32 %v2644_v46, %v2640_v28  ;;  %7930 = vmatprep.subr.bf16.mxu1 %v8902_v37  ;;  %1159 = vst [vmem:[#allocation2 + $0xe8] sm:$0x1] %v965_v49  ;;  %v699_v0 = vpop.f32.mrb[18].mxu0  ;;  %v8906_v27 = vld [vmem:[%s11622_s4 + $0x2f0] sm:$0xff]  }
 0x126   : > { %1156 = vst [vmem:[#allocation2 + $0xd0] sm:$0xff] %v964_v57  ;;  %v966_v2 = vsel %vm942_vm1, %v962_v38, %v965_v49  ;;  %v698_v63 = vadd.f32 %v697_v59, %v9390_v14  ;;  %3809 = vmatprep.mubr.bf16.mxu0 %v2662_v60  ;;  %3656 = vmatprep.mubr.bf16.mxu1 %v9501_v51  ;;  %v830_v6 = vmax.f32 %v696_v58, 0.0  ;;  %v701_v8 = vpop.f32.mrb[19].mxu0  ;;  %v2678_v11 = vshll.u32 %v9501_v51, 16  ;;  %v8917_v28 = vld [vmem:[%s11622_s4 + $0x18] sm:$0xff]   ;;  %v8918_v41 = vld [vmem:[%s11622_s4 + $0x60] sm:$0xff]  }
 0x127   : > { %v9525_v4 = vpack.c.bf16 %v2472_v1, %v2472_v1  ;;  %1157 = vst [vmem:[#allocation2 + $0xd8] sm:$0xff] %v966_v2  ;;  %v700_v7 = vadd.f32 %v699_v0, %v9385_v12  ;;  %v2650_v10 = vsel %vm1749_vm2, %v2645_v62, %v2649_v52  ;;  %3657 = vmatmul.mubr.bf16.gmra.mrb[16].mxu1 %v9496_v47  ;;  %v2676_v24 = vshrl.u32 %v9501_v51, 16  ;;  %v8912_v49 = vld [vmem:[%s11622_s4 + $0x2f8] sm:$0xff]  }
 0x128   : > { %8038 = vmatprep.subr.bf16.mxu0 %v8913_v48  ;;  %v831_v13 = vmax.f32 %v698_v63, 0.0  ;;  %v702_v15 = vadd.f32 %v701_v8, %v9390_v14  ;;  %3810 = vmatmul.mubr.bf16.gmra.mrb[68].mxu0 %v2650_v10  ;;  %v9536_v18 = vpack.c.bf16 %v2471_v3, %v2471_v3  ;;  %v967_v20 = vrot.slane %v830_v6, 7  ;;  %v8907_v48 = vld [vmem:[%s11622_s4 + $0x2b0] sm:$0xff]   ;;  %v8920_v8 = vld [vmem:[%s11622_s4 + $0x68] sm:$0xff]  }
 0x129   : > { %v2683_v17 = vshll.u32 %v9525_v4, 16  ;;  %7931 = vmatpush3.bf16.msra.mxu1 %v8903_v53  ;;  %v832_v21 = vmax.f32 %v700_v7, 0.0  ;;  %v2680_v25 = vrot.slane %v2678_v11, 1  ;;  %8039 = vmatpush3.bf16.msra.mxu0 %v8915_v30  ;;  %v2666_v34 = vshll.u32 %v9496_v47, 16  ;;  %v2473_v35 = vld [vmem:[#allocation2 + $0xc0] sm:$0xff] }
 0x12a   : > { %7932 = vmatprep.subr.bf16.mxu1 %v8904_v54  ;;  %v968_v31 = vrot.slane %v831_v13, 7  ;;  %v833_v32 = vmax.f32 %v702_v15, 0.0  ;;  %8040 = vmatprep.subr.bf16.mxu0 %v8916_v5  ;;  %1160 = vst [vmem:[#allocation2 + $0xf0] sm:$0xfe] %v967_v20  ;;  %v2664_v39 = vshrl.u32 %v9496_v47, 16  ;;  %v2671_v40 = vshll.u32 %v9536_v18, 16 }
 0x12b   : > { %v2685_v33 = vrot.slane %v2683_v17, 1  ;;  %v969_v36 = vrot.slane %v832_v21, 7  ;;  %v2681_v37 = vor.u32 %v2680_v25, %v2676_v24  ;;  %v2474_v38 = vld [vmem:[#allocation2 + $0xc8] sm:$0xff]  ;;  %v705_v43 = vpop.f32.mrb[20].mxu0  ;;  %v2668_v45 = vrot.slane %v2666_v34, 1  ;;  %v8914_v17 = vld [vmem:[%s11622_s4 + $0x2b8] sm:$0xff]  }
 0x12c   : > { %1161 = vst [vmem:[#allocation2 + $0xf8] sm:$0xfe] %v968_v31  ;;  %v971_v42 = vrot.slane %v833_v32, 7  ;;  %v9554_v44 = vpack.c.bf16 %v966_v2, %v2474_v38  ;;  %v9556_v46 = vpack.c.bf16 %v964_v57, %v2473_v35  ;;  %v706_v52 = vadd.f32 %v705_v43, %v9385_v12  ;;  %v707_v53 = vpop.f32.mrb[21].mxu0  ;;  %v2478_v57 = vld [vmem:[#allocation2 + $0xe8] sm:$0x3] }
 0x12d   : > { %7933 = vmatpush3.bf16.msra.mxu1 %v8905_v19  ;;  %v970_v50 = vsel %vm942_vm1, %v967_v20, %v969_v36  ;;  %1164 = vst [vmem:[#allocation2 + $0x110] sm:$0x1] %v969_v36  ;;  %v2686_v54 = vsel %vm1749_vm2, %v2681_v37, %v2685_v33  ;;  %v2673_v58 = vrot.slane %v2671_v40, 1  ;;  %v2477_v59 = vld [vmem:[#allocation2 + $0xe0] sm:$0x3]  ;;  %8041 = vmatpush3.bf16.msra.mxu0 %v8917_v28  ;;  %v709_v1 = vpop.f32.mrb[22].mxu0 }
 0x12e   : > { %7934 = vmatprep.subr.bf16.mxu1 %v8906_v27  ;;  %1162 = vst [vmem:[#allocation2 + $0x100] sm:$0xff] %v970_v50  ;;  %v972_v60 = vsel %vm942_vm1, %v968_v31, %v971_v42  ;;  %1165 = vst [vmem:[#allocation2 + $0x118] sm:$0x1] %v971_v42  ;;  %v708_v62 = vadd.f32 %v707_v53, %v9390_v14  ;;  %3817 = vmatprep.mubr.bf16.mxu0 %v2686_v54  ;;  %v2700_v30 = vshrl.u32 %v9554_v44, 16  ;;  %v8919_v2 = vld [vmem:[%s11622_s4 + $0x20] sm:$0xff]   ;;  %v711_v5 = vpop.f32.mrb[23].mxu0 }
 0x12f   : > { %3664 = vmatprep.mubr.bf16.mxu1 %v9554_v44  ;;  %v2669_v3 = vor.u32 %v2668_v45, %v2664_v39  ;;  %1163 = vst [vmem:[#allocation2 + $0x108] sm:$0xff] %v972_v60  ;;  %v834_v63 = vmax.f32 %v706_v52, 0.0  ;;  %v710_v0 = vadd.f32 %v709_v1, %v9385_v12  ;;  %v9576_v6 = vpack.c.bf16 %v2478_v57, %v2478_v57  ;;  %v8923_v25 = vld [vmem:[%s11622_s4 + $0xc0] sm:$0xff]   ;;  %v8921_v39 = vld [vmem:[%s11622_s4 + $0x28] sm:$0xff]  }
 0x130   : > { %3665 = vmatmul.mubr.bf16.gmra.mrb[20].mxu1 %v9556_v46  ;;  %v2702_v7 = vshll.u32 %v9554_v44, 16  ;;  %8042 = vmatprep.subr.bf16.mxu0 %v8918_v41  ;;  %v835_v10 = vmax.f32 %v708_v62, 0.0  ;;  %v712_v11 = vadd.f32 %v711_v5, %v9390_v14  ;;  %v9584_v15 = vpack.c.bf16 %v2477_v59, %v2477_v59 }
 0x131   : > { %v2674_v13 = vsel %vm1749_vm2, %v2669_v3, %v2673_v58  ;;  %7935 = vmatpush3.bf16.msra.mxu1 %v8907_v48  ;;  %v973_v19 = vrot.slane %v834_v63, 7  ;;  %v836_v20 = vmax.f32 %v710_v0, 0.0  ;;  %v2707_v24 = vshll.u32 %v9576_v6, 16  ;;  %v2479_v33 = vld [vmem:[#allocation2 + $0xf0] sm:$0xff]  ;;  %8043 = vmatpush3.bf16.msra.mxu0 %v8919_v2 }
 0x132   : > { %3818 = vmatmul.mubr.bf16.gmra.mrb[72].mxu0 %v2674_v13  ;;  %v2704_v21 = vrot.slane %v2702_v7, 1  ;;  %7936 = vmatprep.subr.bf16.mxu1 %v8912_v49  ;;  %v974_v27 = vrot.slane %v835_v10, 7  ;;  %v837_v28 = vmax.f32 %v712_v11, 0.0  ;;  %v2688_v31 = vshrl.u32 %v9556_v46, 16  ;;  %v8922_v48 = vld [vmem:[%s11622_s4 + $0x70] sm:$0xff]  }
 0x133   : > { %v2690_v32 = vshll.u32 %v9556_v46, 16  ;;  %1166 = vst [vmem:[#allocation2 + $0x120] sm:$0xfe] %v973_v19  ;;  %v975_v34 = vrot.slane %v836_v20, 7  ;;  %v2709_v36 = vrot.slane %v2707_v24, 1  ;;  %v2480_v37 = vld [vmem:[#allocation2 + $0xf8] sm:$0xff]  ;;  %8044 = vmatprep.subr.bf16.mxu0 %v8920_v8  ;;  %v9601_v45 = vpack.c.bf16 %v970_v50, %v2479_v33 }
 0x134   : > { %v2705_v35 = vor.u32 %v2704_v21, %v2700_v30  ;;  %v2695_v38 = vshll.u32 %v9584_v15, 16  ;;  %1167 = vst [vmem:[#allocation2 + $0x128] sm:$0xfe] %v974_v27  ;;  %v977_v40 = vrot.slane %v837_v28, 7  ;;  %v715_v41 = vpop.f32.mrb[24].mxu0  ;;  %v9599_v42 = vpack.c.bf16 %v972_v60, %v2480_v37  ;;  %v8924_v7 = vld [vmem:[%s11622_s4 + $0x30] sm:$0xff]  }
 0x135   : > { %v2692_v43 = vrot.slane %v2690_v32, 1  ;;  %11706 = vst [vmem:[#allocation3_spill] sm:$0xff] %v9601_v45  ;;  %7937 = vmatpush3.bf16.msra.mxu1 %v8914_v17  ;;  %v976_v49 = vsel %vm942_vm1, %v973_v19, %v975_v34  ;;  %1170 = vst [vmem:[#allocation2 + $0x140] sm:$0x1] %v975_v34  ;;  %v716_v52 = vadd.f32 %v715_v41, %v9385_v12  ;;  %v717_v53 = vpop.f32.mrb[25].mxu0  ;;  %8045 = vmatpush3.bf16.msra.mxu0 %v8921_v39  ;;  %v8926_v17 = vld [vmem:[%s11622_s4 + $0x78] sm:$0xff]  }
 0x136   : > { %v2710_v54 = vsel %vm1749_vm2, %v2705_v35, %v2709_v36  ;;  %v2697_v58 = vrot.slane %v2695_v38, 1  ;;  %v2484_v57 = vld [vmem:[#allocation2 + $0x118] sm:$0x3]  ;;  %v2483_v59 = vld [vmem:[#allocation2 + $0x110] sm:$0x3]  ;;  %8146 = vmatprep.subr.bf16.mxu1 %v8923_v25  ;;  %1168 = vst [vmem:[#allocation2 + $0x130] sm:$0xff] %v976_v49  ;;  %v978_v50 = vsel %vm942_vm1, %v974_v27, %v977_v40  ;;  %v718_v60 = vadd.f32 %v717_v53, %v9390_v14 }
 0x137   : > { %1171 = vst [vmem:[#allocation2 + $0x148] sm:$0x1] %v977_v40  ;;  %v719_v62 = vpop.f32.mrb[26].mxu0  ;;  %3825 = vmatprep.mubr.bf16.mxu0 %v2710_v54  ;;  %3672 = vmatprep.mubr.bf16.mxu1 %v9599_v42  ;;  %v2693_v1 = vor.u32 %v2692_v43, %v2688_v31  ;;  %v2724_v3 = vshrl.u32 %v9599_v42, 16  ;;  %1169 = vst [vmem:[#allocation2 + $0x138] sm:$0xff] %v978_v50  ;;  %v838_v30 = vmax.f32 %v716_v52, 0.0 }
 0x138   : > { %v720_v2 = vadd.f32 %v719_v62, %v9385_v12  ;;  %v721_v63 = vpop.f32.mrb[27].mxu0  ;;  %3673 = vmatmul.mubr.bf16.gmra.mrb[24].mxu1 %v9601_v45  ;;  %v9615_v0 = vpack.c.bf16 %v2484_v57, %v2484_v57  ;;  %v2726_v5 = vshll.u32 %v9599_v42, 16  ;;  %v839_v8 = vmax.f32 %v718_v60, 0.0  ;;  %8046 = vmatprep.subr.bf16.mxu0 %v8922_v48  ;;  %v8927_v38 = vld [vmem:[%s11622_s4 + $0x38] sm:$0xff]  }
 0x139   : > { %v722_v10 = vadd.f32 %v721_v63, %v9390_v14  ;;  %v2698_v11 = vsel %vm1749_vm2, %v2693_v1, %v2697_v58  ;;  %v9623_v13 = vpack.c.bf16 %v2483_v59, %v2483_v59  ;;  %v979_v19 = vrot.slane %v838_v30, 7  ;;  %8047 = vmatpush3.bf16.msra.mxu0 %v8924_v7 }
 0x13a   : > { %v840_v20 = vmax.f32 %v720_v2, 0.0  ;;  %3826 = vmatmul.mubr.bf16.gmra.mrb[76].mxu0 %v2698_v11  ;;  %v2728_v21 = vrot.slane %v2726_v5, 1  ;;  %v2731_v24 = vshll.u32 %v9615_v0, 16  ;;  %v980_v25 = vrot.slane %v839_v8, 7  ;;  %v2485_v32 = vld [vmem:[#allocation2 + $0x120] sm:$0xff]  ;;  %8048 = vmatprep.subr.bf16.mxu0 %v8926_v17 }
 0x13b   : > { %11707 = vst [vmem:[#allocation4_spill] sm:$0xff] %v9623_v13  ;;  %v841_v27 = vmax.f32 %v722_v10, 0.0  ;;  %v2712_v28 = vshrl.u32 %v9601_v45, 16  ;;  %v2714_v31 = vshll.u32 %v9601_v45, 16  ;;  %1172 = vst [vmem:[#allocation2 + $0x150] sm:$0xfe] %v979_v19  ;;  %v9637_v48 = vpack.c.bf16 %v976_v49, %v2485_v32 }
 0x13c   : > { %v981_v33 = vrot.slane %v840_v20, 7  ;;  %v2729_v34 = vor.u32 %v2728_v21, %v2724_v3  ;;  %v2733_v35 = vrot.slane %v2731_v24, 1  ;;  %v2486_v36 = vld [vmem:[#allocation2 + $0x128] sm:$0xff]  ;;  %v2719_v37 = vshll.u32 %v9623_v13, 16  ;;  %1173 = vst [vmem:[#allocation2 + $0x158] sm:$0xfe] %v980_v25 }
 0x13d   : > { %v983_v39 = vrot.slane %v841_v27, 7  ;;  %v725_v40 = vpop.f32.mrb[28].mxu0  ;;  %v9635_v41 = vpack.c.bf16 %v978_v50, %v2486_v36  ;;  %v2716_v43 = vrot.slane %v2714_v31, 1  ;;  %11709 = vst [vmem:[#allocation6_spill] sm:$0xff] %v9637_v48  ;;  %v2489_v60 = vld [vmem:[#allocation2 + $0x140] sm:$0x3]  ;;  %8049 = vmatpush3.bf16.msra.mxu0 %v8927_v38 }
 0x13e   : > { %v982_v52 = vsel %vm942_vm1, %v979_v19, %v981_v33  ;;  %1176 = vst [vmem:[#allocation2 + $0x170] sm:$0x1] %v981_v33  ;;  %v726_v53 = vadd.f32 %v725_v40, %v9385_v12  ;;  %v727_v54 = vpop.f32.mrb[29].mxu0  ;;  %v2734_v58 = vsel %vm1749_vm2, %v2729_v34, %v2733_v35  ;;  %v2721_v57 = vrot.slane %v2719_v37, 1  ;;  %v2490_v59 = vld [vmem:[#allocation2 + $0x148] sm:$0x3] }
 0x13f   : > { %11708 = vst [vmem:[#allocation5_spill] sm:$0xff] %v9635_v41  ;;  %1174 = vst [vmem:[#allocation2 + $0x160] sm:$0xff] %v982_v52  ;;  %v984_v62 = vsel %vm942_vm1, %v980_v25, %v983_v39  ;;  %v728_v50 = vadd.f32 %v727_v54, %v9390_v14  ;;  %v729_v49 = vpop.f32.mrb[30].mxu0  ;;  %3833 = vmatprep.mubr.bf16.mxu0 %v2734_v58  ;;  %3680 = vmatprep.mubr.bf16.mxu1 %v9635_v41  ;;  %v2748_v3 = vshrl.u32 %v9635_v41, 16 }
 0x140   : > { %1177 = vst [vmem:[#allocation2 + $0x178] sm:$0x1] %v983_v39  ;;  %v2717_v1 = vor.u32 %v2716_v43, %v2712_v28  ;;  %1175 = vst [vmem:[#allocation2 + $0x168] sm:$0xff] %v984_v62  ;;  %v842_v30 = vmax.f32 %v726_v53, 0.0  ;;  %v730_v2 = vadd.f32 %v729_v49, %v9385_v12  ;;  %v731_v63 = vpop.f32.mrb[31].mxu0  ;;  %3681 = vmatmul.mubr.bf16.gmra.mrb[28].mxu1 %v9637_v48  ;;  %v2750_v7 = vshll.u32 %v9635_v41, 16 }
 0x141   : > { %v9648_v5 = vpack.c.bf16 %v2490_v59, %v2490_v59  ;;  %v843_v8 = vmax.f32 %v728_v50, 0.0  ;;  %v732_v10 = vadd.f32 %v731_v63, %v9390_v14  ;;  %v9653_v17 = vpack.c.bf16 %v2489_v60, %v2489_v60 }
 0x142   : > { %v2722_v11 = vsel %vm1749_vm2, %v2717_v1, %v2721_v57  ;;  %v985_v19 = vrot.slane %v842_v30, 7  ;;  %v844_v20 = vmax.f32 %v730_v2, 0.0  ;;  %v2752_v21 = vrot.slane %v2750_v7, 1  ;;  %v2491_v32 = vld [vmem:[#allocation2 + $0x150] sm:$0xff] }
 0x143   : > { %11710 = vst [vmem:[#allocation7_spill] sm:$0xff] %v9648_v5  ;;  %11711 = vst [vmem:[#allocation8_spill] sm:$0xff] %v9653_v17  ;;  %3834 = vmatmul.mubr.bf16.gmra.mrb[80].mxu0 %v2722_v11  ;;  %v2755_v24 = vshll.u32 %v9648_v5, 16  ;;  %v986_v25 = vrot.slane %v843_v8, 7  ;;  %v845_v27 = vmax.f32 %v732_v10, 0.0  ;;  %v2736_v28 = vshrl.u32 %v9637_v48, 16 }
 0x144   : > { %v2738_v31 = vshll.u32 %v9637_v48, 16  ;;  %1178 = vst [vmem:[#allocation2 + $0x180] sm:$0xfe] %v985_v19  ;;  %v987_v33 = vrot.slane %v844_v20, 7  ;;  %v2753_v34 = vor.u32 %v2752_v21, %v2748_v3  ;;  %v2492_v36 = vld [vmem:[#allocation2 + $0x158] sm:$0xff]  ;;  %v2743_v37 = vshll.u32 %v9653_v17, 16 }
 0x145   : > { %v2757_v35 = vrot.slane %v2755_v24, 1  ;;  %1179 = vst [vmem:[#allocation2 + $0x188] sm:$0xfe] %v986_v25  ;;  %v989_v38 = vrot.slane %v845_v27, 7  ;;  %v735_v39 = vpop.f32.mrb[32].mxu0  ;;  %v9659_v40 = vpack.c.bf16 %v984_v62, %v2492_v36  ;;  %v9661_v53 = vpack.c.bf16 %v982_v52, %v2491_v32 }
 0x146   : > { %v2740_v43 = vrot.slane %v2738_v31, 1  ;;  %v988_v54 = vsel %vm942_vm1, %v985_v19, %v987_v33  ;;  %1182 = vst [vmem:[#allocation2 + $0x1a0] sm:$0x1] %v987_v33  ;;  %v736_v58 = vadd.f32 %v735_v39, %v9385_v12  ;;  %v737_v57 = vpop.f32.mrb[33].mxu0  ;;  %v2745_v60 = vrot.slane %v2743_v37, 1 }
 0x147   : > { %11712 = vst [vmem:[#allocation9_spill] sm:$0xff] %v9659_v40  ;;  %11713 = vst [vmem:[#allocation10_spill] sm:$0xff] %v9661_v53  ;;  %v2758_v59 = vsel %vm1749_vm2, %v2753_v34, %v2757_v35  ;;  %v2496_v50 = vld [vmem:[#allocation2 + $0x178] sm:$0x3]  ;;  %v2495_v49 = vld [vmem:[#allocation2 + $0x170] sm:$0x3]  ;;  %v990_v1 = vsel %vm942_vm1, %v986_v25, %v989_v38  ;;  %v738_v62 = vadd.f32 %v737_v57, %v9390_v14  ;;  %3688 = vmatprep.mubr.bf16.mxu1 %v9659_v40 }
 0x148   : > { %1180 = vst [vmem:[#allocation2 + $0x190] sm:$0xff] %v988_v54  ;;  %1183 = vst [vmem:[#allocation2 + $0x1a8] sm:$0x1] %v989_v38  ;;  %v739_v3 = vpop.f32.mrb[34].mxu0  ;;  %3841 = vmatprep.mubr.bf16.mxu0 %v2758_v59  ;;  %v2741_v52 = vor.u32 %v2740_v43, %v2736_v28  ;;  %v2772_v30 = vshrl.u32 %v9659_v40, 16  ;;  %v846_v2 = vmax.f32 %v736_v58, 0.0  ;;  %3689 = vmatmul.mubr.bf16.gmra.mrb[32].mxu1 %v9661_v53 }
 0x149   : > { %1181 = vst [vmem:[#allocation2 + $0x198] sm:$0xff] %v990_v1  ;;  %v740_v63 = vadd.f32 %v739_v3, %v9385_v12  ;;  %v741_v7 = vpop.f32.mrb[35].mxu0  ;;  %v9672_v8 = vpack.c.bf16 %v2496_v50, %v2496_v50  ;;  %v2774_v10 = vshll.u32 %v9659_v40, 16  ;;  %v847_v11 = vmax.f32 %v738_v62, 0.0 }
 0x14a   : > { %v742_v19 = vadd.f32 %v741_v7, %v9390_v14  ;;  %v2746_v20 = vsel %vm1749_vm2, %v2741_v52, %v2745_v60  ;;  %v9677_v21 = vpack.c.bf16 %v2495_v49, %v2495_v49  ;;  %v991_v24 = vrot.slane %v846_v2, 7 }
 0x14b   : > { %11714 = vst [vmem:[#allocation11_spill] sm:$0xff] %v9672_v8  ;;  %v848_v25 = vmax.f32 %v740_v63, 0.0  ;;  %3842 = vmatmul.mubr.bf16.gmra.mrb[84].mxu0 %v2746_v20  ;;  %v2776_v27 = vrot.slane %v2774_v10, 1  ;;  %v2779_v28 = vshll.u32 %v9672_v8, 16  ;;  %v992_v31 = vrot.slane %v847_v11, 7  ;;  %v2497_v35 = vld [vmem:[#allocation2 + $0x180] sm:$0xff] }
 0x14c   : > { %11715 = vst [vmem:[#allocation12_spill] sm:$0xff] %v9677_v21  ;;  %v849_v32 = vmax.f32 %v742_v19, 0.0  ;;  %v2760_v33 = vshrl.u32 %v9661_v53, 16  ;;  %v2762_v34 = vshll.u32 %v9661_v53, 16  ;;  %1184 = vst [vmem:[#allocation2 + $0x1b0] sm:$0xfe] %v991_v24  ;;  %v9685_v50 = vpack.c.bf16 %v988_v54, %v2497_v35 }
 0x14d   : > { %v993_v36 = vrot.slane %v848_v25, 7  ;;  %v2777_v37 = vor.u32 %v2776_v27, %v2772_v30  ;;  %v2781_v38 = vrot.slane %v2779_v28, 1  ;;  %v2498_v39 = vld [vmem:[#allocation2 + $0x188] sm:$0xff]  ;;  %v2767_v43 = vshll.u32 %v9677_v21, 16  ;;  %1185 = vst [vmem:[#allocation2 + $0x1b8] sm:$0xfe] %v992_v31 }
 0x14e   : > { %v995_v58 = vrot.slane %v849_v32, 7  ;;  %v745_v57 = vpop.f32.mrb[36].mxu0  ;;  %v9683_v59 = vpack.c.bf16 %v990_v1, %v2498_v39  ;;  %v2764_v60 = vrot.slane %v2762_v34, 1  ;;  %11717 = vst [vmem:[#allocation14_spill] sm:$0xff] %v9685_v50  ;;  %v2501_v63 = vld [vmem:[#allocation2 + $0x1a0] sm:$0x3] }
 0x14f   : > { %v994_v49 = vsel %vm942_vm1, %v991_v24, %v993_v36  ;;  %1188 = vst [vmem:[#allocation2 + $0x1d0] sm:$0x1] %v993_v36  ;;  %v746_v62 = vadd.f32 %v745_v57, %v9385_v12  ;;  %v747_v3 = vpop.f32.mrb[37].mxu0  ;;  %v2782_v52 = vsel %vm1749_vm2, %v2777_v37, %v2781_v38  ;;  %v2769_v30 = vrot.slane %v2767_v43, 1  ;;  %v2502_v2 = vld [vmem:[#allocation2 + $0x1a8] sm:$0x3] }
 0x150   : > { %11716 = vst [vmem:[#allocation13_spill] sm:$0xff] %v9683_v59  ;;  %1186 = vst [vmem:[#allocation2 + $0x1c0] sm:$0xff] %v994_v49  ;;  %v996_v7 = vsel %vm942_vm1, %v992_v31, %v995_v58  ;;  %v748_v1 = vadd.f32 %v747_v3, %v9390_v14  ;;  %v749_v10 = vpop.f32.mrb[38].mxu0  ;;  %3849 = vmatprep.mubr.bf16.mxu0 %v2782_v52  ;;  %3696 = vmatprep.mubr.bf16.mxu1 %v9683_v59  ;;  %v2796_v11 = vshrl.u32 %v9683_v59, 16 }
 0x151   : > { %1189 = vst [vmem:[#allocation2 + $0x1d8] sm:$0x1] %v995_v58  ;;  %v2765_v54 = vor.u32 %v2764_v60, %v2760_v33  ;;  %1187 = vst [vmem:[#allocation2 + $0x1c8] sm:$0xff] %v996_v7  ;;  %v850_v19 = vmax.f32 %v746_v62, 0.0  ;;  %v750_v20 = vadd.f32 %v749_v10, %v9385_v12  ;;  %v751_v24 = vpop.f32.mrb[39].mxu0  ;;  %3697 = vmatmul.mubr.bf16.gmra.mrb[36].mxu1 %v9685_v50  ;;  %v2798_v27 = vshll.u32 %v9683_v59, 16 }
 0x152   : > { %v9696_v25 = vpack.c.bf16 %v2502_v2, %v2502_v2  ;;  %v851_v28 = vmax.f32 %v748_v1, 0.0  ;;  %v752_v31 = vadd.f32 %v751_v24, %v9390_v14  ;;  %v9701_v34 = vpack.c.bf16 %v2501_v63, %v2501_v63 }
 0x153   : > { %v2770_v32 = vsel %vm1749_vm2, %v2765_v54, %v2769_v30  ;;  %v997_v33 = vrot.slane %v850_v19, 7  ;;  %v852_v35 = vmax.f32 %v750_v20, 0.0  ;;  %v2800_v36 = vrot.slane %v2798_v27, 1  ;;  %v2503_v57 = vld [vmem:[#allocation2 + $0x1b0] sm:$0xff]  ;;  %v755_v63 = vpop.f32.mrb[40].mxu0 }
 0x154   : > { %11718 = vst [vmem:[#allocation15_spill] sm:$0xff] %v9696_v25  ;;  %11719 = vst [vmem:[#allocation16_spill] sm:$0xff] %v9701_v34  ;;  %3850 = vmatmul.mubr.bf16.gmra.mrb[88].mxu0 %v2770_v32  ;;  %v2803_v37 = vshll.u32 %v9696_v25, 16  ;;  %v998_v38 = vrot.slane %v851_v28, 7  ;;  %v853_v39 = vmax.f32 %v752_v31, 0.0  ;;  %v2784_v43 = vshrl.u32 %v9685_v50, 16 }
 0x155   : > { %v2786_v58 = vshll.u32 %v9685_v50, 16  ;;  %1190 = vst [vmem:[#allocation2 + $0x1e0] sm:$0xfe] %v997_v33  ;;  %v999_v60 = vrot.slane %v852_v35, 7  ;;  %v2801_v62 = vor.u32 %v2800_v36, %v2796_v11  ;;  %v2504_v52 = vld [vmem:[#allocation2 + $0x1b8] sm:$0xff]  ;;  %v2791_v30 = vshll.u32 %v9701_v34, 16 }
 0x156   : > { %v2805_v3 = vrot.slane %v2803_v37, 1  ;;  %1191 = vst [vmem:[#allocation2 + $0x1e8] sm:$0xfe] %v998_v38  ;;  %v1001_v2 = vrot.slane %v853_v39, 7  ;;  %v9707_v1 = vpack.c.bf16 %v996_v7, %v2504_v52  ;;  %v9709_v54 = vpack.c.bf16 %v994_v49, %v2503_v57  ;;  %v757_v24 = vpop.f32.mrb[41].mxu0 }
 0x157   : > { %v2788_v10 = vrot.slane %v2786_v58, 1  ;;  %v1000_v19 = vsel %vm942_vm1, %v997_v33, %v999_v60  ;;  %1194 = vst [vmem:[#allocation2 + $0x200] sm:$0x1] %v999_v60  ;;  %v756_v20 = vadd.f32 %v755_v63, %v9385_v12  ;;  %v2793_v27 = vrot.slane %v2791_v30, 1  ;;  %v2507_v31 = vld [vmem:[#allocation2 + $0x1d0] sm:$0x3] }
 0x158   : > { %11720 = vst [vmem:[#allocation17_spill] sm:$0xff] %v9707_v1  ;;  %11721 = vst [vmem:[#allocation18_spill] sm:$0xff] %v9709_v54  ;;  %v2806_v11 = vsel %vm1749_vm2, %v2801_v62, %v2805_v3  ;;  %v2508_v28 = vld [vmem:[#allocation2 + $0x1d8] sm:$0x3]  ;;  %v1002_v32 = vsel %vm942_vm1, %v998_v38, %v1001_v2  ;;  %v758_v7 = vadd.f32 %v757_v24, %v9390_v14  ;;  %v759_v35 = vpop.f32.mrb[42].mxu0  ;;  %3704 = vmatprep.mubr.bf16.mxu1 %v9707_v1 }
 0x159   : > { %1192 = vst [vmem:[#allocation2 + $0x1f0] sm:$0xff] %v1000_v19  ;;  %1195 = vst [vmem:[#allocation2 + $0x208] sm:$0x1] %v1001_v2  ;;  %3857 = vmatprep.mubr.bf16.mxu0 %v2806_v11  ;;  %v2789_v49 = vor.u32 %v2788_v10, %v2784_v43  ;;  %v2820_v33 = vshrl.u32 %v9707_v1, 16  ;;  %v854_v36 = vmax.f32 %v756_v20, 0.0  ;;  %v760_v37 = vadd.f32 %v759_v35, %v9385_v12  ;;  %v761_v39 = vpop.f32.mrb[43].mxu0 }
 0x15a   : > { %1193 = vst [vmem:[#allocation2 + $0x1f8] sm:$0xff] %v1002_v32  ;;  %3705 = vmatmul.mubr.bf16.gmra.mrb[40].mxu1 %v9709_v54  ;;  %v9720_v58 = vpack.c.bf16 %v2508_v28, %v2508_v28  ;;  %v2822_v38 = vshll.u32 %v9707_v1, 16  ;;  %v855_v57 = vmax.f32 %v758_v7, 0.0  ;;  %v762_v60 = vadd.f32 %v761_v39, %v9390_v14 }
 0x15b   : > { %v2794_v62 = vsel %vm1749_vm2, %v2789_v49, %v2793_v27  ;;  %v9725_v3 = vpack.c.bf16 %v2507_v31, %v2507_v31  ;;  %v1003_v43 = vrot.slane %v854_v36, 7  ;;  %v856_v52 = vmax.f32 %v760_v37, 0.0  ;;  %v765_v36 = vpop.f32.mrb[44].mxu0 }
 0x15c   : > { %11722 = vst [vmem:[#allocation19_spill] sm:$0xff] %v9720_v58  ;;  %3858 = vmatmul.mubr.bf16.gmra.mrb[92].mxu0 %v2794_v62  ;;  %v2824_v30 = vrot.slane %v2822_v38, 1  ;;  %v2827_v2 = vshll.u32 %v9720_v58, 16  ;;  %v1004_v63 = vrot.slane %v855_v57, 7  ;;  %v857_v10 = vmax.f32 %v762_v60, 0.0  ;;  %v2509_v11 = vld [vmem:[#allocation2 + $0x1e0] sm:$0xff] }
 0x15d   : > { %11723 = vst [vmem:[#allocation20_spill] sm:$0xff] %v9725_v3  ;;  %v2808_v20 = vshrl.u32 %v9709_v54, 16  ;;  %v2810_v24 = vshll.u32 %v9709_v54, 16  ;;  %1196 = vst [vmem:[#allocation2 + $0x210] sm:$0xfe] %v1003_v43  ;;  %v1005_v28 = vrot.slane %v856_v52, 7  ;;  %v9733_v38 = vpack.c.bf16 %v1000_v19, %v2509_v11 }
 0x15e   : > { %v2825_v7 = vor.u32 %v2824_v30, %v2820_v33  ;;  %v2829_v35 = vrot.slane %v2827_v2, 1  ;;  %v2510_v27 = vld [vmem:[#allocation2 + $0x1e8] sm:$0xff]  ;;  %v2815_v31 = vshll.u32 %v9725_v3, 16  ;;  %1197 = vst [vmem:[#allocation2 + $0x218] sm:$0xfe] %v1004_v63  ;;  %v1007_v49 = vrot.slane %v857_v10, 7 }
 0x15f   : > { %v9731_v37 = vpack.c.bf16 %v1002_v32, %v2510_v27  ;;  %v2812_v39 = vrot.slane %v2810_v24, 1  ;;  %11725 = vst [vmem:[#allocation22_spill] sm:$0xff] %v9733_v38  ;;  %v2513_v57 = vld [vmem:[#allocation2 + $0x200] sm:$0x3]  ;;  %v9735_v60 = vpop.f32.mrb[4].mxu1  ;;  %v1006_v62 = vsel %vm942_vm1, %v1003_v43, %v1005_v28  ;;  %v766_v33 = vadd.f32 %v765_v36, %v9385_v12  ;;  %v767_v52 = vpop.f32.mrb[45].mxu0 }
 0x160   : > { %1200 = vst [vmem:[#allocation2 + $0x230] sm:$0x1] %v1005_v28  ;;  %v2830_v30 = vsel %vm1749_vm2, %v2825_v7, %v2829_v35  ;;  %v2817_v2 = vrot.slane %v2815_v31, 1  ;;  %v2514_v54 = vld [vmem:[#allocation2 + $0x208] sm:$0x3]  ;;  %v9740_v10 = vpop.f32.mrb[5].mxu1  ;;  %v1008_v32 = vsel %vm942_vm1, %v1004_v63, %v1007_v49  ;;  %v768_v19 = vadd.f32 %v767_v52, %v9390_v14 }
 0x161   : > { %11724 = vst [vmem:[#allocation21_spill] sm:$0xff] %v9731_v37  ;;  %1198 = vst [vmem:[#allocation2 + $0x220] sm:$0xff] %v1006_v62  ;;  %v769_v24 = vpop.f32.mrb[46].mxu0  ;;  %3865 = vmatprep.mubr.bf16.mxu0 %v2830_v30  ;;  %3712 = vmatprep.mubr.bf16.mxu1 %v9731_v37  ;;  %v2813_v43 = vor.u32 %v2812_v39, %v2808_v20  ;;  %v2844_v11 = vshrl.u32 %v9731_v37, 16  ;;  %v9746_v28 = vpop.f32.mrb[6].mxu1  ;;  %v858_v7 = vmax.f32 %v766_v33, 0.0 }
 0x162   : > { %1201 = vst [vmem:[#allocation2 + $0x238] sm:$0x1] %v1007_v49  ;;  %1199 = vst [vmem:[#allocation2 + $0x228] sm:$0xff] %v1008_v32  ;;  %v770_v35 = vadd.f32 %v769_v24, %v9385_v12  ;;  %v771_v27 = vpop.f32.mrb[47].mxu0  ;;  %3713 = vmatmul.mubr.bf16.gmra.mrb[44].mxu1 %v9733_v38  ;;  %v9750_v63 = vpack.c.bf16 %v2514_v54, %v2514_v54  ;;  %v2846_v31 = vshll.u32 %v9731_v37, 16  ;;  %v859_v49 = vmax.f32 %v768_v19, 0.0 }
 0x163   : > { %v772_v36 = vadd.f32 %v771_v27, %v9390_v14  ;;  %v2818_v20 = vsel %vm1749_vm2, %v2813_v43, %v2817_v2  ;;  %v9755_v39 = vpack.c.bf16 %v2513_v57, %v2513_v57  ;;  %v1009_v52 = vrot.slane %v858_v7, 7  ;;  %v9758_v3 = vpop.f32.mrb[7].mxu1 }
 0x164   : > { %11726 = vst [vmem:[#allocation23_spill] sm:$0xff] %v9750_v63  ;;  %v860_v30 = vmax.f32 %v770_v35, 0.0  ;;  %3866 = vmatmul.mubr.bf16.gmra.mrb[96].mxu0 %v2818_v20  ;;  %v2848_v33 = vrot.slane %v2846_v31, 1  ;;  %v2851_v24 = vshll.u32 %v9750_v63, 16  ;;  %v1010_v1 = vrot.slane %v859_v49, 7  ;;  %v2515_v37 = vld [vmem:[#allocation2 + $0x210] sm:$0xff] }
 0x165   : > { %11727 = vst [vmem:[#allocation24_spill] sm:$0xff] %v9755_v39  ;;  %v861_v54 = vmax.f32 %v772_v36, 0.0  ;;  %v2832_v50 = vshrl.u32 %v9733_v38, 16  ;;  %v2834_v19 = vshll.u32 %v9733_v38, 16  ;;  %1202 = vst [vmem:[#allocation2 + $0x240] sm:$0xfe] %v1009_v52  ;;  %v9765_v49 = vpack.c.bf16 %v1006_v62, %v2515_v37 }
 0x166   : > { %v1011_v27 = vrot.slane %v860_v30, 7  ;;  %v2849_v2 = vor.u32 %v2848_v33, %v2844_v11  ;;  %v2853_v57 = vrot.slane %v2851_v24, 1  ;;  %v2516_v43 = vld [vmem:[#allocation2 + $0x218] sm:$0xff]  ;;  %v2839_v7 = vshll.u32 %v9755_v39, 16  ;;  %1203 = vst [vmem:[#allocation2 + $0x248] sm:$0xfe] %v1010_v1 }
 0x167   : > { %v1013_v35 = vrot.slane %v861_v54, 7  ;;  %v775_v31 = vpop.f32.mrb[48].mxu0  ;;  %v9763_v20 = vpack.c.bf16 %v1008_v32, %v2516_v43  ;;  %v2836_v63 = vrot.slane %v2834_v19, 1  ;;  %v2519_v24 = vld [vmem:[#allocation2 + $0x230] sm:$0x3]  ;;  %v2858_v39 = vshll.u32 %v9765_v49, 16 }
 0x168   : > { %v1012_v36 = vsel %vm942_vm1, %v1009_v52, %v1011_v27  ;;  %1206 = vst [vmem:[#allocation2 + $0x260] sm:$0x1] %v1011_v27  ;;  %v776_v38 = vadd.f32 %v775_v31, %v9385_v12  ;;  %v777_v58 = vpop.f32.mrb[49].mxu0  ;;  %v2854_v11 = vsel %vm1749_vm2, %v2849_v2, %v2853_v57  ;;  %v2841_v30 = vrot.slane %v2839_v7, 1 }
 0x169   : > { %v2520_v33 = vld [vmem:[#allocation2 + $0x238] sm:$0x3]  ;;  %1204 = vst [vmem:[#allocation2 + $0x250] sm:$0xff] %v1012_v36  ;;  %v1014_v54 = vsel %vm942_vm1, %v1010_v1, %v1013_v35  ;;  %1207 = vst [vmem:[#allocation2 + $0x268] sm:$0x1] %v1013_v35  ;;  %v778_v32 = vadd.f32 %v777_v58, %v9390_v14  ;;  %v779_v19 = vpop.f32.mrb[50].mxu0  ;;  %3873 = vmatprep.mubr.bf16.mxu0 %v2854_v11  ;;  %3720 = vmatprep.mubr.bf16.mxu1 %v9763_v20 }
 0x16a   : > { %v2837_v37 = vor.u32 %v2836_v63, %v2832_v50  ;;  %v2868_v62 = vshrl.u32 %v9763_v20, 16  ;;  %1205 = vst [vmem:[#allocation2 + $0x258] sm:$0xff] %v1014_v54  ;;  %v862_v52 = vmax.f32 %v776_v38, 0.0  ;;  %v780_v27 = vadd.f32 %v779_v19, %v9385_v12  ;;  %v781_v2 = vpop.f32.mrb[51].mxu0  ;;  %3721 = vmatmul.mubr.bf16.gmra.mrb[48].mxu1 %v9765_v49 }
 0x16b   : > { %v9776_v57 = vpack.c.bf16 %v2520_v33, %v2520_v33  ;;  %v2870_v1 = vshll.u32 %v9763_v20, 16  ;;  %v863_v43 = vmax.f32 %v778_v32, 0.0  ;;  %v782_v58 = vadd.f32 %v781_v2, %v9390_v14 }
 0x16c   : > { %v2842_v7 = vsel %vm1749_vm2, %v2837_v37, %v2841_v30  ;;  %v9781_v35 = vpack.c.bf16 %v2519_v24, %v2519_v24  ;;  %v1015_v50 = vrot.slane %v862_v52, 7  ;;  %v864_v63 = vmax.f32 %v780_v27, 0.0  ;;  %v2521_v34 = vld [vmem:[#allocation2 + $0x240] sm:$0xff]  ;;  %v785_v52 = vpop.f32.mrb[52].mxu0 }
 0x16d   : > { %3874 = vmatmul.mubr.bf16.gmra.mrb[100].mxu0 %v2842_v7  ;;  %v2872_v38 = vrot.slane %v2870_v1, 1  ;;  %v2875_v31 = vshll.u32 %v9776_v57, 16  ;;  %v1016_v11 = vrot.slane %v863_v43, 7  ;;  %v865_v19 = vmax.f32 %v782_v58, 0.0  ;;  %v2522_v30 = vld [vmem:[#allocation2 + $0x248] sm:$0xff]  ;;  %v787_v53 = vpop.f32.mrb[53].mxu0 }
 0x16e   : > { %v2856_v33 = vshrl.u32 %v9765_v49, 16  ;;  %1208 = vst [vmem:[#allocation2 + $0x270] sm:$0xfe] %v1015_v50  ;;  %v1017_v32 = vrot.slane %v864_v63, 7  ;;  %v2863_v24 = vshll.u32 %v9781_v35, 16  ;;  %v9787_v27 = vpack.c.bf16 %v1014_v54, %v2522_v30 }
 0x16f   : > { %v2873_v2 = vor.u32 %v2872_v38, %v2868_v62  ;;  %v2877_v59 = vrot.slane %v2875_v31, 1  ;;  %1209 = vst [vmem:[#allocation2 + $0x278] sm:$0xfe] %v1016_v11  ;;  %v1019_v37 = vrot.slane %v865_v19, 7  ;;  %v2860_v1 = vrot.slane %v2858_v39, 1  ;;  %v789_v39 = vpop.f32.mrb[54].mxu0 }
 0x170   : > { %v9789_v43 = vpack.c.bf16 %v1012_v36, %v2521_v34  ;;  %v1018_v58 = vsel %vm942_vm1, %v1015_v50, %v1017_v32  ;;  %1212 = vst [vmem:[#allocation2 + $0x290] sm:$0x1] %v1017_v32  ;;  %v786_v7 = vadd.f32 %v785_v52, %v9385_v12  ;;  %v2865_v63 = vrot.slane %v2863_v24, 1  ;;  %v2526_v38 = vld [vmem:[#allocation2 + $0x268] sm:$0x3]  ;;  %3728 = vmatprep.mubr.bf16.mxu1 %v9787_v27  ;;  %v791_v32 = vpop.f32.mrb[55].mxu0 }
 0x171   : > { %v2878_v62 = vsel %vm1749_vm2, %v2873_v2, %v2877_v59  ;;  %v2525_v31 = vld [vmem:[#allocation2 + $0x260] sm:$0x3]  ;;  %1210 = vst [vmem:[#allocation2 + $0x280] sm:$0xff] %v1018_v58  ;;  %v1020_v19 = vsel %vm942_vm1, %v1016_v11, %v1019_v37  ;;  %1213 = vst [vmem:[#allocation2 + $0x298] sm:$0x1] %v1019_v37  ;;  %v788_v54 = vadd.f32 %v787_v53, %v9390_v14  ;;  %v2892_v36 = vshrl.u32 %v9787_v27, 16 }
 0x172   : > { %3881 = vmatprep.mubr.bf16.mxu0 %v2878_v62  ;;  %v2861_v34 = vor.u32 %v2860_v1, %v2856_v33  ;;  %1211 = vst [vmem:[#allocation2 + $0x288] sm:$0xff] %v1020_v19  ;;  %v866_v50 = vmax.f32 %v786_v7, 0.0  ;;  %v790_v59 = vadd.f32 %v789_v39, %v9385_v12  ;;  %3729 = vmatmul.mubr.bf16.gmra.mrb[52].mxu1 %v9789_v43  ;;  %v2894_v11 = vshll.u32 %v9787_v27, 16 }
 0x173   : > { %v9800_v2 = vpack.c.bf16 %v2526_v38, %v2526_v38  ;;  %v867_v30 = vmax.f32 %v788_v54, 0.0  ;;  %v792_v53 = vadd.f32 %v791_v32, %v9390_v14  ;;  %v9805_v37 = vpack.c.bf16 %v2525_v31, %v2525_v31 }
 0x174   : > { %v2866_v24 = vsel %vm1749_vm2, %v2861_v34, %v2865_v63  ;;  %v1021_v33 = vrot.slane %v866_v50, 7  ;;  %v868_v52 = vmax.f32 %v790_v59, 0.0  ;;  %v2896_v1 = vrot.slane %v2894_v11, 1  ;;  %v795_v50 = vpop.f32.mrb[56].mxu0 }
 0x175   : > { %3882 = vmatmul.mubr.bf16.gmra.mrb[104].mxu0 %v2866_v24  ;;  %v2899_v7 = vshll.u32 %v9800_v2, 16  ;;  %v1022_v62 = vrot.slane %v867_v30, 7  ;;  %v869_v39 = vmax.f32 %v792_v53, 0.0  ;;  %v2880_v38 = vshrl.u32 %v9789_v43, 16  ;;  %v2527_v21 = vld [vmem:[#allocation2 + $0x270] sm:$0xff]  ;;  %v797_v48 = vpop.f32.mrb[57].mxu0 }
 0x176   : > { %v2882_v25 = vshll.u32 %v9789_v43, 16  ;;  %1214 = vst [vmem:[#allocation2 + $0x2a0] sm:$0xfe] %v1021_v33  ;;  %v1023_v54 = vrot.slane %v868_v52, 7  ;;  %v2897_v32 = vor.u32 %v2896_v1, %v2892_v36  ;;  %v2528_v63 = vld [vmem:[#allocation2 + $0x278] sm:$0xff]  ;;  %v2887_v31 = vshll.u32 %v9805_v37, 16 }
 0x177   : > { %v2901_v40 = vrot.slane %v2899_v7, 1  ;;  %1215 = vst [vmem:[#allocation2 + $0x2a8] sm:$0xfe] %v1022_v62  ;;  %v1025_v34 = vrot.slane %v869_v39, 7  ;;  %v9811_v59 = vpack.c.bf16 %v1020_v19, %v2528_v63  ;;  %v9813_v30 = vpack.c.bf16 %v1018_v58, %v2527_v21  ;;  %v2531_v7 = vld [vmem:[#allocation2 + $0x290] sm:$0x3] }
 0x178   : > { %v2884_v11 = vrot.slane %v2882_v25, 1  ;;  %v1024_v53 = vsel %vm942_vm1, %v1021_v33, %v1023_v54  ;;  %1218 = vst [vmem:[#allocation2 + $0x2c0] sm:$0x1] %v1023_v54  ;;  %v796_v24 = vadd.f32 %v795_v50, %v9385_v12  ;;  %v2889_v52 = vrot.slane %v2887_v31, 1  ;;  %v2532_v1 = vld [vmem:[#allocation2 + $0x298] sm:$0x3] }
 0x179   : > { %v2902_v36 = vsel %vm1749_vm2, %v2897_v32, %v2901_v40  ;;  %1216 = vst [vmem:[#allocation2 + $0x2b0] sm:$0xff] %v1024_v53  ;;  %v1026_v39 = vsel %vm942_vm1, %v1022_v62, %v1025_v34  ;;  %1219 = vst [vmem:[#allocation2 + $0x2c8] sm:$0x1] %v1025_v34  ;;  %v798_v19 = vadd.f32 %v797_v48, %v9390_v14  ;;  %v799_v25 = vpop.f32.mrb[58].mxu0  ;;  %3736 = vmatprep.mubr.bf16.mxu1 %v9811_v59 }
 0x17a   : > { %3889 = vmatprep.mubr.bf16.mxu0 %v2902_v36  ;;  %v2885_v21 = vor.u32 %v2884_v11, %v2880_v38  ;;  %v2916_v58 = vshrl.u32 %v9811_v59, 16  ;;  %1217 = vst [vmem:[#allocation2 + $0x2b8] sm:$0xff] %v1026_v39  ;;  %v870_v33 = vmax.f32 %v796_v24, 0.0  ;;  %v800_v40 = vadd.f32 %v799_v25, %v9385_v12  ;;  %v801_v54 = vpop.f32.mrb[59].mxu0  ;;  %3737 = vmatmul.mubr.bf16.gmra.mrb[56].mxu1 %v9813_v30 }
 0x17b   : > { %v9824_v32 = vpack.c.bf16 %v2532_v1, %v2532_v1  ;;  %v2918_v62 = vshll.u32 %v9811_v59, 16  ;;  %v871_v63 = vmax.f32 %v798_v19, 0.0  ;;  %v802_v48 = vadd.f32 %v801_v54, %v9390_v14 }
 0x17c   : > { %v2890_v31 = vsel %vm1749_vm2, %v2885_v21, %v2889_v52  ;;  %v9829_v34 = vpack.c.bf16 %v2531_v7, %v2531_v7  ;;  %v1027_v38 = vrot.slane %v870_v33, 7  ;;  %v872_v50 = vmax.f32 %v800_v40, 0.0  ;;  %v805_v33 = vpop.f32.mrb[60].mxu0 }
 0x17d   : > { %3890 = vmatmul.mubr.bf16.gmra.mrb[108].mxu0 %v2890_v31  ;;  %v2920_v11 = vrot.slane %v2918_v62, 1  ;;  %v2923_v24 = vshll.u32 %v9824_v32, 16  ;;  %v1028_v36 = vrot.slane %v871_v63, 7  ;;  %v873_v25 = vmax.f32 %v802_v48, 0.0  ;;  %v2533_v17 = vld [vmem:[#allocation2 + $0x2a0] sm:$0xff]  ;;  %v807_v45 = vpop.f32.mrb[61].mxu0 }
 0x17e   : > { %v2904_v1 = vshrl.u32 %v9813_v30, 16  ;;  %v2906_v8 = vshll.u32 %v9813_v30, 16  ;;  %1220 = vst [vmem:[#allocation2 + $0x2d0] sm:$0xfe] %v1027_v38  ;;  %v1029_v19 = vrot.slane %v872_v50, 7  ;;  %v2534_v52 = vld [vmem:[#allocation2 + $0x2a8] sm:$0xff]  ;;  %v9837_v63 = vpack.c.bf16 %v1024_v53, %v2533_v17 }
 0x17f   : > { %v2921_v54 = vor.u32 %v2920_v11, %v2916_v58  ;;  %v2925_v41 = vrot.slane %v2923_v24, 1  ;;  %v2911_v7 = vshll.u32 %v9829_v34, 16  ;;  %1221 = vst [vmem:[#allocation2 + $0x2d8] sm:$0xfe] %v1028_v36  ;;  %v1031_v21 = vrot.slane %v873_v25, 7 }
 0x180   : > { %v9835_v40 = vpack.c.bf16 %v1026_v39, %v2534_v52  ;;  %v2908_v62 = vrot.slane %v2906_v8, 1  ;;  %v1030_v48 = vsel %vm942_vm1, %v1027_v38, %v1029_v19  ;;  %1224 = vst [vmem:[#allocation2 + $0x2f0] sm:$0x1] %v1029_v19  ;;  %v806_v31 = vadd.f32 %v805_v33, %v9385_v12  ;;  %v2538_v11 = vld [vmem:[#allocation2 + $0x2c8] sm:$0x3]  ;;  %v809_v8 = vpop.f32.mrb[62].mxu0 }
 0x181   : > { %v2926_v58 = vsel %vm1749_vm2, %v2921_v54, %v2925_v41  ;;  %v2913_v50 = vrot.slane %v2911_v7, 1  ;;  %v2537_v24 = vld [vmem:[#allocation2 + $0x2c0] sm:$0x3]  ;;  %1222 = vst [vmem:[#allocation2 + $0x2e0] sm:$0xff] %v1030_v48  ;;  %v1032_v25 = vsel %vm942_vm1, %v1028_v36, %v1031_v21  ;;  %1225 = vst [vmem:[#allocation2 + $0x2f8] sm:$0x1] %v1031_v21  ;;  %v808_v39 = vadd.f32 %v807_v45, %v9390_v14 }
 0x182   : > { %3897 = vmatprep.mubr.bf16.mxu0 %v2926_v58  ;;  %3744 = vmatprep.mubr.bf16.mxu1 %v9835_v40  ;;  %v2909_v17 = vor.u32 %v2908_v62, %v2904_v1  ;;  %v2940_v53 = vshrl.u32 %v9835_v40, 16  ;;  %1223 = vst [vmem:[#allocation2 + $0x2e8] sm:$0xff] %v1032_v25  ;;  %v874_v38 = vmax.f32 %v806_v31, 0.0  ;;  %v810_v41 = vadd.f32 %v809_v8, %v9385_v12  ;;  %v811_v19 = vpop.f32.mrb[63].mxu0  ;;  %v8940_v31 = vld [vmem:[%s11622_s4 + $0x140] sm:$0xff]  }
 0x183   : > { %3745 = vmatmul.mubr.bf16.gmra.mrb[60].mxu1 %v9837_v63  ;;  %v9848_v54 = vpack.c.bf16 %v2538_v11, %v2538_v11  ;;  %v2942_v36 = vshll.u32 %v9835_v40, 16  ;;  %v875_v52 = vmax.f32 %v808_v39, 0.0  ;;  %v812_v45 = vadd.f32 %v811_v19, %v9390_v14  ;;  %8258 = vmatprep.subr.bf16.mxu0 %v8940_v31 }
 0x184   : > { %v2914_v7 = vsel %vm1749_vm2, %v2909_v17, %v2913_v50  ;;  %v9853_v21 = vpack.c.bf16 %v2537_v24, %v2537_v24  ;;  %v1033_v1 = vrot.slane %v874_v38, 7  ;;  %v876_v33 = vmax.f32 %v810_v41, 0.0 }
 0x185   : > { %3898 = vmatmul.mubr.bf16.gmra.mrb[112].mxu0 %v2914_v7  ;;  %v2944_v62 = vrot.slane %v2942_v36, 1  ;;  %v2947_v12 = vshll.u32 %v9848_v54, 16  ;;  %v1034_v58 = vrot.slane %v875_v52, 7  ;;  %v877_v11 = vmax.f32 %v812_v45, 0.0  ;;  %v2539_v8 = vld [vmem:[#allocation2 + $0x2d0] sm:$0xff] }
 0x186   : > { %v2928_v39 = vshrl.u32 %v9837_v63, 16  ;;  %v2930_v14 = vshll.u32 %v9837_v63, 16  ;;  %1226 = vst [vmem:[#allocation2 + $0x300] sm:$0xfe] %v1033_v1  ;;  %v1035_v50 = vrot.slane %v876_v33, 7  ;;  %v2540_v38 = vld [vmem:[#allocation2 + $0x2d8] sm:$0xff]  ;;  %v9864_v52 = vpack.c.bf16 %v1030_v48, %v2539_v8 }
 0x187   : > { %v2945_v24 = vor.u32 %v2944_v62, %v2940_v53  ;;  %v2949_v17 = vrot.slane %v2947_v12, 1  ;;  %v2935_v41 = vshll.u32 %v9853_v21, 16  ;;  %1227 = vst [vmem:[#allocation2 + $0x308] sm:$0xfe] %v1034_v58  ;;  %v1037_v19 = vrot.slane %v877_v11, 7 }
 0x188   : > { %v9862_v36 = vpack.c.bf16 %v1032_v25, %v2540_v38  ;;  %v2932_v7 = vrot.slane %v2930_v14, 1  ;;  %v2543_v45 = vld [vmem:[#allocation2 + $0x2f0] sm:$0x3]  ;;  %v1036_v5 = vsel %vm942_vm1, %v1033_v1, %v1035_v50  ;;  %1230 = vst [vmem:[#allocation2 + $0x320] sm:$0x1] %v1035_v50  ;;  %v2954_v31 = vshll.u32 %v9864_v52, 16 }
 0x189   : > { %v2950_v13 = vsel %vm1749_vm2, %v2945_v24, %v2949_v17  ;;  %v2937_v33 = vrot.slane %v2935_v41, 1  ;;  %v2544_v53 = vld [vmem:[#allocation2 + $0x2f8] sm:$0x3]  ;;  %v9868_v62 = vpack.c.bf16 %v2543_v45, %v2543_v45  ;;  %1228 = vst [vmem:[#allocation2 + $0x310] sm:$0xff] %v1036_v5  ;;  %v1038_v12 = vsel %vm942_vm1, %v1034_v58, %v1037_v19  ;;  %1231 = vst [vmem:[#allocation2 + $0x328] sm:$0x1] %v1037_v19 }
 0x18a   : > { %3905 = vmatprep.mubr.bf16.mxu0 %v2950_v13  ;;  %3752 = vmatprep.mubr.bf16.mxu1 %v9862_v36  ;;  %v2933_v25 = vor.u32 %v2932_v7, %v2928_v39  ;;  %v9872_v48 = vpack.c.bf16 %v2544_v53, %v2544_v53  ;;  %1229 = vst [vmem:[#allocation2 + $0x318] sm:$0xff] %v1038_v12  ;;  %v2966_v1 = vshll.u32 %v9862_v36, 16  ;;  %v2964_v13 = vshrl.u32 %v9862_v36, 16 }
 0x18b   : > { %11728 = vst [vmem:[#allocation25_spill] sm:$0xff] %v9868_v62  ;;  %3753 = vmatmul.mubr.bf16.gmra.mrb[64].mxu1 %v9864_v52  ;;  %v2959_v11 = vshll.u32 %v9868_v62, 16  ;;  %v2952_v39 = vshrl.u32 %v9864_v52, 16  ;;  %v2956_v50 = vrot.slane %v2954_v31, 1 }
 0x18c   : > { %v2938_v14 = vsel %vm1749_vm2, %v2933_v25, %v2937_v33  ;;  %v2971_v58 = vshll.u32 %v9872_v48, 16  ;;  %v2968_v8 = vrot.slane %v2966_v1, 1 }
 0x18d   : > { %3906 = vmatmul.mubr.bf16.gmra.mrb[116].mxu0 %v2938_v14  ;;  %v2545_v17 = vld [vmem:[#allocation2 + $0x300] sm:$0xff]  ;;  %v2957_v19 = vor.u32 %v2956_v50, %v2952_v39  ;;  %v2961_v7 = vrot.slane %v2959_v11, 1 }
 0x18e   : > { %v2973_v24 = vrot.slane %v2971_v58, 1  ;;  %v2969_v38 = vor.u32 %v2968_v8, %v2964_v13  ;;  %v2546_v41 = vld [vmem:[#allocation2 + $0x308] sm:$0xff]  ;;  %v9882_v45 = vpack.c.bf16 %v1036_v5, %v2545_v17 }
 0x18f   : > { %v9884_v53 = vpack.c.bf16 %v1038_v12, %v2546_v41  ;;  %v2549_v33 = vld [vmem:[#allocation2 + $0x320] sm:$0x3]  ;;  %v2962_v5 = vsel %vm1749_vm2, %v2957_v19, %v2961_v7  ;;  %v3105_v41 = vrot.slane %v9474_v16, 1  ;;  %v1590_v19 = vld [vmem:[#allocation2 + $0x8] sm:$0xff] }
 0x190   : > { %v2974_v25 = vsel %vm1749_vm2, %v2969_v38, %v2973_v24  ;;  %v2550_v14 = vld [vmem:[#allocation2 + $0x328] sm:$0x3]  ;;  %v9887_v62 = vpack.c.bf16 %v2549_v33, %v2549_v33  ;;  %v2978_v58 = vshll.u32 %v9882_v45, 16  ;;  %v2976_v17 = vshrl.u32 %v9882_v45, 16 }
 0x191   : > { %3913 = vmatprep.mubr.bf16.mxu0 %v2974_v25  ;;  %3760 = vmatprep.mubr.bf16.mxu1 %v9884_v53  ;;  %v9890_v1 = vpack.c.bf16 %v2550_v14, %v2550_v14  ;;  %v2990_v31 = vshll.u32 %v9884_v53, 16  ;;  %v2988_v12 = vshrl.u32 %v9884_v53, 16  ;;  %v3096_v38 = vrot.slane %v9424_v22, 1  ;;  %v8925_v14 = vld [vmem:[%s11622_s4 + $0x80] sm:$0xff]   ;;  %v8928_v22 = vld [vmem:[%s11622_s4 + $0xc8] sm:$0xff]  }
 0x192   : > { %v2980_v8 = vrot.slane %v2978_v58, 1  ;;  %v2983_v39 = vshll.u32 %v9887_v62, 16  ;;  %v3095_v25 = vrot.slane %v9413_v9, 1  ;;  %v9014_v58 = vld [vmem:[#allocation2 + $0x18] sm:$0xff] }
 0x193   : > { %3761 = vmatmul.mubr.bf16.gmra.mrb[68].mxu1 %v9882_v45  ;;  %v2992_v11 = vrot.slane %v2990_v31, 1  ;;  %v2995_v13 = vshll.u32 %v9890_v1, 16  ;;  %v3104_v31 = vrot.slane %v9457_v61, 1  ;;  %v8929_v61 = vld [vmem:[%s11622_s4 + $0x88] sm:$0xff]  }
 0x194   : > { %3962 = vmatprep.mubr.bf16.mxu1 %v9514_v55  ;;  %v2981_v33 = vor.u32 %v2980_v8, %v2976_v17  ;;  %v2985_v55 = vrot.slane %v2983_v39, 1  ;;  %v3097_v16 = vsel %vm2230_vm3, %v3095_v25, %v3096_v38  ;;  %v3102_v8 = vrot.slane %v9480_v23, 1  ;;  %v9015_v17 = vld [vmem:[#allocation2 + $0x10] sm:$0xff]  ;;  %v8932_v23 = vld [vmem:[%s11622_s4 + $0xd8] sm:$0xff]  }
 0x195   : > { %3914 = vmatmul.mubr.bf16.gmra.mrb[120].mxu0 %v2962_v5  ;;  %v2993_v50 = vor.u32 %v2992_v11, %v2988_v12  ;;  %v2997_v24 = vrot.slane %v2995_v13, 1  ;;  %v9913_v5 = vpack.c.bf16 %v9014_v58, %v1590_v19  ;;  %v3106_v12 = vsel %vm2230_vm3, %v3104_v31, %v3105_v41  ;;  %v8930_v11 = vld [vmem:[%s11622_s4 + $0xd0] sm:$0xff]   ;;  %v1589_v13 = vld [vmem:[#allocation2] sm:$0xff]  ;;  %v1598_v41 = vld [vmem:[#allocation2 + $0x48] sm:$0xff] }
 0x196   : > { %v2986_v9 = vsel %vm1749_vm2, %v2981_v33, %v2985_v55  ;;  %v3111_v39 = vrot.slane %v9525_v4, 1  ;;  %v9930_v38 = vpack.c.bf16 %v9015_v17, %v1589_v13  ;;  %v3110_v19 = vrot.slane %v9501_v51, 1  ;;  %v1596_v33 = vld [vmem:[#allocation2 + $0x38] sm:$0xff]  ;;  %v8942_v51 = vld [vmem:[%s11622_s4 + $0x148] sm:$0xff]   ;;  %v1595_v31 = vld [vmem:[#allocation2 + $0x30] sm:$0xff] }
 0x197   : > { %v2998_v7 = vsel %vm1749_vm2, %v2993_v50, %v2997_v24  ;;  %v3101_v50 = vrot.slane %v9449_v56, 1  ;;  %v8931_v24 = vld [vmem:[%s11622_s4 + $0x90] sm:$0xff]   ;;  %v8941_v56 = vld [vmem:[%s11622_s4 + $0x100] sm:$0xff]   ;;  %v3108_v25 = vrot.slane %v9536_v18, 1  ;;  %v1403_v58 = vadd.f32 %v9740_v10, %v9401_v29 }
 0x198   : > { %3921 = vmatprep.mubr.bf16.mxu0 %v2998_v7  ;;  %v1597_v7 = vld [vmem:[#allocation2 + $0x40] sm:$0xff]  ;;  %v3112_v55 = vsel %vm2230_vm3, %v3110_v19, %v3111_v39  ;;  %v1407_v13 = vadd.f32 %v9758_v3, %v9401_v29  ;;  %v8936_v19 = vld [vmem:[%s11622_s4 + $0xe8] sm:$0xff]  }
 0x199   : > { %v3103_v4 = vsel %vm2230_vm3, %v3101_v50, %v3102_v8  ;;  %v9955_v18 = vpack.c.bf16 %v1597_v7, %v1595_v31  ;;  %v1414_v10 = vmax.f32 %v1403_v58, 0.0  ;;  %v3158_v50 = vrot.slane %v9763_v20, 1  ;;  %v8935_v29 = vld [vmem:[%s11622_s4 + $0xa0] sm:$0xff]   ;;  %v1603_v58 = vld [vmem:[#allocation2 + $0x70] sm:$0xff] }
 0x19a   : > { %v1416_v17 = vmax.f32 %v1407_v13, 0.0  ;;  %v3170_v13 = vrot.slane %v9811_v59, 1  ;;  %v8950_v59 = vld [vmem:[%s11622_s4 + $0x160] sm:$0xff]  }
 0x19b   : > { %3963 = vmatmul.mubr.bf16.vlgmr.msra.gmra.mrb[72].mxu1 %v3097_v16  ;;  %v1401_v16 = vadd.f32 %v9735_v60, %v9399_v26  ;;  %v3117_v60 = vrot.slane %v9576_v6, 1  ;;  %v8945_v6 = vld [vmem:[%s11622_s4 + $0x150] sm:$0xff]  }
 0x19c   : > { %8147 = vmatpush3.bf16.msra.mxu1 %v8925_v14  ;;  %3970 = vmatprep.mubr.bf16.mxu1 %v3106_v12  ;;  %v9945_v14 = vpack.c.bf16 %v1598_v41, %v1596_v33  ;;  %v3107_v12 = vrot.slane %v9496_v47, 1  ;;  %v8943_v47 = vld [vmem:[%s11622_s4 + $0x108] sm:$0xff]   ;;  %v1604_v41 = vld [vmem:[#allocation2 + $0x78] sm:$0xff]  ;;  %v1454_v33 = vmul.f32 0.0, %v1416_v17  ;;  %v3174_v17 = vrot.slane %v9853_v21, 1 }
 0x19d   : > { %3922 = vmatmul.mubr.bf16.gmra.mrb[124].mxu0 %v2986_v9  ;;  %8148 = vmatprep.subr.bf16.mxu1 %v8928_v22  ;;  %v8933_v22 = vld [vmem:[%s11622_s4 + $0x98] sm:$0xff]   ;;  %v8934_v9 = vld [vmem:[%s11622_s4 + $0xe0] sm:$0xff]  }
 0x19e   : > { %4411 = vmatprep.mubr.bf16.mxu0 %v9913_v5  ;;  %v3109_v8 = vsel %vm2230_vm3, %v3107_v12, %v3108_v25  ;;  %v1602_v25 = vld [vmem:[#allocation2 + $0x68] sm:$0xff]  ;;  %v1463_v12 = vrot.slane %v1454_v33, 7  ;;  %v1608_v21 = vld [vmem:[#allocation2 + $0x98] sm:$0xff] }
 0x19f   : > { %v8946_v33 = vld [vmem:[%s11622_s4 + $0xb8] sm:$0xff]  }
 0x1a0   : > { %8149 = vmatpush3.bf16.msra.mxu1 %v8929_v61  ;;  %v1405_v61 = vadd.f32 %v9746_v28, %v9399_v26  ;;  %v3159_v26 = vrot.slane %v9776_v57, 1  ;;  %v3116_v28 = vrot.slane %v9554_v44, 1  ;;  %v3155_v44 = vrot.slane %v9765_v49, 1  ;;  %1477 = vst [vmem:[#allocation2 + $0x358] sm:$0x1] %v1463_v12 }
 0x1a1   : > { %8150 = vmatprep.subr.bf16.mxu1 %v8930_v11  ;;  %v1413_v11 = vmax.f32 %v1401_v16, 0.0  ;;  %v3164_v49 = vrot.slane %v9787_v27, 1  ;;  %v10000_v16 = vpack.c.bf16 %v1604_v41, %v1602_v25  ;;  %v3161_v27 = vrot.slane %v9789_v43, 1  ;;  %v1601_v43 = vld [vmem:[#allocation2 + $0x60] sm:$0xff]  ;;  %v8944_v41 = vld [vmem:[%s11622_s4 + $0xf8] sm:$0xff]  }
 0x1a2   : > { %v1415_v39 = vmax.f32 %v1405_v61, 0.0  ;;  %v9981_v57 = vsel %vm2230_vm3, %v3158_v50, %v3159_v26  ;;  %v3114_v61 = vrot.slane %v9584_v15, 1  ;;  %v3123_v50 = vrot.slane %v9615_v0, 1  ;;  %v8939_v0 = vld [vmem:[%s11622_s4 + $0xb0] sm:$0xff]  }
 0x1a3   : > { %3971 = vmatmul.mubr.bf16.gmra.mrb[76].mxu1 %v3103_v4  ;;  %v1451_v3 = vmul.f32 0.0, %v1413_v11  ;;  %v3118_v4 = vsel %vm2230_vm3, %v3116_v28, %v3117_v60  ;;  %v3167_v26 = vrot.slane %v9813_v30, 1  ;;  %v3177_v30 = vrot.slane %v9848_v54, 1 }
 0x1a4   : > { %3978 = vmatprep.mubr.bf16.mxu1 %v3112_v55  ;;  %8151 = vmatpush3.bf16.msra.mxu1 %v8931_v24  ;;  %v1452_v24 = vmul.f32 0.0, %v1414_v10  ;;  %v1453_v20 = vmul.f32 0.0, %v1415_v39  ;;  %v8947_v55 = vld [vmem:[%s11622_s4 + $0x110] sm:$0xff]   ;;  %v10026_v39 = vpack.c.bf16 %v1603_v58, %v1601_v43  ;;  %v3182_v54 = vrot.slane %v9862_v36, 1  ;;  %v8952_v36 = vld [vmem:[%s11622_s4 + $0x168] sm:$0xff]  }
 0x1a5   : > { %4412 = vmatmul.mubr.bf16.vlgmr.msra.gmra.mrb[128].mxu0 %v9930_v38  ;;  %8152 = vmatprep.subr.bf16.mxu1 %v8932_v23  ;;  %v3156_v23 = vrot.slane %v9781_v35, 1  ;;  %v1459_v7 = vrot.slane %v1451_v3, 7  ;;  %v3165_v35 = vrot.slane %v9800_v2, 1  ;;  %v3162_v2 = vrot.slane %v9805_v37, 1  ;;  %v8938_v10 = vld [vmem:[%s11622_s4 + $0xf0] sm:$0xff]   ;;  %v8953_v58 = vld [vmem:[%s11622_s4 + $0x128] sm:$0xff]  }
 0x1a6   : > { %4419 = vmatprep.mubr.bf16.mxu0 %v9945_v14  ;;  %8259 = vmatpush3.bf16.msra.mxu0 %v8941_v56  ;;  %v1460_v56 = vrot.slane %v1452_v24, 7  ;;  %v3122_v3 = vrot.slane %v9599_v42, 1  ;;  %v3183_v42 = vrot.slane %v9872_v48, 1 }
 0x1a7   : > { %8260 = vmatprep.subr.bf16.mxu0 %v8942_v51  ;;  %v1461_v51 = vrot.slane %v1453_v20, 7  ;;  %v9993_v31 = vsel %vm2230_vm3, %v3155_v44, %v3156_v23  ;;  %1472 = vst [vmem:[#allocation2 + $0x330] sm:$0xfe] %v1459_v7  ;;  %v10011_v11 = vsel %vm2230_vm3, %v3164_v49, %v3165_v35  ;;  %v10019_v15 = vsel %vm2230_vm3, %v3161_v27, %v3162_v2  ;;  %v8955_v35 = vld [vmem:[%s11622_s4 + $0x340] sm:$0xff]  }
 0x1a8   : > { %8153 = vmatpush3.bf16.msra.mxu1 %v8933_v22  ;;  %v8948_v22 = vld [vmem:[%s11622_s4 + $0x158] sm:$0xff]   ;;  %1473 = vst [vmem:[#allocation2 + $0x338] sm:$0xfe] %v1460_v56  ;;  %v1464_v37 = vsel %vm942_vm1, %v1460_v56, %v1463_v12  ;;  %v3179_v23 = vrot.slane %v9864_v52, 1  ;;  %v10073_v56 = vsel %vm2230_vm3, %v3182_v54, %v3183_v42  ;;  %v3188_v52 = vrot.slane %v9884_v53, 1  ;;  %v11731_v12 = vld [vmem:[#allocation7_spill] sm:$0xff] }
 0x1a9   : > { %8154 = vmatprep.subr.bf16.mxu1 %v8934_v9  ;;  %v8937_v9 = vld [vmem:[%s11622_s4 + $0xa8] sm:$0xff]   ;;  %v1462_v60 = vsel %vm942_vm1, %v1459_v7, %v1461_v51  ;;  %1476 = vst [vmem:[#allocation2 + $0x350] sm:$0x1] %v1461_v51  ;;  %1475 = vst [vmem:[#allocation2 + $0x348] sm:$0xff] %v1464_v37  ;;  %v3185_v51 = vrot.slane %v9882_v45, 1  ;;  %v3186_v49 = vrot.slane %v9887_v62, 1 }
 0x1aa   : > { %8261 = vmatpush3.bf16.msra.mxu0 %v8943_v47  ;;  %1474 = vst [vmem:[#allocation2 + $0x340] sm:$0xff] %v1462_v60  ;;  %v3171_v47 = vrot.slane %v9824_v32, 1  ;;  %v3113_v32 = vrot.slane %v9556_v46, 1  ;;  %v3173_v46 = vrot.slane %v9837_v63, 1  ;;  %v8951_v63 = vld [vmem:[%s11622_s4 + $0x120] sm:$0xff]   ;;  %v3129_v45 = vrot.slane %v11731_v12, 1 }
 0x1ab   : > { %3979 = vmatmul.mubr.bf16.gmra.mrb[80].mxu1 %v3109_v8  ;;  %8262 = vmatprep.subr.bf16.mxu0 %v8945_v6  ;;  %v8949_v8 = vld [vmem:[%s11622_s4 + $0x118] sm:$0xff]   ;;  %v3168_v6 = vrot.slane %v9829_v34, 1  ;;  %v1610_v34 = vld [vmem:[#allocation2 + $0xa8] sm:$0xff]  ;;  %v10099_v62 = vsel %vm2230_vm3, %v3185_v51, %v3186_v49  ;;  %v1609_v27 = vld [vmem:[#allocation2 + $0xa0] sm:$0xff] }
 0x1ac   : > { %3986 = vmatprep.mubr.bf16.mxu1 %v3118_v4  ;;  %8155 = vmatpush3.bf16.msra.mxu1 %v8935_v29  ;;  %v10036_v28 = vsel %vm2230_vm3, %v3170_v13, %v3171_v47  ;;  %v3176_v29 = vrot.slane %v9835_v40, 1  ;;  %v3115_v20 = vsel %vm2230_vm3, %v3113_v32, %v3114_v61  ;;  %v10063_v44 = vsel %vm2230_vm3, %v3173_v46, %v3174_v17  ;;  %v11729_v4 = vld [vmem:[#allocation25_spill] sm:$0xff]  ;;  %v11732_v2 = vld [vmem:[#allocation3_spill] sm:$0xff]  ;;  %v1616_v60 = vld [vmem:[#allocation2 + $0xd8] sm:$0xff] }
 0x1ad   : > { %4420 = vmatmul.mubr.bf16.gmra.mrb[132].mxu0 %v9955_v18  ;;  %8156 = vmatprep.subr.bf16.mxu1 %v8936_v19  ;;  %v10045_v24 = vsel %vm2230_vm3, %v3167_v26, %v3168_v6  ;;  %v3124_v19 = vsel %vm2230_vm3, %v3122_v3, %v3123_v50  ;;  %v3180_v7 = vrot.slane %v11729_v4, 1  ;;  %v10070_v48 = vpack.c.bf16 %v1610_v34, %v1608_v21  ;;  %v1607_v37 = vld [vmem:[#allocation2 + $0x90] sm:$0xff]  ;;  %v1614_v50 = vld [vmem:[#allocation2 + $0xc8] sm:$0xff]  ;;  %v8958_v6 = vld [vmem:[%s11622_s4 + $0x178] sm:$0xff]  }
 0x1ae   : > { %4427 = vmatprep.mubr.bf16.mxu0 %v10000_v16  ;;  %8263 = vmatpush3.bf16.msra.mxu0 %v8947_v55  ;;  %v10054_v40 = vsel %vm2230_vm3, %v3176_v29, %v3177_v30  ;;  %v3189_v55 = vrot.slane %v9890_v1, 1  ;;  %v3119_v61 = vrot.slane %v11732_v2, 1  ;;  %v8956_v47 = vld [vmem:[%s11622_s4 + $0x130] sm:$0xff]   ;;  %v11734_v32 = vld [vmem:[#allocation8_spill] sm:$0xff]  ;;  %v8959_v29 = vld [vmem:[%s11622_s4 + $0x138] sm:$0xff]  }
 0x1af   : > { %8264 = vmatprep.subr.bf16.mxu0 %v8948_v22  ;;  %v10082_v25 = vsel %vm2230_vm3, %v3179_v23, %v3180_v7  ;;  %v11730_v22 = vld [vmem:[#allocation4_spill] sm:$0xff]  ;;  %v11735_v30 = vld [vmem:[#allocation11_spill] sm:$0xff]  ;;  %v1615_v3 = vld [vmem:[#allocation2 + $0xd0] sm:$0xff] }
 0x1b0   : > { %8157 = vmatpush3.bf16.msra.mxu1 %v8937_v9  ;;  %v3120_v53 = vrot.slane %v11730_v22, 1  ;;  %v10092_v1 = vsel %vm2230_vm3, %v3188_v52, %v3189_v55  ;;  %v8954_v9 = vld [vmem:[%s11622_s4 + $0x170] sm:$0xff]   ;;  %v3135_v34 = vrot.slane %v11735_v30, 1  ;;  %v11736_v46 = vld [vmem:[#allocation6_spill] sm:$0xff]  ;;  %v1613_v42 = vld [vmem:[#allocation2 + $0xc0] sm:$0xff] }
 0x1b1   : > { %8158 = vmatprep.subr.bf16.mxu1 %v8938_v10  ;;  %v11733_v10 = vld [vmem:[#allocation5_spill] sm:$0xff]  ;;  %v3125_v17 = vrot.slane %v11736_v46, 1  ;;  %v10128_v21 = vpack.c.bf16 %v1615_v3, %v1613_v42  ;;  %v11738_v7 = vld [vmem:[#allocation12_spill] sm:$0xff]  ;;  %v1621_v55 = vld [vmem:[#allocation2 + $0x100] sm:$0xff] }
 0x1b2   : > { %8265 = vmatpush3.bf16.msra.mxu0 %v8949_v8  ;;  %v3128_v43 = vrot.slane %v11733_v10, 1  ;;  %v3121_v13 = vsel %vm2230_vm3, %v3119_v61, %v3120_v53  ;;  %v10110_v8 = vpack.c.bf16 %v1609_v27, %v1607_v37  ;;  %v11740_v51 = vld [vmem:[#allocation10_spill] sm:$0xff]  ;;  %v11741_v22 = vld [vmem:[#allocation13_spill] sm:$0xff]  ;;  %v11742_v61 = vld [vmem:[#allocation16_spill] sm:$0xff] }
 0x1b3   : > { %3987 = vmatmul.mubr.bf16.gmra.mrb[84].mxu1 %v3115_v20  ;;  %8266 = vmatprep.subr.bf16.mxu0 %v8950_v59  ;;  %v10116_v59 = vpack.c.bf16 %v1616_v60, %v1614_v50  ;;  %v11737_v20 = vld [vmem:[#allocation9_spill] sm:$0xff]  ;;  %v3131_v49 = vrot.slane %v11740_v51, 1  ;;  %v3140_v53 = vrot.slane %v11741_v22, 1  ;;  %v3138_v60 = vrot.slane %v11742_v61, 1  ;;  %v11743_v10 = vld [vmem:[#allocation19_spill] sm:$0xff]  ;;  %v1634_v50 = vld [vmem:[#allocation2 + $0x168] sm:$0xff] }
 0x1b4   : > { %3994 = vmatprep.mubr.bf16.mxu1 %v3124_v19  ;;  %8159 = vmatpush3.bf16.msra.mxu1 %v8939_v0  ;;  %v3130_v26 = vsel %vm2230_vm3, %v3128_v43, %v3129_v45  ;;  %v3126_v0 = vrot.slane %v11734_v32, 1  ;;  %v3134_v54 = vrot.slane %v11737_v20, 1  ;;  %v1620_v19 = vld [vmem:[#allocation2 + $0xf8] sm:$0xff]  ;;  %v3147_v43 = vrot.slane %v11743_v10, 1  ;;  %v1627_v37 = vld [vmem:[#allocation2 + $0x130] sm:$0xff]  ;;  %v1625_v32 = vld [vmem:[#allocation2 + $0x120] sm:$0xff] }
 0x1b5   : > { %4428 = vmatmul.mubr.bf16.gmra.mrb[136].mxu0 %v10026_v39  ;;  %8160 = vmatprep.subr.bf16.mxu1 %v8944_v41  ;;  %v1622_v41 = vld [vmem:[#allocation2 + $0x108] sm:$0xff]  ;;  %v1632_v30 = vld [vmem:[#allocation2 + $0x158] sm:$0xff] }
 0x1b6   : > { %4435 = vmatprep.mubr.bf16.mxu0 %v10070_v48  ;;  %8267 = vmatpush3.bf16.msra.mxu0 %v8951_v63  ;;  %v3127_v63 = vsel %vm2230_vm3, %v3125_v17, %v3126_v0  ;;  %v3136_v23 = vsel %vm2230_vm3, %v3134_v54, %v3135_v34  ;;  %v10131_v4 = vpack.c.bf16 %v1622_v41, %v1620_v19  ;;  %v11746_v46 = vld [vmem:[#allocation20_spill] sm:$0xff]  ;;  %v11747_v41 = vld [vmem:[#allocation23_spill] sm:$0xff]  ;;  %v11748_v42 = vld [vmem:[#allocation18_spill] sm:$0xff] }
 0x1b7   : > { %8268 = vmatprep.subr.bf16.mxu0 %v8952_v36  ;;  %v3132_v36 = vrot.slane %v11738_v7, 1  ;;  %v10155_v3 = vpack.c.bf16 %v1634_v50, %v1632_v30  ;;  %v3144_v17 = vrot.slane %v11746_v46, 1  ;;  %v3153_v20 = vrot.slane %v11747_v41, 1  ;;  %v1633_v54 = vld [vmem:[#allocation2 + $0x160] sm:$0xff]  ;;  %v1640_v19 = vld [vmem:[#allocation2 + $0x198] sm:$0xff] }
 0x1b8   : > { %8161 = vmatpush3.bf16.msra.mxu1 %v8946_v33  ;;  %v11739_v33 = vld [vmem:[#allocation15_spill] sm:$0xff]  ;;  %v1644_v10 = vld [vmem:[#allocation2 + $0x1b8] sm:$0xff] }
 0x1b9   : > { %8370 = vmatprep.subr.bf16.mxu1 %v8955_v35  ;;  %v3141_v52 = vrot.slane %v11739_v33, 1  ;;  %v1628_v35 = vld [vmem:[#allocation2 + $0x138] sm:$0xff]  ;;  %v3133_v12 = vsel %vm2230_vm3, %v3131_v49, %v3132_v36  ;;  %v1631_v36 = vld [vmem:[#allocation2 + $0x150] sm:$0xff] }
 0x1ba   : > { %8269 = vmatpush3.bf16.msra.mxu0 %v8953_v58  ;;  %v1619_v58 = vld [vmem:[#allocation2 + $0xf0] sm:$0xff] }
 0x1bb   : > { %3995 = vmatmul.mubr.bf16.gmra.mrb[88].mxu1 %v3121_v13  ;;  %8270 = vmatprep.subr.bf16.mxu0 %v8954_v9  ;;  %v10140_v45 = vpack.c.bf16 %v1621_v55, %v1619_v58  ;;  %v1626_v9 = vld [vmem:[#allocation2 + $0x128] sm:$0xff]  ;;  %v3142_v27 = vsel %vm2230_vm3, %v3140_v53, %v3141_v52  ;;  %v11744_v13 = vld [vmem:[#allocation14_spill] sm:$0xff]  ;;  %v10164_v52 = vpack.c.bf16 %v1633_v54, %v1631_v36  ;;  %v1639_v53 = vld [vmem:[#allocation2 + $0x190] sm:$0xff] }
 0x1bc   : > { %4002 = vmatprep.mubr.bf16.mxu1 %v3130_v26  ;;  %v10143_v2 = vpack.c.bf16 %v1628_v35, %v1626_v9  ;;  %v11745_v26 = vld [vmem:[#allocation17_spill] sm:$0xff]  ;;  %v1638_v55 = vld [vmem:[#allocation2 + $0x188] sm:$0xff]  ;;  %v11751_v58 = vld [vmem:[#allocation22_spill] sm:$0xff] }
 0x1bd   : > { %4436 = vmatmul.mubr.bf16.gmra.mrb[140].mxu0 %v10110_v8  ;;  %v10167_v49 = vpack.c.bf16 %v1640_v19, %v1638_v55  ;;  %v11750_v35 = vld [vmem:[#allocation24_spill] sm:$0xff] }
 0x1be   : > { %4443 = vmatprep.mubr.bf16.mxu0 %v10116_v59  ;;  %8271 = vmatpush3.bf16.msra.mxu0 %v8956_v47  ;;  %v3137_v47 = vrot.slane %v11744_v13, 1  ;;  %v3150_v22 = vrot.slane %v11750_v35, 1  ;;  %v1646_v9 = vld [vmem:[#allocation2 + $0x1c8] sm:$0xff]  ;;  %v1652_v13 = vld [vmem:[#allocation2 + $0x1f8] sm:$0xff] }
 0x1bf   : > { %8272 = vmatprep.subr.bf16.mxu0 %v8958_v6  ;;  %v3146_v6 = vrot.slane %v11745_v26, 1  ;;  %v1650_v26 = vld [vmem:[#allocation2 + $0x1e8] sm:$0xff] }
 0x1c0   : > { %v3139_v0 = vsel %vm2230_vm3, %v3137_v47, %v3138_v60  ;;  %v1643_v47 = vld [vmem:[#allocation2 + $0x1b0] sm:$0xff] }
 0x1c1   : > { %v3148_v34 = vsel %vm2230_vm3, %v3146_v6, %v3147_v43  ;;  %v10176_v43 = vpack.c.bf16 %v1646_v9, %v1644_v10  ;;  %v10184_v6 = vpack.c.bf16 %v1652_v13, %v1650_v26 }
 0x1c2   : > { %8273 = vmatpush3.bf16.msra.mxu0 %v8959_v29  ;;  %v10152_v29 = vpack.c.bf16 %v1627_v37, %v1625_v32  ;;  %v1645_v37 = vld [vmem:[#allocation2 + $0x1c0] sm:$0xff] }
 0x1c3   : > { %4003 = vmatmul.mubr.bf16.gmra.mrb[92].mxu1 %v3127_v63  ;;  %v3143_v63 = vrot.slane %v11748_v42, 1  ;;  %v10181_v50 = vpack.c.bf16 %v1645_v37, %v1643_v47 }
 0x1c4   : > { %4010 = vmatprep.mubr.bf16.mxu1 %v3136_v23  ;;  %v11749_v23 = vld [vmem:[#allocation21_spill] sm:$0xff] }
 0x1c5   : > { %4444 = vmatmul.mubr.bf16.gmra.mrb[144].mxu0 %v10128_v21  ;;  %v3152_v7 = vrot.slane %v11749_v23, 1  ;;  %v3145_v33 = vsel %vm2230_vm3, %v3143_v63, %v3144_v17  ;;  %v1658_v17 = vld [vmem:[#allocation2 + $0x228] sm:$0xff] }
 0x1c6   : > { %4451 = vmatprep.mubr.bf16.mxu0 %v10131_v4 }
 0x1c7   : > { %v3154_v51 = vsel %vm2230_vm3, %v3152_v7, %v3153_v20  ;;  %v1649_v20 = vld [vmem:[#allocation2 + $0x1e0] sm:$0xff] }
 0x1cb   : > { %4011 = vmatmul.mubr.bf16.gmra.mrb[96].mxu1 %v3133_v12  ;;  %v3149_v12 = vrot.slane %v11751_v58, 1 }
 0x1cc   : > { %4018 = vmatprep.mubr.bf16.mxu1 %v3142_v27  ;;  %v1637_v27 = vld [vmem:[#allocation2 + $0x180] sm:$0xff] }
 0x1cd   : > { %4452 = vmatmul.mubr.bf16.gmra.mrb[148].mxu0 %v10140_v45  ;;  %v3151_v61 = vsel %vm2230_vm3, %v3149_v12, %v3150_v22  ;;  %v10174_v60 = vpack.c.bf16 %v1639_v53, %v1637_v27  ;;  %v1664_v22 = vld [vmem:[#allocation2 + $0x258] sm:$0xff]  ;;  %v1655_v12 = vld [vmem:[#allocation2 + $0x210] sm:$0xff]  ;;  %v1662_v27 = vld [vmem:[#allocation2 + $0x248] sm:$0xff] }
 0x1ce   : > { %4459 = vmatprep.mubr.bf16.mxu0 %v10143_v2  ;;  %v10204_v10 = vpack.c.bf16 %v1664_v22, %v1662_v27  ;;  %v1669_v22 = vld [vmem:[#allocation2 + $0x280] sm:$0xff] }
 0x1d3   : > { %4019 = vmatmul.mubr.bf16.gmra.mrb[100].mxu1 %v3139_v0 }
 0x1d4   : > { %4026 = vmatprep.mubr.bf16.mxu1 %v3148_v34  ;;  %v1651_v34 = vld [vmem:[#allocation2 + $0x1f0] sm:$0xff] }
 0x1d5   : > { %4460 = vmatmul.mubr.bf16.gmra.mrb[152].mxu0 %v10152_v29  ;;  %v10189_v54 = vpack.c.bf16 %v1651_v34, %v1649_v20  ;;  %v1661_v20 = vld [vmem:[#allocation2 + $0x240] sm:$0xff] }
 0x1d6   : > { %4467 = vmatprep.mubr.bf16.mxu0 %v10155_v3 }
 0x1db   : > { %4027 = vmatmul.mubr.bf16.gmra.mrb[104].mxu1 %v3145_v33 }
 0x1dc   : > { %4034 = vmatprep.mubr.bf16.mxu1 %v3154_v51  ;;  %v1657_v51 = vld [vmem:[#allocation2 + $0x220] sm:$0xff] }
 0x1dd   : > { %4468 = vmatmul.mubr.bf16.gmra.mrb[156].mxu0 %v10164_v52  ;;  %v10199_v9 = vpack.c.bf16 %v1657_v51, %v1655_v12  ;;  %v1676_v12 = vld [vmem:[#allocation2 + $0x2b8] sm:$0xff] }
 0x1de   : > { %4475 = vmatprep.mubr.bf16.mxu0 %v10167_v49 }
 0x1e3   : > { %4035 = vmatmul.mubr.bf16.gmra.mrb[108].mxu1 %v3151_v61 }
 0x1e4   : > { %4042 = vmatprep.mubr.bf16.mxu1 %v9981_v57 }
 0x1e5   : > { %4476 = vmatmul.mubr.bf16.gmra.mrb[160].mxu0 %v10174_v60 }
 0x1e6   : > { %4483 = vmatprep.mubr.bf16.mxu0 %v10176_v43 }
 0x1e9   : > { %v7714_v57 = vpop.f32.mrb[8].mxu1 }
 0x1ea   : > { %v7715_v32 = vpop.f32.mrb[9].mxu1 }
 0x1eb   : > { %4043 = vmatmul.mubr.bf16.gmra.mrb[112].mxu1 %v9993_v31  ;;  %v7716_v0 = vadd.f32 %v7715_v32, %v7714_v57  ;;  %v7717_v30 = vpop.f32.mrb[10].mxu1  ;;  %v1656_v31 = vld [vmem:[#allocation2 + $0x218] sm:$0xff] }
 0x1ec   : > { %4050 = vmatprep.mubr.bf16.mxu1 %v10011_v11  ;;  %v7718_v46 = vpop.f32.mrb[11].mxu1  ;;  %v10192_v42 = vpack.c.bf16 %v1658_v17, %v1656_v31 }
 0x1ed   : > { %4484 = vmatmul.mubr.bf16.gmra.mrb[164].mxu0 %v10181_v50  ;;  %v7719_v41 = vadd.f32 %v7718_v46, %v7717_v30  ;;  %v1670_v46 = vld [vmem:[#allocation2 + $0x288] sm:$0xff] }
 0x1ee   : > { %4491 = vmatprep.mubr.bf16.mxu0 %v10184_v6 }
 0x1f1   : > { %v7720_v63 = vpop.f32.mrb[12].mxu1 }
 0x1f2   : > { %v7826_v11 = vpop.f32.mrb[64].mxu0  ;;  %v7721_v23 = vpop.f32.mrb[13].mxu1 }
 0x1f3   : > { %4051 = vmatmul.mubr.bf16.gmra.mrb[116].mxu1 %v10019_v15  ;;  %v7827_v19 = vpop.f32.mrb[65].mxu0  ;;  %v7722_v36 = vadd.f32 %v7721_v23, %v7720_v63  ;;  %v7723_v55 = vpop.f32.mrb[14].mxu1  ;;  %v1668_v63 = vld [vmem:[#allocation2 + $0x278] sm:$0xff]  ;;  %v1594_v23 = vld [vmem:[#allocation2 + $0x28] sm:$0x3] }
 0x1f4   : > { %4058 = vmatprep.mubr.bf16.mxu1 %v10036_v28  ;;  %v7828_v7 = vadd.f32 %v7827_v19, %v7826_v11  ;;  %v7829_v33 = vpop.f32.mrb[66].mxu0  ;;  %v7724_v15 = vpop.f32.mrb[15].mxu1  ;;  %v10214_v19 = vpack.c.bf16 %v1670_v46, %v1668_v63  ;;  %v10224_v51 = vpack.c.bf16 %v1594_v23, %v1594_v23  ;;  %v1593_v46 = vld [vmem:[#allocation2 + $0x20] sm:$0x3] }
 0x1f5   : > { %4492 = vmatmul.mubr.bf16.gmra.mrb[168].mxu0 %v10189_v54  ;;  %v7830_v35 = vpop.f32.mrb[67].mxu0  ;;  %v7725_v28 = vadd.f32 %v7724_v15, %v7723_v55  ;;  %v10239_v23 = vpack.c.bf16 %v1593_v46, %v1593_v46 }
 0x1f6   : > { %4499 = vmatprep.mubr.bf16.mxu0 %v10192_v42  ;;  %v10197_v53 = vadd.f32 %v7828_v7, %v7716_v0  ;;  %v7831_v58 = vadd.f32 %v7830_v35, %v7829_v33  ;;  %v1663_v0 = vld [vmem:[#allocation2 + $0x250] sm:$0xff] }
 0x1f7   : > { %v10211_v11 = vpack.c.bf16 %v1663_v0, %v1661_v20 }
 0x1f8   : > { %v10202_v61 = vadd.f32 %v7831_v58, %v7719_v41 }
 0x1fa   : > { %v7726_v37 = vpop.f32.mrb[16].mxu1 }
 0x1fb   : > { %4059 = vmatmul.mubr.bf16.gmra.mrb[120].mxu1 %v10045_v24  ;;  %v7832_v13 = vpop.f32.mrb[68].mxu0  ;;  %v7727_v47 = vpop.f32.mrb[17].mxu1 }
 0x1fc   : > { %4066 = vmatprep.mubr.bf16.mxu1 %v10054_v40  ;;  %v7833_v26 = vpop.f32.mrb[69].mxu0  ;;  %v7728_v57 = vadd.f32 %v7727_v47, %v7726_v37  ;;  %v7729_v32 = vpop.f32.mrb[18].mxu1  ;;  %v1667_v47 = vld [vmem:[#allocation2 + $0x270] sm:$0xff] }
 0x1fd   : > { %4500 = vmatmul.mubr.bf16.gmra.mrb[172].mxu0 %v10199_v9  ;;  %v7834_v30 = vadd.f32 %v7833_v26, %v7832_v13  ;;  %v7835_v24 = vpop.f32.mrb[70].mxu0  ;;  %v7730_v34 = vpop.f32.mrb[19].mxu1  ;;  %v1674_v26 = vld [vmem:[#allocation2 + $0x2a8] sm:$0xff]  ;;  %v10227_v0 = vpack.c.bf16 %v1669_v22, %v1667_v47 }
 0x1fe   : > { %4507 = vmatprep.mubr.bf16.mxu0 %v10204_v10  ;;  %v7836_v17 = vpop.f32.mrb[71].mxu0  ;;  %v7731_v41 = vadd.f32 %v7730_v34, %v7729_v32  ;;  %v1770_v34 = vshll.u32 %v10224_v51, 16  ;;  %v10232_v20 = vpack.c.bf16 %v1676_v12, %v1674_v26 }
 0x1ff   : > { %v10209_v31 = vadd.f32 %v7834_v30, %v7722_v36  ;;  %v7837_v40 = vadd.f32 %v7836_v17, %v7835_v24  ;;  %v8972_v36 = vld [vmem:[%s11622_s4 + $0x3c0] sm:$0xff]   ;;  %v1763_v30 = vshrl.u32 %v9913_v5, 16 }
 0x200   : > { %8482 = vmatprep.subr.bf16.mxu0 %v8972_v36 }
 0x201   : > { %11752 = vst [vmem:[#allocation25_spill] sm:$0xff] %v10209_v31  ;;  %v10217_v7 = vadd.f32 %v7837_v40, %v7725_v28 }
 0x203   : > { %4067 = vmatmul.mubr.bf16.gmra.mrb[124].mxu1 %v10063_v44  ;;  %11753 = vst [vmem:[#allocation4_spill] sm:$0xff] %v10217_v7  ;;  %v7732_v33 = vpop.f32.mrb[20].mxu1  ;;  %v1765_v44 = vshll.u32 %v9913_v5, 16 }
 0x204   : > { %4074 = vmatprep.mubr.bf16.mxu1 %v10073_v56  ;;  %v7733_v55 = vpop.f32.mrb[21].mxu1 }
 0x205   : > { %4508 = vmatmul.mubr.bf16.gmra.mrb[176].mxu0 %v10211_v11  ;;  %v7838_v35 = vpop.f32.mrb[72].mxu0  ;;  %v7734_v15 = vadd.f32 %v7733_v55, %v7732_v33  ;;  %v7735_v56 = vpop.f32.mrb[22].mxu1  ;;  %v1767_v24 = vrot.slane %v1765_v44, 1  ;;  %v1600_v33 = vld [vmem:[#allocation2 + $0x58] sm:$0x3] }
 0x206   : > { %4515 = vmatprep.mubr.bf16.mxu0 %v10214_v19  ;;  %v7839_v58 = vpop.f32.mrb[73].mxu0  ;;  %v7736_v28 = vpop.f32.mrb[23].mxu1  ;;  %v10248_v47 = vpack.c.bf16 %v1600_v33, %v1600_v33 }
 0x207   : > { %v7840_v27 = vadd.f32 %v7839_v58, %v7838_v35  ;;  %v7841_v37 = vpop.f32.mrb[74].mxu0  ;;  %v7737_v13 = vadd.f32 %v7736_v28, %v7735_v56  ;;  %v1768_v44 = vor.u32 %v1767_v24, %v1763_v30  ;;  %v1772_v35 = vrot.slane %v1770_v34, 1  ;;  %v1675_v58 = vld [vmem:[#allocation2 + $0x2b0] sm:$0xff]  ;;  %v1673_v30 = vld [vmem:[#allocation2 + $0x2a0] sm:$0xff] }
 0x208   : > { %v7842_v32 = vpop.f32.mrb[75].mxu0  ;;  %v1789_v56 = vshll.u32 %v9945_v14, 16  ;;  %v1758_v34 = vshll.u32 %v10239_v23, 16 }
 0x209   : > { %v7843_v17 = vadd.f32 %v7842_v32, %v7841_v37  ;;  %v10235_v40 = vadd.f32 %v7840_v27, %v7728_v57  ;;  %v1682_v27 = vld [vmem:[#allocation2 + $0x2e8] sm:$0xff]  ;;  %v1751_v37 = vshrl.u32 %v9930_v38, 16 }
 0x20b   : > { %4075 = vmatmul.mubr.bf16.gmra.mrb[128].mxu1 %v10082_v25  ;;  %11754 = vst [vmem:[#allocation7_spill] sm:$0xff] %v10235_v40  ;;  %v7738_v63 = vpop.f32.mrb[24].mxu1  ;;  %v1753_v25 = vshll.u32 %v9930_v38, 16  ;;  %v10242_v36 = vadd.f32 %v7843_v17, %v7731_v41  ;;  %v10253_v17 = vpack.c.bf16 %v1675_v58, %v1673_v30  ;;  %v1599_v58 = vld [vmem:[#allocation2 + $0x50] sm:$0x3] }
 0x20c   : > { %4082 = vmatprep.mubr.bf16.mxu1 %v10092_v1  ;;  %v7739_v55 = vpop.f32.mrb[25].mxu1 }
 0x20d   : > { %4516 = vmatmul.mubr.bf16.gmra.mrb[180].mxu0 %v10227_v0  ;;  %11755 = vst [vmem:[#allocation3_spill] sm:$0xff] %v10242_v36  ;;  %v7844_v1 = vpop.f32.mrb[76].mxu0  ;;  %v10245_v57 = vadd.f32 %v7739_v55, %v7738_v63  ;;  %v7741_v22 = vpop.f32.mrb[26].mxu1  ;;  %v1755_v24 = vrot.slane %v1753_v25, 1  ;;  %11756 = vst [vmem:[#allocation5_spill] sm:$0xff] %v10253_v17  ;;  %v1680_v63 = vld [vmem:[#allocation2 + $0x2d8] sm:$0xff]  ;;  %v1773_v55 = vsel %vm1749_vm2, %v1768_v44, %v1772_v35 }
 0x20e   : > { %4523 = vmatprep.mubr.bf16.mxu0 %v10232_v20  ;;  %v7845_v28 = vpop.f32.mrb[77].mxu0  ;;  %v7742_v12 = vpop.f32.mrb[27].mxu1  ;;  %v1791_v36 = vrot.slane %v1789_v56, 1  ;;  %v10257_v33 = vpack.c.bf16 %v1682_v27, %v1680_v63  ;;  %v1787_v25 = vshrl.u32 %v9945_v14, 16  ;;  %v1777_v44 = vshll.u32 %v9955_v18, 16  ;;  %v1681_v63 = vld [vmem:[#allocation2 + $0x2e0] sm:$0xff] }
 0x20f   : > { %v7846_v26 = vadd.f32 %v7845_v28, %v7844_v1  ;;  %v7847_v41 = vpop.f32.mrb[78].mxu0  ;;  %v10250_v32 = vadd.f32 %v7742_v12, %v7741_v22  ;;  %v1794_v22 = vshll.u32 %v10248_v47, 16  ;;  %v1756_v28 = vor.u32 %v1755_v24, %v1751_v37  ;;  %v1606_v35 = vld [vmem:[#allocation2 + $0x88] sm:$0x3] }
 0x210   : > { %v7848_v46 = vpop.f32.mrb[79].mxu0  ;;  %11757 = vst [vmem:[#allocation8_spill] sm:$0xff] %v10257_v33  ;;  %v1760_v12 = vrot.slane %v1758_v34, 1  ;;  %v10274_v37 = vpack.c.bf16 %v1599_v58, %v1599_v58 }
 0x211   : > { %v7849_v40 = vadd.f32 %v7848_v46, %v7847_v41  ;;  %v10259_v1 = vadd.f32 %v7846_v26, %v7734_v15  ;;  %v1792_v15 = vor.u32 %v1791_v36, %v1787_v25  ;;  %v1813_v26 = vshll.u32 %v10000_v16, 16 }
 0x212   : > { %v1796_v36 = vrot.slane %v1794_v22, 1  ;;  %v10278_v25 = vpack.c.bf16 %v1606_v35, %v1606_v35  ;;  %v1761_v58 = vsel %vm1749_vm2, %v1756_v28, %v1760_v12  ;;  %v1775_v35 = vshrl.u32 %v9955_v18, 16 }
 0x213   : > { %4083 = vmatmul.mubr.bf16.gmra.mrb[132].mxu1 %v10099_v62  ;;  %11758 = vst [vmem:[#allocation11_spill] sm:$0xff] %v10259_v1  ;;  %v7744_v62 = vpop.f32.mrb[28].mxu1  ;;  %v10266_v56 = vadd.f32 %v7849_v40, %v7737_v13  ;;  %v2234_v13 = vrot.slane %v9913_v5, 1  ;;  %v2235_v40 = vrot.slane %v10224_v51, 1  ;;  %v1815_v51 = vrot.slane %v1813_v26, 1 }
 0x214   : > { %4572 = vmatprep.mubr.bf16.mxu1 %v1773_v55  ;;  %v7745_v27 = vpop.f32.mrb[29].mxu1  ;;  %v8957_v55 = vld [vmem:[%s11622_s4 + $0x300] sm:$0xff]   ;;  %v1797_v5 = vsel %vm1749_vm2, %v1792_v15, %v1796_v36  ;;  %v1811_v12 = vshrl.u32 %v10000_v16, 16  ;;  %v1837_v36 = vshll.u32 %v10070_v48, 16 }
 0x215   : > { %4524 = vmatmul.mubr.bf16.gmra.mrb[184].mxu0 %v10253_v17  ;;  %11759 = vst [vmem:[#allocation6_spill] sm:$0xff] %v10266_v56  ;;  %v10269_v30 = vadd.f32 %v7745_v27, %v7744_v62  ;;  %v7747_v46 = vpop.f32.mrb[30].mxu1  ;;  %v8960_v62 = vld [vmem:[%s11622_s4 + $0x348] sm:$0xff]   ;;  %v1779_v17 = vrot.slane %v1777_v44, 1  ;;  %v1605_v44 = vld [vmem:[#allocation2 + $0x80] sm:$0x3] }
 0x216   : > { %4531 = vmatprep.mubr.bf16.mxu0 %v10257_v33  ;;  %v7850_v41 = vpop.f32.mrb[80].mxu0  ;;  %v7748_v34 = vpop.f32.mrb[31].mxu1  ;;  %v1679_v33 = vld [vmem:[#allocation2 + $0x2d0] sm:$0xff] }
 0x217   : > { %v7851_v24 = vpop.f32.mrb[81].mxu0  ;;  %v10283_v1 = vadd.f32 %v7748_v34, %v7747_v46  ;;  %v10286_v31 = vpack.c.bf16 %v1681_v63, %v1679_v33  ;;  %v8961_v46 = vld [vmem:[%s11622_s4 + $0x308] sm:$0xff]   ;;  %v2236_v33 = vsel %vm2230_vm3, %v2234_v13, %v2235_v40  ;;  %v1780_v26 = vor.u32 %v1779_v17, %v1775_v35  ;;  %v1612_v63 = vld [vmem:[#allocation2 + $0xb8] sm:$0x3] }
 0x218   : > { %v7852_v27 = vadd.f32 %v7851_v24, %v7850_v41  ;;  %v7853_v56 = vpop.f32.mrb[82].mxu0  ;;  %v1782_v41 = vshll.u32 %v10274_v37, 16  ;;  %v2231_v34 = vrot.slane %v9930_v38, 1  ;;  %v2232_v13 = vrot.slane %v10239_v23, 1 }
 0x219   : > { %v7854_v7 = vpop.f32.mrb[83].mxu0  ;;  %v1816_v40 = vor.u32 %v1815_v51, %v1811_v12  ;;  %v10313_v17 = vpack.c.bf16 %v1605_v44, %v1605_v44  ;;  %v2240_v38 = vrot.slane %v9945_v14, 1  ;;  %v2241_v23 = vrot.slane %v10248_v47, 1  ;;  %v8973_v14 = vld [vmem:[%s11622_s4 + $0x380] sm:$0xff]  }
 0x21a   : > { %v7855_v22 = vadd.f32 %v7854_v7, %v7853_v56  ;;  %v10295_v28 = vadd.f32 %v7852_v27, %v10245_v57  ;;  %v1818_v7 = vshll.u32 %v10278_v25, 16  ;;  %v8962_v56 = vld [vmem:[%s11622_s4 + $0x350] sm:$0xff]   ;;  %v1801_v57 = vshll.u32 %v10026_v39, 16 }
 0x21b   : > { %4573 = vmatmul.mubr.bf16.vlgmr.msra.gmra.mrb[136].mxu1 %v1761_v58  ;;  %v7750_v15 = vpop.f32.mrb[32].mxu1 }
 0x21c   : > { %8371 = vmatpush3.bf16.msra.mxu1 %v8957_v55  ;;  %4580 = vmatprep.mubr.bf16.mxu1 %v1797_v5  ;;  %v10306_v55 = vadd.f32 %v7855_v22, %v10250_v32  ;;  %v7751_v24 = vpop.f32.mrb[33].mxu1  ;;  %v1784_v5 = vrot.slane %v1782_v41, 1  ;;  %v8963_v32 = vld [vmem:[%s11622_s4 + $0x310] sm:$0xff]   ;;  %v1820_v51 = vrot.slane %v1818_v7, 1  ;;  %v8964_v41 = vld [vmem:[%s11622_s4 + $0x358] sm:$0xff]   ;;  %v2233_v7 = vsel %vm2230_vm3, %v2231_v34, %v2232_v13 }
 0x21d   : > { %4532 = vmatmul.mubr.bf16.gmra.mrb[188].mxu0 %v10286_v31  ;;  %8372 = vmatprep.subr.bf16.mxu1 %v8960_v62  ;;  %v10311_v27 = vadd.f32 %v7751_v24, %v7750_v15  ;;  %v7753_v58 = vpop.f32.mrb[34].mxu1  ;;  %v1803_v24 = vrot.slane %v1801_v57, 1  ;;  %v1806_v57 = vshll.u32 %v10313_v17, 16  ;;  %v2242_v13 = vsel %vm2230_vm3, %v2240_v38, %v2241_v23  ;;  %v8975_v38 = vld [vmem:[%s11622_s4 + $0x388] sm:$0xff]  }
 0x21e   : > { %4733 = vmatprep.mubr.bf16.mxu0 %v2236_v33  ;;  %v7856_v62 = vpop.f32.mrb[84].mxu0  ;;  %v7754_v35 = vpop.f32.mrb[35].mxu1  ;;  %v10320_v33 = vpack.c.bf16 %v1612_v63, %v1612_v63  ;;  %v1785_v15 = vsel %vm1749_vm2, %v1780_v26, %v1784_v5  ;;  %v1839_v63 = vrot.slane %v1837_v36, 1  ;;  %v1799_v26 = vshrl.u32 %v10026_v39, 16  ;;  %v8965_v5 = vld [vmem:[%s11622_s4 + $0x318] sm:$0xff]  }
 0x21f   : > { %v7857_v22 = vpop.f32.mrb[85].mxu0  ;;  %v10325_v44 = vadd.f32 %v7754_v35, %v7753_v58 }
 0x220   : > { %8373 = vmatpush3.bf16.msra.mxu1 %v8961_v46  ;;  %v7858_v12 = vadd.f32 %v7857_v22, %v7856_v62  ;;  %v7859_v46 = vpop.f32.mrb[86].mxu0  ;;  %v8974_v62 = vld [vmem:[%s11622_s4 + $0x3c8] sm:$0xff]   ;;  %v1842_v36 = vshll.u32 %v10320_v33, 16  ;;  %v1611_v22 = vld [vmem:[#allocation2 + $0xb0] sm:$0x3] }
 0x221   : > { %8374 = vmatprep.subr.bf16.mxu1 %v8962_v56  ;;  %v7860_v47 = vpop.f32.mrb[87].mxu0  ;;  %v1821_v56 = vsel %vm1749_vm2, %v1816_v40, %v1820_v51  ;;  %v1835_v40 = vshrl.u32 %v10070_v48, 16  ;;  %v1804_v51 = vor.u32 %v1803_v24, %v1799_v26  ;;  %v8977_v24 = vld [vmem:[%s11622_s4 + $0x3d0] sm:$0xff]  }
 0x222   : > { %v7861_v58 = vadd.f32 %v7860_v47, %v7859_v46  ;;  %v10342_v34 = vadd.f32 %v7858_v12, %v10269_v30  ;;  %v1825_v46 = vshll.u32 %v10110_v8, 16  ;;  %v1618_v30 = vld [vmem:[#allocation2 + $0xe8] sm:$0x3] }
 0x223   : > { %4581 = vmatmul.mubr.bf16.gmra.mrb[140].mxu1 %v1785_v15  ;;  %v2238_v15 = vrot.slane %v10274_v37, 1  ;;  %v1840_v47 = vor.u32 %v1839_v63, %v1835_v40  ;;  %v1844_v40 = vrot.slane %v1842_v36, 1 }
 0x224   : > { %4588 = vmatprep.mubr.bf16.mxu1 %v1821_v56  ;;  %8375 = vmatpush3.bf16.msra.mxu1 %v8963_v32  ;;  %11760 = vst [vmem:[#allocation9_spill] sm:$0xff] %v10342_v34  ;;  %v8966_v32 = vld [vmem:[%s11622_s4 + $0x360] sm:$0xff]   ;;  %v7756_v35 = vpop.f32.mrb[36].mxu1  ;;  %v10355_v23 = vadd.f32 %v7861_v58, %v10283_v1  ;;  %v10365_v1 = vpack.c.bf16 %v1611_v22, %v1611_v22  ;;  %v2247_v58 = vrot.slane %v10278_v25, 1  ;;  %v1827_v34 = vrot.slane %v1825_v46, 1 }
 0x225   : > { %4734 = vmatmul.mubr.bf16.vlgmr.msra.gmra.mrb[192].mxu0 %v2233_v7  ;;  %8376 = vmatprep.subr.bf16.mxu1 %v8964_v41  ;;  %v7757_v12 = vpop.f32.mrb[37].mxu1  ;;  %v2237_v41 = vrot.slane %v9955_v18, 1  ;;  %v1861_v7 = vshll.u32 %v10116_v59, 16  ;;  %v8967_v18 = vld [vmem:[%s11622_s4 + $0x320] sm:$0xff]  }
 0x226   : > { %4741 = vmatprep.mubr.bf16.mxu0 %v2242_v13  ;;  %8483 = vmatpush3.bf16.msra.mxu0 %v8973_v14  ;;  %11761 = vst [vmem:[#allocation12_spill] sm:$0xff] %v10355_v23  ;;  %v10363_v56 = vadd.f32 %v7757_v12, %v7756_v35  ;;  %v7759_v26 = vpop.f32.mrb[38].mxu1  ;;  %v1808_v13 = vrot.slane %v1806_v57, 1  ;;  %v10372_v23 = vpack.c.bf16 %v1618_v30, %v1618_v30  ;;  %v8968_v57 = vld [vmem:[%s11622_s4 + $0x368] sm:$0xff]  }
 0x227   : > { %8484 = vmatprep.subr.bf16.mxu0 %v8974_v62  ;;  %v7862_v14 = vpop.f32.mrb[88].mxu0  ;;  %v7760_v63 = vpop.f32.mrb[39].mxu1  ;;  %v2246_v62 = vrot.slane %v10000_v16, 1  ;;  %v8979_v16 = vld [vmem:[%s11622_s4 + $0x390] sm:$0xff]   ;;  %v2239_v36 = vsel %vm2230_vm3, %v2237_v41, %v2238_v15  ;;  %v1863_v30 = vrot.slane %v1861_v7, 1  ;;  %v8969_v41 = vld [vmem:[%s11622_s4 + $0x328] sm:$0xff]  }
 0x228   : > { %8377 = vmatpush3.bf16.msra.mxu1 %v8965_v5  ;;  %v7863_v37 = vpop.f32.mrb[89].mxu0  ;;  %v10377_v35 = vadd.f32 %v7760_v63, %v7759_v26  ;;  %v1809_v12 = vsel %vm1749_vm2, %v1804_v51, %v1808_v13  ;;  %v1830_v26 = vshll.u32 %v10365_v1, 16  ;;  %v1866_v7 = vshll.u32 %v10372_v23, 16 }
 0x229   : > { %8378 = vmatprep.subr.bf16.mxu1 %v8966_v32  ;;  %v7864_v22 = vadd.f32 %v7863_v37, %v7862_v14  ;;  %v7865_v5 = vpop.f32.mrb[90].mxu0  ;;  %v1845_v32 = vsel %vm1749_vm2, %v1840_v47, %v1844_v40  ;;  %v8980_v14 = vld [vmem:[%s11622_s4 + $0x3d8] sm:$0xff]   ;;  %v2248_v15 = vsel %vm2230_vm3, %v2246_v62, %v2247_v58  ;;  %v1859_v47 = vshrl.u32 %v10116_v59, 16 }
 0x22a   : > { %8485 = vmatpush3.bf16.msra.mxu0 %v8975_v38  ;;  %v7866_v25 = vpop.f32.mrb[91].mxu0  ;;  %v1823_v38 = vshrl.u32 %v10110_v8, 16  ;;  %v1849_v63 = vshll.u32 %v10128_v21, 16  ;;  %v1624_v40 = vld [vmem:[#allocation2 + $0x118] sm:$0x3] }
 0x22b   : > { %4589 = vmatmul.mubr.bf16.gmra.mrb[144].mxu1 %v1809_v12  ;;  %8486 = vmatprep.subr.bf16.mxu0 %v8977_v24  ;;  %v10389_v51 = vadd.f32 %v7864_v22, %v10311_v27  ;;  %v7867_v46 = vadd.f32 %v7866_v25, %v7865_v5  ;;  %v1617_v27 = vld [vmem:[#allocation2 + $0xe0] sm:$0x3]  ;;  %v8970_v24 = vld [vmem:[%s11622_s4 + $0x370] sm:$0xff]   ;;  %v8981_v62 = vld [vmem:[%s11622_s4 + $0x398] sm:$0xff]   ;;  %v2244_v22 = vrot.slane %v10313_v17, 1  ;;  %v1864_v5 = vor.u32 %v1863_v30, %v1859_v47 }
 0x22c   : > { %4596 = vmatprep.mubr.bf16.mxu1 %v1845_v32  ;;  %8379 = vmatpush3.bf16.msra.mxu1 %v8967_v18  ;;  %v1828_v37 = vor.u32 %v1827_v34, %v1823_v38  ;;  %v8982_v34 = vld [vmem:[%s11622_s4 + $0x3e0] sm:$0xff]   ;;  %v10417_v32 = vpack.c.bf16 %v1617_v27, %v1617_v27  ;;  %v1868_v38 = vrot.slane %v1866_v7, 1 }
 0x22d   : > { %4742 = vmatmul.mubr.bf16.gmra.mrb[196].mxu0 %v2239_v36  ;;  %8380 = vmatprep.subr.bf16.mxu1 %v8968_v57  ;;  %v10403_v13 = vadd.f32 %v7867_v46, %v10325_v44  ;;  %v7762_v18 = vpop.f32.mrb[40].mxu1  ;;  %v2243_v57 = vrot.slane %v10026_v39, 1  ;;  %v1885_v44 = vshll.u32 %v10131_v4, 16  ;;  %v1832_v36 = vrot.slane %v1830_v26, 1  ;;  %v8971_v39 = vld [vmem:[%s11622_s4 + $0x330] sm:$0xff]   ;;  %v8976_v26 = vld [vmem:[%s11622_s4 + $0x378] sm:$0xff]  }
 0x22e   : > { %4749 = vmatprep.mubr.bf16.mxu0 %v2248_v15  ;;  %8487 = vmatpush3.bf16.msra.mxu0 %v8979_v16  ;;  %v7763_v58 = vpop.f32.mrb[41].mxu1  ;;  %v2253_v46 = vrot.slane %v10320_v33, 1  ;;  %v10424_v15 = vpack.c.bf16 %v1624_v40, %v1624_v40 }
 0x22f   : > { %8488 = vmatprep.subr.bf16.mxu0 %v8980_v14  ;;  %v7868_v12 = vpop.f32.mrb[92].mxu0  ;;  %v10415_v25 = vadd.f32 %v7763_v58, %v7762_v18  ;;  %v7765_v16 = vpop.f32.mrb[42].mxu1  ;;  %v2252_v14 = vrot.slane %v10070_v48, 1  ;;  %v1833_v18 = vsel %vm1749_vm2, %v1828_v37, %v1832_v36  ;;  %v1851_v58 = vrot.slane %v1849_v63, 1  ;;  %v8983_v48 = vld [vmem:[%s11622_s4 + $0x3a0] sm:$0xff]  }
 0x230   : > { %8381 = vmatpush3.bf16.msra.mxu1 %v8969_v41  ;;  %v7869_v17 = vpop.f32.mrb[93].mxu0  ;;  %v7766_v30 = vpop.f32.mrb[43].mxu1  ;;  %v2245_v7 = vsel %vm2230_vm3, %v2243_v57, %v2244_v22  ;;  %v1887_v40 = vrot.slane %v1885_v44, 1  ;;  %v8978_v57 = vld [vmem:[%s11622_s4 + $0x338] sm:$0xff]   ;;  %v1890_v44 = vshll.u32 %v10424_v15, 16 }
 0x231   : > { %8382 = vmatprep.subr.bf16.mxu1 %v8970_v24  ;;  %v7870_v47 = vadd.f32 %v7869_v17, %v7868_v12  ;;  %v7871_v41 = vpop.f32.mrb[94].mxu0  ;;  %v10429_v27 = vadd.f32 %v7766_v30, %v7765_v16  ;;  %v1869_v24 = vsel %vm1749_vm2, %v1864_v5, %v1868_v38  ;;  %v8984_v12 = vld [vmem:[%s11622_s4 + $0x3e8] sm:$0xff]   ;;  %v1854_v16 = vshll.u32 %v10417_v32, 16 }
 0x232   : > { %8489 = vmatpush3.bf16.msra.mxu0 %v8981_v62  ;;  %v7872_v33 = vpop.f32.mrb[95].mxu0  ;;  %v1847_v62 = vshrl.u32 %v10128_v21, 16  ;;  %v2254_v22 = vsel %vm2230_vm3, %v2252_v14, %v2253_v46  ;;  %v1883_v5 = vshrl.u32 %v10131_v4, 16  ;;  %v1873_v30 = vshll.u32 %v10140_v45, 16  ;;  %v1630_v38 = vld [vmem:[#allocation2 + $0x148] sm:$0x3] }
 0x233   : > { %4597 = vmatmul.mubr.bf16.gmra.mrb[148].mxu1 %v1833_v18  ;;  %8490 = vmatprep.subr.bf16.mxu0 %v8982_v34  ;;  %v10441_v37 = vadd.f32 %v7870_v47, %v10363_v56  ;;  %v7873_v63 = vadd.f32 %v7872_v33, %v7871_v41  ;;  %v1623_v56 = vld [vmem:[#allocation2 + $0x110] sm:$0x3]  ;;  %v8987_v34 = vld [vmem:[%s11622_s4 + $0x440] sm:$0xff]   ;;  %v8985_v14 = vld [vmem:[%s11622_s4 + $0x3a8] sm:$0xff]   ;;  %v2250_v47 = vrot.slane %v10365_v1, 1  ;;  %v2258_v1 = vrot.slane %v10116_v59, 1 }
 0x234   : > { %4604 = vmatprep.mubr.bf16.mxu1 %v1869_v24  ;;  %8383 = vmatpush3.bf16.msra.mxu1 %v8971_v39  ;;  %v1852_v17 = vor.u32 %v1851_v58, %v1847_v62  ;;  %v1888_v41 = vor.u32 %v1887_v40, %v1883_v5  ;;  %v8986_v18 = vld [vmem:[%s11622_s4 + $0x3f0] sm:$0xff]   ;;  %v10469_v24 = vpack.c.bf16 %v1623_v56, %v1623_v56  ;;  %v2259_v40 = vrot.slane %v10372_v23, 1 }
 0x235   : > { %4750 = vmatmul.mubr.bf16.gmra.mrb[200].mxu0 %v2245_v7  ;;  %8384 = vmatprep.subr.bf16.mxu1 %v8976_v26  ;;  %v10455_v36 = vadd.f32 %v7873_v63, %v10377_v35  ;;  %v7768_v39 = vpop.f32.mrb[44].mxu1  ;;  %v2249_v26 = vrot.slane %v10110_v8, 1  ;;  %v1909_v35 = vshll.u32 %v10143_v2, 16  ;;  %v1856_v7 = vrot.slane %v1854_v16, 1 }
 0x236   : > { %4757 = vmatprep.mubr.bf16.mxu0 %v2254_v22  ;;  %8491 = vmatpush3.bf16.msra.mxu0 %v8983_v48  ;;  %v7769_v46 = vpop.f32.mrb[45].mxu1  ;;  %v1892_v62 = vrot.slane %v1890_v44, 1  ;;  %v1875_v16 = vrot.slane %v1873_v30, 1 }
 0x237   : > { %11762 = vst [vmem:[#allocation15_spill] sm:$0xff] %v10455_v36  ;;  %8492 = vmatprep.subr.bf16.mxu0 %v8984_v12  ;;  %v7874_v58 = vpop.f32.mrb[96].mxu0  ;;  %v10467_v33 = vadd.f32 %v7769_v46, %v7768_v39  ;;  %v7771_v48 = vpop.f32.mrb[46].mxu1  ;;  %v10473_v12 = vpack.c.bf16 %v1630_v38, %v1630_v38  ;;  %v1857_v39 = vsel %vm1749_vm2, %v1852_v17, %v1856_v7  ;;  %v1911_v44 = vrot.slane %v1909_v35, 1  ;;  %v8991_v7 = vld [vmem:[%s11622_s4 + $0x3b8] sm:$0xff]  }
 0x238   : > { %8385 = vmatpush3.bf16.msra.mxu1 %v8978_v57  ;;  %v7875_v63 = vpop.f32.mrb[97].mxu0  ;;  %v7772_v8 = vpop.f32.mrb[47].mxu1  ;;  %v8988_v57 = vld [vmem:[%s11622_s4 + $0x3b0] sm:$0xff]   ;;  %v2251_v59 = vsel %vm2230_vm3, %v2249_v26, %v2250_v47  ;;  %v1893_v23 = vsel %vm1749_vm2, %v1888_v41, %v1892_v62  ;;  %v1871_v38 = vshrl.u32 %v10140_v45, 16  ;;  %v2260_v46 = vsel %vm2230_vm3, %v2258_v1, %v2259_v40  ;;  %v1629_v41 = vld [vmem:[#allocation2 + $0x140] sm:$0x3] }
 0x239   : > { %8594 = vmatprep.subr.bf16.mxu1 %v8987_v34  ;;  %v7876_v22 = vadd.f32 %v7875_v63, %v7874_v58  ;;  %v7877_v5 = vpop.f32.mrb[98].mxu0  ;;  %v10475_v36 = vadd.f32 %v7772_v8, %v7771_v48  ;;  %v8990_v34 = vld [vmem:[%s11622_s4 + $0x3f8] sm:$0xff]   ;;  %v1907_v26 = vshrl.u32 %v10143_v2, 16  ;;  %v1914_v47 = vshll.u32 %v10473_v12, 16 }
 0x23a   : > { %8493 = vmatpush3.bf16.msra.mxu0 %v8985_v14  ;;  %v7878_v56 = vpop.f32.mrb[99].mxu0  ;;  %v1878_v14 = vshll.u32 %v10469_v24, 16  ;;  %v1897_v58 = vshll.u32 %v10152_v29, 16  ;;  %v1636_v48 = vld [vmem:[#allocation2 + $0x178] sm:$0x3]  ;;  %v2255_v8 = vrot.slane %v10128_v21, 1 }
 0x23b   : > { %4605 = vmatmul.mubr.bf16.gmra.mrb[152].mxu1 %v1857_v39  ;;  %8494 = vmatprep.subr.bf16.mxu0 %v8986_v18  ;;  %v10487_v17 = vadd.f32 %v7876_v22, %v10415_v25  ;;  %v7879_v30 = vadd.f32 %v7878_v56, %v7877_v5  ;;  %v1876_v18 = vor.u32 %v1875_v16, %v1871_v38  ;;  %v2256_v1 = vrot.slane %v10417_v32, 1 }
 0x23c   : > { %4612 = vmatprep.mubr.bf16.mxu1 %v1893_v23  ;;  %v1912_v40 = vor.u32 %v1911_v44, %v1907_v26  ;;  %v1880_v39 = vrot.slane %v1878_v14, 1  ;;  %v10506_v16 = vpack.c.bf16 %v1629_v41, %v1629_v41  ;;  %v2265_v23 = vrot.slane %v10424_v15, 1 }
 0x23d   : > { %4758 = vmatmul.mubr.bf16.gmra.mrb[204].mxu0 %v2251_v59  ;;  %v10495_v35 = vadd.f32 %v7879_v30, %v10429_v27  ;;  %v7774_v25 = vpop.f32.mrb[48].mxu1  ;;  %v1933_v27 = vshll.u32 %v10155_v3, 16  ;;  %v2264_v59 = vrot.slane %v10131_v4, 1  ;;  %v1916_v21 = vrot.slane %v1914_v47, 1 }
 0x23e   : > { %4765 = vmatprep.mubr.bf16.mxu0 %v2260_v46  ;;  %8495 = vmatpush3.bf16.msra.mxu0 %v8988_v57  ;;  %v7775_v63 = vpop.f32.mrb[49].mxu1  ;;  %v10510_v30 = vpack.c.bf16 %v1636_v48, %v1636_v48  ;;  %v1899_v46 = vrot.slane %v1897_v58, 1  ;;  %v2257_v14 = vsel %vm2230_vm3, %v2255_v8, %v2256_v1  ;;  %v1895_v47 = vshrl.u32 %v10152_v29, 16 }
 0x23f   : > { %8496 = vmatprep.subr.bf16.mxu0 %v8990_v34  ;;  %v10504_v22 = vadd.f32 %v7775_v63, %v7774_v25  ;;  %v7777_v5 = vpop.f32.mrb[50].mxu1  ;;  %v1881_v34 = vsel %vm1749_vm2, %v1876_v18, %v1880_v39  ;;  %v1917_v41 = vsel %vm1749_vm2, %v1912_v40, %v1916_v21  ;;  %v1935_v25 = vrot.slane %v1933_v27, 1  ;;  %v1635_v63 = vld [vmem:[#allocation2 + $0x170] sm:$0x3]  ;;  %v1642_v27 = vld [vmem:[#allocation2 + $0x1a8] sm:$0x3] }
 0x240   : > { %v7880_v62 = vpop.f32.mrb[100].mxu0  ;;  %v7778_v56 = vpop.f32.mrb[51].mxu1  ;;  %v1902_v48 = vshll.u32 %v10506_v16, 16  ;;  %v2266_v18 = vsel %vm2230_vm3, %v2264_v59, %v2265_v23  ;;  %v1931_v58 = vshrl.u32 %v10155_v3, 16  ;;  %v1900_v1 = vor.u32 %v1899_v46, %v1895_v47 }
 0x241   : > { %v7881_v57 = vpop.f32.mrb[101].mxu0  ;;  %v7779_v38 = vadd.f32 %v7778_v56, %v7777_v5  ;;  %v1921_v40 = vshll.u32 %v10164_v52, 16  ;;  %v2261_v5 = vrot.slane %v10140_v45, 1  ;;  %v2262_v39 = vrot.slane %v10469_v24, 1 }
 0x242   : > { %v7882_v32 = vadd.f32 %v7881_v57, %v7880_v62  ;;  %v7883_v44 = vpop.f32.mrb[102].mxu0  ;;  %8497 = vmatpush3.bf16.msra.mxu0 %v8991_v7  ;;  %v1938_v7 = vshll.u32 %v10510_v30, 16  ;;  %v1936_v57 = vor.u32 %v1935_v25, %v1931_v58  ;;  %v1957_v56 = vshll.u32 %v10167_v49, 16 }
 0x243   : > { %v7884_v26 = vpop.f32.mrb[103].mxu0  ;;  %4613 = vmatmul.mubr.bf16.gmra.mrb[156].mxu1 %v1881_v34  ;;  %v2270_v46 = vrot.slane %v10143_v2, 1  ;;  %v1923_v47 = vrot.slane %v1921_v40, 1  ;;  %v1955_v40 = vshrl.u32 %v10167_v49, 16 }
 0x244   : > { %v10516_v4 = vadd.f32 %v7882_v32, %v10467_v33  ;;  %v7885_v15 = vadd.f32 %v7884_v26, %v7883_v44  ;;  %4620 = vmatprep.mubr.bf16.mxu1 %v1917_v41  ;;  %v1904_v32 = vrot.slane %v1902_v48, 1  ;;  %v2271_v26 = vrot.slane %v10473_v12, 1 }
 0x245   : > { %4766 = vmatmul.mubr.bf16.gmra.mrb[208].mxu0 %v2257_v14  ;;  %v7780_v33 = vpop.f32.mrb[52].mxu1  ;;  %v1940_v14 = vrot.slane %v1938_v7, 1  ;;  %v10534_v41 = vpack.c.bf16 %v1642_v27, %v1642_v27  ;;  %v2263_v48 = vsel %vm2230_vm3, %v2261_v5, %v2262_v39  ;;  %v1919_v7 = vshrl.u32 %v10164_v52, 16 }
 0x246   : > { %v10524_v8 = vadd.f32 %v7885_v15, %v10475_v36  ;;  %4773 = vmatprep.mubr.bf16.mxu0 %v2266_v18  ;;  %v7781_v62 = vpop.f32.mrb[53].mxu1  ;;  %v10530_v36 = vpack.c.bf16 %v1635_v63, %v1635_v63  ;;  %v1905_v15 = vsel %vm1749_vm2, %v1900_v1, %v1904_v32  ;;  %v1959_v63 = vrot.slane %v1957_v56, 1  ;;  %v1648_v56 = vld [vmem:[#allocation2 + $0x1d8] sm:$0x3] }
 0x247   : > { %v7782_v23 = vadd.f32 %v7781_v62, %v7780_v33  ;;  %v7783_v21 = vpop.f32.mrb[54].mxu1  ;;  %v1941_v58 = vsel %vm1749_vm2, %v1936_v57, %v1940_v14  ;;  %v2272_v1 = vsel %vm2230_vm3, %v2270_v46, %v2271_v26  ;;  %v1962_v27 = vshll.u32 %v10534_v41, 16  ;;  %v1641_v62 = vld [vmem:[#allocation2 + $0x1a0] sm:$0x3] }
 0x248   : > { %v7886_v59 = vpop.f32.mrb[104].mxu0  ;;  %v7784_v34 = vpop.f32.mrb[55].mxu1  ;;  %v1926_v33 = vshll.u32 %v10530_v36, 16  ;;  %v1945_v57 = vshll.u32 %v10174_v60, 16  ;;  %v2268_v32 = vrot.slane %v10506_v16, 1 }
 0x249   : > { %v7887_v44 = vpop.f32.mrb[105].mxu0  ;;  %v7785_v25 = vadd.f32 %v7784_v34, %v7783_v21  ;;  %v2267_v21 = vrot.slane %v10152_v29, 1  ;;  %v1981_v34 = vshll.u32 %v10176_v43, 16 }
 0x24a   : > { %v7888_v45 = vadd.f32 %v7887_v44, %v7886_v59  ;;  %v7889_v24 = vpop.f32.mrb[106].mxu0  ;;  %v1960_v44 = vor.u32 %v1959_v63, %v1955_v40 }
 0x24b   : > { %v7890_v18 = vpop.f32.mrb[107].mxu0  ;;  %4621 = vmatmul.mubr.bf16.gmra.mrb[160].mxu1 %v1905_v15 }
 0x24c   : > { %v10540_v2 = vadd.f32 %v7888_v45, %v10504_v22  ;;  %v7891_v12 = vadd.f32 %v7890_v18, %v7889_v24  ;;  %4628 = vmatprep.mubr.bf16.mxu1 %v1941_v58  ;;  %v1924_v22 = vor.u32 %v1923_v47, %v1919_v7  ;;  %v1928_v45 = vrot.slane %v1926_v33, 1 }
 0x24d   : > { %4774 = vmatmul.mubr.bf16.gmra.mrb[212].mxu0 %v2263_v48  ;;  %v7786_v39 = vpop.f32.mrb[56].mxu1  ;;  %v2276_v47 = vrot.slane %v10155_v3, 1  ;;  %v2277_v18 = vrot.slane %v10510_v30, 1  ;;  %v1964_v48 = vrot.slane %v1962_v27, 1  ;;  %v10557_v58 = vpack.c.bf16 %v1648_v56, %v1648_v56 }
 0x24e   : > { %v10547_v5 = vadd.f32 %v7891_v12, %v7779_v38  ;;  %4781 = vmatprep.mubr.bf16.mxu0 %v2272_v1  ;;  %v7787_v59 = vpop.f32.mrb[57].mxu1  ;;  %v10553_v38 = vpack.c.bf16 %v1641_v62, %v1641_v62  ;;  %v1929_v12 = vsel %vm1749_vm2, %v1924_v22, %v1928_v45  ;;  %v1947_v7 = vrot.slane %v1945_v57, 1 }
 0x24f   : > { %v7788_v26 = vadd.f32 %v7787_v59, %v7786_v39  ;;  %v7789_v14 = vpop.f32.mrb[58].mxu1  ;;  %v2269_v33 = vsel %vm2230_vm3, %v2267_v21, %v2268_v32  ;;  %v1965_v40 = vsel %vm1749_vm2, %v1960_v44, %v1964_v48  ;;  %v1983_v62 = vrot.slane %v1981_v34, 1  ;;  %v1647_v59 = vld [vmem:[#allocation2 + $0x1d0] sm:$0x3]  ;;  %v1654_v34 = vld [vmem:[#allocation2 + $0x208] sm:$0x3] }
 0x250   : > { %v7892_v46 = vpop.f32.mrb[108].mxu0  ;;  %v7790_v15 = vpop.f32.mrb[59].mxu1  ;;  %v1943_v30 = vshrl.u32 %v10174_v60, 16  ;;  %v1950_v27 = vshll.u32 %v10553_v38, 16  ;;  %v2278_v56 = vsel %vm2230_vm3, %v2276_v47, %v2277_v18  ;;  %v1979_v22 = vshrl.u32 %v10176_v43, 16 }
 0x251   : > { %v7893_v24 = vpop.f32.mrb[109].mxu0  ;;  %v7791_v63 = vadd.f32 %v7790_v15, %v7789_v14  ;;  %v1986_v57 = vshll.u32 %v10557_v58, 16  ;;  %v1969_v44 = vshll.u32 %v10181_v50, 16  ;;  %v2273_v14 = vrot.slane %v10164_v52, 1 }
 0x252   : > { %v7894_v29 = vadd.f32 %v7893_v24, %v7892_v46  ;;  %v7895_v16 = vpop.f32.mrb[110].mxu0  ;;  %v2274_v45 = vrot.slane %v10530_v36, 1  ;;  %v1984_v24 = vor.u32 %v1983_v62, %v1979_v22  ;;  %v2005_v15 = vshll.u32 %v10184_v6, 16 }
 0x253   : > { %v7896_v1 = vpop.f32.mrb[111].mxu0  ;;  %4629 = vmatmul.mubr.bf16.gmra.mrb[164].mxu1 %v1929_v12 }
 0x254   : > { %v10562_v39 = vadd.f32 %v7894_v29, %v7782_v23  ;;  %v7897_v3 = vadd.f32 %v7896_v1, %v7895_v16  ;;  %4636 = vmatprep.mubr.bf16.mxu1 %v1965_v40  ;;  %v1948_v23 = vor.u32 %v1947_v7, %v1943_v30  ;;  %v1952_v29 = vrot.slane %v1950_v27, 1 }
 0x255   : > { %4782 = vmatmul.mubr.bf16.gmra.mrb[216].mxu0 %v2269_v33  ;;  %v2282_v7 = vrot.slane %v10167_v49, 1  ;;  %v2283_v1 = vrot.slane %v10534_v41, 1  ;;  %v1988_v33 = vrot.slane %v1986_v57, 1  ;;  %v10579_v40 = vpack.c.bf16 %v1654_v34, %v1654_v34 }
 0x256   : > { %v10569_v21 = vadd.f32 %v7897_v3, %v7785_v25  ;;  %4789 = vmatprep.mubr.bf16.mxu0 %v2278_v56  ;;  %v7792_v32 = vpop.f32.mrb[60].mxu1  ;;  %v10575_v25 = vpack.c.bf16 %v1647_v59, %v1647_v59  ;;  %v1953_v3 = vsel %vm1749_vm2, %v1948_v23, %v1952_v29  ;;  %v1971_v30 = vrot.slane %v1969_v44, 1 }
 0x257   : > { %v7793_v46 = vpop.f32.mrb[61].mxu1  ;;  %v2275_v27 = vsel %vm2230_vm3, %v2273_v14, %v2274_v45  ;;  %v1989_v22 = vsel %vm1749_vm2, %v1984_v24, %v1988_v33  ;;  %v2007_v59 = vrot.slane %v2005_v15, 1  ;;  %v1967_v41 = vshrl.u32 %v10181_v50, 16  ;;  %v1660_v15 = vld [vmem:[#allocation2 + $0x238] sm:$0x3] }
 0x258   : > { %v7898_v47 = vpop.f32.mrb[112].mxu0  ;;  %v7794_v18 = vadd.f32 %v7793_v46, %v7792_v32  ;;  %v7795_v48 = vpop.f32.mrb[62].mxu1  ;;  %v1974_v57 = vshll.u32 %v10575_v25, 16  ;;  %v2284_v34 = vsel %vm2230_vm3, %v2282_v7, %v2283_v1  ;;  %v2003_v23 = vshrl.u32 %v10184_v6, 16  ;;  %v1653_v46 = vld [vmem:[#allocation2 + $0x200] sm:$0x3] }
 0x259   : > { %v7899_v16 = vpop.f32.mrb[113].mxu0  ;;  %v7796_v12 = vpop.f32.mrb[63].mxu1  ;;  %v2010_v44 = vshll.u32 %v10579_v40, 16  ;;  %v1993_v24 = vshll.u32 %v10189_v54, 16  ;;  %v2280_v29 = vrot.slane %v10553_v38, 1 }
 0x25a   : > { %v7900_v52 = vadd.f32 %v7899_v16, %v7898_v47  ;;  %v7901_v36 = vpop.f32.mrb[114].mxu0  ;;  %v7797_v62 = vadd.f32 %v7796_v12, %v7795_v48  ;;  %v2279_v48 = vrot.slane %v10174_v60, 1  ;;  %v2008_v16 = vor.u32 %v2007_v59, %v2003_v23 }
 0x25b   : > { %v7902_v56 = vpop.f32.mrb[115].mxu0  ;;  %4637 = vmatmul.mubr.bf16.gmra.mrb[168].mxu1 %v1953_v3  ;;  %v2029_v12 = vshll.u32 %v10192_v42, 16 }
 0x25c   : > { %v10584_v32 = vadd.f32 %v7900_v52, %v7788_v26  ;;  %v7903_v49 = vadd.f32 %v7902_v56, %v7901_v36  ;;  %4644 = vmatprep.mubr.bf16.mxu1 %v1989_v22  ;;  %v1972_v26 = vor.u32 %v1971_v30, %v1967_v41  ;;  %v1976_v52 = vrot.slane %v1974_v57, 1 }
 0x25d   : > { %4790 = vmatmul.mubr.bf16.gmra.mrb[220].mxu0 %v2275_v27  ;;  %v2288_v30 = vrot.slane %v10176_v43, 1  ;;  %v2289_v56 = vrot.slane %v10557_v58, 1  ;;  %v2012_v27 = vrot.slane %v2010_v44, 1  ;;  %v10601_v22 = vpack.c.bf16 %v1660_v15, %v1660_v15 }
 0x25e   : > { %v10591_v14 = vadd.f32 %v7903_v49, %v7791_v63  ;;  %4797 = vmatprep.mubr.bf16.mxu0 %v2284_v34  ;;  %v7798_v45 = vpop.f32.mrb[64].mxu1  ;;  %v10597_v63 = vpack.c.bf16 %v1653_v46, %v1653_v46  ;;  %v1977_v49 = vsel %vm1749_vm2, %v1972_v26, %v1976_v52  ;;  %v1995_v41 = vrot.slane %v1993_v24, 1 }
 0x25f   : > { %v7799_v47 = vpop.f32.mrb[65].mxu1  ;;  %v2281_v57 = vsel %vm2230_vm3, %v2279_v48, %v2280_v29  ;;  %v2013_v23 = vsel %vm1749_vm2, %v2008_v16, %v2012_v27  ;;  %v2031_v46 = vrot.slane %v2029_v12, 1  ;;  %v1991_v58 = vshrl.u32 %v10189_v54, 16  ;;  %v1666_v12 = vld [vmem:[#allocation2 + $0x268] sm:$0x3] }
 0x260   : > { %v7904_v7 = vpop.f32.mrb[116].mxu0  ;;  %v7800_v1 = vadd.f32 %v7799_v47, %v7798_v45  ;;  %v7801_v33 = vpop.f32.mrb[66].mxu1  ;;  %v1998_v44 = vshll.u32 %v10597_v63, 16  ;;  %v2290_v15 = vsel %vm2230_vm3, %v2288_v30, %v2289_v56  ;;  %v2027_v26 = vshrl.u32 %v10192_v42, 16  ;;  %v1659_v47 = vld [vmem:[#allocation2 + $0x230] sm:$0x3] }
 0x261   : > { %v7905_v36 = vpop.f32.mrb[117].mxu0  ;;  %v7802_v3 = vpop.f32.mrb[67].mxu1  ;;  %v2034_v24 = vshll.u32 %v10601_v22, 16  ;;  %v2017_v16 = vshll.u32 %v10199_v9, 16  ;;  %v2286_v52 = vrot.slane %v10575_v25, 1 }
 0x262   : > { %v7906_v60 = vadd.f32 %v7905_v36, %v7904_v7  ;;  %v7907_v38 = vpop.f32.mrb[118].mxu0  ;;  %v7803_v59 = vadd.f32 %v7802_v3, %v7801_v33  ;;  %v2285_v33 = vrot.slane %v10181_v50, 1  ;;  %v2032_v36 = vor.u32 %v2031_v46, %v2027_v26 }
 0x263   : > { %v7908_v34 = vpop.f32.mrb[119].mxu0  ;;  %4645 = vmatmul.mubr.bf16.gmra.mrb[172].mxu1 %v1977_v49  ;;  %v2053_v3 = vshll.u32 %v10204_v10, 16  ;;  %v10625_v50 = vpack.c.bf16 %v1666_v12, %v1666_v12  ;;  %v1665_v12 = vld [vmem:[#allocation2 + $0x260] sm:$0x3] }
 0x264   : > { %v10606_v45 = vadd.f32 %v7906_v60, %v7794_v18  ;;  %v7909_v43 = vadd.f32 %v7908_v34, %v7907_v38  ;;  %4652 = vmatprep.mubr.bf16.mxu1 %v2013_v23  ;;  %v1996_v18 = vor.u32 %v1995_v41, %v1991_v58  ;;  %v10621_v60 = vpack.c.bf16 %v1659_v47, %v1659_v47 }
 0x265   : > { %4798 = vmatmul.mubr.bf16.gmra.mrb[224].mxu0 %v2281_v57  ;;  %v2294_v41 = vrot.slane %v10184_v6, 1  ;;  %v2295_v34 = vrot.slane %v10579_v40, 1  ;;  %v2036_v57 = vrot.slane %v2034_v24, 1  ;;  %v2019_v58 = vrot.slane %v2017_v16, 1 }
 0x266   : > { %v10613_v48 = vadd.f32 %v7909_v43, %v7797_v62  ;;  %4805 = vmatprep.mubr.bf16.mxu0 %v2290_v15  ;;  %v7804_v29 = vpop.f32.mrb[68].mxu1  ;;  %v2000_v62 = vrot.slane %v1998_v44, 1  ;;  %v2287_v44 = vsel %vm2230_vm3, %v2285_v33, %v2286_v52  ;;  %v2055_v47 = vrot.slane %v2053_v3, 1  ;;  %v1672_v3 = vld [vmem:[#allocation2 + $0x298] sm:$0x3] }
 0x267   : > { %v7805_v7 = vpop.f32.mrb[69].mxu1  ;;  %v2037_v26 = vsel %vm1749_vm2, %v2032_v36, %v2036_v57  ;;  %v2015_v24 = vshrl.u32 %v10199_v9, 16  ;;  %v2051_v16 = vshrl.u32 %v10204_v10, 16  ;;  %v2041_v33 = vshll.u32 %v10211_v11, 16 }
 0x268   : > { %v7910_v30 = vpop.f32.mrb[120].mxu0  ;;  %v10619_v56 = vadd.f32 %v7805_v7, %v7804_v29  ;;  %v7807_v27 = vpop.f32.mrb[70].mxu1  ;;  %v2001_v43 = vsel %vm1749_vm2, %v1996_v18, %v2000_v62  ;;  %v2022_v29 = vshll.u32 %v10621_v60, 16  ;;  %v2296_v18 = vsel %vm2230_vm3, %v2294_v41, %v2295_v34 }
 0x269   : > { %v7911_v38 = vpop.f32.mrb[121].mxu0  ;;  %v7808_v49 = vpop.f32.mrb[71].mxu1  ;;  %v2058_v7 = vshll.u32 %v10625_v50, 16  ;;  %v2020_v36 = vor.u32 %v2019_v58, %v2015_v24  ;;  %v2056_v62 = vor.u32 %v2055_v47, %v2051_v16  ;;  %v2301_v58 = vrot.slane %v10601_v22, 1 }
 0x26a   : > { %v7912_v25 = vadd.f32 %v7911_v38, %v7910_v30  ;;  %v7913_v23 = vpop.f32.mrb[122].mxu0  ;;  %v10627_v46 = vadd.f32 %v7808_v49, %v7807_v27  ;;  %v2291_v27 = vrot.slane %v10189_v54, 1  ;;  %v10643_v38 = vpack.c.bf16 %v1665_v12, %v1665_v12 }
 0x26b   : > { %v7914_v15 = vpop.f32.mrb[123].mxu0  ;;  %4653 = vmatmul.mubr.bf16.gmra.mrb[176].mxu1 %v2001_v43  ;;  %v2077_v49 = vshll.u32 %v10214_v19, 16  ;;  %v10649_v54 = vpack.c.bf16 %v1672_v3, %v1672_v3 }
 0x26c   : > { %v10632_v6 = vadd.f32 %v7912_v25, %v7800_v1  ;;  %v7915_v40 = vadd.f32 %v7914_v15, %v7913_v23  ;;  %4660 = vmatprep.mubr.bf16.mxu1 %v2037_v26  ;;  %v2292_v25 = vrot.slane %v10597_v63, 1  ;;  %v2024_v23 = vrot.slane %v2022_v29, 1 }
 0x26d   : > { %4806 = vmatmul.mubr.bf16.gmra.mrb[228].mxu0 %v2287_v44  ;;  %v2060_v44 = vrot.slane %v2058_v7, 1  ;;  %v2043_v26 = vrot.slane %v2041_v33, 1  ;;  %v2046_v29 = vshll.u32 %v10643_v38, 16  ;;  %v2079_v22 = vrot.slane %v2077_v49, 1 }
 0x26e   : > { %v10640_v52 = vadd.f32 %v7915_v40, %v7803_v59  ;;  %4813 = vmatprep.mubr.bf16.mxu0 %v2296_v18  ;;  %v7938_v1 = vpop.f32.mrb[72].mxu1  ;;  %v2300_v59 = vrot.slane %v10192_v42, 1  ;;  %v2025_v12 = vsel %vm1749_vm2, %v2020_v36, %v2024_v23  ;;  %v2039_v42 = vshrl.u32 %v10211_v11, 16 }
 0x26f   : > { %v7939_v30 = vpop.f32.mrb[73].mxu1  ;;  %v2061_v63 = vsel %vm1749_vm2, %v2056_v62, %v2060_v44  ;;  %v2082_v62 = vshll.u32 %v10649_v54, 16  ;;  %v2048_v23 = vrot.slane %v2046_v29, 1  ;;  %v11763_v29 = vld [vmem:[#allocation25_spill] sm:$0xff] }
 0x270   : > { %v7916_v41 = vpop.f32.mrb[124].mxu0  ;;  %v7940_v34 = vadd.f32 %v7939_v30, %v7938_v1  ;;  %v7941_v57 = vpop.f32.mrb[74].mxu1  ;;  %v2293_v1 = vsel %vm2230_vm3, %v2291_v27, %v2292_v25  ;;  %v2044_v3 = vor.u32 %v2043_v26, %v2039_v42  ;;  %v2075_v30 = vshrl.u32 %v10214_v19, 16 }
 0x271   : > { %v7917_v43 = vpop.f32.mrb[125].mxu0  ;;  %v7942_v15 = vpop.f32.mrb[75].mxu1  ;;  %v2065_v27 = vshll.u32 %v10227_v0, 16  ;;  %v2298_v25 = vrot.slane %v10621_v60, 1 }
 0x272   : > { %v7918_v47 = vadd.f32 %v7917_v43, %v7916_v41  ;;  %v7919_v40 = vpop.f32.mrb[126].mxu0  ;;  %v7943_v24 = vadd.f32 %v7942_v15, %v7941_v57  ;;  %v3965_v18 = vadd.f32 %v7940_v34, %v10197_v53  ;;  %v2302_v53 = vsel %vm2230_vm3, %v2300_v59, %v2301_v58  ;;  %v1671_v41 = vld [vmem:[#allocation2 + $0x290] sm:$0x3]  ;;  %v1678_v57 = vld [vmem:[#allocation2 + $0x2c8] sm:$0x3] }
 0x273   : > { %v7920_v16 = vpop.f32.mrb[127].mxu0  ;;  %4661 = vmatmul.mubr.bf16.gmra.mrb[180].mxu1 %v2025_v12  ;;  %v2297_v34 = vrot.slane %v10199_v9, 1  ;;  %v2080_v59 = vor.u32 %v2079_v22, %v2075_v30  ;;  %v2101_v43 = vshll.u32 %v10232_v20, 16  ;;  %v10672_v26 = vpack.c.bf16 %v1671_v41, %v1671_v41 }
 0x274   : > { %v10657_v7 = vadd.f32 %v7918_v47, %v10619_v56  ;;  %v7921_v33 = vadd.f32 %v7920_v16, %v7919_v40  ;;  %4668 = vmatprep.mubr.bf16.mxu1 %v2061_v63  ;;  %v3968_v36 = vadd.f32 %v7943_v24, %v10202_v61  ;;  %v2049_v9 = vsel %vm1749_vm2, %v2044_v3, %v2048_v23  ;;  %v11765_v23 = vld [vmem:[#allocation5_spill] sm:$0xff] }
 0x275   : > { %4814 = vmatmul.mubr.bf16.gmra.mrb[232].mxu0 %v2293_v1  ;;  %v2307_v24 = vrot.slane %v10625_v50, 1  ;;  %v2084_v12 = vrot.slane %v2082_v62, 1  ;;  %v10676_v16 = vpack.c.bf16 %v1678_v57, %v1678_v57  ;;  %v2063_v30 = vshrl.u32 %v10227_v0, 16  ;;  %v11764_v62 = vld [vmem:[#allocation4_spill] sm:$0xff] }
 0x276   : > { %v10665_v49 = vadd.f32 %v7921_v33, %v10627_v46  ;;  %4821 = vmatprep.mubr.bf16.mxu0 %v2302_v53  ;;  %v7944_v56 = vpop.f32.mrb[76].mxu1  ;;  %v2306_v46 = vrot.slane %v10204_v10, 1  ;;  %v2067_v33 = vrot.slane %v2065_v27, 1  ;;  %v2299_v10 = vsel %vm2230_vm3, %v2297_v34, %v2298_v25 }
 0x277   : > { %v7945_v61 = vpop.f32.mrb[77].mxu1  ;;  %v2085_v53 = vsel %vm1749_vm2, %v2080_v59, %v2084_v12  ;;  %v2103_v3 = vrot.slane %v2101_v43, 1  ;;  %v2070_v57 = vshll.u32 %v10672_v26, 16  ;;  %v2099_v34 = vshrl.u32 %v10232_v20, 16  ;;  %v11766_v12 = vld [vmem:[#allocation8_spill] sm:$0xff] }
 0x278   : > { %v8050_v15 = vpop.f32.mrb[128].mxu0  ;;  %v7946_v58 = vadd.f32 %v7945_v61, %v7944_v56  ;;  %v7947_v44 = vpop.f32.mrb[78].mxu1  ;;  %v1677_v61 = vld [vmem:[#allocation2 + $0x2c0] sm:$0x3]  ;;  %v2308_v27 = vsel %vm2230_vm3, %v2306_v46, %v2307_v24  ;;  %v2106_v25 = vshll.u32 %v10676_v16, 16  ;;  %v2089_v59 = vshll.u32 %v11765_v23, 16 }
 0x279   : > { %v8051_v47 = vpop.f32.mrb[129].mxu0  ;;  %v7948_v40 = vpop.f32.mrb[79].mxu1  ;;  %v2068_v43 = vor.u32 %v2067_v33, %v2063_v30  ;;  %v2125_v46 = vshll.u32 %v11766_v12, 16  ;;  %v2313_v33 = vrot.slane %v10649_v54, 1 }
 0x27a   : > { %v8052_v60 = vadd.f32 %v8051_v47, %v8050_v15  ;;  %v8053_v63 = vpop.f32.mrb[130].mxu0  ;;  %v7949_v42 = vadd.f32 %v7948_v40, %v7947_v44  ;;  %v3973_v22 = vadd.f32 %v7946_v58, %v11763_v29  ;;  %v1684_v58 = vld [vmem:[#allocation2 + $0x2f8] sm:$0x3]  ;;  %v2303_v47 = vrot.slane %v10211_v11, 1 }
 0x27b   : > { %v8054_v1 = vpop.f32.mrb[131].mxu0  ;;  %4669 = vmatmul.mubr.bf16.gmra.mrb[184].mxu1 %v2049_v9  ;;  %v2104_v40 = vor.u32 %v2103_v3, %v2099_v34  ;;  %v10693_v9 = vpack.c.bf16 %v1677_v61, %v1677_v61  ;;  %v2072_v29 = vrot.slane %v2070_v57, 1  ;;  %v2091_v30 = vrot.slane %v2089_v59, 1 }
 0x27c   : > { %v10682_v41 = vadd.f32 %v8052_v60, %v3965_v18  ;;  %v8055_v50 = vadd.f32 %v8054_v1, %v8053_v63  ;;  %4676 = vmatprep.mubr.bf16.mxu1 %v2085_v53  ;;  %v3976_v56 = vadd.f32 %v7949_v42, %v11764_v62  ;;  %v2304_v42 = vrot.slane %v10643_v38, 1 }
 0x27d   : > { %4822 = vmatmul.mubr.bf16.gmra.mrb[236].mxu0 %v2299_v10  ;;  %v2108_v53 = vrot.slane %v2106_v25, 1  ;;  %v10699_v11 = vpack.c.bf16 %v1684_v58, %v1684_v58  ;;  %v2073_v34 = vsel %vm1749_vm2, %v2068_v43, %v2072_v29  ;;  %v2094_v57 = vshll.u32 %v10693_v9, 16  ;;  %v11768_v58 = vld [vmem:[#allocation3_spill] sm:$0xff]  ;;  %v1683_v29 = vld [vmem:[#allocation2 + $0x2f0] sm:$0x3] }
 0x27e   : > { %v10690_v15 = vadd.f32 %v8055_v50, %v3968_v36  ;;  %4829 = vmatprep.mubr.bf16.mxu0 %v2308_v27  ;;  %v7950_v18 = vpop.f32.mrb[80].mxu1  ;;  %v2312_v36 = vrot.slane %v10214_v19, 1  ;;  %v11767_v50 = vld [vmem:[#allocation7_spill] sm:$0xff]  ;;  %v2087_v19 = vshrl.u32 %v11765_v23, 16  ;;  %v2127_v54 = vrot.slane %v2125_v46, 1 }
 0x27f   : > { %v7951_v44 = vpop.f32.mrb[81].mxu1  ;;  %v2109_v38 = vsel %vm1749_vm2, %v2104_v40, %v2108_v53  ;;  %v2130_v40 = vshll.u32 %v10699_v11, 16  ;;  %v2113_v46 = vshll.u32 %v10286_v31, 16  ;;  %v2309_v53 = vrot.slane %v10227_v0, 1  ;;  %v11769_v0 = vld [vmem:[#allocation11_spill] sm:$0xff] }
 0x280   : > { %v8056_v24 = vpop.f32.mrb[132].mxu0  ;;  %v7952_v60 = vadd.f32 %v7951_v44, %v7950_v18  ;;  %v7953_v63 = vpop.f32.mrb[82].mxu1  ;;  %v2314_v43 = vsel %vm2230_vm3, %v2312_v36, %v2313_v33 }
 0x281   : > { %v8057_v1 = vpop.f32.mrb[133].mxu0  ;;  %v7954_v10 = vpop.f32.mrb[83].mxu1 }
 0x282   : > { %v8058_v3 = vadd.f32 %v8057_v1, %v8056_v24  ;;  %v3981_v62 = vadd.f32 %v7952_v60, %v11767_v50  ;;  %v8059_v61 = vpop.f32.mrb[134].mxu0  ;;  %v7955_v27 = vadd.f32 %v7954_v10, %v7953_v63  ;;  %v2305_v24 = vsel %vm2230_vm3, %v2303_v47, %v2304_v42 }
 0x283   : > { %v8060_v18 = vpop.f32.mrb[135].mxu0  ;;  %4677 = vmatmul.mubr.bf16.gmra.mrb[188].mxu1 %v2073_v34  ;;  %v2092_v60 = vor.u32 %v2091_v30, %v2087_v19  ;;  %v2123_v63 = vshrl.u32 %v11766_v12, 16  ;;  %v2310_v47 = vrot.slane %v10672_v26, 1  ;;  %v2096_v42 = vrot.slane %v2094_v57, 1 }
 0x284   : > { %v10706_v25 = vadd.f32 %v8058_v3, %v3973_v22  ;;  %v8061_v59 = vadd.f32 %v8060_v18, %v8059_v61  ;;  %v3984_v44 = vadd.f32 %v7955_v27, %v11768_v58  ;;  %4684 = vmatprep.mubr.bf16.mxu1 %v2109_v38  ;;  %v10718_v50 = vpack.c.bf16 %v1683_v29, %v1683_v29  ;;  %v4866_v58 = vld [vmem:[#allocation2 + $0x78] sm:$0xff] }
 0x285   : > { %4830 = vmatmul.mubr.bf16.gmra.mrb[240].mxu0 %v2305_v24  ;;  %v2128_v3 = vor.u32 %v2127_v54, %v2123_v63  ;;  %v2318_v34 = vrot.slane %v10232_v20, 1  ;;  %v2319_v18 = vrot.slane %v10676_v16, 1  ;;  %v2132_v38 = vrot.slane %v2130_v40, 1  ;;  %v11770_v16 = vld [vmem:[#allocation6_spill] sm:$0xff] }
 0x286   : > { %v10713_v1 = vadd.f32 %v8061_v59, %v3976_v56  ;;  %4837 = vmatprep.mubr.bf16.mxu0 %v2314_v43  ;;  %v7956_v22 = vpop.f32.mrb[84].mxu1  ;;  %v2097_v56 = vsel %vm1749_vm2, %v2092_v60, %v2096_v42  ;;  %v2115_v54 = vrot.slane %v2113_v46, 1  ;;  %v2311_v43 = vsel %vm2230_vm3, %v2309_v53, %v2310_v47 }
 0x287   : > { %v7957_v10 = vpop.f32.mrb[85].mxu1  ;;  %v2133_v63 = vsel %vm1749_vm2, %v2128_v3, %v2132_v38  ;;  %v2111_v60 = vshrl.u32 %v10286_v31, 16  ;;  %v2320_v46 = vsel %vm2230_vm3, %v2318_v34, %v2319_v18  ;;  %v2324_v18 = vrot.slane %v11766_v12, 1 }
 0x288   : > { %v8062_v36 = vpop.f32.mrb[136].mxu0  ;;  %v7958_v33 = vadd.f32 %v7957_v10, %v7956_v22  ;;  %v7959_v30 = vpop.f32.mrb[86].mxu1  ;;  %v2118_v22 = vshll.u32 %v10718_v50, 16  ;;  %v4864_v10 = vld [vmem:[#allocation2 + $0x68] sm:$0xff] }
 0x289   : > { %v8063_v61 = vpop.f32.mrb[137].mxu0  ;;  %v7960_v27 = vpop.f32.mrb[87].mxu1  ;;  %v10732_v42 = vpack.c.bf16 %v4866_v58, %v4864_v10  ;;  %v2116_v3 = vor.u32 %v2115_v54, %v2111_v60 }
 0x28a   : > { %v8064_v19 = vadd.f32 %v8063_v61, %v8062_v36  ;;  %v3989_v59 = vadd.f32 %v7958_v33, %v11769_v0  ;;  %v8065_v26 = vpop.f32.mrb[138].mxu0  ;;  %v7961_v57 = vadd.f32 %v7960_v27, %v7959_v30  ;;  %v2315_v27 = vrot.slane %v11765_v23, 1  ;;  %v4863_v23 = vld [vmem:[#allocation2 + $0x60] sm:$0xff] }
 0x28b   : > { %v8066_v24 = vpop.f32.mrb[139].mxu0  ;;  %4685 = vmatmul.mubr.bf16.gmra.mrb[192].mxu1 %v2097_v56  ;;  %v2316_v56 = vrot.slane %v10693_v9, 1  ;;  %v2120_v38 = vrot.slane %v2118_v22, 1 }
 0x28c   : > { %v10727_v29 = vadd.f32 %v8064_v19, %v3981_v62  ;;  %v8067_v20 = vadd.f32 %v8066_v24, %v8065_v26  ;;  %v3992_v40 = vadd.f32 %v7961_v57, %v11770_v16  ;;  %4692 = vmatprep.mubr.bf16.mxu1 %v2133_v63  ;;  %v4868_v62 = vld [vmem:[#allocation2 + $0x88] sm:$0x3]  ;;  %v4865_v19 = vld [vmem:[#allocation2 + $0x70] sm:$0xff]  ;;  %v5038_v26 = vshll.u32 %v10732_v42, 16 }
 0x28d   : > { %4838 = vmatmul.mubr.bf16.gmra.mrb[244].mxu0 %v2311_v43  ;;  %v2121_v43 = vsel %vm1749_vm2, %v2116_v3, %v2120_v38  ;;  %v4872_v63 = vld [vmem:[#allocation2 + $0xa8] sm:$0xff]  ;;  %v10743_v60 = vpack.c.bf16 %v4865_v19, %v4863_v23  ;;  %v2317_v22 = vsel %vm2230_vm3, %v2315_v27, %v2316_v56 }
 0x28e   : > { %v10734_v53 = vadd.f32 %v8067_v20, %v3984_v44  ;;  %4845 = vmatprep.mubr.bf16.mxu0 %v2320_v46  ;;  %v7962_v47 = vpop.f32.mrb[88].mxu1  ;;  %v2325_v44 = vrot.slane %v10699_v11, 1  ;;  %v10745_v20 = vpack.c.bf16 %v4868_v62, %v4868_v62  ;;  %v5040_v46 = vrot.slane %v5038_v26, 1 }
 0x28f   : > { %v7963_v36 = vpop.f32.mrb[89].mxu1  ;;  %11771 = vst [vmem:[#allocation10_spill] sm:$0xff] %v10743_v60  ;;  %v2322_v62 = vrot.slane %v10718_v50, 1 }
 0x290   : > { %v8068_v33 = vpop.f32.mrb[140].mxu0  ;;  %v7964_v30 = vadd.f32 %v7963_v36, %v7962_v47  ;;  %v7965_v61 = vpop.f32.mrb[90].mxu1  ;;  %v2326_v10 = vsel %vm2230_vm3, %v2324_v18, %v2325_v44  ;;  %v5043_v27 = vshll.u32 %v10745_v20, 16 }
 0x291   : > { %v8069_v0 = vpop.f32.mrb[141].mxu0  ;;  %v7966_v34 = vpop.f32.mrb[91].mxu1 }
 0x292   : > { %v8070_v57 = vadd.f32 %v8069_v0, %v8068_v33  ;;  %v3997_v54 = vadd.f32 %v7964_v30, %v10295_v28  ;;  %v8071_v58 = vpop.f32.mrb[142].mxu0  ;;  %v7967_v24 = vadd.f32 %v7966_v34, %v7965_v61  ;;  %v4870_v28 = vld [vmem:[#allocation2 + $0x98] sm:$0xff]  ;;  %v5026_v30 = vshll.u32 %v10743_v60, 16  ;;  %v4871_v0 = vld [vmem:[#allocation2 + $0xa0] sm:$0xff] }
 0x293   : > { %v8072_v9 = vpop.f32.mrb[143].mxu0  ;;  %4693 = vmatmul.mubr.bf16.gmra.mrb[196].mxu1 %v2121_v43  ;;  %v10753_v47 = vpack.c.bf16 %v4872_v63, %v4870_v28  ;;  %v5036_v61 = vshrl.u32 %v10732_v42, 16  ;;  %v4874_v34 = vld [vmem:[#allocation2 + $0xb8] sm:$0x3] }
 0x294   : > { %v10747_v12 = vadd.f32 %v8070_v57, %v3989_v59  ;;  %v8073_v11 = vadd.f32 %v8072_v9, %v8071_v58  ;;  %v4000_v16 = vadd.f32 %v7967_v24, %v10306_v55  ;;  %6048 = vmatprep.mubr.bf16.mxu1 %v10732_v42  ;;  %v2321_v59 = vrot.slane %v10286_v31, 1  ;;  %v4867_v55 = vld [vmem:[#allocation2 + $0x80] sm:$0x3]  ;;  %v8992_v57 = vld [vmem:[%s11622_s4 + $0x448] sm:$0xff]   ;;  %v11774_v24 = vld [vmem:[#allocation9_spill] sm:$0xff] }
 0x295   : > { %4846 = vmatmul.mubr.bf16.gmra.mrb[248].mxu0 %v2317_v22  ;;  %11772 = vst [vmem:[#allocation13_spill] sm:$0xff] %v10753_v47  ;;  %v5041_v50 = vor.u32 %v5040_v46, %v5036_v61  ;;  %v10765_v44 = vpack.c.bf16 %v4867_v55, %v4867_v55  ;;  %v5062_v26 = vshll.u32 %v10753_v47, 16  ;;  %v4878_v22 = vld [vmem:[#allocation2 + $0xd8] sm:$0xff]  ;;  %v5045_v46 = vrot.slane %v5043_v27, 1 }
 0x296   : > { %v10755_v3 = vadd.f32 %v8073_v11, %v3992_v40  ;;  %4853 = vmatprep.mubr.bf16.mxu0 %v2326_v10  ;;  %v7968_v36 = vpop.f32.mrb[92].mxu1  ;;  %v8989_v40 = vld [vmem:[%s11622_s4 + $0x400] sm:$0xff]   ;;  %v2323_v9 = vsel %vm2230_vm3, %v2321_v59, %v2322_v62  ;;  %v4869_v11 = vld [vmem:[#allocation2 + $0x90] sm:$0xff]  ;;  %v5028_v10 = vrot.slane %v5026_v30, 1  ;;  %v10778_v55 = vpack.c.bf16 %v4874_v34, %v4874_v34  ;;  %v4876_v59 = vld [vmem:[#allocation2 + $0xc8] sm:$0xff] }
 0x297   : > { %v7969_v33 = vpop.f32.mrb[93].mxu1  ;;  %11773 = vst [vmem:[#allocation16_spill] sm:$0xff] %v10765_v44  ;;  %v8993_v62 = vld [vmem:[%s11622_s4 + $0x408] sm:$0xff]   ;;  %v5046_v30 = vsel %vm1749_vm2, %v5041_v50, %v5045_v46  ;;  %v5064_v27 = vrot.slane %v5062_v26, 1  ;;  %v5060_v50 = vshrl.u32 %v10753_v47, 16 }
 0x298   : > { %v8074_v56 = vpop.f32.mrb[144].mxu0  ;;  %v7970_v38 = vadd.f32 %v7969_v33, %v7968_v36  ;;  %v7971_v19 = vpop.f32.mrb[94].mxu1  ;;  %v10776_v36 = vpack.c.bf16 %v4871_v0, %v4869_v11  ;;  %11775 = vst [vmem:[#allocation19_spill] sm:$0xff] %v10778_v55  ;;  %v10792_v0 = vpack.c.bf16 %v4878_v22, %v4876_v59  ;;  %v5067_v26 = vshll.u32 %v10778_v55, 16  ;;  %v4880_v22 = vld [vmem:[#allocation2 + $0xe8] sm:$0x3] }
 0x299   : > { %v8075_v31 = vpop.f32.mrb[145].mxu0  ;;  %v7972_v18 = vpop.f32.mrb[95].mxu1 }
 0x29a   : > { %v8076_v58 = vadd.f32 %v8075_v31, %v8074_v56  ;;  %v10772_v43 = vadd.f32 %v7970_v38, %v11774_v24  ;;  %v8077_v23 = vpop.f32.mrb[146].mxu0  ;;  %v7973_v63 = vadd.f32 %v7972_v18, %v7971_v19  ;;  %v11776_v56 = vld [vmem:[#allocation12_spill] sm:$0xff]  ;;  %v5024_v19 = vshrl.u32 %v10743_v60, 16  ;;  %11777 = vst [vmem:[#allocation14_spill] sm:$0xff] %v10792_v0  ;;  %v4873_v18 = vld [vmem:[#allocation2 + $0xb0] sm:$0x3] }
 0x29b   : > { %v8078_v28 = vpop.f32.mrb[147].mxu0  ;;  %6049 = vmatmul.mubr.bf16.vlgmr.msra.gmra.mrb[200].mxu1 %v10743_v60  ;;  %v5086_v59 = vshll.u32 %v10792_v0, 16 }
 0x29c   : > { %v10780_v33 = vadd.f32 %v8076_v58, %v3997_v54  ;;  %v8079_v61 = vadd.f32 %v8078_v28, %v8077_v23  ;;  %v10783_v38 = vadd.f32 %v7973_v63, %v11776_v56  ;;  %8595 = vmatpush3.bf16.msra.mxu1 %v8989_v40  ;;  %6056 = vmatprep.mubr.bf16.mxu1 %v10753_v47  ;;  %v5031_v54 = vshll.u32 %v10765_v44, 16  ;;  %v8994_v40 = vld [vmem:[%s11622_s4 + $0x450] sm:$0xff]  }
 0x29d   : > { %4854 = vmatmul.mubr.bf16.gmra.mrb[252].mxu0 %v2323_v9  ;;  %8596 = vmatprep.subr.bf16.mxu1 %v8992_v57  ;;  %v5029_v58 = vor.u32 %v5028_v10, %v5024_v19  ;;  %v5050_v23 = vshll.u32 %v10776_v36, 16  ;;  %v4877_v63 = vld [vmem:[#allocation2 + $0xd0] sm:$0xff]  ;;  %v10805_v56 = vpack.c.bf16 %v4873_v18, %v4873_v18  ;;  %v4875_v19 = vld [vmem:[#allocation2 + $0xc0] sm:$0xff]  ;;  %v10818_v44 = vpack.c.bf16 %v4880_v22, %v4880_v22 }
 0x29e   : > { %v10797_v34 = vadd.f32 %v8079_v61, %v4000_v16  ;;  %6209 = vmatprep.mubr.bf16.mxu0 %v5046_v30  ;;  %v7974_v31 = vpop.f32.mrb[96].mxu1  ;;  %v8995_v16 = vld [vmem:[%s11622_s4 + $0x410] sm:$0xff]   ;;  %v5033_v10 = vrot.slane %v5031_v54, 1  ;;  %v5065_v61 = vor.u32 %v5064_v27, %v5060_v50  ;;  %v8996_v30 = vld [vmem:[%s11622_s4 + $0x458] sm:$0xff]   ;;  %v10814_v47 = vpack.c.bf16 %v4877_v63, %v4875_v19  ;;  %v4884_v54 = vld [vmem:[#allocation2 + $0x108] sm:$0xff] }
 0x29f   : > { %v7975_v24 = vpop.f32.mrb[97].mxu1  ;;  %11778 = vst [vmem:[#allocation17_spill] sm:$0xff] %v10805_v56  ;;  %v5052_v50 = vrot.slane %v5050_v23, 1  ;;  %11780 = vst [vmem:[#allocation23_spill] sm:$0xff] %v10818_v44  ;;  %v5048_v63 = vshrl.u32 %v10776_v36, 16  ;;  %v5091_v19 = vshll.u32 %v10818_v44, 16 }
 0x2a0   : > { %v8080_v9 = vpop.f32.mrb[148].mxu0  ;;  %v7976_v57 = vadd.f32 %v7975_v24, %v7974_v31  ;;  %v7977_v11 = vpop.f32.mrb[98].mxu1  ;;  %8597 = vmatpush3.bf16.msra.mxu1 %v8993_v62  ;;  %11779 = vst [vmem:[#allocation20_spill] sm:$0xff] %v10814_v47  ;;  %v5034_v18 = vsel %vm1749_vm2, %v5029_v58, %v5033_v10  ;;  %v8997_v58 = vld [vmem:[%s11622_s4 + $0x418] sm:$0xff]  }
 0x2a1   : > { %v8081_v28 = vpop.f32.mrb[149].mxu0  ;;  %v7978_v46 = vpop.f32.mrb[99].mxu1  ;;  %8598 = vmatprep.subr.bf16.mxu1 %v8994_v40  ;;  %v5069_v40 = vrot.slane %v5067_v26, 1  ;;  %v5088_v26 = vrot.slane %v5086_v59, 1  ;;  %v5053_v10 = vor.u32 %v5052_v50, %v5048_v63  ;;  %v9000_v63 = vld [vmem:[%s11622_s4 + $0x468] sm:$0xff]  }
 0x2a2   : > { %v8082_v31 = vadd.f32 %v8081_v28, %v8080_v9  ;;  %v10812_v62 = vadd.f32 %v7976_v57, %v10389_v51  ;;  %v8083_v24 = vpop.f32.mrb[150].mxu0  ;;  %v7979_v55 = vadd.f32 %v7978_v46, %v7977_v11  ;;  %v4882_v57 = vld [vmem:[#allocation2 + $0xf8] sm:$0xff]  ;;  %v4879_v28 = vld [vmem:[#allocation2 + $0xe0] sm:$0x3] }
 0x2a3   : > { %v8084_v27 = vpop.f32.mrb[151].mxu0  ;;  %6057 = vmatmul.mubr.bf16.gmra.mrb[204].mxu1 %v10776_v36  ;;  %v5070_v23 = vsel %vm1749_vm2, %v5065_v61, %v5069_v40  ;;  %v10833_v11 = vpack.c.bf16 %v4884_v54, %v4882_v57  ;;  %v5084_v61 = vshrl.u32 %v10792_v0, 16  ;;  %v4886_v54 = vld [vmem:[#allocation2 + $0x118] sm:$0x3]  ;;  %v10847_v57 = vpack.c.bf16 %v4879_v28, %v4879_v28 }
 0x2a4   : > { %v10821_v60 = vadd.f32 %v8082_v31, %v10772_v43  ;;  %v8085_v9 = vadd.f32 %v8084_v27, %v8083_v24  ;;  %v10824_v51 = vadd.f32 %v7979_v55, %v10403_v13  ;;  %6064 = vmatprep.mubr.bf16.mxu1 %v10792_v0  ;;  %8599 = vmatpush3.bf16.msra.mxu1 %v8995_v16  ;;  %v5055_v43 = vshll.u32 %v10805_v56, 16  ;;  %v8998_v13 = vld [vmem:[%s11622_s4 + $0x460] sm:$0xff]   ;;  %v4881_v0 = vld [vmem:[#allocation2 + $0xf0] sm:$0xff]  ;;  %v4890_v56 = vld [vmem:[#allocation2 + $0x138] sm:$0xff] }
 0x2a5   : > { %6210 = vmatmul.mubr.bf16.vlgmr.msra.gmra.mrb[0].mxu0 %v5034_v18  ;;  %11781 = vst [vmem:[#allocation18_spill] sm:$0xff] %v10833_v11  ;;  %8600 = vmatprep.subr.bf16.mxu1 %v8996_v30  ;;  %v5074_v16 = vshll.u32 %v10814_v47, 16  ;;  %v4883_v24 = vld [vmem:[#allocation2 + $0x100] sm:$0xff]  ;;  %11782 = vst [vmem:[#allocation21_spill] sm:$0xff] %v10847_v57  ;;  %v5110_v50 = vshll.u32 %v10833_v11, 16  ;;  %v5093_v28 = vrot.slane %v5091_v19, 1 }
 0x2a6   : > { %v10839_v55 = vadd.f32 %v8085_v9, %v10783_v38  ;;  %6217 = vmatprep.mubr.bf16.mxu0 %v5070_v23  ;;  %v7980_v22 = vpop.f32.mrb[100].mxu1  ;;  %v8999_v38 = vld [vmem:[%s11622_s4 + $0x420] sm:$0xff]   ;;  %v5057_v40 = vrot.slane %v5055_v43, 1  ;;  %v5089_v9 = vor.u32 %v5088_v26, %v5084_v61  ;;  %v10860_v61 = vpack.c.bf16 %v4886_v54, %v4886_v54  ;;  %v9002_v54 = vld [vmem:[%s11622_s4 + $0x470] sm:$0xff]  }
 0x2a7   : > { %v7981_v46 = vpop.f32.mrb[101].mxu1  ;;  %v5076_v44 = vrot.slane %v5074_v16, 1  ;;  %v5072_v16 = vshrl.u32 %v10814_v47, 16  ;;  %v5079_v19 = vshll.u32 %v10847_v57, 16  ;;  %v4887_v57 = vld [vmem:[#allocation2 + $0x120] sm:$0xff] }
 0x2a8   : > { %v8086_v59 = vpop.f32.mrb[152].mxu0  ;;  %v7982_v30 = vadd.f32 %v7981_v46, %v7980_v22  ;;  %v7983_v31 = vpop.f32.mrb[102].mxu1  ;;  %8601 = vmatpush3.bf16.msra.mxu1 %v8997_v58  ;;  %v5058_v26 = vsel %vm1749_vm2, %v5053_v10, %v5057_v40  ;;  %11784 = vst [vmem:[#allocation22_spill] sm:$0xff] %v10860_v61  ;;  %v9001_v10 = vld [vmem:[%s11622_s4 + $0x428] sm:$0xff]  }
 0x2a9   : > { %v8087_v27 = vpop.f32.mrb[153].mxu0  ;;  %v7984_v18 = vpop.f32.mrb[103].mxu1  ;;  %8602 = vmatprep.subr.bf16.mxu1 %v8998_v13  ;;  %v10858_v13 = vpack.c.bf16 %v4883_v24, %v4881_v0  ;;  %v5094_v0 = vsel %vm1749_vm2, %v5089_v9, %v5093_v28  ;;  %v5115_v9 = vshll.u32 %v10860_v61, 16  ;;  %v4892_v28 = vld [vmem:[#allocation2 + $0x148] sm:$0x3] }
 0x2aa   : > { %v8088_v23 = vadd.f32 %v8087_v27, %v8086_v59  ;;  %v10854_v58 = vadd.f32 %v7982_v30, %v10441_v37  ;;  %v8089_v22 = vpop.f32.mrb[154].mxu0  ;;  %v7985_v46 = vadd.f32 %v7984_v18, %v7983_v31  ;;  %v11785_v30 = vld [vmem:[#allocation15_spill] sm:$0xff]  ;;  %v4888_v31 = vld [vmem:[#allocation2 + $0x128] sm:$0xff] }
 0x2ab   : > { %v8090_v43 = vpop.f32.mrb[155].mxu0  ;;  %6065 = vmatmul.mubr.bf16.gmra.mrb[208].mxu1 %v10814_v47  ;;  %11783 = vst [vmem:[#allocation24_spill] sm:$0xff] %v10858_v13  ;;  %v10873_v24 = vpack.c.bf16 %v4890_v56, %v4888_v31  ;;  %v4896_v47 = vld [vmem:[#allocation2 + $0x168] sm:$0xff] }
 0x2ac   : > { %v10863_v59 = vadd.f32 %v8088_v23, %v10812_v62  ;;  %v8091_v37 = vadd.f32 %v8090_v43, %v8089_v22  ;;  %v4024_v27 = vadd.f32 %v7985_v46, %v11785_v30  ;;  %6072 = vmatprep.mubr.bf16.mxu1 %v10833_v11  ;;  %8603 = vmatpush3.bf16.msra.mxu1 %v8999_v38  ;;  %v5112_v62 = vrot.slane %v5110_v50, 1  ;;  %v4885_v46 = vld [vmem:[#allocation2 + $0x110] sm:$0x3] }
 0x2ad   : > { %6218 = vmatmul.mubr.bf16.gmra.mrb[4].mxu0 %v5058_v26  ;;  %11786 = vst [vmem:[#allocation25_spill] sm:$0xff] %v10873_v24  ;;  %8604 = vmatprep.subr.bf16.mxu1 %v9000_v63  ;;  %v5077_v23 = vor.u32 %v5076_v44, %v5072_v16  ;;  %v5108_v22 = vshrl.u32 %v10833_v11, 16  ;;  %v4889_v50 = vld [vmem:[#allocation2 + $0x130] sm:$0xff]  ;;  %v5098_v26 = vshll.u32 %v10858_v13, 16  ;;  %v5081_v44 = vrot.slane %v5079_v19, 1 }
 0x2ae   : > { %v10879_v18 = vadd.f32 %v8091_v37, %v10824_v51  ;;  %6225 = vmatprep.mubr.bf16.mxu0 %v5094_v0  ;;  %v7986_v38 = vpop.f32.mrb[104].mxu1  ;;  %v9003_v51 = vld [vmem:[%s11622_s4 + $0x430] sm:$0xff]   ;;  %v5134_v31 = vshll.u32 %v10873_v24, 16  ;;  %v9004_v0 = vld [vmem:[%s11622_s4 + $0x478] sm:$0xff]   ;;  %v10892_v11 = vpack.c.bf16 %v4885_v46, %v4885_v46 }
 0x2af   : > { %v7987_v40 = vpop.f32.mrb[105].mxu1  ;;  %v5113_v16 = vor.u32 %v5112_v62, %v5108_v22  ;;  %v5082_v19 = vsel %vm1749_vm2, %v5077_v23, %v5081_v44  ;;  %v5117_v62 = vrot.slane %v5115_v9, 1  ;;  %v10898_v22 = vpack.c.bf16 %v4892_v28, %v4892_v28  ;;  %v9005_v23 = vld [vmem:[%s11622_s4 + $0x438] sm:$0xff]  }
 0x2b0   : > { %11787 = vst [vmem:[#allocation4_spill] sm:$0xff] %v10879_v18  ;;  %v8092_v56 = vpop.f32.mrb[156].mxu0  ;;  %v7988_v43 = vadd.f32 %v7987_v40, %v7986_v38  ;;  %v7989_v63 = vpop.f32.mrb[106].mxu1  ;;  %8605 = vmatpush3.bf16.msra.mxu1 %v9001_v10  ;;  %11788 = vst [vmem:[#allocation5_spill] sm:$0xff] %v10892_v11  ;;  %v5100_v46 = vrot.slane %v5098_v26, 1  ;;  %v5136_v9 = vrot.slane %v5134_v31, 1 }
 0x2b1   : > { %v8093_v37 = vpop.f32.mrb[157].mxu0  ;;  %v7990_v30 = vpop.f32.mrb[107].mxu1  ;;  %8606 = vmatprep.subr.bf16.mxu1 %v9002_v54  ;;  %v10896_v54 = vpack.c.bf16 %v4889_v50, %v4887_v57  ;;  %11790 = vst [vmem:[#allocation7_spill] sm:$0xff] %v10898_v22  ;;  %v5118_v57 = vsel %vm1749_vm2, %v5113_v16, %v5117_v62  ;;  %v4891_v26 = vld [vmem:[#allocation2 + $0x140] sm:$0x3] }
 0x2b2   : > { %v8094_v38 = vadd.f32 %v8093_v37, %v8092_v56  ;;  %v4029_v40 = vadd.f32 %v7988_v43, %v10487_v17  ;;  %v8095_v61 = vpop.f32.mrb[158].mxu0  ;;  %v7991_v10 = vadd.f32 %v7990_v30, %v7989_v63  ;;  %v4894_v63 = vld [vmem:[#allocation2 + $0x158] sm:$0xff]  ;;  %v5132_v37 = vshrl.u32 %v10873_v24, 16 }
 0x2b3   : > { %v8096_v18 = vpop.f32.mrb[159].mxu0  ;;  %6073 = vmatmul.mubr.bf16.gmra.mrb[212].mxu1 %v10858_v13  ;;  %11789 = vst [vmem:[#allocation8_spill] sm:$0xff] %v10896_v54  ;;  %v10909_v50 = vpack.c.bf16 %v4896_v47, %v4894_v63  ;;  %v5139_v30 = vshll.u32 %v10898_v22, 16  ;;  %v10918_v62 = vpack.c.bf16 %v4891_v26, %v4891_v26 }
 0x2b4   : > { %v10901_v56 = vadd.f32 %v8094_v38, %v10854_v58  ;;  %v8097_v17 = vadd.f32 %v8096_v18, %v8095_v61  ;;  %v4032_v43 = vadd.f32 %v7991_v10, %v10495_v35  ;;  %6080 = vmatprep.mubr.bf16.mxu1 %v10873_v24  ;;  %8607 = vmatpush3.bf16.msra.mxu1 %v9003_v51  ;;  %v5096_v35 = vshrl.u32 %v10858_v13, 16  ;;  %v4893_v13 = vld [vmem:[#allocation2 + $0x150] sm:$0xff] }
 0x2b5   : > { %6226 = vmatmul.mubr.bf16.gmra.mrb[8].mxu0 %v5082_v19  ;;  %11791 = vst [vmem:[#allocation3_spill] sm:$0xff] %v10909_v50  ;;  %8608 = vmatprep.subr.bf16.mxu1 %v9004_v0  ;;  %v5103_v18 = vshll.u32 %v10892_v11, 16  ;;  %v5122_v51 = vshll.u32 %v10896_v54, 16  ;;  %v4898_v0 = vld [vmem:[#allocation2 + $0x178] sm:$0x3]  ;;  %v5137_v19 = vor.u32 %v5136_v9, %v5132_v37  ;;  %11792 = vst [vmem:[#allocation11_spill] sm:$0xff] %v10918_v62 }
 0x2b6   : > { %v10911_v58 = vadd.f32 %v8097_v17, %v4024_v27  ;;  %6233 = vmatprep.mubr.bf16.mxu0 %v5118_v57  ;;  %v7992_v61 = vpop.f32.mrb[108].mxu1  ;;  %v5101_v31 = vor.u32 %v5100_v46, %v5096_v35  ;;  %v4895_v27 = vld [vmem:[#allocation2 + $0x160] sm:$0xff]  ;;  %v5158_v17 = vshll.u32 %v10909_v50, 16  ;;  %v10925_v9 = vpack.c.bf16 %v4898_v0, %v4898_v0 }
 0x2b7   : > { %v7993_v28 = vpop.f32.mrb[109].mxu1  ;;  %v5105_v22 = vrot.slane %v5103_v18, 1  ;;  %v5124_v46 = vrot.slane %v5122_v51, 1  ;;  %v10923_v35 = vpack.c.bf16 %v4895_v27, %v4893_v13  ;;  %v4900_v18 = vld [vmem:[#allocation2 + $0x188] sm:$0xff]  ;;  %v4897_v27 = vld [vmem:[#allocation2 + $0x170] sm:$0x3] }
 0x2b8   : > { %v8098_v44 = vpop.f32.mrb[160].mxu0  ;;  %v7994_v47 = vadd.f32 %v7993_v28, %v7992_v61  ;;  %v7995_v16 = vpop.f32.mrb[110].mxu1  ;;  %8609 = vmatpush3.bf16.msra.mxu1 %v9005_v23  ;;  %v4902_v61 = vld [vmem:[#allocation2 + $0x198] sm:$0xff]  ;;  %v5141_v23 = vrot.slane %v5139_v30, 1  ;;  %11794 = vst [vmem:[#allocation9_spill] sm:$0xff] %v10925_v9  ;;  %v5160_v30 = vrot.slane %v5158_v17, 1 }
 0x2b9   : > { %v8099_v38 = vpop.f32.mrb[161].mxu0  ;;  %v7996_v10 = vpop.f32.mrb[111].mxu1  ;;  %11793 = vst [vmem:[#allocation6_spill] sm:$0xff] %v10923_v35  ;;  %v10934_v13 = vpack.c.bf16 %v4902_v61, %v4900_v18  ;;  %v4901_v17 = vld [vmem:[#allocation2 + $0x190] sm:$0xff] }
 0x2ba   : > { %v8100_v63 = vadd.f32 %v8099_v38, %v8098_v44  ;;  %v4037_v57 = vadd.f32 %v7994_v47, %v10516_v4  ;;  %v8101_v24 = vpop.f32.mrb[162].mxu0  ;;  %v7997_v11 = vadd.f32 %v7996_v10, %v7995_v16  ;;  %v5106_v4 = vsel %vm1749_vm2, %v5101_v31, %v5105_v22 }
 0x2bb   : > { %v8102_v28 = vpop.f32.mrb[163].mxu0  ;;  %6081 = vmatmul.mubr.bf16.gmra.mrb[216].mxu1 %v10896_v54  ;;  %v5142_v51 = vsel %vm1749_vm2, %v5137_v19, %v5141_v23  ;;  %v5127_v47 = vshll.u32 %v10918_v62, 16  ;;  %11795 = vst [vmem:[#allocation12_spill] sm:$0xff] %v10934_v13  ;;  %v5156_v22 = vshrl.u32 %v10909_v50, 16  ;;  %v5163_v31 = vshll.u32 %v10925_v9, 16  ;;  %v4899_v9 = vld [vmem:[#allocation2 + $0x180] sm:$0xff] }
 0x2bc   : > { %v10927_v26 = vadd.f32 %v8100_v63, %v4029_v40  ;;  %v8103_v37 = vadd.f32 %v8102_v28, %v8101_v24  ;;  %v4040_v44 = vadd.f32 %v7997_v11, %v10524_v8  ;;  %6088 = vmatprep.mubr.bf16.mxu1 %v10909_v50  ;;  %v5120_v40 = vshrl.u32 %v10896_v54, 16  ;;  %v4904_v63 = vld [vmem:[#allocation2 + $0x1a8] sm:$0x3] }
 0x2bd   : > { %6234 = vmatmul.mubr.bf16.gmra.mrb[12].mxu0 %v5106_v4  ;;  %v5146_v11 = vshll.u32 %v10923_v35, 16  ;;  %v5129_v28 = vrot.slane %v5127_v47, 1  ;;  %v5161_v23 = vor.u32 %v5160_v30, %v5156_v22  ;;  %v10944_v62 = vpack.c.bf16 %v4897_v27, %v4897_v27  ;;  %v4908_v54 = vld [vmem:[#allocation2 + $0x1c8] sm:$0xff]  ;;  %v4906_v27 = vld [vmem:[#allocation2 + $0x1b8] sm:$0xff] }
 0x2be   : > { %v10936_v16 = vadd.f32 %v8103_v37, %v4032_v43  ;;  %6241 = vmatprep.mubr.bf16.mxu0 %v5142_v51  ;;  %v7998_v24 = vpop.f32.mrb[112].mxu1  ;;  %v5125_v19 = vor.u32 %v5124_v46, %v5120_v40  ;;  %v5182_v37 = vshll.u32 %v10934_v13, 16  ;;  %v5165_v46 = vrot.slane %v5163_v31, 1 }
 0x2bf   : > { %v7999_v8 = vpop.f32.mrb[113].mxu1  ;;  %11796 = vst [vmem:[#allocation15_spill] sm:$0xff] %v10944_v62  ;;  %v10947_v40 = vpack.c.bf16 %v4901_v17, %v4899_v9  ;;  %v10949_v47 = vpack.c.bf16 %v4904_v63, %v4904_v63  ;;  %v5144_v31 = vshrl.u32 %v10923_v35, 16  ;;  %v5151_v17 = vshll.u32 %v10944_v62, 16 }
 0x2c0   : > { %v8104_v0 = vpop.f32.mrb[164].mxu0  ;;  %v8000_v38 = vadd.f32 %v7999_v8, %v7998_v24  ;;  %v8001_v10 = vpop.f32.mrb[114].mxu1  ;;  %v5148_v8 = vrot.slane %v5146_v11, 1  ;;  %v5166_v11 = vsel %vm1749_vm2, %v5161_v23, %v5165_v46  ;;  %v5180_v63 = vshrl.u32 %v10934_v13, 16 }
 0x2c1   : > { %v8105_v43 = vpop.f32.mrb[165].mxu0  ;;  %v8002_v61 = vpop.f32.mrb[115].mxu1  ;;  %11797 = vst [vmem:[#allocation26_spill] sm:$0xff] %v10947_v40  ;;  %11798 = vst [vmem:[#allocation27_spill] sm:$0xff] %v10949_v47  ;;  %v5153_v62 = vrot.slane %v5151_v17, 1  ;;  %v4912_v17 = vld [vmem:[#allocation2 + $0x1e8] sm:$0xff] }
 0x2c2   : > { %v8106_v4 = vadd.f32 %v8105_v43, %v8104_v0  ;;  %v4045_v18 = vadd.f32 %v8000_v38, %v10540_v2  ;;  %v8107_v51 = vpop.f32.mrb[166].mxu0  ;;  %v8003_v50 = vadd.f32 %v8002_v61, %v8001_v10  ;;  %v5130_v0 = vsel %vm1749_vm2, %v5125_v19, %v5129_v28 }
 0x2c3   : > { %v8108_v24 = vpop.f32.mrb[167].mxu0  ;;  %6089 = vmatmul.mubr.bf16.gmra.mrb[220].mxu1 %v10923_v35  ;;  %v5184_v38 = vrot.slane %v5182_v37, 1  ;;  %v10957_v10 = vpack.c.bf16 %v4908_v54, %v4906_v27  ;;  %v5170_v19 = vshll.u32 %v10947_v40, 16  ;;  %v5187_v43 = vshll.u32 %v10949_v47, 16  ;;  %v4910_v37 = vld [vmem:[#allocation2 + $0x1d8] sm:$0x3] }
 0x2c4   : > { %v10951_v30 = vadd.f32 %v8106_v4, %v4037_v57  ;;  %v8109_v22 = vadd.f32 %v8108_v24, %v8107_v51  ;;  %v4048_v2 = vadd.f32 %v8003_v50, %v10547_v5  ;;  %6096 = vmatprep.mubr.bf16.mxu1 %v10934_v13  ;;  %v4903_v5 = vld [vmem:[#allocation2 + $0x1a0] sm:$0x3]  ;;  %v5149_v23 = vor.u32 %v5148_v8, %v5144_v31  ;;  %v4905_v47 = vld [vmem:[#allocation2 + $0x1b0] sm:$0xff]  ;;  %v4914_v35 = vld [vmem:[#allocation2 + $0x1f8] sm:$0xff] }
 0x2c5   : > { %6242 = vmatmul.mubr.bf16.gmra.mrb[16].mxu0 %v5130_v0  ;;  %11799 = vst [vmem:[#allocation28_spill] sm:$0xff] %v10957_v10  ;;  %v5185_v24 = vor.u32 %v5184_v38, %v5180_v63  ;;  %v10966_v46 = vpack.c.bf16 %v4903_v5, %v4903_v5  ;;  %v5189_v8 = vrot.slane %v5187_v43, 1  ;;  %v10973_v38 = vpack.c.bf16 %v4910_v37, %v4910_v37  ;;  %v4909_v37 = vld [vmem:[#allocation2 + $0x1d0] sm:$0x3] }
 0x2c6   : > { %v10959_v9 = vadd.f32 %v8109_v22, %v4040_v44  ;;  %6249 = vmatprep.mubr.bf16.mxu0 %v5166_v11  ;;  %v8004_v57 = vpop.f32.mrb[116].mxu1  ;;  %v4907_v44 = vld [vmem:[#allocation2 + $0x1c0] sm:$0xff]  ;;  %v5206_v22 = vshll.u32 %v10957_v10, 16 }
 0x2c7   : > { %v8005_v50 = vpop.f32.mrb[117].mxu1  ;;  %11800 = vst [vmem:[#allocation29_spill] sm:$0xff] %v10966_v46  ;;  %v10971_v31 = vpack.c.bf16 %v4907_v44, %v4905_v47  ;;  %11802 = vst [vmem:[#allocation31_spill] sm:$0xff] %v10973_v38  ;;  %v10982_v47 = vpack.c.bf16 %v4914_v35, %v4912_v17  ;;  %v4913_v35 = vld [vmem:[#allocation2 + $0x1f0] sm:$0xff] }
 0x2c8   : > { %v8110_v61 = vpop.f32.mrb[168].mxu0  ;;  %v8006_v28 = vadd.f32 %v8005_v50, %v8004_v57  ;;  %v8007_v54 = vpop.f32.mrb[118].mxu1  ;;  %v5172_v50 = vrot.slane %v5170_v19, 1  ;;  %v5190_v19 = vsel %vm1749_vm2, %v5185_v24, %v5189_v8  ;;  %v5208_v43 = vrot.slane %v5206_v22, 1 }
 0x2c9   : > { %v8111_v4 = vpop.f32.mrb[169].mxu0  ;;  %v8008_v51 = vpop.f32.mrb[119].mxu1  ;;  %11801 = vst [vmem:[#allocation30_spill] sm:$0xff] %v10971_v31  ;;  %11803 = vst [vmem:[#allocation32_spill] sm:$0xff] %v10982_v47 }
 0x2ca   : > { %v8112_v0 = vadd.f32 %v8111_v4, %v8110_v61  ;;  %v4053_v27 = vadd.f32 %v8006_v28, %v10562_v39  ;;  %v8113_v11 = vpop.f32.mrb[170].mxu0  ;;  %v8009_v13 = vadd.f32 %v8008_v51, %v8007_v54  ;;  %v5154_v39 = vsel %vm1749_vm2, %v5149_v23, %v5153_v62 }
 0x2cb   : > { %v8114_v57 = vpop.f32.mrb[171].mxu0  ;;  %6097 = vmatmul.mubr.bf16.gmra.mrb[224].mxu1 %v10947_v40  ;;  %v5175_v28 = vshll.u32 %v10966_v46, 16  ;;  %v5194_v62 = vshll.u32 %v10971_v31, 16  ;;  %v5211_v23 = vshll.u32 %v10973_v38, 16  ;;  %v10992_v46 = vpack.c.bf16 %v4909_v37, %v4909_v37  ;;  %v4911_v38 = vld [vmem:[#allocation2 + $0x1e0] sm:$0xff]  ;;  %v4918_v37 = vld [vmem:[#allocation2 + $0x218] sm:$0xff] }
 0x2cc   : > { %v10975_v5 = vadd.f32 %v8112_v0, %v4045_v18  ;;  %v8115_v63 = vadd.f32 %v8114_v57, %v8113_v11  ;;  %v4056_v61 = vadd.f32 %v8009_v13, %v10569_v21  ;;  %6104 = vmatprep.mubr.bf16.mxu1 %v10957_v10  ;;  %v5168_v18 = vshrl.u32 %v10947_v40, 16  ;;  %v4916_v0 = vld [vmem:[#allocation2 + $0x208] sm:$0x3] }
 0x2cd   : > { %6250 = vmatmul.mubr.bf16.gmra.mrb[20].mxu0 %v5154_v39  ;;  %v5204_v13 = vshrl.u32 %v10957_v10, 16  ;;  %v5177_v57 = vrot.slane %v5175_v28, 1  ;;  %11804 = vst [vmem:[#allocation33_spill] sm:$0xff] %v10992_v46  ;;  %v4920_v40 = vld [vmem:[#allocation2 + $0x228] sm:$0xff]  ;;  %v10997_v28 = vpack.c.bf16 %v4916_v0, %v4916_v0  ;;  %v5228_v0 = vshrl.u32 %v10982_v47, 16 }
 0x2ce   : > { %v10984_v54 = vadd.f32 %v8115_v63, %v4048_v2  ;;  %6257 = vmatprep.mubr.bf16.mxu0 %v5190_v19  ;;  %v8010_v44 = vpop.f32.mrb[120].mxu1  ;;  %v5173_v22 = vor.u32 %v5172_v50, %v5168_v18  ;;  %v5230_v63 = vshll.u32 %v10982_v47, 16  ;;  %v5213_v50 = vrot.slane %v5211_v23, 1 }
 0x2cf   : > { %v8011_v21 = vpop.f32.mrb[121].mxu1  ;;  %v5209_v8 = vor.u32 %v5208_v43, %v5204_v13  ;;  %v10995_v18 = vpack.c.bf16 %v4913_v35, %v4911_v38  ;;  %11806 = vst [vmem:[#allocation35_spill] sm:$0xff] %v10997_v28  ;;  %v5192_v23 = vshrl.u32 %v10971_v31, 16  ;;  %v5199_v35 = vshll.u32 %v10992_v46, 16 }
 0x2d0   : > { %v8116_v4 = vpop.f32.mrb[172].mxu0  ;;  %v8012_v51 = vadd.f32 %v8011_v21, %v8010_v44  ;;  %v8013_v24 = vpop.f32.mrb[122].mxu1  ;;  %v5196_v21 = vrot.slane %v5194_v62, 1 }
 0x2d1   : > { %v8117_v2 = vpop.f32.mrb[173].mxu0  ;;  %v8014_v11 = vpop.f32.mrb[123].mxu1  ;;  %11805 = vst [vmem:[#allocation34_spill] sm:$0xff] %v10995_v18  ;;  %v5214_v62 = vsel %vm1749_vm2, %v5209_v8, %v5213_v50  ;;  %v5201_v46 = vrot.slane %v5199_v35, 1  ;;  %v4924_v35 = vld [vmem:[#allocation2 + $0x248] sm:$0xff] }
 0x2d2   : > { %v8118_v39 = vadd.f32 %v8117_v2, %v8116_v4  ;;  %v4061_v17 = vadd.f32 %v8012_v51, %v10584_v32  ;;  %v8119_v19 = vpop.f32.mrb[174].mxu0  ;;  %v8015_v10 = vadd.f32 %v8014_v11, %v8013_v24  ;;  %v5178_v4 = vsel %vm1749_vm2, %v5173_v22, %v5177_v57 }
 0x2d3   : > { %v8120_v44 = vpop.f32.mrb[175].mxu0  ;;  %6105 = vmatmul.mubr.bf16.gmra.mrb[228].mxu1 %v10971_v31  ;;  %v5232_v51 = vrot.slane %v5230_v63, 1  ;;  %v11005_v24 = vpack.c.bf16 %v4920_v40, %v4918_v37  ;;  %v5218_v22 = vshll.u32 %v10995_v18, 16  ;;  %v5235_v2 = vshll.u32 %v10997_v28, 16  ;;  %v4922_v63 = vld [vmem:[#allocation2 + $0x238] sm:$0x3] }
 0x2d4   : > { %v10999_v43 = vadd.f32 %v8118_v39, %v4053_v27  ;;  %v8121_v13 = vadd.f32 %v8120_v44, %v8119_v19  ;;  %v4064_v32 = vadd.f32 %v8015_v10, %v10591_v14  ;;  %6112 = vmatprep.mubr.bf16.mxu1 %v10982_v47  ;;  %v4915_v14 = vld [vmem:[#allocation2 + $0x200] sm:$0x3]  ;;  %v5197_v8 = vor.u32 %v5196_v21, %v5192_v23  ;;  %v4917_v28 = vld [vmem:[#allocation2 + $0x210] sm:$0xff]  ;;  %v4926_v31 = vld [vmem:[#allocation2 + $0x258] sm:$0xff] }
 0x2d5   : > { %6258 = vmatmul.mubr.bf16.gmra.mrb[24].mxu0 %v5178_v4  ;;  %11807 = vst [vmem:[#allocation36_spill] sm:$0xff] %v11005_v24  ;;  %v5233_v44 = vor.u32 %v5232_v51, %v5228_v0  ;;  %v11014_v50 = vpack.c.bf16 %v4915_v14, %v4915_v14  ;;  %v5237_v21 = vrot.slane %v5235_v2, 1  ;;  %v11021_v51 = vpack.c.bf16 %v4922_v63, %v4922_v63  ;;  %v4921_v63 = vld [vmem:[#allocation2 + $0x230] sm:$0x3] }
 0x2d6   : > { %v11007_v38 = vadd.f32 %v8121_v13, %v4056_v61  ;;  %6265 = vmatprep.mubr.bf16.mxu0 %v5214_v62  ;;  %v8016_v27 = vpop.f32.mrb[124].mxu1  ;;  %v4919_v61 = vld [vmem:[#allocation2 + $0x220] sm:$0xff]  ;;  %v5254_v13 = vshll.u32 %v11005_v24, 16 }
 0x2d7   : > { %v8017_v10 = vpop.f32.mrb[125].mxu1  ;;  %11808 = vst [vmem:[#allocation37_spill] sm:$0xff] %v11014_v50  ;;  %v11019_v23 = vpack.c.bf16 %v4919_v61, %v4917_v28  ;;  %11810 = vst [vmem:[#allocation39_spill] sm:$0xff] %v11021_v51  ;;  %v11030_v28 = vpack.c.bf16 %v4926_v31, %v4924_v35  ;;  %v4925_v31 = vld [vmem:[#allocation2 + $0x250] sm:$0xff] }
 0x2d8   : > { %v8122_v11 = vpop.f32.mrb[176].mxu0  ;;  %v8018_v57 = vadd.f32 %v8017_v10, %v8016_v27  ;;  %v8019_v40 = vpop.f32.mrb[126].mxu1  ;;  %v5220_v10 = vrot.slane %v5218_v22, 1  ;;  %v5238_v22 = vsel %vm1749_vm2, %v5233_v44, %v5237_v21  ;;  %v5256_v2 = vrot.slane %v5254_v13, 1 }
 0x2d9   : > { %v8123_v39 = vpop.f32.mrb[177].mxu0  ;;  %v8020_v19 = vpop.f32.mrb[127].mxu1  ;;  %11809 = vst [vmem:[#allocation38_spill] sm:$0xff] %v11019_v23  ;;  %11811 = vst [vmem:[#allocation40_spill] sm:$0xff] %v11030_v28 }
 0x2da   : > { %v8124_v4 = vadd.f32 %v8123_v39, %v8122_v11  ;;  %v4069_v37 = vadd.f32 %v8018_v57, %v10606_v45  ;;  %v8125_v62 = vpop.f32.mrb[178].mxu0  ;;  %v8021_v47 = vadd.f32 %v8020_v19, %v8019_v40  ;;  %v5202_v45 = vsel %vm1749_vm2, %v5197_v8, %v5201_v46 }
 0x2db   : > { %v8126_v27 = vpop.f32.mrb[179].mxu0  ;;  %6113 = vmatmul.mubr.bf16.gmra.mrb[232].mxu1 %v10995_v18  ;;  %v5223_v57 = vshll.u32 %v11014_v50, 16  ;;  %v5242_v46 = vshll.u32 %v11019_v23, 16  ;;  %v5259_v8 = vshll.u32 %v11021_v51, 16  ;;  %v11040_v50 = vpack.c.bf16 %v4921_v63, %v4921_v63  ;;  %v4923_v51 = vld [vmem:[#allocation2 + $0x240] sm:$0xff]  ;;  %v4930_v63 = vld [vmem:[#allocation2 + $0x278] sm:$0xff] }
 0x2dc   : > { %v11023_v14 = vadd.f32 %v8124_v4, %v4061_v17  ;;  %v8127_v0 = vadd.f32 %v8126_v27, %v8125_v62  ;;  %v4072_v11 = vadd.f32 %v8021_v47, %v10613_v48  ;;  %6120 = vmatprep.mubr.bf16.mxu1 %v11005_v24  ;;  %v5216_v17 = vshrl.u32 %v10995_v18, 16  ;;  %v4928_v4 = vld [vmem:[#allocation2 + $0x268] sm:$0x3] }
 0x2dd   : > { %6266 = vmatmul.mubr.bf16.gmra.mrb[28].mxu0 %v5202_v45  ;;  %v5252_v47 = vshrl.u32 %v11005_v24, 16  ;;  %v5225_v27 = vrot.slane %v5223_v57, 1  ;;  %11812 = vst [vmem:[#allocation41_spill] sm:$0xff] %v11040_v50  ;;  %v4932_v18 = vld [vmem:[#allocation2 + $0x288] sm:$0xff]  ;;  %v11045_v57 = vpack.c.bf16 %v4928_v4, %v4928_v4  ;;  %v5276_v4 = vshrl.u32 %v11030_v28, 16 }
 0x2de   : > { %v11032_v40 = vadd.f32 %v8127_v0, %v4064_v32  ;;  %6273 = vmatprep.mubr.bf16.mxu0 %v5238_v22  ;;  %v8022_v61 = vpop.f32.mrb[128].mxu1  ;;  %v5221_v13 = vor.u32 %v5220_v10, %v5216_v17  ;;  %v5278_v0 = vshll.u32 %v11030_v28, 16  ;;  %v5261_v10 = vrot.slane %v5259_v8, 1 }
 0x2df   : > { %v8023_v48 = vpop.f32.mrb[129].mxu1  ;;  %v5257_v21 = vor.u32 %v5256_v2, %v5252_v47  ;;  %v11043_v17 = vpack.c.bf16 %v4925_v31, %v4923_v51  ;;  %11813 = vst [vmem:[#allocation42_spill] sm:$0xff] %v11045_v57  ;;  %v5240_v8 = vshrl.u32 %v11019_v23, 16  ;;  %v5247_v31 = vshll.u32 %v11040_v50, 16 }
 0x2e0   : > { %v8128_v39 = vpop.f32.mrb[180].mxu0  ;;  %v8024_v19 = vadd.f32 %v8023_v48, %v8022_v61  ;;  %v8025_v44 = vpop.f32.mrb[130].mxu1  ;;  %v5244_v48 = vrot.slane %v5242_v46, 1 }
 0x2e1   : > { %v8129_v32 = vpop.f32.mrb[181].mxu0  ;;  %v8026_v62 = vpop.f32.mrb[131].mxu1  ;;  %v5262_v46 = vsel %vm1749_vm2, %v5257_v21, %v5261_v10  ;;  %v5249_v50 = vrot.slane %v5247_v31, 1  ;;  %v4936_v31 = vld [vmem:[#allocation2 + $0x2a8] sm:$0xff] }
 0x2e2   : > { %v8130_v45 = vadd.f32 %v8129_v32, %v8128_v39  ;;  %v4077_v35 = vadd.f32 %v8024_v19, %v10632_v6  ;;  %v8131_v22 = vpop.f32.mrb[182].mxu0  ;;  %v8027_v24 = vadd.f32 %v8026_v62, %v8025_v44  ;;  %v5226_v39 = vsel %vm1749_vm2, %v5221_v13, %v5225_v27 }
 0x2e3   : > { %v8132_v61 = vpop.f32.mrb[183].mxu0  ;;  %6121 = vmatmul.mubr.bf16.gmra.mrb[236].mxu1 %v11019_v23  ;;  %v5280_v19 = vrot.slane %v5278_v0, 1  ;;  %v11053_v44 = vpack.c.bf16 %v4932_v18, %v4930_v63  ;;  %v5266_v13 = vshll.u32 %v11043_v17, 16  ;;  %v5283_v32 = vshll.u32 %v11045_v57, 16  ;;  %v4934_v0 = vld [vmem:[#allocation2 + $0x298] sm:$0x3] }
 0x2e4   : > { %v11047_v2 = vadd.f32 %v8130_v45, %v4069_v37  ;;  %v8133_v47 = vadd.f32 %v8132_v61, %v8131_v22  ;;  %v4080_v6 = vadd.f32 %v8027_v24, %v10640_v52  ;;  %6128 = vmatprep.mubr.bf16.mxu1 %v11030_v28  ;;  %v4927_v52 = vld [vmem:[#allocation2 + $0x260] sm:$0x3]  ;;  %v5245_v21 = vor.u32 %v5244_v48, %v5240_v8 }
 0x2e5   : > { %6274 = vmatmul.mubr.bf16.gmra.mrb[32].mxu0 %v5226_v39  ;;  %11814 = vst [vmem:[#allocation43_spill] sm:$0xff] %v11053_v44  ;;  %v5264_v61 = vshrl.u32 %v11043_v17, 16  ;;  %v5281_v10 = vor.u32 %v5280_v19, %v5276_v4  ;;  %v5302_v39 = vshll.u32 %v11053_v44, 16  ;;  %v5268_v8 = vrot.slane %v5266_v13, 1 }
 0x2e6   : > { %v11055_v51 = vadd.f32 %v8133_v47, %v4072_v11  ;;  %6281 = vmatprep.mubr.bf16.mxu0 %v5262_v46  ;;  %v8028_v37 = vpop.f32.mrb[132].mxu1  ;;  %v4931_v11 = vld [vmem:[#allocation2 + $0x280] sm:$0xff]  ;;  %v11063_v47 = vpack.c.bf16 %v4927_v52, %v4927_v52  ;;  %v5285_v23 = vrot.slane %v5283_v32, 1  ;;  %v11070_v19 = vpack.c.bf16 %v4934_v0, %v4934_v0 }
 0x2e7   : > { %v8029_v24 = vpop.f32.mrb[133].mxu1  ;;  %v5304_v32 = vrot.slane %v5302_v39, 1 }
 0x2e8   : > { %11815 = vst [vmem:[#allocation44_spill] sm:$0xff] %v11055_v51  ;;  %v8134_v62 = vpop.f32.mrb[184].mxu0  ;;  %v8030_v27 = vadd.f32 %v8029_v24, %v8028_v37  ;;  %v8031_v18 = vpop.f32.mrb[134].mxu1  ;;  %v4929_v37 = vld [vmem:[#allocation2 + $0x270] sm:$0xff]  ;;  %v4938_v24 = vld [vmem:[#allocation2 + $0x2b8] sm:$0xff]  ;;  %11817 = vst [vmem:[#allocation46_spill] sm:$0xff] %v11070_v19  ;;  %v5286_v13 = vsel %vm1749_vm2, %v5281_v10, %v5285_v23 }
 0x2e9   : > { %v8135_v45 = vpop.f32.mrb[185].mxu0  ;;  %v8032_v22 = vpop.f32.mrb[135].mxu1  ;;  %v11068_v51 = vpack.c.bf16 %v4931_v11, %v4929_v37  ;;  %v4940_v10 = vld [vmem:[#allocation2 + $0x2c8] sm:$0x3] }
 0x2ea   : > { %v8136_v63 = vadd.f32 %v8135_v45, %v8134_v62  ;;  %v4085_v46 = vadd.f32 %v8030_v27, %v10657_v7  ;;  %v8137_v28 = vpop.f32.mrb[186].mxu0  ;;  %v8033_v57 = vadd.f32 %v8032_v22, %v8031_v18  ;;  %v5250_v7 = vsel %vm1749_vm2, %v5245_v21, %v5249_v50 }
 0x2eb   : > { %v8138_v48 = vpop.f32.mrb[187].mxu0  ;;  %6129 = vmatmul.mubr.bf16.gmra.mrb[240].mxu1 %v11043_v17  ;;  %11816 = vst [vmem:[#allocation45_spill] sm:$0xff] %v11068_v51  ;;  %v5271_v27 = vshll.u32 %v11063_v47, 16  ;;  %v11079_v18 = vpack.c.bf16 %v4938_v24, %v4936_v31  ;;  %v5290_v50 = vshll.u32 %v11068_v51, 16  ;;  %v5307_v21 = vshll.u32 %v11070_v19, 16  ;;  %v4944_v19 = vld [vmem:[#allocation2 + $0x2e8] sm:$0xff] }
 0x2ec   : > { %v11072_v52 = vadd.f32 %v8136_v63, %v4077_v35  ;;  %v8139_v4 = vadd.f32 %v8138_v48, %v8137_v28  ;;  %v4088_v62 = vadd.f32 %v8033_v57, %v10665_v49  ;;  %6136 = vmatprep.mubr.bf16.mxu1 %v11053_v44  ;;  %v4933_v28 = vld [vmem:[#allocation2 + $0x290] sm:$0x3]  ;;  %v5269_v49 = vor.u32 %v5268_v8, %v5264_v61 }
 0x2ed   : > { %6282 = vmatmul.mubr.bf16.gmra.mrb[36].mxu0 %v5250_v7  ;;  %11818 = vst [vmem:[#allocation47_spill] sm:$0xff] %v11079_v18  ;;  %v5300_v57 = vshrl.u32 %v11053_v44, 16  ;;  %v5273_v37 = vrot.slane %v5271_v27, 1  ;;  %v11086_v24 = vpack.c.bf16 %v4933_v28, %v4933_v28  ;;  %v4937_v48 = vld [vmem:[#allocation2 + $0x2b0] sm:$0xff]  ;;  %v5292_v44 = vrot.slane %v5290_v50, 1 }
 0x2ee   : > { %v11081_v11 = vadd.f32 %v8139_v4, %v4080_v6  ;;  %6289 = vmatprep.mubr.bf16.mxu0 %v5286_v13  ;;  %v8162_v35 = vpop.f32.mrb[136].mxu1  ;;  %v5326_v4 = vshll.u32 %v11079_v18, 16  ;;  %v5288_v13 = vshrl.u32 %v11068_v51, 16  ;;  %v5309_v27 = vrot.slane %v5307_v21, 1 }
 0x2ef   : > { %v8163_v0 = vpop.f32.mrb[137].mxu1  ;;  %v5305_v6 = vor.u32 %v5304_v32, %v5300_v57  ;;  %11819 = vst [vmem:[#allocation48_spill] sm:$0xff] %v11086_v24  ;;  %v4935_v32 = vld [vmem:[#allocation2 + $0x2a0] sm:$0xff]  ;;  %v11093_v28 = vpack.c.bf16 %v4940_v10, %v4940_v10  ;;  %v5295_v50 = vshll.u32 %v11086_v24, 16 }
 0x2f0   : > { %v8140_v45 = vpop.f32.mrb[188].mxu0  ;;  %v8164_v23 = vadd.f32 %v8163_v0, %v8162_v35  ;;  %v8165_v22 = vpop.f32.mrb[138].mxu1  ;;  %v5274_v0 = vsel %vm1749_vm2, %v5269_v49, %v5273_v37 }
 0x2f1   : > { %v8141_v39 = vpop.f32.mrb[189].mxu0  ;;  %v8166_v63 = vpop.f32.mrb[139].mxu1  ;;  %11820 = vst [vmem:[#allocation49_spill] sm:$0xff] %v11093_v28  ;;  %v5310_v49 = vsel %vm1749_vm2, %v5305_v6, %v5309_v27 }
 0x2f2   : > { %v8142_v61 = vadd.f32 %v8141_v39, %v8140_v45  ;;  %v8143_v8 = vpop.f32.mrb[190].mxu0  ;;  %v4575_v7 = vadd.f32 %v8164_v23, %v10682_v41  ;;  %v8167_v31 = vadd.f32 %v8166_v63, %v8165_v22  ;;  %v11099_v41 = vpack.c.bf16 %v4937_v48, %v4935_v32  ;;  %v4942_v23 = vld [vmem:[#allocation2 + $0x2d8] sm:$0xff]  ;;  %v4939_v63 = vld [vmem:[#allocation2 + $0x2c0] sm:$0x3] }
 0x2f3   : > { %v8144_v35 = vpop.f32.mrb[191].mxu0  ;;  %6137 = vmatmul.mubr.bf16.gmra.mrb[244].mxu1 %v11068_v51  ;;  %v5328_v22 = vrot.slane %v5326_v4, 1  ;;  %v11103_v21 = vpack.c.bf16 %v4944_v19, %v4942_v23  ;;  %v5331_v48 = vshll.u32 %v11093_v28, 16  ;;  %v4946_v4 = vld [vmem:[#allocation2 + $0x2f8] sm:$0x3] }
 0x2f4   : > { %v11095_v57 = vadd.f32 %v8142_v61, %v4085_v46  ;;  %v8145_v45 = vadd.f32 %v8144_v35, %v8143_v8  ;;  %v4578_v39 = vadd.f32 %v8167_v31, %v10690_v15  ;;  %6144 = vmatprep.mubr.bf16.mxu1 %v11079_v18  ;;  %v5293_v15 = vor.u32 %v5292_v44, %v5288_v13 }
 0x2f5   : > { %6290 = vmatmul.mubr.bf16.gmra.mrb[40].mxu0 %v5274_v0  ;;  %11821 = vst [vmem:[#allocation50_spill] sm:$0xff] %v11103_v21  ;;  %v5324_v61 = vshrl.u32 %v11079_v18, 16  ;;  %v5314_v6 = vshll.u32 %v11099_v41, 16  ;;  %v4943_v0 = vld [vmem:[#allocation2 + $0x2e0] sm:$0xff]  ;;  %v5350_v23 = vshll.u32 %v11103_v21, 16  ;;  %v4941_v18 = vld [vmem:[#allocation2 + $0x2d0] sm:$0xff] }
 0x2f6   : > { %v11105_v10 = vadd.f32 %v8145_v45, %v4088_v62  ;;  %6297 = vmatprep.mubr.bf16.mxu0 %v5310_v49  ;;  %v8168_v46 = vpop.f32.mrb[140].mxu1  ;;  %v5297_v62 = vrot.slane %v5295_v50, 1  ;;  %v11110_v45 = vpack.c.bf16 %v4939_v63, %v4939_v63  ;;  %v5333_v51 = vrot.slane %v5331_v48, 1 }
 0x2f7   : > { %v8169_v37 = vpop.f32.mrb[141].mxu1  ;;  %v5329_v32 = vor.u32 %v5328_v22, %v5324_v61  ;;  %v11118_v50 = vpack.c.bf16 %v4946_v4, %v4946_v4 }
 0x2f8   : > { %11822 = vst [vmem:[#allocation51_spill] sm:$0xff] %v11105_v10  ;;  %v8274_v8 = vpop.f32.mrb[192].mxu0  ;;  %v8170_v31 = vadd.f32 %v8169_v37, %v8168_v46  ;;  %v8171_v35 = vpop.f32.mrb[142].mxu1  ;;  %11823 = vst [vmem:[#allocation52_spill] sm:$0xff] %v11110_v45  ;;  %v4950_v46 = vld [vmem:[#allocation2 + $0x318] sm:$0xff]  ;;  %v5298_v24 = vsel %vm1749_vm2, %v5293_v15, %v5297_v62  ;;  %v11116_v10 = vpack.c.bf16 %v4943_v0, %v4941_v18  ;;  %v5319_v15 = vshll.u32 %v11110_v45, 16 }
 0x2f9   : > { %v8275_v19 = vpop.f32.mrb[193].mxu0  ;;  %v8172_v27 = vpop.f32.mrb[143].mxu1  ;;  %11824 = vst [vmem:[#allocation53_spill] sm:$0xff] %v11118_v50 }
 0x2fa   : > { %v8276_v44 = vadd.f32 %v8275_v19, %v8274_v8  ;;  %v4583_v13 = vadd.f32 %v8170_v31, %v10706_v25  ;;  %v8277_v49 = vpop.f32.mrb[194].mxu0  ;;  %v8173_v28 = vadd.f32 %v8172_v27, %v8171_v35  ;;  %v5316_v25 = vrot.slane %v5314_v6, 1  ;;  %v4948_v8 = vld [vmem:[#allocation2 + $0x308] sm:$0xff]  ;;  %v4945_v6 = vld [vmem:[#allocation2 + $0x2f0] sm:$0x3] }
 0x2fb   : > { %v8278_v37 = vpop.f32.mrb[195].mxu0  ;;  %6145 = vmatmul.mubr.bf16.gmra.mrb[248].mxu1 %v11099_v41  ;;  %v5334_v31 = vsel %vm1749_vm2, %v5329_v32, %v5333_v51  ;;  %v5352_v35 = vrot.slane %v5350_v23, 1  ;;  %v11126_v48 = vpack.c.bf16 %v4950_v46, %v4948_v8  ;;  %v4949_v32 = vld [vmem:[#allocation2 + $0x310] sm:$0xff]  ;;  %v4952_v23 = vld [vmem:[#allocation2 + $0x328] sm:$0x3] }
 0x2fc   : > { %v11120_v22 = vadd.f32 %v8276_v44, %v4575_v7  ;;  %v8279_v63 = vadd.f32 %v8278_v37, %v8277_v49  ;;  %v4586_v61 = vadd.f32 %v8173_v28, %v10713_v1  ;;  %6152 = vmatprep.mubr.bf16.mxu1 %v11103_v21  ;;  %v5312_v7 = vshrl.u32 %v11099_v41, 16 }
 0x2fd   : > { %6298 = vmatmul.mubr.bf16.gmra.mrb[44].mxu0 %v5298_v24  ;;  %11826 = vst [vmem:[#allocation55_spill] sm:$0xff] %v11126_v48  ;;  %v5338_v1 = vshll.u32 %v11116_v10, 16  ;;  %v5348_v28 = vshrl.u32 %v11103_v21, 16  ;;  %v5355_v24 = vshll.u32 %v11118_v50, 16  ;;  %v5321_v49 = vrot.slane %v5319_v15, 1  ;;  %v4947_v50 = vld [vmem:[#allocation2 + $0x300] sm:$0xff] }
 0x2fe   : > { %11825 = vst [vmem:[#allocation54_spill] sm:$0xff] %v11120_v22  ;;  %v11128_v18 = vadd.f32 %v8279_v63, %v4578_v39  ;;  %6305 = vmatprep.mubr.bf16.mxu0 %v5334_v31  ;;  %v8174_v0 = vpop.f32.mrb[144].mxu1  ;;  %v5317_v62 = vor.u32 %v5316_v25, %v5312_v7  ;;  %v5374_v37 = vshll.u32 %v11126_v48, 16  ;;  %v11136_v22 = vpack.c.bf16 %v4945_v6, %v4945_v6  ;;  %v4954_v21 = vld [vmem:[#allocation2 + $0x338] sm:$0xff] }
 0x2ff   : > { %v8175_v4 = vpop.f32.mrb[145].mxu1  ;;  %v5353_v46 = vor.u32 %v5352_v35, %v5348_v28  ;;  %v5340_v25 = vrot.slane %v5338_v1, 1  ;;  %v5357_v7 = vrot.slane %v5355_v24, 1  ;;  %v11139_v45 = vpack.c.bf16 %v4949_v32, %v4947_v50 }
 0x300   : > { %11827 = vst [vmem:[#allocation56_spill] sm:$0xff] %v11128_v18  ;;  %v8280_v51 = vpop.f32.mrb[196].mxu0  ;;  %v8176_v19 = vadd.f32 %v8175_v4, %v8174_v0  ;;  %v8177_v27 = vpop.f32.mrb[146].mxu1  ;;  %v4956_v0 = vld [vmem:[#allocation2 + $0x348] sm:$0xff]  ;;  %v11141_v15 = vpack.c.bf16 %v4952_v23, %v4952_v23  ;;  %v5322_v6 = vsel %vm1749_vm2, %v5317_v62, %v5321_v49  ;;  %v5336_v24 = vshrl.u32 %v11116_v10, 16 }
 0x301   : > { %v8281_v39 = vpop.f32.mrb[197].mxu0  ;;  %v8178_v44 = vpop.f32.mrb[147].mxu1  ;;  %v5358_v1 = vsel %vm1749_vm2, %v5353_v46, %v5357_v7  ;;  %v5343_v32 = vshll.u32 %v11136_v22, 16  ;;  %v5372_v62 = vshrl.u32 %v11126_v48, 16  ;;  %v5360_v7 = vshrl.u32 %v11139_v45, 16 }
 0x302   : > { %v8282_v63 = vadd.f32 %v8281_v39, %v8280_v51  ;;  %v4591_v8 = vadd.f32 %v8176_v19, %v10727_v29  ;;  %v8283_v31 = vpop.f32.mrb[198].mxu0  ;;  %v8179_v18 = vadd.f32 %v8178_v44, %v8177_v27  ;;  %11828 = vst [vmem:[#allocation57_spill] sm:$0xff] %v11141_v15  ;;  %v4951_v51 = vld [vmem:[#allocation2 + $0x320] sm:$0x3]  ;;  %v5376_v19 = vrot.slane %v5374_v37, 1  ;;  %v4953_v37 = vld [vmem:[#allocation2 + $0x330] sm:$0xff] }
 0x303   : > { %v8284_v4 = vpop.f32.mrb[199].mxu0  ;;  %6153 = vmatmul.mubr.bf16.gmra.mrb[252].mxu1 %v11116_v10  ;;  %v11149_v27 = vpack.c.bf16 %v4956_v0, %v4954_v21  ;;  %v5379_v23 = vshll.u32 %v11141_v15, 16  ;;  %v11157_v39 = vpack.c.bf16 %v4951_v51, %v4951_v51  ;;  %v5362_v44 = vshll.u32 %v11139_v45, 16 }
 0x304   : > { %v11143_v35 = vadd.f32 %v8282_v63, %v4583_v13  ;;  %v8285_v28 = vadd.f32 %v8284_v4, %v8283_v31  ;;  %v4594_v29 = vadd.f32 %v8179_v18, %v10734_v53  ;;  %6160 = vmatprep.mubr.bf16.mxu1 %v11126_v48  ;;  %v4958_v53 = vld [vmem:[#allocation2 + $0x358] sm:$0x3]  ;;  %v5341_v46 = vor.u32 %v5340_v25, %v5336_v24  ;;  %v4955_v63 = vld [vmem:[#allocation2 + $0x340] sm:$0xff] }
 0x305   : > { %6306 = vmatmul.mubr.bf16.gmra.mrb[48].mxu0 %v5322_v6  ;;  %v5377_v4 = vor.u32 %v5376_v19, %v5372_v62  ;;  %v5398_v6 = vshll.u32 %v11149_v27, 16  ;;  %v5345_v15 = vrot.slane %v5343_v32, 1  ;;  %v5381_v25 = vrot.slane %v5379_v23, 1 }
 0x306   : > { %11829 = vst [vmem:[#allocation58_spill] sm:$0xff] %v11143_v35  ;;  %v11151_v50 = vadd.f32 %v8285_v28, %v4586_v61  ;;  %6313 = vmatprep.mubr.bf16.mxu0 %v5358_v1  ;;  %v8180_v13 = vpop.f32.mrb[148].mxu1  ;;  %v11161_v28 = vpack.c.bf16 %v4958_v53, %v4958_v53  ;;  %v5364_v24 = vrot.slane %v5362_v44, 1  ;;  %v11167_v19 = vpack.c.bf16 %v4955_v63, %v4953_v37 }
 0x307   : > { %v8181_v18 = vpop.f32.mrb[149].mxu1  ;;  %v5396_v32 = vshrl.u32 %v11149_v27, 16  ;;  %v5400_v23 = vrot.slane %v5398_v6, 1 }
 0x308   : > { %11830 = vst [vmem:[#allocation59_spill] sm:$0xff] %v11151_v50  ;;  %v8286_v21 = vpop.f32.mrb[200].mxu0  ;;  %v8182_v49 = vadd.f32 %v8181_v18, %v8180_v13  ;;  %v8183_v61 = vpop.f32.mrb[150].mxu1  ;;  %v5367_v18 = vshll.u32 %v11157_v39, 16  ;;  %v5403_v44 = vshll.u32 %v11161_v28, 16  ;;  %v5365_v37 = vor.u32 %v5364_v24, %v5360_v7 }
 0x309   : > { %v8287_v31 = vpop.f32.mrb[201].mxu0  ;;  %v8184_v0 = vpop.f32.mrb[151].mxu1 }
 0x30a   : > { %v8288_v1 = vadd.f32 %v8287_v31, %v8286_v21  ;;  %v4599_v51 = vadd.f32 %v8182_v49, %v10747_v12  ;;  %v8289_v50 = vpop.f32.mrb[202].mxu0  ;;  %v8185_v35 = vadd.f32 %v8184_v0, %v8183_v61  ;;  %v5346_v21 = vsel %vm1749_vm2, %v5341_v46, %v5345_v15  ;;  %v4957_v49 = vld [vmem:[#allocation2 + $0x350] sm:$0x3] }
 0x30b   : > { %v8290_v13 = vpop.f32.mrb[203].mxu0  ;;  %6161 = vmatmul.mubr.bf16.gmra.mrb[0].mxu1 %v11139_v45  ;;  %v5382_v12 = vsel %vm1749_vm2, %v5377_v4, %v5381_v25  ;;  %v5507_v15 = vrot.slane %v10745_v20, 1  ;;  %v11182_v0 = vpack.c.bf16 %v4957_v49, %v4957_v49 }
 0x30c   : > { %v11169_v62 = vadd.f32 %v8288_v1, %v4591_v8  ;;  %v8291_v53 = vadd.f32 %v8290_v13, %v8289_v50  ;;  %v4602_v48 = vadd.f32 %v8185_v35, %v10755_v3  ;;  %6168 = vmatprep.mubr.bf16.mxu1 %v11149_v27  ;;  %v5506_v3 = vrot.slane %v10732_v42, 1 }
 0x30d   : > { %6314 = vmatmul.mubr.bf16.gmra.mrb[52].mxu0 %v5346_v21  ;;  %v5386_v35 = vshll.u32 %v11167_v19, 16  ;;  %v5369_v1 = vrot.slane %v5367_v18, 1  ;;  %v5405_v13 = vrot.slane %v5403_v44, 1  ;;  %v11831_v44 = vld [vmem:[#allocation10_spill] sm:$0xff] }
 0x30e   : > { %v11177_v61 = vadd.f32 %v8291_v53, %v4594_v29  ;;  %6321 = vmatprep.mubr.bf16.mxu0 %v5382_v12  ;;  %v8186_v8 = vpop.f32.mrb[152].mxu1  ;;  %v5401_v29 = vor.u32 %v5400_v23, %v5396_v32  ;;  %v5508_v21 = vsel %vm2230_vm3, %v5506_v3, %v5507_v15  ;;  %v5384_v12 = vshrl.u32 %v11167_v19, 16  ;;  %v11832_v15 = vld [vmem:[#allocation16_spill] sm:$0xff] }
 0x30f   : > { %v8187_v50 = vpop.f32.mrb[153].mxu1  ;;  %v5370_v20 = vsel %vm1749_vm2, %v5365_v37, %v5369_v1  ;;  %v5388_v49 = vrot.slane %v5386_v35, 1 }
 0x310   : > { %v8292_v46 = vpop.f32.mrb[204].mxu0  ;;  %v8188_v63 = vadd.f32 %v8187_v50, %v8186_v8  ;;  %v8189_v31 = vpop.f32.mrb[154].mxu1  ;;  %v5406_v23 = vsel %vm1749_vm2, %v5401_v29, %v5405_v13  ;;  %v5503_v50 = vrot.slane %v11831_v44, 1 }
 0x311   : > { %v8293_v4 = vpop.f32.mrb[205].mxu0  ;;  %v8190_v6 = vpop.f32.mrb[155].mxu1 }
 0x312   : > { %v8294_v25 = vadd.f32 %v8293_v4, %v8292_v46  ;;  %v4607_v53 = vadd.f32 %v8188_v63, %v10780_v33  ;;  %v8295_v7 = vpop.f32.mrb[206].mxu0  ;;  %v8191_v24 = vadd.f32 %v8190_v6, %v8189_v31  ;;  %v5391_v33 = vshll.u32 %v11182_v0, 16  ;;  %v11834_v31 = vld [vmem:[#allocation19_spill] sm:$0xff] }
 0x313   : > { %v8296_v42 = vpop.f32.mrb[207].mxu0  ;;  %6169 = vmatmul.mubr.bf16.gmra.mrb[4].mxu1 %v11167_v19  ;;  %v5504_v46 = vrot.slane %v11832_v15, 1  ;;  %v5513_v4 = vrot.slane %v11834_v31, 1 }
 0x314   : > { %v11189_v8 = vadd.f32 %v8294_v25, %v4599_v51  ;;  %v8297_v18 = vadd.f32 %v8296_v42, %v8295_v7  ;;  %v4610_v32 = vadd.f32 %v8191_v24, %v10797_v34  ;;  %6370 = vmatprep.mubr.bf16.mxu1 %v5508_v21  ;;  %v11833_v51 = vld [vmem:[#allocation13_spill] sm:$0xff]  ;;  %v5389_v25 = vor.u32 %v5388_v49, %v5384_v12 }
 0x315   : > { %6322 = vmatmul.mubr.bf16.gmra.mrb[56].mxu0 %v5370_v20  ;;  %v5512_v63 = vrot.slane %v11833_v51, 1  ;;  %v5393_v7 = vrot.slane %v5391_v33, 1  ;;  %v5505_v21 = vsel %vm2230_vm3, %v5503_v50, %v5504_v46  ;;  %v5509_v49 = vrot.slane %v10776_v36, 1  ;;  %v11836_v51 = vld [vmem:[#allocation14_spill] sm:$0xff] }
 0x316   : > { %v11195_v37 = vadd.f32 %v8297_v18, %v4602_v48  ;;  %6329 = vmatprep.mubr.bf16.mxu0 %v5406_v23  ;;  %v8192_v3 = vpop.f32.mrb[156].mxu1  ;;  %v5518_v31 = vrot.slane %v11836_v51, 1  ;;  %v11841_v51 = vld [vmem:[#allocation18_spill] sm:$0xff] }
 0x317   : > { %v8193_v35 = vpop.f32.mrb[157].mxu1  ;;  %v5514_v23 = vsel %vm2230_vm3, %v5512_v63, %v5513_v4  ;;  %v5394_v12 = vsel %vm1749_vm2, %v5389_v25, %v5393_v7  ;;  %v11837_v63 = vld [vmem:[#allocation23_spill] sm:$0xff] }
 0x318   : > { %v8298_v34 = vpop.f32.mrb[208].mxu0  ;;  %v8194_v6 = vadd.f32 %v8193_v35, %v8192_v3  ;;  %v8195_v1 = vpop.f32.mrb[158].mxu1  ;;  %v11835_v35 = vld [vmem:[#allocation17_spill] sm:$0xff] }
 0x319   : > { %v8299_v24 = vpop.f32.mrb[209].mxu0  ;;  %v8196_v29 = vpop.f32.mrb[159].mxu1  ;;  %v5510_v50 = vrot.slane %v11835_v35, 1 }
 0x31a   : > { %v8300_v13 = vadd.f32 %v8299_v24, %v8298_v34  ;;  %v4615_v48 = vadd.f32 %v8194_v6, %v10821_v60  ;;  %v8301_v42 = vpop.f32.mrb[210].mxu0  ;;  %v8197_v20 = vadd.f32 %v8196_v29, %v8195_v1 }
 0x31b   : > { %v8302_v18 = vpop.f32.mrb[211].mxu0  ;;  %6371 = vmatmul.mubr.bf16.vlgmr.msra.gmra.mrb[8].mxu1 %v5505_v21  ;;  %v11838_v21 = vld [vmem:[#allocation4_spill] sm:$0xff] }
 0x31c   : > { %v11203_v44 = vadd.f32 %v8300_v13, %v4607_v53  ;;  %v8303_v15 = vadd.f32 %v8302_v18, %v8301_v42  ;;  %v4618_v3 = vadd.f32 %v8197_v20, %v10839_v55  ;;  %6378 = vmatprep.mubr.bf16.mxu1 %v5514_v23  ;;  %v5519_v53 = vrot.slane %v11837_v63, 1  ;;  %v11839_v23 = vld [vmem:[#allocation20_spill] sm:$0xff] }
 0x31d   : > { %6330 = vmatmul.mubr.bf16.gmra.mrb[60].mxu0 %v5394_v12 }
 0x31e   : > { %v11208_v60 = vadd.f32 %v8303_v15, %v4610_v32  ;;  %v8198_v33 = vpop.f32.mrb[160].mxu1  ;;  %v5511_v32 = vsel %vm2230_vm3, %v5509_v49, %v5510_v50  ;;  %v5520_v13 = vsel %vm2230_vm3, %v5518_v31, %v5519_v53  ;;  %v5515_v15 = vrot.slane %v11839_v23, 1  ;;  %v11842_v50 = vld [vmem:[#allocation22_spill] sm:$0xff] }
 0x31f   : > { %v8199_v46 = vpop.f32.mrb[161].mxu1  ;;  %v5524_v49 = vrot.slane %v11841_v51, 1  ;;  %v5525_v63 = vrot.slane %v11842_v50, 1  ;;  %v11845_v51 = vld [vmem:[#allocation25_spill] sm:$0xff] }
 0x320   : > { %v8304_v4 = vpop.f32.mrb[212].mxu0  ;;  %v8200_v34 = vadd.f32 %v8199_v46, %v8198_v33  ;;  %v8201_v6 = vpop.f32.mrb[162].mxu1 }
 0x321   : > { %v8305_v55 = vpop.f32.mrb[213].mxu0  ;;  %v8202_v1 = vpop.f32.mrb[163].mxu1 }
 0x322   : > { %v8306_v25 = vadd.f32 %v8305_v55, %v8304_v4  ;;  %v4623_v7 = vadd.f32 %v8200_v34, %v10863_v59  ;;  %v8307_v24 = vpop.f32.mrb[214].mxu0  ;;  %v8203_v36 = vadd.f32 %v8202_v1, %v8201_v6  ;;  %v11840_v59 = vld [vmem:[#allocation21_spill] sm:$0xff] }
 0x323   : > { %v8308_v29 = vpop.f32.mrb[215].mxu0  ;;  %6379 = vmatmul.mubr.bf16.gmra.mrb[12].mxu1 %v5511_v32  ;;  %v5516_v35 = vrot.slane %v11840_v59, 1 }
 0x324   : > { %v11216_v42 = vadd.f32 %v8306_v25, %v4615_v48  ;;  %v8309_v20 = vadd.f32 %v8308_v29, %v8307_v24  ;;  %v4626_v18 = vadd.f32 %v8203_v36, %v11838_v21  ;;  %6386 = vmatprep.mubr.bf16.mxu1 %v5520_v13  ;;  %v5526_v36 = vsel %vm2230_vm3, %v5524_v49, %v5525_v63 }
 0x326   : > { %v11220_v12 = vadd.f32 %v8309_v20, %v4618_v3  ;;  %v8204_v33 = vpop.f32.mrb[164].mxu1  ;;  %v5517_v3 = vsel %vm2230_vm3, %v5515_v15, %v5516_v35  ;;  %v11843_v20 = vld [vmem:[#allocation24_spill] sm:$0xff]  ;;  %v5530_v15 = vrot.slane %v11845_v51, 1  ;;  %v11846_v35 = vld [vmem:[#allocation7_spill] sm:$0xff] }
 0x327   : > { %v8205_v46 = vpop.f32.mrb[165].mxu1  ;;  %v5521_v21 = vrot.slane %v11843_v20, 1  ;;  %v5531_v50 = vrot.slane %v11846_v35, 1  ;;  %v11849_v51 = vld [vmem:[#allocation3_spill] sm:$0xff] }
 0x328   : > { %v8310_v4 = vpop.f32.mrb[216].mxu0  ;;  %v8206_v31 = vadd.f32 %v8205_v46, %v8204_v33  ;;  %v8207_v48 = vpop.f32.mrb[166].mxu1 }
 0x329   : > { %v8311_v53 = vpop.f32.mrb[217].mxu0  ;;  %v8208_v34 = vpop.f32.mrb[167].mxu1 }
 0x32a   : > { %v8312_v6 = vadd.f32 %v8311_v53, %v8310_v4  ;;  %v4631_v55 = vadd.f32 %v8206_v31, %v10901_v56  ;;  %v8313_v1 = vpop.f32.mrb[218].mxu0  ;;  %v8209_v25 = vadd.f32 %v8208_v34, %v8207_v48  ;;  %v11844_v56 = vld [vmem:[#allocation5_spill] sm:$0xff] }
 0x32b   : > { %v8314_v24 = vpop.f32.mrb[219].mxu0  ;;  %6387 = vmatmul.mubr.bf16.gmra.mrb[16].mxu1 %v5517_v3  ;;  %v5522_v59 = vrot.slane %v11844_v56, 1 }
 0x32c   : > { %v11228_v32 = vadd.f32 %v8312_v6, %v4623_v7  ;;  %v8315_v29 = vadd.f32 %v8314_v24, %v8313_v1  ;;  %v4634_v13 = vadd.f32 %v8209_v25, %v10911_v58  ;;  %6394 = vmatprep.mubr.bf16.mxu1 %v5526_v36  ;;  %v5532_v1 = vsel %vm2230_vm3, %v5530_v15, %v5531_v50  ;;  %v11847_v36 = vld [vmem:[#allocation8_spill] sm:$0xff] }
 0x32e   : > { %v11232_v23 = vadd.f32 %v8315_v29, %v4626_v18  ;;  %v8210_v33 = vpop.f32.mrb[168].mxu1  ;;  %v5523_v18 = vsel %vm2230_vm3, %v5521_v21, %v5522_v59  ;;  %v5527_v29 = vrot.slane %v11847_v36, 1  ;;  %v5536_v21 = vrot.slane %v11849_v51, 1  ;;  %v11850_v59 = vld [vmem:[#allocation9_spill] sm:$0xff]  ;;  %v11853_v51 = vld [vmem:[#allocation12_spill] sm:$0xff] }
 0x32f   : > { %v8211_v46 = vpop.f32.mrb[169].mxu1  ;;  %v5537_v35 = vrot.slane %v11850_v59, 1 }
 0x330   : > { %v8316_v4 = vpop.f32.mrb[220].mxu0  ;;  %v8212_v49 = vadd.f32 %v8211_v46, %v8210_v33  ;;  %v8213_v7 = vpop.f32.mrb[170].mxu1 }
 0x331   : > { %v8317_v63 = vpop.f32.mrb[221].mxu0  ;;  %v8214_v31 = vpop.f32.mrb[171].mxu1 }
 0x332   : > { %v8318_v48 = vadd.f32 %v8317_v63, %v8316_v4  ;;  %v4639_v58 = vadd.f32 %v8212_v49, %v10927_v26  ;;  %v8319_v53 = vpop.f32.mrb[222].mxu0  ;;  %v8215_v34 = vadd.f32 %v8214_v31, %v8213_v7  ;;  %v11848_v26 = vld [vmem:[#allocation11_spill] sm:$0xff] }
 0x333   : > { %v8320_v6 = vpop.f32.mrb[223].mxu0  ;;  %6395 = vmatmul.mubr.bf16.gmra.mrb[20].mxu1 %v5523_v18  ;;  %v5528_v56 = vrot.slane %v11848_v26, 1 }
 0x334   : > { %v11240_v25 = vadd.f32 %v8318_v48, %v4631_v55  ;;  %v8321_v3 = vadd.f32 %v8320_v6, %v8319_v53  ;;  %v4642_v24 = vadd.f32 %v8215_v34, %v10936_v16  ;;  %6402 = vmatprep.mubr.bf16.mxu1 %v5532_v1  ;;  %v5538_v53 = vsel %vm2230_vm3, %v5536_v21, %v5537_v35  ;;  %v11851_v1 = vld [vmem:[#allocation6_spill] sm:$0xff] }
 0x336   : > { %v11244_v20 = vadd.f32 %v8321_v3, %v4634_v13  ;;  %v8216_v33 = vpop.f32.mrb[172].mxu1  ;;  %v5529_v13 = vsel %vm2230_vm3, %v5527_v29, %v5528_v56  ;;  %v5533_v3 = vrot.slane %v11851_v1, 1  ;;  %v5542_v29 = vrot.slane %v11853_v51, 1  ;;  %v11854_v56 = vld [vmem:[#allocation27_spill] sm:$0xff]  ;;  %v11857_v51 = vld [vmem:[#allocation28_spill] sm:$0xff] }
 0x337   : > { %v8217_v46 = vpop.f32.mrb[173].mxu1  ;;  %v5543_v59 = vrot.slane %v11854_v56, 1 }
 0x338   : > { %v8322_v4 = vpop.f32.mrb[224].mxu0  ;;  %v8218_v15 = vadd.f32 %v8217_v46, %v8216_v33  ;;  %v8219_v55 = vpop.f32.mrb[174].mxu1 }
 0x339   : > { %v8323_v50 = vpop.f32.mrb[225].mxu0  ;;  %v8220_v49 = vpop.f32.mrb[175].mxu1 }
 0x33a   : > { %v8324_v7 = vadd.f32 %v8323_v50, %v8322_v4  ;;  %v4647_v16 = vadd.f32 %v8218_v15, %v10951_v30  ;;  %v8325_v63 = vpop.f32.mrb[226].mxu0  ;;  %v8221_v31 = vadd.f32 %v8220_v49, %v8219_v55  ;;  %v11852_v30 = vld [vmem:[#allocation15_spill] sm:$0xff] }
 0x33b   : > { %v8326_v48 = vpop.f32.mrb[227].mxu0  ;;  %6403 = vmatmul.mubr.bf16.gmra.mrb[24].mxu1 %v5529_v13  ;;  %v5534_v26 = vrot.slane %v11852_v30, 1 }
 0x33c   : > { %v11252_v34 = vadd.f32 %v8324_v7, %v4639_v58  ;;  %v8327_v18 = vadd.f32 %v8326_v48, %v8325_v63  ;;  %v4650_v6 = vadd.f32 %v8221_v31, %v10959_v9  ;;  %6410 = vmatprep.mubr.bf16.mxu1 %v5538_v53  ;;  %v5544_v63 = vsel %vm2230_vm3, %v5542_v29, %v5543_v59  ;;  %v11855_v53 = vld [vmem:[#allocation26_spill] sm:$0xff] }
 0x33e   : > { %v11256_v36 = vadd.f32 %v8327_v18, %v4642_v24  ;;  %v8222_v33 = vpop.f32.mrb[176].mxu1  ;;  %v5535_v24 = vsel %vm2230_vm3, %v5533_v3, %v5534_v26  ;;  %v5539_v18 = vrot.slane %v11855_v53, 1  ;;  %v5548_v3 = vrot.slane %v11857_v51, 1  ;;  %v11858_v26 = vld [vmem:[#allocation31_spill] sm:$0xff]  ;;  %v11860_v53 = vld [vmem:[#allocation33_spill] sm:$0xff]  ;;  %v11862_v51 = vld [vmem:[#allocation32_spill] sm:$0xff] }
 0x33f   : > { %v8223_v46 = vpop.f32.mrb[177].mxu1  ;;  %v5549_v56 = vrot.slane %v11858_v26, 1 }
 0x340   : > { %v8328_v4 = vpop.f32.mrb[228].mxu0  ;;  %v8224_v21 = vadd.f32 %v8223_v46, %v8222_v33  ;;  %v8225_v58 = vpop.f32.mrb[178].mxu1 }
 0x341   : > { %v8329_v35 = vpop.f32.mrb[229].mxu0  ;;  %v8226_v15 = vpop.f32.mrb[179].mxu1 }
 0x342   : > { %v8330_v55 = vadd.f32 %v8329_v35, %v8328_v4  ;;  %v4655_v9 = vadd.f32 %v8224_v21, %v10975_v5  ;;  %v8331_v50 = vpop.f32.mrb[230].mxu0  ;;  %v8227_v49 = vadd.f32 %v8226_v15, %v8225_v58  ;;  %v11856_v5 = vld [vmem:[#allocation29_spill] sm:$0xff] }
 0x343   : > { %v8332_v7 = vpop.f32.mrb[231].mxu0  ;;  %6411 = vmatmul.mubr.bf16.gmra.mrb[28].mxu1 %v5535_v24  ;;  %v5540_v30 = vrot.slane %v11856_v5, 1 }
 0x344   : > { %v11264_v31 = vadd.f32 %v8330_v55, %v4647_v16  ;;  %v8333_v13 = vadd.f32 %v8332_v7, %v8331_v50  ;;  %v4658_v48 = vadd.f32 %v8227_v49, %v10984_v54  ;;  %6418 = vmatprep.mubr.bf16.mxu1 %v5544_v63  ;;  %v5550_v50 = vsel %vm2230_vm3, %v5548_v3, %v5549_v56  ;;  %v11859_v63 = vld [vmem:[#allocation30_spill] sm:$0xff] }
 0x346   : > { %v11268_v1 = vadd.f32 %v8333_v13, %v4650_v6  ;;  %v8228_v33 = vpop.f32.mrb[180].mxu1  ;;  %v5541_v6 = vsel %vm2230_vm3, %v5539_v18, %v5540_v30  ;;  %v5545_v13 = vrot.slane %v11859_v63, 1  ;;  %v5554_v18 = vrot.slane %v11862_v51, 1  ;;  %v11863_v30 = vld [vmem:[#allocation35_spill] sm:$0xff] }
 0x347   : > { %v8229_v46 = vpop.f32.mrb[181].mxu1  ;;  %v5555_v26 = vrot.slane %v11863_v30, 1  ;;  %v11869_v30 = vld [vmem:[#allocation39_spill] sm:$0xff] }
 0x348   : > { %v8334_v4 = vpop.f32.mrb[232].mxu0  ;;  %v8230_v29 = vadd.f32 %v8229_v46, %v8228_v33  ;;  %v8231_v16 = vpop.f32.mrb[182].mxu1  ;;  %v5546_v33 = vrot.slane %v11860_v53, 1  ;;  %v11867_v53 = vld [vmem:[#allocation37_spill] sm:$0xff] }
 0x349   : > { %v8335_v59 = vpop.f32.mrb[233].mxu0  ;;  %v8232_v21 = vpop.f32.mrb[183].mxu1 }
 0x34a   : > { %v8336_v58 = vadd.f32 %v8335_v59, %v8334_v4  ;;  %v4663_v54 = vadd.f32 %v8230_v29, %v10999_v43  ;;  %v8337_v35 = vpop.f32.mrb[234].mxu0  ;;  %v8233_v15 = vadd.f32 %v8232_v21, %v8231_v16  ;;  %v5547_v16 = vsel %vm2230_vm3, %v5545_v13, %v5546_v33 }
 0x34b   : > { %v8338_v55 = vpop.f32.mrb[235].mxu0  ;;  %6419 = vmatmul.mubr.bf16.gmra.mrb[32].mxu1 %v5541_v6  ;;  %v5552_v33 = vrot.slane %v11867_v53, 1 }
 0x34c   : > { %v11276_v49 = vadd.f32 %v8336_v58, %v4655_v9  ;;  %v8339_v24 = vadd.f32 %v8338_v55, %v8337_v35  ;;  %v4666_v7 = vadd.f32 %v8233_v15, %v11007_v38  ;;  %6426 = vmatprep.mubr.bf16.mxu1 %v5550_v50  ;;  %v9006_v38 = vld [vmem:[%s11624_s6] sm:$0xff]   ;;  %v5556_v15 = vsel %vm2230_vm3, %v5554_v18, %v5555_v26 }
 0x34d   : > { %8730 = vmatprep.subr.bf16.mxu0 %v9006_v38  ;;  %8778 = vmatprep.subr.bf16.mxu1 %v9006_v38  ;;  %v5561_v18 = vrot.slane %v11869_v30, 1  ;;  %v11875_v30 = vld [vmem:[#allocation40_spill] sm:$0xff] }
 0x34e   : > { %v11281_v5 = vadd.f32 %v8339_v24, %v4658_v48  ;;  %v8234_v43 = vpop.f32.mrb[184].mxu1  ;;  %8731 = vmatpush3.bf16.msra.mxu0 %v9006_v38  ;;  %8786 = vmatpush3.bf16.msra.mxu1 %v9006_v38  ;;  %v11865_v24 = vld [vmem:[#allocation34_spill] sm:$0xff] }
 0x34f   : > { %v8235_v46 = vpop.f32.mrb[185].mxu1  ;;  %v5551_v63 = vrot.slane %v11865_v24, 1 }
 0x350   : > { %11861 = vst [vmem:[#allocation10_spill] sm:$0xff] %v11281_v5  ;;  %v8340_v4 = vpop.f32.mrb[236].mxu0  ;;  %v8236_v3 = vadd.f32 %v8235_v46, %v8234_v43  ;;  %v8237_v9 = vpop.f32.mrb[186].mxu1  ;;  %v11868_v46 = vld [vmem:[#allocation36_spill] sm:$0xff] }
 0x351   : > { %v8341_v56 = vpop.f32.mrb[237].mxu0  ;;  %v8238_v29 = vpop.f32.mrb[187].mxu1  ;;  %v5560_v51 = vrot.slane %v11868_v46, 1 }
 0x352   : > { %v8342_v59 = vadd.f32 %v8341_v56, %v8340_v4  ;;  %v4671_v48 = vadd.f32 %v8236_v3, %v11023_v14  ;;  %v8343_v21 = vpop.f32.mrb[238].mxu0  ;;  %v8239_v58 = vadd.f32 %v8238_v29, %v8237_v9 }
 0x353   : > { %v8344_v35 = vpop.f32.mrb[239].mxu0  ;;  %6427 = vmatmul.mubr.bf16.gmra.mrb[36].mxu1 %v5547_v16 }
 0x354   : > { %v11291_v6 = vadd.f32 %v8342_v59, %v4663_v54  ;;  %v8345_v55 = vadd.f32 %v8344_v35, %v8343_v21  ;;  %v4674_v50 = vadd.f32 %v8239_v58, %v11032_v40  ;;  %6434 = vmatprep.mubr.bf16.mxu1 %v5556_v15  ;;  %v5562_v59 = vsel %vm2230_vm3, %v5560_v51, %v5561_v18  ;;  %v11871_v35 = vld [vmem:[#allocation44_spill] sm:$0xff] }
 0x355   : > { %v9007_v18 = vld [vmem:[%s11624_s6 + $0x8] sm:$0xff]  }
 0x356   : > { %11864 = vst [vmem:[#allocation16_spill] sm:$0xff] %v11291_v6  ;;  %v11295_v13 = vadd.f32 %v8345_v55, %v4666_v7  ;;  %v8240_v14 = vpop.f32.mrb[188].mxu1  ;;  %v5553_v7 = vsel %vm2230_vm3, %v5551_v63, %v5552_v33  ;;  %v11872_v55 = vld [vmem:[#allocation38_spill] sm:$0xff]  ;;  %v5566_v63 = vrot.slane %v11875_v30, 1  ;;  %8732 = vmatprep.subr.bf16.mxu0 %v9007_v18  ;;  %8779 = vmatprep.subr.bf16.mxu1 %v9007_v18 }
 0x357   : > { %v8241_v43 = vpop.f32.mrb[189].mxu1  ;;  %v5557_v24 = vrot.slane %v11872_v55, 1  ;;  %v11876_v33 = vld [vmem:[#allocation42_spill] sm:$0xff]  ;;  %8733 = vmatpush3.bf16.msra.mxu0 %v9007_v18  ;;  %8787 = vmatpush3.bf16.msra.mxu1 %v9007_v18  ;;  %v5563_v55 = vrot.slane %v11043_v17, 1 }
 0x358   : > { %11866 = vst [vmem:[#allocation13_spill] sm:$0xff] %v11295_v13  ;;  %v8346_v26 = vpop.f32.mrb[240].mxu0  ;;  %v8242_v54 = vadd.f32 %v8241_v43, %v8240_v14  ;;  %v8243_v4 = vpop.f32.mrb[190].mxu1  ;;  %v11873_v14 = vld [vmem:[#allocation41_spill] sm:$0xff]  ;;  %v11880_v30 = vld [vmem:[#allocation46_spill] sm:$0xff] }
 0x359   : > { %v8347_v3 = vpop.f32.mrb[241].mxu0  ;;  %v8244_v9 = vpop.f32.mrb[191].mxu1  ;;  %v5558_v53 = vrot.slane %v11873_v14, 1  ;;  %v5564_v14 = vrot.slane %v11063_v47, 1 }
 0x35a   : > { %v8348_v40 = vadd.f32 %v8347_v3, %v8346_v26  ;;  %v4679_v38 = vadd.f32 %v8242_v54, %v11047_v2  ;;  %v8349_v56 = vpop.f32.mrb[242].mxu0  ;;  %v8245_v29 = vadd.f32 %v8244_v9, %v8243_v4  ;;  %v5567_v26 = vrot.slane %v11876_v33, 1 }
 0x35b   : > { %v8350_v16 = vpop.f32.mrb[243].mxu0  ;;  %6435 = vmatmul.mubr.bf16.gmra.mrb[40].mxu1 %v5553_v7  ;;  %v5559_v9 = vsel %vm2230_vm3, %v5557_v24, %v5558_v53 }
 0x35c   : > { %v11303_v21 = vadd.f32 %v8348_v40, %v4671_v48  ;;  %v8351_v58 = vadd.f32 %v8350_v16, %v8349_v56  ;;  %v4682_v15 = vadd.f32 %v8245_v29, %v11871_v35  ;;  %6442 = vmatprep.mubr.bf16.mxu1 %v5562_v59  ;;  %v5568_v16 = vsel %vm2230_vm3, %v5566_v63, %v5567_v26 }
 0x35d   : > { %v5573_v63 = vrot.slane %v11880_v30, 1 }
 0x35e   : > { %11870 = vst [vmem:[#allocation19_spill] sm:$0xff] %v11303_v21  ;;  %v11308_v43 = vadd.f32 %v8351_v58, %v4674_v50  ;;  %v8246_v2 = vpop.f32.mrb[192].mxu1 }
 0x35f   : > { %v8247_v46 = vpop.f32.mrb[193].mxu1 }
 0x360   : > { %11874 = vst [vmem:[#allocation17_spill] sm:$0xff] %v11308_v43  ;;  %v8352_v54 = vpop.f32.mrb[244].mxu0  ;;  %v8248_v51 = vadd.f32 %v8247_v46, %v8246_v2  ;;  %v8249_v48 = vpop.f32.mrb[194].mxu1  ;;  %v11879_v2 = vld [vmem:[#allocation43_spill] sm:$0xff] }
 0x361   : > { %v8353_v4 = vpop.f32.mrb[245].mxu0  ;;  %v8250_v3 = vpop.f32.mrb[195].mxu1  ;;  %v5572_v46 = vrot.slane %v11879_v2, 1  ;;  %v11886_v2 = vld [vmem:[#allocation47_spill] sm:$0xff] }
 0x362   : > { %v8354_v40 = vadd.f32 %v8353_v4, %v8352_v54  ;;  %v4687_v50 = vadd.f32 %v8248_v51, %v11072_v52  ;;  %v8355_v56 = vpop.f32.mrb[246].mxu0  ;;  %v8251_v29 = vadd.f32 %v8250_v3, %v8249_v48 }
 0x363   : > { %v8356_v7 = vpop.f32.mrb[247].mxu0  ;;  %6443 = vmatmul.mubr.bf16.gmra.mrb[44].mxu1 %v5559_v9  ;;  %v5574_v47 = vsel %vm2230_vm3, %v5572_v46, %v5573_v63  ;;  %v9008_v63 = vld [vmem:[%s11624_s6 + $0x10] sm:$0xff]  }
 0x364   : > { %v11318_v59 = vadd.f32 %v8354_v40, %v4679_v38  ;;  %v8357_v58 = vadd.f32 %v8356_v7, %v8355_v56  ;;  %v4690_v35 = vadd.f32 %v8251_v29, %v11081_v11  ;;  %6450 = vmatprep.mubr.bf16.mxu1 %v5568_v16  ;;  %v11882_v40 = vld [vmem:[#allocation51_spill] sm:$0xff]  ;;  %v11883_v29 = vld [vmem:[#allocation45_spill] sm:$0xff]  ;;  %8734 = vmatprep.subr.bf16.mxu0 %v9008_v63 }
 0x365   : > { %v5569_v7 = vrot.slane %v11883_v29, 1  ;;  %8780 = vmatprep.subr.bf16.mxu1 %v9008_v63  ;;  %8735 = vmatpush3.bf16.msra.mxu0 %v9008_v63  ;;  %v11890_v29 = vld [vmem:[#allocation52_spill] sm:$0xff] }
 0x366   : > { %11877 = vst [vmem:[#allocation14_spill] sm:$0xff] %v11318_v59  ;;  %v11322_v24 = vadd.f32 %v8357_v58, %v4682_v15  ;;  %v8252_v52 = vpop.f32.mrb[196].mxu1  ;;  %v5565_v15 = vsel %vm2230_vm3, %v5563_v55, %v5564_v14  ;;  %v5578_v55 = vrot.slane %v11886_v2, 1  ;;  %v11887_v14 = vld [vmem:[#allocation49_spill] sm:$0xff]  ;;  %8788 = vmatpush3.bf16.msra.mxu1 %v9008_v63 }
 0x367   : > { %v8253_v53 = vpop.f32.mrb[197].mxu1  ;;  %v5579_v30 = vrot.slane %v11887_v14, 1  ;;  %v11892_v2 = vld [vmem:[#allocation53_spill] sm:$0xff] }
 0x368   : > { %11878 = vst [vmem:[#allocation23_spill] sm:$0xff] %v11322_v24  ;;  %v8358_v33 = vpop.f32.mrb[248].mxu0  ;;  %v8254_v38 = vadd.f32 %v8253_v53, %v8252_v52  ;;  %v8255_v26 = vpop.f32.mrb[198].mxu1 }
 0x369   : > { %v8359_v54 = vpop.f32.mrb[249].mxu0  ;;  %v8256_v51 = vpop.f32.mrb[199].mxu1 }
 0x36a   : > { %v8360_v11 = vadd.f32 %v8359_v54, %v8358_v33  ;;  %v4695_v48 = vadd.f32 %v8254_v38, %v11095_v57  ;;  %v8361_v18 = vpop.f32.mrb[250].mxu0  ;;  %v8257_v17 = vadd.f32 %v8256_v51, %v8255_v26  ;;  %v11885_v57 = vld [vmem:[#allocation48_spill] sm:$0xff] }
 0x36b   : > { %v8362_v4 = vpop.f32.mrb[251].mxu0  ;;  %6451 = vmatmul.mubr.bf16.gmra.mrb[48].mxu1 %v5565_v15  ;;  %v5570_v52 = vrot.slane %v11885_v57, 1  ;;  %v9010_v57 = vld [vmem:[%s11624_s6 + $0x20] sm:$0xff]  }
 0x36c   : > { %v11330_v3 = vadd.f32 %v8360_v11, %v4687_v50  ;;  %v8363_v9 = vadd.f32 %v8362_v4, %v8361_v18  ;;  %v4698_v56 = vadd.f32 %v8257_v17, %v11882_v40  ;;  %6458 = vmatprep.mubr.bf16.mxu1 %v5574_v47  ;;  %v5580_v17 = vsel %vm2230_vm3, %v5578_v55, %v5579_v30 }
 0x36d   : > { %v5571_v11 = vsel %vm2230_vm3, %v5569_v7, %v5570_v52  ;;  %v5575_v47 = vrot.slane %v11099_v41, 1  ;;  %v9009_v7 = vld [vmem:[%s11624_s6 + $0x18] sm:$0xff]   ;;  %v5585_v55 = vrot.slane %v11892_v2, 1 }
 0x36e   : > { %11881 = vst [vmem:[#allocation4_spill] sm:$0xff] %v11330_v3  ;;  %v11334_v16 = vadd.f32 %v8363_v9, %v4690_v35  ;;  %v8386_v58 = vpop.f32.mrb[200].mxu1  ;;  %v11891_v52 = vld [vmem:[#allocation50_spill] sm:$0xff]  ;;  %8736 = vmatprep.subr.bf16.mxu0 %v9009_v7  ;;  %8781 = vmatprep.subr.bf16.mxu1 %v9009_v7 }
 0x36f   : > { %v8387_v53 = vpop.f32.mrb[201].mxu1  ;;  %8737 = vmatpush3.bf16.msra.mxu0 %v9009_v7  ;;  %8789 = vmatpush3.bf16.msra.mxu1 %v9009_v7 }
 0x370   : > { %11884 = vst [vmem:[#allocation20_spill] sm:$0xff] %v11334_v16  ;;  %v8364_v33 = vpop.f32.mrb[252].mxu0  ;;  %v8388_v46 = vadd.f32 %v8387_v53, %v8386_v58  ;;  %v8389_v50 = vpop.f32.mrb[202].mxu1  ;;  %v5576_v58 = vrot.slane %v11890_v29, 1  ;;  %v5584_v53 = vrot.slane %v11891_v52, 1  ;;  %8738 = vmatprep.subr.bf16.mxu0 %v9010_v57  ;;  %8782 = vmatprep.subr.bf16.mxu1 %v9010_v57  ;;  %v5582_v29 = vrot.slane %v11136_v22, 1 }
 0x371   : > { %v8365_v38 = vpop.f32.mrb[253].mxu0  ;;  %v8390_v26 = vpop.f32.mrb[203].mxu1 }
 0x372   : > { %v8366_v54 = vadd.f32 %v8365_v38, %v8364_v33  ;;  %v8367_v35 = vpop.f32.mrb[254].mxu0  ;;  %v8391_v51 = vadd.f32 %v8390_v26, %v8389_v50  ;;  %v5577_v26 = vsel %vm2230_vm3, %v5575_v47, %v5576_v58  ;;  %v11893_v58 = vld [vmem:[#allocation55_spill] sm:$0xff] }
 0x373   : > { %v8368_v18 = vpop.f32.mrb[255].mxu0  ;;  %6459 = vmatmul.mubr.bf16.gmra.mrb[52].mxu1 %v5571_v11  ;;  %8739 = vmatpush3.bf16.msra.mxu0 %v9010_v57  ;;  %v5590_v7 = vrot.slane %v11893_v58, 1 }
 0x374   : > { %v11344_v15 = vadd.f32 %v8366_v54, %v4695_v48  ;;  %v8369_v4 = vadd.f32 %v8368_v18, %v8367_v35  ;;  %6466 = vmatprep.mubr.bf16.mxu1 %v5580_v17  ;;  %v5586_v35 = vsel %vm2230_vm3, %v5584_v53, %v5585_v55  ;;  %8790 = vmatpush3.bf16.msra.mxu1 %v9010_v57  ;;  %v5581_v17 = vrot.slane %v11116_v10, 1 }
 0x376   : > { %11888 = vst [vmem:[#allocation21_spill] sm:$0xff] %v11344_v15  ;;  %v11347_v9 = vadd.f32 %v8369_v4, %v4698_v56  ;;  %v8392_v40 = vpop.f32.mrb[204].mxu1  ;;  %v5583_v10 = vsel %vm2230_vm3, %v5581_v17, %v5582_v29  ;;  %v5588_v17 = vrot.slane %v11157_v39, 1  ;;  %v5597_v29 = vrot.slane %v11161_v28, 1 }
 0x377   : > { %v8393_v48 = vpop.f32.mrb[205].mxu1 }
 0x378   : > { %11889 = vst [vmem:[#allocation18_spill] sm:$0xff] %v11347_v9  ;;  %v8498_v14 = vpop.f32.mrb[0].mxu0  ;;  %v8394_v41 = vadd.f32 %v8393_v48, %v8392_v40  ;;  %v8395_v56 = vpop.f32.mrb[206].mxu1  ;;  %v11894_v48 = vld [vmem:[#allocation57_spill] sm:$0xff] }
 0x379   : > { %v8499_v30 = vpop.f32.mrb[1].mxu0  ;;  %v8396_v33 = vpop.f32.mrb[207].mxu1  ;;  %v5591_v52 = vrot.slane %v11894_v48, 1 }
 0x37a   : > { %v8500_v50 = vadd.f32 %v8499_v30, %v8498_v14  ;;  %v8501_v63 = vpop.f32.mrb[2].mxu0  ;;  %v8397_v38 = vadd.f32 %v8396_v33, %v8395_v56 }
 0x37b   : > { %v8502_v54 = vpop.f32.mrb[3].mxu0  ;;  %6467 = vmatmul.mubr.bf16.gmra.mrb[56].mxu1 %v5577_v26  ;;  %v5592_v33 = vsel %vm2230_vm3, %v5590_v7, %v5591_v52  ;;  %v9012_v26 = vld [vmem:[%s11624_s6 + $0x30] sm:$0xff]  }
 0x37c   : > { %v11360_v11 = vadd.f32 %v8500_v50, %v8388_v46  ;;  %v8503_v18 = vadd.f32 %v8502_v54, %v8501_v63  ;;  %6474 = vmatprep.mubr.bf16.mxu1 %v5586_v35  ;;  %v9011_v63 = vld [vmem:[%s11624_s6 + $0x28] sm:$0xff]  }
 0x37d   : > { %8740 = vmatprep.subr.bf16.mxu0 %v9011_v63  ;;  %8783 = vmatprep.subr.bf16.mxu1 %v9011_v63 }
 0x37e   : > { %v11363_v4 = vadd.f32 %v8503_v18, %v8391_v51  ;;  %v8398_v40 = vpop.f32.mrb[208].mxu1  ;;  %v5587_v18 = vrot.slane %v11139_v45, 1  ;;  %8741 = vmatpush3.bf16.msra.mxu0 %v9011_v63  ;;  %8791 = vmatpush3.bf16.msra.mxu1 %v9011_v63 }
 0x37f   : > { %v8399_v47 = vpop.f32.mrb[209].mxu1  ;;  %8742 = vmatprep.subr.bf16.mxu0 %v9012_v26  ;;  %8784 = vmatprep.subr.bf16.mxu1 %v9012_v26 }
 0x380   : > { %v8504_v2 = vpop.f32.mrb[4].mxu0  ;;  %v8400_v53 = vadd.f32 %v8399_v47, %v8398_v40  ;;  %v8401_v46 = vpop.f32.mrb[210].mxu1  ;;  %v5596_v40 = vrot.slane %v11149_v27, 1  ;;  %v5589_v27 = vsel %vm2230_vm3, %v5587_v18, %v5588_v17 }
 0x381   : > { %v8505_v55 = vpop.f32.mrb[5].mxu0  ;;  %v8402_v14 = vpop.f32.mrb[211].mxu1 }
 0x382   : > { %v8506_v56 = vadd.f32 %v8505_v55, %v8504_v2  ;;  %v8507_v30 = vpop.f32.mrb[6].mxu0  ;;  %v8403_v57 = vadd.f32 %v8402_v14, %v8401_v46  ;;  %v5598_v28 = vsel %vm2230_vm3, %v5596_v40, %v5597_v29  ;;  %8743 = vmatpush3.bf16.msra.mxu0 %v9012_v26  ;;  %8792 = vmatpush3.bf16.msra.mxu1 %v9012_v26 }
 0x383   : > { %v8508_v51 = vpop.f32.mrb[7].mxu0  ;;  %6475 = vmatmul.mubr.bf16.gmra.mrb[60].mxu1 %v5583_v10  ;;  %v5593_v10 = vrot.slane %v11167_v19, 1 }
 0x384   : > { %v11370_v22 = vadd.f32 %v8506_v56, %v8394_v41  ;;  %v8509_v50 = vadd.f32 %v8508_v51, %v8507_v30  ;;  %6482 = vmatprep.mubr.bf16.mxu1 %v5592_v33  ;;  %v5594_v51 = vrot.slane %v11182_v0, 1 }
 0x386   : > { %v11378_v54 = vadd.f32 %v8509_v50, %v8397_v38  ;;  %v8404_v35 = vpop.f32.mrb[212].mxu1  ;;  %v9013_v38 = vld [vmem:[%s11624_s6 + $0x38] sm:$0xff]  }
 0x387   : > { %v8405_v41 = vpop.f32.mrb[213].mxu1  ;;  %8744 = vmatprep.subr.bf16.mxu0 %v9013_v38  ;;  %8785 = vmatprep.subr.bf16.mxu1 %v9013_v38 }
 0x388   : > { %v8510_v47 = vpop.f32.mrb[8].mxu0  ;;  %v8406_v58 = vadd.f32 %v8405_v41, %v8404_v35  ;;  %v8407_v7 = vpop.f32.mrb[214].mxu1  ;;  %8745 = vmatpush3.bf16.msra.mxu0 %v9013_v38  ;;  %8793 = vmatpush3.bf16.msra.mxu1 %v9013_v38 }
 0x389   : > { %v8511_v45 = vpop.f32.mrb[9].mxu0  ;;  %v8408_v39 = vpop.f32.mrb[215].mxu1 }
 0x38a   : > { %v8512_v48 = vadd.f32 %v8511_v45, %v8510_v47  ;;  %v8513_v52 = vpop.f32.mrb[10].mxu0  ;;  %v8409_v2 = vadd.f32 %v8408_v39, %v8407_v7 }
 0x38b   : > { %v8514_v46 = vpop.f32.mrb[11].mxu0  ;;  %6483 = vmatmul.mubr.bf16.gmra.mrb[64].mxu1 %v5589_v27 }
 0x38c   : > { %v11389_v55 = vadd.f32 %v8512_v48, %v8400_v53  ;;  %v8515_v14 = vadd.f32 %v8514_v46, %v8513_v52  ;;  %6490 = vmatprep.mubr.bf16.mxu1 %v5598_v28 }
 0x38e   : > { %v11391_v56 = vadd.f32 %v8515_v14, %v8403_v57  ;;  %v8410_v30 = vpop.f32.mrb[216].mxu1  ;;  %v5595_v57 = vsel %vm2230_vm3, %v5593_v10, %v5594_v51 }
 0x38f   : > { %v8411_v33 = vpop.f32.mrb[217].mxu1 }
 0x390   : > { %v8516_v50 = vpop.f32.mrb[12].mxu0  ;;  %v8412_v63 = vadd.f32 %v8411_v33, %v8410_v30  ;;  %v8413_v35 = vpop.f32.mrb[218].mxu1 }
 0x391   : > { %v8517_v18 = vpop.f32.mrb[13].mxu0  ;;  %v8414_v53 = vpop.f32.mrb[219].mxu1 }
 0x392   : > { %v8518_v17 = vadd.f32 %v8517_v18, %v8516_v50  ;;  %v8519_v41 = vpop.f32.mrb[14].mxu0  ;;  %v8415_v40 = vadd.f32 %v8414_v53, %v8413_v35 }
 0x393   : > { %v8520_v26 = vpop.f32.mrb[15].mxu0  ;;  %6491 = vmatmul.mubr.bf16.gmra.mrb[68].mxu1 %v5595_v57 }
 0x394   : > { %v11396_v29 = vadd.f32 %v8518_v17, %v8406_v58  ;;  %v8521_v19 = vadd.f32 %v8520_v26, %v8519_v41 }
 0x396   : > { %v11398_v0 = vadd.f32 %v8521_v19, %v8409_v2  ;;  %v8416_v47 = vpop.f32.mrb[220].mxu1 }
 0x397   : > { %v8417_v7 = vpop.f32.mrb[221].mxu1 }
 0x398   : > { %v8522_v45 = vpop.f32.mrb[16].mxu0  ;;  %v8418_v39 = vadd.f32 %v8417_v7, %v8416_v47  ;;  %v8419_v48 = vpop.f32.mrb[222].mxu1 }
 0x399   : > { %v8523_v52 = vpop.f32.mrb[17].mxu0  ;;  %v8420_v27 = vpop.f32.mrb[223].mxu1 }
 0x39a   : > { %v8524_v38 = vadd.f32 %v8523_v52, %v8522_v45  ;;  %v8525_v46 = vpop.f32.mrb[18].mxu0  ;;  %v8421_v28 = vadd.f32 %v8420_v27, %v8419_v48 }
 0x39b   : > { %v8526_v14 = vpop.f32.mrb[19].mxu0 }
 0x39c   : > { %v11400_v30 = vadd.f32 %v8524_v38, %v8412_v63  ;;  %v8527_v10 = vadd.f32 %v8526_v14, %v8525_v46 }
 0x39e   : > { %v11402_v51 = vadd.f32 %v8527_v10, %v8415_v40  ;;  %v8422_v58 = vpop.f32.mrb[224].mxu1 }
 0x39f   : > { %v8423_v33 = vpop.f32.mrb[225].mxu1 }
 0x3a0   : > { %v8528_v2 = vpop.f32.mrb[20].mxu0  ;;  %v8424_v50 = vadd.f32 %v8423_v33, %v8422_v58  ;;  %v8425_v35 = vpop.f32.mrb[226].mxu1 }
 0x3a1   : > { %v8529_v18 = vpop.f32.mrb[21].mxu0  ;;  %v8426_v53 = vpop.f32.mrb[227].mxu1 }
 0x3a2   : > { %v8530_v17 = vadd.f32 %v8529_v18, %v8528_v2  ;;  %v8531_v41 = vpop.f32.mrb[22].mxu0  ;;  %v8427_v57 = vadd.f32 %v8426_v53, %v8425_v35 }
 0x3a3   : > { %v8532_v26 = vpop.f32.mrb[23].mxu0 }
 0x3a4   : > { %v11404_v19 = vadd.f32 %v8530_v17, %v8418_v39  ;;  %v8533_v47 = vadd.f32 %v8532_v26, %v8531_v41 }
 0x3a6   : > { %v11406_v7 = vadd.f32 %v8533_v47, %v8421_v28  ;;  %v8428_v63 = vpop.f32.mrb[228].mxu1 }
 0x3a7   : > { %v8429_v45 = vpop.f32.mrb[229].mxu1 }
 0x3a8   : > { %v8534_v40 = vpop.f32.mrb[24].mxu0  ;;  %v8430_v48 = vadd.f32 %v8429_v45, %v8428_v63  ;;  %v8431_v52 = vpop.f32.mrb[230].mxu1 }
 0x3a9   : > { %v8535_v27 = vpop.f32.mrb[25].mxu0  ;;  %v8432_v38 = vpop.f32.mrb[231].mxu1 }
 0x3aa   : > { %v8536_v46 = vadd.f32 %v8535_v27, %v8534_v40  ;;  %v8537_v14 = vpop.f32.mrb[26].mxu0  ;;  %v8433_v10 = vadd.f32 %v8432_v38, %v8431_v52 }
 0x3ab   : > { %v8538_v58 = vpop.f32.mrb[27].mxu0 }
 0x3ac   : > { %v11408_v33 = vadd.f32 %v8536_v46, %v8424_v50  ;;  %v8539_v2 = vadd.f32 %v8538_v58, %v8537_v14 }
 0x3ae   : > { %v11410_v35 = vadd.f32 %v8539_v2, %v8427_v57  ;;  %v8434_v39 = vpop.f32.mrb[232].mxu1 }
 0x3af   : > { %v8435_v18 = vpop.f32.mrb[233].mxu1 }
 0x3b0   : > { %v8540_v28 = vpop.f32.mrb[28].mxu0  ;;  %v8436_v53 = vadd.f32 %v8435_v18, %v8434_v39  ;;  %v8437_v17 = vpop.f32.mrb[234].mxu1 }
 0x3b1   : > { %v8541_v41 = vpop.f32.mrb[29].mxu0  ;;  %v8438_v26 = vpop.f32.mrb[235].mxu1 }
 0x3b2   : > { %v8542_v47 = vadd.f32 %v8541_v41, %v8540_v28  ;;  %v8543_v63 = vpop.f32.mrb[30].mxu0  ;;  %v8439_v45 = vadd.f32 %v8438_v26, %v8437_v17 }
 0x3b3   : > { %v8544_v9 = vpop.f32.mrb[31].mxu0 }
 0x3b4   : > { %v11412_v40 = vadd.f32 %v8542_v47, %v8430_v48  ;;  %v8545_v52 = vadd.f32 %v8544_v9, %v8543_v63 }
 0x3b6   : > { %v11414_v27 = vadd.f32 %v8545_v52, %v8433_v10  ;;  %v8440_v50 = vpop.f32.mrb[236].mxu1 }
 0x3b7   : > { %v8441_v38 = vpop.f32.mrb[237].mxu1 }
 0x3b8   : > { %v8546_v57 = vpop.f32.mrb[32].mxu0  ;;  %v8442_v46 = vadd.f32 %v8441_v38, %v8440_v50  ;;  %v8443_v14 = vpop.f32.mrb[238].mxu1 }
 0x3b9   : > { %v8547_v58 = vpop.f32.mrb[33].mxu0  ;;  %v8444_v2 = vpop.f32.mrb[239].mxu1 }
 0x3ba   : > { %v8548_v39 = vadd.f32 %v8547_v58, %v8546_v57  ;;  %v8549_v18 = vpop.f32.mrb[34].mxu0  ;;  %v8445_v15 = vadd.f32 %v8444_v2, %v8443_v14 }
 0x3bb   : > { %v8550_v16 = vpop.f32.mrb[35].mxu0 }
 0x3bc   : > { %v11416_v28 = vadd.f32 %v8548_v39, %v8436_v53  ;;  %v8551_v17 = vadd.f32 %v8550_v16, %v8549_v18 }
 0x3be   : > { %v11418_v41 = vadd.f32 %v8551_v17, %v8439_v45  ;;  %v8446_v48 = vpop.f32.mrb[240].mxu1 }
 0x3bf   : > { %v8447_v9 = vpop.f32.mrb[241].mxu1 }
 0x3c0   : > { %v8552_v10 = vpop.f32.mrb[36].mxu0  ;;  %v8448_v26 = vadd.f32 %v8447_v9, %v8446_v48  ;;  %v8449_v47 = vpop.f32.mrb[242].mxu1 }
 0x3c1   : > { %v8553_v63 = vpop.f32.mrb[37].mxu0  ;;  %v8450_v52 = vpop.f32.mrb[243].mxu1 }
 0x3c2   : > { %v8554_v50 = vadd.f32 %v8553_v63, %v8552_v10  ;;  %v8555_v38 = vpop.f32.mrb[38].mxu0  ;;  %v8451_v3 = vadd.f32 %v8450_v52, %v8449_v47 }
 0x3c3   : > { %v8556_v24 = vpop.f32.mrb[39].mxu0 }
 0x3c4   : > { %v11420_v57 = vadd.f32 %v8554_v50, %v8442_v46  ;;  %v8557_v14 = vadd.f32 %v8556_v24, %v8555_v38 }
 0x3c6   : > { %v11422_v58 = vadd.f32 %v8557_v14, %v8445_v15  ;;  %v8452_v53 = vpop.f32.mrb[244].mxu1 }
 0x3c7   : > { %v8453_v16 = vpop.f32.mrb[245].mxu1 }
 0x3c8   : > { %v8558_v45 = vpop.f32.mrb[40].mxu0  ;;  %v8454_v2 = vadd.f32 %v8453_v16, %v8452_v53  ;;  %v8455_v39 = vpop.f32.mrb[246].mxu1 }
 0x3c9   : > { %v8559_v18 = vpop.f32.mrb[41].mxu0  ;;  %v8456_v17 = vpop.f32.mrb[247].mxu1 }
 0x3ca   : > { %v8560_v48 = vadd.f32 %v8559_v18, %v8558_v45  ;;  %v8561_v9 = vpop.f32.mrb[42].mxu0  ;;  %v8457_v59 = vadd.f32 %v8456_v17, %v8455_v39 }
 0x3cb   : > { %v8562_v43 = vpop.f32.mrb[43].mxu0 }
 0x3cc   : > { %v11424_v10 = vadd.f32 %v8560_v48, %v8448_v26  ;;  %v8563_v47 = vadd.f32 %v8562_v43, %v8561_v9 }
 0x3ce   : > { %v11426_v63 = vadd.f32 %v8563_v47, %v8451_v3  ;;  %v8458_v46 = vpop.f32.mrb[248].mxu1 }
 0x3cf   : > { %v8459_v24 = vpop.f32.mrb[249].mxu1 }
 0x3d0   : > { %v8564_v15 = vpop.f32.mrb[44].mxu0  ;;  %v8460_v52 = vadd.f32 %v8459_v24, %v8458_v46  ;;  %v8461_v50 = vpop.f32.mrb[250].mxu1 }
 0x3d1   : > { %v8565_v38 = vpop.f32.mrb[45].mxu0  ;;  %v8462_v14 = vpop.f32.mrb[251].mxu1 }
 0x3d2   : > { %v8566_v53 = vadd.f32 %v8565_v38, %v8564_v15  ;;  %v8567_v16 = vpop.f32.mrb[46].mxu0  ;;  %v8463_v21 = vadd.f32 %v8462_v14, %v8461_v50 }
 0x3d3   : > { %v8568_v13 = vpop.f32.mrb[47].mxu0 }
 0x3d4   : > { %v11428_v45 = vadd.f32 %v8566_v53, %v8454_v2  ;;  %v8569_v39 = vadd.f32 %v8568_v13, %v8567_v16 }
 0x3d6   : > { %11895 = vst [vmem:[#allocation22_spill] sm:$0xff] %v11428_v45  ;;  %v11430_v18 = vadd.f32 %v8569_v39, %v8457_v59  ;;  %v8464_v26 = vpop.f32.mrb[252].mxu1 }
 0x3d7   : > { %v8465_v43 = vpop.f32.mrb[253].mxu1 }
 0x3d8   : > { %11896 = vst [vmem:[#allocation24_spill] sm:$0xff] %v11430_v18  ;;  %v8570_v3 = vpop.f32.mrb[48].mxu0  ;;  %v8466_v17 = vadd.f32 %v8465_v43, %v8464_v26  ;;  %v8467_v48 = vpop.f32.mrb[254].mxu1 }
 0x3d9   : > { %v8571_v9 = vpop.f32.mrb[49].mxu0  ;;  %v8468_v47 = vpop.f32.mrb[255].mxu1 }
 0x3da   : > { %v8572_v46 = vadd.f32 %v8571_v9, %v8570_v3  ;;  %v8573_v24 = vpop.f32.mrb[50].mxu0  ;;  %v8469_v6 = vadd.f32 %v8468_v47, %v8467_v48 }
 0x3db   : > { %v8574_v5 = vpop.f32.mrb[51].mxu0 }
 0x3dc   : > { %v11432_v15 = vadd.f32 %v8572_v46, %v8460_v52  ;;  %v8575_v50 = vadd.f32 %v8574_v5, %v8573_v24 }
 0x3de   : > { %11897 = vst [vmem:[#allocation5_spill] sm:$0xff] %v11432_v15  ;;  %v11434_v38 = vadd.f32 %v8575_v50, %v8463_v21  ;;  %v8470_v2 = vpop.f32.mrb[0].mxu1 }
 0x3df   : > { %v8471_v13 = vpop.f32.mrb[1].mxu1 }
 0x3e0   : > { %11898 = vst [vmem:[#allocation25_spill] sm:$0xff] %v11434_v38  ;;  %v8576_v59 = vpop.f32.mrb[52].mxu0  ;;  %v8472_v14 = vadd.f32 %v8471_v13, %v8470_v2  ;;  %v8473_v53 = vpop.f32.mrb[2].mxu1 }
 0x3e1   : > { %v8577_v16 = vpop.f32.mrb[53].mxu0  ;;  %v8474_v39 = vpop.f32.mrb[3].mxu1 }
 0x3e2   : > { %v8578_v26 = vadd.f32 %v8577_v16, %v8576_v59  ;;  %v8579_v43 = vpop.f32.mrb[54].mxu0  ;;  %v8475_v18 = vadd.f32 %v8474_v39, %v8473_v53 }
 0x3e3   : > { %v8580_v45 = vpop.f32.mrb[55].mxu0 }
 0x3e4   : > { %v11436_v3 = vadd.f32 %v8578_v26, %v8466_v17  ;;  %v8581_v48 = vadd.f32 %v8580_v45, %v8579_v43 }
 0x3e6   : > { %v11438_v9 = vadd.f32 %v8581_v48, %v8469_v6  ;;  %v8476_v52 = vpop.f32.mrb[4].mxu1 }
 0x3e7   : > { %v8477_v5 = vpop.f32.mrb[5].mxu1 }
 0x3e8   : > { %11899 = vst [vmem:[#allocation7_spill] sm:$0xff] %v11438_v9  ;;  %v8582_v21 = vpop.f32.mrb[56].mxu0  ;;  %v8478_v47 = vadd.f32 %v8477_v5, %v8476_v52  ;;  %v8479_v46 = vpop.f32.mrb[6].mxu1 }
 0x3e9   : > { %v8583_v24 = vpop.f32.mrb[57].mxu0  ;;  %v8480_v50 = vpop.f32.mrb[7].mxu1 }
 0x3ea   : > { %v8584_v2 = vadd.f32 %v8583_v24, %v8582_v21  ;;  %v8585_v13 = vpop.f32.mrb[58].mxu0  ;;  %v8481_v38 = vadd.f32 %v8480_v50, %v8479_v46 }
 0x3eb   : > { %v8586_v15 = vpop.f32.mrb[59].mxu0 }
 0x3ec   : > { %v11440_v59 = vadd.f32 %v8584_v2, %v8472_v14  ;;  %v8587_v53 = vadd.f32 %v8586_v15, %v8585_v13  ;;  %v11448_v14 = vld [vmem:[%s11623_s5] ss:$0 sm:$0xff]  ;;  %v11900_v15 = vld [vmem:[#allocation54_spill] sm:$0xff] }
 0x3ee   : > { %v11442_v16 = vadd.f32 %v8587_v53, %v8475_v18  ;;  %v8610_v17 = vpop.f32.mrb[8].mxu1  ;;  %v11901_v53 = vld [vmem:[#allocation56_spill] sm:$0xff] }
 0x3ef   : > { %v8611_v45 = vpop.f32.mrb[9].mxu1 }
 0x3f0   : > { %v8588_v6 = vpop.f32.mrb[60].mxu0  ;;  %v8612_v39 = vadd.f32 %v8611_v45, %v8610_v17  ;;  %v8613_v26 = vpop.f32.mrb[10].mxu1 }
 0x3f1   : > { %v8589_v43 = vpop.f32.mrb[61].mxu0  ;;  %v8614_v48 = vpop.f32.mrb[11].mxu1 }
 0x3f2   : > { %v8590_v52 = vadd.f32 %v8589_v43, %v8588_v6  ;;  %v8591_v5 = vpop.f32.mrb[62].mxu0  ;;  %v6373_v9 = vadd.f32 %v8612_v39, %v11360_v11  ;;  %v8615_v21 = vadd.f32 %v8614_v48, %v8613_v26 }
 0x3f3   : > { %v8592_v24 = vpop.f32.mrb[63].mxu0 }
 0x3f4   : > { %v11450_v18 = vadd.f32 %v8590_v52, %v8478_v47  ;;  %v6499_v46 = vadd.f32 %v6373_v9, %v11900_v15  ;;  %v8593_v50 = vadd.f32 %v8592_v24, %v8591_v5  ;;  %v6376_v2 = vadd.f32 %v8615_v21, %v11363_v4  ;;  %v11902_v24 = vld [vmem:[#allocation58_spill] sm:$0xff] }
 0x3f6   : > { %v11454_v13 = vadd.f32 %v8593_v50, %v8481_v38  ;;  %v6500_v17 = vadd.f32 %v6376_v2, %v11901_v53  ;;  %v8616_v45 = vpop.f32.mrb[12].mxu1  ;;  %v6538_v11 = vadd.f32 %v11448_v14, %v6499_v46  ;;  %v11903_v50 = vld [vmem:[#allocation59_spill] sm:$0xff] }
 0x3f7   : > { %v8617_v6 = vpop.f32.mrb[13].mxu1 }
 0x3f8   : > { %v8618_v39 = vadd.f32 %v8617_v6, %v8616_v45  ;;  %v8619_v26 = vpop.f32.mrb[14].mxu1  ;;  %v6539_v43 = vadd.f32 %v11448_v14, %v6500_v17  ;;  %v6570_v9 = vmax.f32 %v6538_v11, 0.0 }
 0x3f9   : > { %v8620_v48 = vpop.f32.mrb[15].mxu1 }
 0x3fa   : > { %v6381_v47 = vadd.f32 %v8618_v39, %v11370_v22  ;;  %v8621_v52 = vadd.f32 %v8620_v48, %v8619_v26  ;;  %v6571_v5 = vmax.f32 %v6539_v43, 0.0 }
 0x3fc   : > { %v6501_v4 = vadd.f32 %v6381_v47, %v11902_v24  ;;  %v6384_v38 = vadd.f32 %v8621_v52, %v11378_v54  ;;  %v6602_v21 = vpack.c.bf16 %v6571_v5, %v6570_v9 }
 0x3fe   : > { %v6540_v15 = vadd.f32 %v11448_v14, %v6501_v4  ;;  %v6502_v46 = vadd.f32 %v6384_v38, %v11903_v50  ;;  %v8622_v2 = vpop.f32.mrb[16].mxu1  ;;  %8746 = vmatprep.mubr.bf16.mxu0 %v6602_v21 }
 0x3ff   : > { %v8623_v53 = vpop.f32.mrb[17].mxu1 }
 0x400   : > { %v6541_v17 = vadd.f32 %v11448_v14, %v6502_v46  ;;  %v8624_v45 = vadd.f32 %v8623_v53, %v8622_v2  ;;  %v8625_v6 = vpop.f32.mrb[18].mxu1  ;;  %v6572_v39 = vmax.f32 %v6540_v15, 0.0 }
 0x401   : > { %v8626_v22 = vpop.f32.mrb[19].mxu1 }
 0x402   : > { %v6573_v11 = vmax.f32 %v6541_v17, 0.0  ;;  %v6389_v26 = vadd.f32 %v8624_v45, %v11389_v55  ;;  %v8627_v43 = vadd.f32 %v8626_v22, %v8625_v6 }
 0x404   : > { %v6603_v48 = vpack.c.bf16 %v6573_v11, %v6572_v39  ;;  %v6503_v54 = vadd.f32 %v6389_v26, %v11169_v62  ;;  %v6392_v47 = vadd.f32 %v8627_v43, %v11391_v56 }
 0x406   : > { %v6504_v52 = vadd.f32 %v6392_v47, %v11177_v61  ;;  %v8628_v9 = vpop.f32.mrb[20].mxu1  ;;  %8747 = vmatmul.mubr.bf16.vlgmr.msra.gmra.mrb[64].mxu0 %v6603_v48  ;;  %v6542_v5 = vadd.f32 %v11448_v14, %v6503_v54 }
 0x407   : > { %v8629_v24 = vpop.f32.mrb[21].mxu1 }
 0x408   : > { %v8630_v4 = vadd.f32 %v8629_v24, %v8628_v9  ;;  %v8631_v38 = vpop.f32.mrb[22].mxu1  ;;  %v6543_v21 = vadd.f32 %v11448_v14, %v6504_v52  ;;  %v6574_v46 = vmax.f32 %v6542_v5, 0.0 }
 0x409   : > { %v8632_v15 = vpop.f32.mrb[23].mxu1 }
 0x40a   : > { %v6397_v55 = vadd.f32 %v8630_v4, %v11396_v29  ;;  %v8633_v50 = vadd.f32 %v8632_v15, %v8631_v38  ;;  %v6575_v2 = vmax.f32 %v6543_v21, 0.0 }
 0x40c   : > { %v6505_v62 = vadd.f32 %v6397_v55, %v11189_v8  ;;  %v6400_v56 = vadd.f32 %v8633_v50, %v11398_v0  ;;  %v6604_v61 = vpack.c.bf16 %v6575_v2, %v6574_v46 }
 0x40e   : > { %v6544_v53 = vadd.f32 %v11448_v14, %v6505_v62  ;;  %v6506_v17 = vadd.f32 %v6400_v56, %v11195_v37  ;;  %v8634_v45 = vpop.f32.mrb[24].mxu1  ;;  %8750 = vmatprep.mubr.bf16.mxu0 %v6604_v61 }
 0x40f   : > { %v8635_v6 = vpop.f32.mrb[25].mxu1 }
 0x410   : > { %v6545_v22 = vadd.f32 %v11448_v14, %v6506_v17  ;;  %v8636_v39 = vadd.f32 %v8635_v6, %v8634_v45  ;;  %v8637_v11 = vpop.f32.mrb[26].mxu1  ;;  %v6576_v26 = vmax.f32 %v6544_v53, 0.0 }
 0x411   : > { %v8638_v29 = vpop.f32.mrb[27].mxu1 }
 0x412   : > { %v6577_v43 = vmax.f32 %v6545_v22, 0.0  ;;  %v6405_v48 = vadd.f32 %v8636_v39, %v11400_v30  ;;  %v8639_v8 = vadd.f32 %v8638_v29, %v8637_v11 }
 0x414   : > { %v6605_v54 = vpack.c.bf16 %v6577_v43, %v6576_v26  ;;  %v6507_v0 = vadd.f32 %v6405_v48, %v11203_v44  ;;  %v6408_v47 = vadd.f32 %v8639_v8, %v11402_v51 }
 0x416   : > { %v6508_v37 = vadd.f32 %v6408_v47, %v11208_v60  ;;  %v8640_v52 = vpop.f32.mrb[28].mxu1  ;;  %8751 = vmatmul.mubr.bf16.gmra.mrb[68].mxu0 %v6605_v54  ;;  %v6546_v9 = vadd.f32 %v11448_v14, %v6507_v0 }
 0x417   : > { %v8641_v5 = vpop.f32.mrb[29].mxu1 }
 0x418   : > { %v8642_v24 = vadd.f32 %v8641_v5, %v8640_v52  ;;  %v8643_v4 = vpop.f32.mrb[30].mxu1  ;;  %v6547_v38 = vadd.f32 %v11448_v14, %v6508_v37  ;;  %v6578_v55 = vmax.f32 %v6546_v9, 0.0 }
 0x419   : > { %v8644_v21 = vpop.f32.mrb[31].mxu1 }
 0x41a   : > { %v6413_v30 = vadd.f32 %v8642_v24, %v11404_v19  ;;  %v8645_v15 = vadd.f32 %v8644_v21, %v8643_v4  ;;  %v6579_v50 = vmax.f32 %v6547_v38, 0.0 }
 0x41c   : > { %v6509_v44 = vadd.f32 %v6413_v30, %v11216_v42  ;;  %v6416_v51 = vadd.f32 %v8645_v15, %v11406_v7  ;;  %v6606_v60 = vpack.c.bf16 %v6579_v50, %v6578_v55 }
 0x41e   : > { %v6548_v46 = vadd.f32 %v11448_v14, %v6509_v44  ;;  %v6510_v2 = vadd.f32 %v6416_v51, %v11220_v12  ;;  %v8646_v62 = vpop.f32.mrb[32].mxu1  ;;  %8754 = vmatprep.mubr.bf16.mxu0 %v6606_v60 }
 0x41f   : > { %v8647_v56 = vpop.f32.mrb[33].mxu1 }
 0x420   : > { %v6549_v61 = vadd.f32 %v11448_v14, %v6510_v2  ;;  %v8648_v53 = vadd.f32 %v8647_v56, %v8646_v62  ;;  %v8649_v17 = vpop.f32.mrb[34].mxu1  ;;  %v6580_v45 = vmax.f32 %v6548_v46, 0.0 }
 0x421   : > { %v8650_v19 = vpop.f32.mrb[35].mxu1 }
 0x422   : > { %v6581_v6 = vmax.f32 %v6549_v61, 0.0  ;;  %v6421_v22 = vadd.f32 %v8648_v53, %v11408_v33  ;;  %v8651_v42 = vadd.f32 %v8650_v19, %v8649_v17 }
 0x424   : > { %v6607_v39 = vpack.c.bf16 %v6581_v6, %v6580_v45  ;;  %v6511_v7 = vadd.f32 %v6421_v22, %v11228_v32  ;;  %v6424_v11 = vadd.f32 %v8651_v42, %v11410_v35 }
 0x426   : > { %v6512_v12 = vadd.f32 %v6424_v11, %v11232_v23  ;;  %v8652_v29 = vpop.f32.mrb[36].mxu1  ;;  %8755 = vmatmul.mubr.bf16.gmra.mrb[72].mxu0 %v6607_v39  ;;  %v6550_v26 = vadd.f32 %v11448_v14, %v6511_v7 }
 0x427   : > { %v8653_v43 = vpop.f32.mrb[37].mxu1 }
 0x428   : > { %v8654_v48 = vadd.f32 %v8653_v43, %v8652_v29  ;;  %v8655_v8 = vpop.f32.mrb[38].mxu1  ;;  %v6551_v54 = vadd.f32 %v11448_v14, %v6512_v12  ;;  %v6582_v37 = vmax.f32 %v6550_v26, 0.0 }
 0x429   : > { %v8656_v0 = vpop.f32.mrb[39].mxu1 }
 0x42a   : > { %v6429_v33 = vadd.f32 %v8654_v48, %v11412_v40  ;;  %v8657_v47 = vadd.f32 %v8656_v0, %v8655_v8  ;;  %v6583_v52 = vmax.f32 %v6551_v54, 0.0  ;;  %v11904_v54 = vld [vmem:[#allocation10_spill] sm:$0xff] }
 0x42c   : > { %v6513_v32 = vadd.f32 %v6429_v33, %v11240_v25  ;;  %v6432_v35 = vadd.f32 %v8657_v47, %v11414_v27  ;;  %v6608_v23 = vpack.c.bf16 %v6583_v52, %v6582_v37 }
 0x42e   : > { %v6552_v9 = vadd.f32 %v11448_v14, %v6513_v32  ;;  %v6514_v5 = vadd.f32 %v6432_v35, %v11244_v20  ;;  %v8658_v24 = vpop.f32.mrb[40].mxu1  ;;  %8758 = vmatprep.mubr.bf16.mxu0 %v6608_v23  ;;  %v11905_v23 = vld [vmem:[#allocation22_spill] sm:$0xff] }
 0x42f   : > { %v8659_v4 = vpop.f32.mrb[41].mxu1 }
 0x430   : > { %v6553_v38 = vadd.f32 %v11448_v14, %v6514_v5  ;;  %v8660_v21 = vadd.f32 %v8659_v4, %v8658_v24  ;;  %v8661_v30 = vpop.f32.mrb[42].mxu1  ;;  %v6584_v15 = vmax.f32 %v6552_v9, 0.0 }
 0x431   : > { %v8662_v40 = vpop.f32.mrb[43].mxu1 }
 0x432   : > { %v6585_v55 = vmax.f32 %v6553_v38, 0.0  ;;  %v6437_v50 = vadd.f32 %v8660_v21, %v11416_v28  ;;  %v8663_v25 = vadd.f32 %v8662_v40, %v8661_v30  ;;  %v11908_v40 = vld [vmem:[#allocation13_spill] sm:$0xff] }
 0x434   : > { %v6609_v44 = vpack.c.bf16 %v6585_v55, %v6584_v15  ;;  %v6515_v27 = vadd.f32 %v6437_v50, %v11252_v34  ;;  %v6440_v51 = vadd.f32 %v8663_v25, %v11418_v41 }
 0x436   : > { %v6516_v20 = vadd.f32 %v6440_v51, %v11256_v36  ;;  %v8664_v60 = vpop.f32.mrb[44].mxu1  ;;  %8759 = vmatmul.mubr.bf16.gmra.mrb[76].mxu0 %v6609_v44  ;;  %v6554_v46 = vadd.f32 %v11448_v14, %v6515_v27 }
 0x437   : > { %v8665_v2 = vpop.f32.mrb[45].mxu1 }
 0x438   : > { %v8666_v62 = vadd.f32 %v8665_v2, %v8664_v60  ;;  %v8667_v56 = vpop.f32.mrb[46].mxu1  ;;  %v6555_v61 = vadd.f32 %v11448_v14, %v6516_v20  ;;  %v6586_v19 = vmax.f32 %v6554_v46, 0.0  ;;  %v11909_v46 = vld [vmem:[#allocation5_spill] sm:$0xff] }
 0x439   : > { %v8668_v53 = vpop.f32.mrb[47].mxu1 }
 0x43a   : > { %v6445_v28 = vadd.f32 %v8666_v62, %v11420_v57  ;;  %v8669_v17 = vadd.f32 %v8668_v53, %v8667_v56  ;;  %v6587_v45 = vmax.f32 %v6555_v61, 0.0  ;;  %v11910_v61 = vld [vmem:[#allocation19_spill] sm:$0xff] }
 0x43c   : > { %v6517_v34 = vadd.f32 %v6445_v28, %v11264_v31  ;;  %v6448_v41 = vadd.f32 %v8669_v17, %v11422_v58  ;;  %v6610_v36 = vpack.c.bf16 %v6587_v45, %v6586_v19  ;;  %v11911_v28 = vld [vmem:[#allocation25_spill] sm:$0xff] }
 0x43d   : > { %v11912_v19 = vld [vmem:[#allocation17_spill] sm:$0xff] }
 0x43e   : > { %v6556_v6 = vadd.f32 %v11448_v14, %v6517_v34  ;;  %v6518_v22 = vadd.f32 %v6448_v41, %v11268_v1  ;;  %v8670_v42 = vpop.f32.mrb[48].mxu1  ;;  %8762 = vmatprep.mubr.bf16.mxu0 %v6610_v36 }
 0x43f   : > { %v8671_v39 = vpop.f32.mrb[49].mxu1 }
 0x440   : > { %v6557_v7 = vadd.f32 %v11448_v14, %v6518_v22  ;;  %v8672_v11 = vadd.f32 %v8671_v39, %v8670_v42  ;;  %v8673_v12 = vpop.f32.mrb[50].mxu1  ;;  %v6588_v29 = vmax.f32 %v6556_v6, 0.0 }
 0x441   : > { %v8674_v57 = vpop.f32.mrb[51].mxu1 }
 0x442   : > { %v6589_v26 = vmax.f32 %v6557_v7, 0.0  ;;  %v6453_v43 = vadd.f32 %v8672_v11, %v11424_v10  ;;  %v8675_v31 = vadd.f32 %v8674_v57, %v8673_v12 }
 0x444   : > { %v6611_v48 = vpack.c.bf16 %v6589_v26, %v6588_v29  ;;  %v6519_v58 = vadd.f32 %v6453_v43, %v11276_v49  ;;  %v6456_v8 = vadd.f32 %v8675_v31, %v11426_v63  ;;  %v11906_v49 = vld [vmem:[#allocation16_spill] sm:$0xff]  ;;  %v11913_v29 = vld [vmem:[#allocation14_spill] sm:$0xff]  ;;  %v11914_v43 = vld [vmem:[#allocation7_spill] sm:$0xff] }
 0x445   : > { %v11907_v63 = vld [vmem:[#allocation24_spill] sm:$0xff] }
 0x446   : > { %v6520_v1 = vadd.f32 %v6456_v8, %v11904_v54  ;;  %v8676_v0 = vpop.f32.mrb[52].mxu1  ;;  %8763 = vmatmul.mubr.bf16.gmra.mrb[80].mxu0 %v6611_v48  ;;  %v6558_v33 = vadd.f32 %v11448_v14, %v6519_v58  ;;  %v11915_v8 = vld [vmem:[#allocation23_spill] sm:$0xff] }
 0x447   : > { %v8677_v47 = vpop.f32.mrb[53].mxu1 }
 0x448   : > { %v8678_v37 = vadd.f32 %v8677_v47, %v8676_v0  ;;  %v8679_v52 = vpop.f32.mrb[54].mxu1  ;;  %v6559_v32 = vadd.f32 %v11448_v14, %v6520_v1  ;;  %v6590_v5 = vmax.f32 %v6558_v33, 0.0 }
 0x449   : > { %v8680_v35 = vpop.f32.mrb[55].mxu1 }
 0x44a   : > { %v6461_v10 = vadd.f32 %v8678_v37, %v11905_v23  ;;  %v8681_v9 = vadd.f32 %v8680_v35, %v8679_v52  ;;  %v6591_v24 = vmax.f32 %v6559_v32, 0.0 }
 0x44c   : > { %v6521_v4 = vadd.f32 %v6461_v10, %v11906_v49  ;;  %v6464_v38 = vadd.f32 %v8681_v9, %v11907_v63  ;;  %v6612_v21 = vpack.c.bf16 %v6591_v24, %v6590_v5  ;;  %v11916_v9 = vld [vmem:[#allocation4_spill] sm:$0xff] }
 0x44d   : > { %v11917_v49 = vld [vmem:[#allocation20_spill] sm:$0xff] }
 0x44e   : > { %v6560_v30 = vadd.f32 %v11448_v14, %v6521_v4  ;;  %v6522_v15 = vadd.f32 %v6464_v38, %v11908_v40  ;;  %v8682_v55 = vpop.f32.mrb[56].mxu1  ;;  %8766 = vmatprep.mubr.bf16.mxu0 %v6612_v21 }
 0x44f   : > { %v8683_v50 = vpop.f32.mrb[57].mxu1 }
 0x450   : > { %v6561_v25 = vadd.f32 %v11448_v14, %v6522_v15  ;;  %v8684_v44 = vadd.f32 %v8683_v50, %v8682_v55  ;;  %v8685_v27 = vpop.f32.mrb[58].mxu1  ;;  %v6592_v20 = vmax.f32 %v6560_v30, 0.0 }
 0x451   : > { %v8686_v51 = vpop.f32.mrb[59].mxu1 }
 0x452   : > { %v6593_v60 = vmax.f32 %v6561_v25, 0.0  ;;  %v6469_v2 = vadd.f32 %v8684_v44, %v11909_v46  ;;  %v8687_v62 = vadd.f32 %v8686_v51, %v8685_v27  ;;  %v11918_v27 = vld [vmem:[#allocation21_spill] sm:$0xff]  ;;  %v11919_v46 = vld [vmem:[#allocation18_spill] sm:$0xff] }
 0x454   : > { %v6613_v56 = vpack.c.bf16 %v6593_v60, %v6592_v20  ;;  %v6523_v53 = vadd.f32 %v6469_v2, %v11910_v61  ;;  %v6472_v17 = vadd.f32 %v8687_v62, %v11911_v28  ;;  %v11552_v28 = vld [vmem:[%s11625_s7] ss:$0 sm:$0xff] }
 0x456   : > { %v6524_v45 = vadd.f32 %v6472_v17, %v11912_v19  ;;  %v8688_v34 = vpop.f32.mrb[60].mxu1  ;;  %8767 = vmatmul.mubr.bf16.gmra.mrb[84].mxu0 %v6613_v56  ;;  %v6562_v41 = vadd.f32 %v11448_v14, %v6523_v53 }
 0x457   : > { %v8689_v36 = vpop.f32.mrb[61].mxu1 }
 0x458   : > { %v8690_v6 = vadd.f32 %v8689_v36, %v8688_v34  ;;  %v8691_v22 = vpop.f32.mrb[62].mxu1  ;;  %v6563_v42 = vadd.f32 %v11448_v14, %v6524_v45  ;;  %v6594_v12 = vmax.f32 %v6562_v41, 0.0 }
 0x459   : > { %v8692_v39 = vpop.f32.mrb[63].mxu1 }
 0x45a   : > { %v6477_v7 = vadd.f32 %v8690_v6, %v11436_v3  ;;  %v8693_v11 = vadd.f32 %v8692_v39, %v8691_v22  ;;  %v6595_v57 = vmax.f32 %v6563_v42, 0.0 }
 0x45c   : > { %v6525_v26 = vadd.f32 %v6477_v7, %v11913_v29  ;;  %v6480_v31 = vadd.f32 %v8693_v11, %v11914_v43  ;;  %v6614_v48 = vpack.c.bf16 %v6595_v57, %v6594_v12 }
 0x45e   : > { %v6564_v58 = vadd.f32 %v11448_v14, %v6525_v26  ;;  %v6526_v54 = vadd.f32 %v6480_v31, %v11915_v8  ;;  %v8694_v1 = vpop.f32.mrb[64].mxu1  ;;  %8770 = vmatprep.mubr.bf16.mxu1 %v6614_v48 }
 0x45f   : > { %v8695_v0 = vpop.f32.mrb[65].mxu1 }
 0x460   : > { %v6565_v33 = vadd.f32 %v11448_v14, %v6526_v54  ;;  %v8696_v47 = vadd.f32 %v8695_v0, %v8694_v1  ;;  %v8697_v37 = vpop.f32.mrb[66].mxu1  ;;  %v6596_v52 = vmax.f32 %v6564_v58, 0.0 }
 0x461   : > { %v8698_v3 = vpop.f32.mrb[67].mxu1 }
 0x462   : > { %v6597_v32 = vmax.f32 %v6565_v33, 0.0  ;;  %v6485_v35 = vadd.f32 %v8696_v47, %v11440_v59  ;;  %v8699_v23 = vadd.f32 %v8698_v3, %v8697_v37 }
 0x464   : > { %v6615_v10 = vpack.c.bf16 %v6597_v32, %v6596_v52  ;;  %v6527_v5 = vadd.f32 %v6485_v35, %v11916_v9  ;;  %v6488_v24 = vadd.f32 %v8699_v23, %v11442_v16 }
 0x466   : > { %v6528_v4 = vadd.f32 %v6488_v24, %v11917_v49  ;;  %v8700_v63 = vpop.f32.mrb[68].mxu1  ;;  %8771 = vmatmul.mubr.bf16.vlgmr.msra.gmra.mrb[72].mxu1 %v6615_v10  ;;  %v6566_v38 = vadd.f32 %v11448_v14, %v6527_v5 }
 0x467   : > { %v8701_v21 = vpop.f32.mrb[69].mxu1 }
 0x468   : > { %v8702_v30 = vadd.f32 %v8701_v21, %v8700_v63  ;;  %v8703_v40 = vpop.f32.mrb[70].mxu1  ;;  %v6567_v15 = vadd.f32 %v11448_v14, %v6528_v4  ;;  %v6598_v25 = vmax.f32 %v6566_v38, 0.0 }
 0x469   : > { %v8704_v55 = vpop.f32.mrb[71].mxu1 }
 0x46a   : > { %v6493_v59 = vadd.f32 %v8702_v30, %v11450_v18  ;;  %v8705_v50 = vadd.f32 %v8704_v55, %v8703_v40  ;;  %v6599_v44 = vmax.f32 %v6567_v15, 0.0 }
 0x46c   : > { %v6529_v51 = vadd.f32 %v6493_v59, %v11918_v27  ;;  %v6496_v16 = vadd.f32 %v8705_v50, %v11454_v13  ;;  %v6616_v20 = vpack.c.bf16 %v6599_v44, %v6598_v25 }
 0x46e   : > { %v6568_v60 = vadd.f32 %v11448_v14, %v6529_v51  ;;  %v6530_v2 = vadd.f32 %v6496_v16, %v11919_v46  ;;  %8774 = vmatprep.mubr.bf16.mxu1 %v6616_v20 }
 0x470   : > { %v6569_v62 = vadd.f32 %v11448_v14, %v6530_v2  ;;  %v6600_v56 = vmax.f32 %v6568_v60, 0.0 }
 0x472   : > { %v6601_v61 = vmax.f32 %v6569_v62, 0.0 }
 0x474   : > { %v6617_v53 = vpack.c.bf16 %v6601_v61, %v6600_v56 }
 0x476   : > { %8775 = vmatmul.mubr.bf16.gmra.mrb[76].mxu1 %v6617_v53 }
 0x4d9   : > { %v8748_v18 = vpop.f32.mrb[64].mxu0 }
 0x4da   : > { %v6723_v13 = vpop.f32.mrb[65].mxu0  ;;  %v6732_v19 = vadd.f32 %v8748_v18, %v11552_v28 }
 0x4db   : > { %v8749_v17 = vpop.f32.mrb[66].mxu0  ;;  %v6724_v41 = vadd.f32 %v11552_v28, %v6723_v13 }
 0x4dc   : > { %v6735_v45 = vadd.f32 %v8749_v17, %v11552_v28  ;;  %v6726_v34 = vpop.f32.mrb[67].mxu0 }
 0x4dd   : > { %v6727_v14 = vadd.f32 %v11552_v28, %v6726_v34 }
 0x4de   : > { %v7611_v36 = vpack.c.bf16 %v6735_v45, %v6732_v19 }
 0x4df   : > { %v7606_v6 = vpack.c.bf16 %v6727_v14, %v6724_v41 }
 0x4e0   : > { %7683 = vst [vmem:[%s11562_s11 + $0x8] sm:$0xff] %v7611_v36  }
 0x4e1   : > { %7607 = vst [vmem:[%s11562_s11] sm:$0xff] %v7606_v6  }
 0x4e9   : > { %v8752_v22 = vpop.f32.mrb[68].mxu0 }
 0x4ea   : > { %v6739_v42 = vpop.f32.mrb[69].mxu0  ;;  %v6748_v7 = vadd.f32 %v8752_v22, %v11552_v28 }
 0x4eb   : > { %v8753_v39 = vpop.f32.mrb[70].mxu0  ;;  %v6740_v57 = vadd.f32 %v11552_v28, %v6739_v42 }
 0x4ec   : > { %v6751_v11 = vadd.f32 %v8753_v39, %v11552_v28  ;;  %v6742_v12 = vpop.f32.mrb[71].mxu0 }
 0x4ed   : > { %v6743_v29 = vadd.f32 %v11552_v28, %v6742_v12 }
 0x4ee   : > { %v7621_v26 = vpack.c.bf16 %v6751_v11, %v6748_v7 }
 0x4ef   : > { %v7616_v43 = vpack.c.bf16 %v6743_v29, %v6740_v57 }
 0x4f0   : > { %7685 = vst [vmem:[%s11562_s11 + $0x18] sm:$0xff] %v7621_v26  }
 0x4f1   : > { %7684 = vst [vmem:[%s11562_s11 + $0x10] sm:$0xff] %v7616_v43  }
 0x4f9   : > { %v8756_v31 = vpop.f32.mrb[72].mxu0 }
 0x4fa   : > { %v6755_v48 = vpop.f32.mrb[73].mxu0  ;;  %v6764_v8 = vadd.f32 %v8756_v31, %v11552_v28 }
 0x4fb   : > { %v8757_v58 = vpop.f32.mrb[74].mxu0  ;;  %v6756_v0 = vadd.f32 %v11552_v28, %v6755_v48 }
 0x4fc   : > { %v6767_v54 = vadd.f32 %v8757_v58, %v11552_v28  ;;  %v6758_v1 = vpop.f32.mrb[75].mxu0 }
 0x4fd   : > { %v6759_v33 = vadd.f32 %v11552_v28, %v6758_v1 }
 0x4fe   : > { %v7631_v47 = vpack.c.bf16 %v6767_v54, %v6764_v8 }
 0x4ff   : > { %v7626_v37 = vpack.c.bf16 %v6759_v33, %v6756_v0 }
 0x500   : > { %7687 = vst [vmem:[%s11562_s11 + $0x28] sm:$0xff] %v7631_v47  }
 0x501   : > { %7686 = vst [vmem:[%s11562_s11 + $0x20] sm:$0xff] %v7626_v37  }
 0x509   : > { %v8760_v3 = vpop.f32.mrb[76].mxu0 }
 0x50a   : > { %v6771_v52 = vpop.f32.mrb[77].mxu0  ;;  %v6780_v35 = vadd.f32 %v8760_v3, %v11552_v28 }
 0x50b   : > { %v8761_v32 = vpop.f32.mrb[78].mxu0  ;;  %v6772_v9 = vadd.f32 %v11552_v28, %v6771_v52 }
 0x50c   : > { %v6783_v23 = vadd.f32 %v8761_v32, %v11552_v28  ;;  %v6774_v10 = vpop.f32.mrb[79].mxu0 }
 0x50d   : > { %v6775_v5 = vadd.f32 %v11552_v28, %v6774_v10 }
 0x50e   : > { %v7641_v24 = vpack.c.bf16 %v6783_v23, %v6780_v35 }
 0x50f   : > { %v7636_v49 = vpack.c.bf16 %v6775_v5, %v6772_v9 }
 0x510   : > { %7689 = vst [vmem:[%s11562_s11 + $0x38] sm:$0xff] %v7641_v24  }
 0x511   : > { %7688 = vst [vmem:[%s11562_s11 + $0x30] sm:$0xff] %v7636_v49  }
 0x519   : > { %v8764_v4 = vpop.f32.mrb[80].mxu0 }
 0x51a   : > { %v6787_v63 = vpop.f32.mrb[81].mxu0  ;;  %v6796_v21 = vadd.f32 %v8764_v4, %v11552_v28 }
 0x51b   : > { %v8765_v38 = vpop.f32.mrb[82].mxu0  ;;  %v6788_v15 = vadd.f32 %v11552_v28, %v6787_v63 }
 0x51c   : > { %v6799_v30 = vadd.f32 %v8765_v38, %v11552_v28  ;;  %v6790_v40 = vpop.f32.mrb[83].mxu0 }
 0x51d   : > { %v6791_v55 = vadd.f32 %v11552_v28, %v6790_v40 }
 0x51e   : > { %v7651_v59 = vpack.c.bf16 %v6799_v30, %v6796_v21 }
 0x51f   : > { %v7646_v50 = vpack.c.bf16 %v6791_v55, %v6788_v15 }
 0x520   : > { %7691 = vst [vmem:[%s11562_s11 + $0x48] sm:$0xff] %v7651_v59  }
 0x521   : > { %7690 = vst [vmem:[%s11562_s11 + $0x40] sm:$0xff] %v7646_v50  }
 0x529   : > { %v8768_v25 = vpop.f32.mrb[84].mxu0 }
 0x52a   : > { %v6803_v44 = vpop.f32.mrb[85].mxu0  ;;  %v6812_v51 = vadd.f32 %v8768_v25, %v11552_v28 }
 0x52b   : > { %v8769_v27 = vpop.f32.mrb[86].mxu0  ;;  %v6804_v60 = vadd.f32 %v11552_v28, %v6803_v44 }
 0x52c   : > { %v6815_v16 = vadd.f32 %v8769_v27, %v11552_v28  ;;  %v6806_v20 = vpop.f32.mrb[87].mxu0 }
 0x52d   : > { %v6807_v46 = vadd.f32 %v11552_v28, %v6806_v20 }
 0x52e   : > { %v7661_v2 = vpack.c.bf16 %v6815_v16, %v6812_v51 }
 0x52f   : > { %v7656_v62 = vpack.c.bf16 %v6807_v46, %v6804_v60 }
 0x530   : > { %7693 = vst [vmem:[%s11562_s11 + $0x58] sm:$0xff] %v7661_v2  }
 0x531   : > { %7692 = vst [vmem:[%s11562_s11 + $0x50] sm:$0xff] %v7656_v62  }
 0x539   : > { %v8772_v56 = vpop.f32.mrb[72].mxu1 }
 0x53a   : > { %v6819_v61 = vpop.f32.mrb[73].mxu1  ;;  %v6828_v18 = vadd.f32 %v8772_v56, %v11552_v28 }
 0x53b   : > { %v8773_v53 = vpop.f32.mrb[74].mxu1  ;;  %v6820_v19 = vadd.f32 %v11552_v28, %v6819_v61 }
 0x53c   : > { %v6831_v13 = vadd.f32 %v8773_v53, %v11552_v28  ;;  %v6822_v17 = vpop.f32.mrb[75].mxu1 }
 0x53d   : > { %v6823_v45 = vadd.f32 %v11552_v28, %v6822_v17 }
 0x53e   : > { %v7671_v34 = vpack.c.bf16 %v6831_v13, %v6828_v18 }
 0x53f   : > { %v7666_v41 = vpack.c.bf16 %v6823_v45, %v6820_v19 }
 0x540   : > { %7695 = vst [vmem:[%s11562_s11 + $0x68] sm:$0xff] %v7671_v34  }
 0x541   : > { %7694 = vst [vmem:[%s11562_s11 + $0x60] sm:$0xff] %v7666_v41  }
 0x549   : > { %v8776_v14 = vpop.f32.mrb[76].mxu1 }
 0x54a   : > { %v6835_v36 = vpop.f32.mrb[77].mxu1  ;;  %v6844_v22 = vadd.f32 %v8776_v14, %v11552_v28 }
 0x54b   : > { %v8777_v6 = vpop.f32.mrb[78].mxu1  ;;  %v6836_v7 = vadd.f32 %v11552_v28, %v6835_v36 }
 0x54c   : > { %v6847_v42 = vadd.f32 %v8777_v6, %v11552_v28  ;;  %v6838_v39 = vpop.f32.mrb[79].mxu1 }
 0x54d   : > { %v6839_v11 = vadd.f32 %v11552_v28, %v6838_v39 }
 0x54e   : > { %v7681_v12 = vpack.c.bf16 %v6847_v42, %v6844_v22 }
 0x54f   : > { %v7676_v57 = vpack.c.bf16 %v6839_v11, %v6836_v7 }
 0x550   : > { %7697 = vst [vmem:[%s11562_s11 + $0x78] sm:$0xff] %v7681_v12  }
 0x551   : > { %7696 = vst [vmem:[%s11562_s11 + $0x70] sm:$0xff] %v7676_v57  }
 0x552 PF: > { %s18_s29 = sadd.s32 1, %s9038_s29   ;;  %s11920_s27 = smov %s9034_s28 }
 0x553   : > { %p15_p5 = scmp.ge.s32.totalorder %s18_s29, 4   ;;  %s11921_s28 = smov %s11923_s30 }
 0x555   :  { %17 = sbr.rel (!%p15_p5) target bundleno = 2 (0x2), region = 125 }

// kernel: _lambda_.15
= control target key start
LH: loop header
LB: loop body
LE: loop exit
PB: predicated region body
PF: predicated region fallthrough
CT: control target
= control target key end

     0   :  { %8 = vsyncpa [#allocation3], 0  ;;  %s1245_s0 = inlined_call_operand.vmem [shape: bf16[2,64,128], index: 0, kind: input, shape index: {}]   ;;  %s1246_s1 = inlined_call_operand.vmem [shape: bf16[2,64,128], index: 1, kind: input, shape index: {}]   ;;  %s1247_s2 = inlined_call_operand.vmem [shape: bf16[2,64,128], index: 2, kind: input, shape index: {}]   ;;  %s1248_s3 = inlined_call_operand.hbm [shape: f32[2,64,128], index: 3, kind: output, shape index: {}]  }
   0x1   :  { %10 = vsyncpa [#allocation3 + $0x1], 0  ;;  %s969_s12 = smov 0   ;;  %s971_s13 = smov 0  }
   0x2   :  { %s973_s14 = smov 0   ;;  %s975_s15 = smov 0  }
   0x3   :  { %s977_s16 = smov 0   ;;  %s979_s17 = smov 0  }
   0x4 LB: > { %s667_s18 = sadd.s32 4294967295, %s944_s17   ;;  %s668_s19 = sadd.s32 4294967294, %s944_s17   ;;  %s944_s17 = sphi %s979_s17, %s16_s17   ;;  %s940_s16 = sphi %s977_s16, %s1255_s16   ;;  %s936_s15 = sphi %s975_s15, %s1254_s15   ;;  %s932_s14 = sphi %s973_s14, %s1253_s14   ;;  %s928_s13 = sphi %s971_s13, %s1252_s13   ;;  %s924_s12 = sphi %s969_s12, %s1251_s12  }
   0x5   : > { %s28_s20 = sadd.s32 1, %s940_s16  ;;  %s121_s21 = sadd.s32 1, %s932_s14 }
   0x6   : > { %p30_p0 = scmp.ge.s32.totalorder %s28_s20, 2  ;;  %p131_p1 = scmp.ne.s32.totalorder %s932_s14, %s928_s13 }
   0x7   : > { %p132_p2 = scmp.eq.s32.totalorder %s667_s18, 1  ;;  %p137_p3 = scmp.ne.s32.totalorder %s928_s13, %s924_s12 }
   0x8   : > { %s1257_s20 = smov (%p30_p0, %s28_s20), 0  ;;  %p138_p5 = scmp.eq.s32.totalorder %s668_s19, 1 }
   0x9   : > { %p1009_p4 = por %p132_p2, %p131_p1  ;;  %s116_s23 = ssub.s32 %s940_s16, %s1257_s20 }
   0xa   : > { %p671_p6 = scmp.ge.s32.totalorder %s944_s17, 1  ;;  %p119_p7 = scmp.eq.s32.totalorder %s116_s23, 0 }
   0xb   : > { %p1016_p8 = por %p138_p5, %p137_p3  ;;  %p195_p9 = scmp.lt.s32.totalorder %s944_s17, 3 }
   0xc   : > { %s1022_s25 = scalar_select %p119_p7, %s932_s14, %s121_s21  }
   0xd   : > { %p196_p10 = pnand %p671_p6, %p195_p9 }
   0xe   : > { %p242_p11 = scmp.lt.s32.totalorder (!%p196_p10), %s936_s15, 1  ;;  %s238_s10 = sand.u32 (!%p196_p10), 1, %s928_s13  }
   0xf   : > { %199 = sbr.rel (%p196_p10) target bundleno = 409 (0x199), region = 32  ;;  %s672_s11 = sshll.u32 (!%p196_p10), %s238_s10, 6 }
  0x10   : > { %s240_s18 = scalar_lea.vmem (!%p196_p10), [#allocation2], %s672_s11  ;;  %s687_s19 = sshll.u32 (!%p196_p10), %s936_s15, 10 }
  0x11   : > { %s552_s21 = sshll.u32 (!%p196_p10), %s240_s18, 4  ;;  %s946_s29 = smov (!%p196_p10), [#allocation2]   ;;  %s1195_s21 = int_to_ptr.vmem [resolvable:$true] %s552_s21 }
  0x12   : > { %s866_s28 = scalar_lea.vmem (!%p196_p10), %s1195_s21, 1024 }
  0x13   : > { %p867_p12 = scmp.ne.s32.totalorder (!%p196_p10), %s1195_s21, %s866_s28 }
  0x15   : > { %p868_p13 = pnand (!%p196_p10), %p867_p12, %p1009_p4 }
  0x16   : > { %s243_s26 = scalar_select %p242_p11, %s936_s15, 1 }
  0x17   : > { %s1199_s15 = scalar_lea.sflag [#allocation3], %s238_s10  ;;  %p869_p0 = pneg %p868_p13 }
  0x18   : > { %s1026_s27 = sshll.u32 %s243_s26, 5 }
  0x19   : > { %s249_s30 = scalar_lea.vmem %s1245_s0, %s1026_s27  ;;  %s259_s6 = scalar_lea.vmem %s1246_s1, %s1026_s27 }
  0x1a   : > { %v736_v0 = vld [vmem:[%s249_s30 + $0x8] sm:$0xff]   ;;  %v689_v1 = vld [vmem:[%s249_s30] sm:$0xff]   ;;  %v737_v6 = vld [vmem:[%s249_s30 + $0x10] sm:$0xff]   ;;  %s269_s9 = scalar_lea.vmem %s1247_s2, %s1026_s27  ;;  %s1193_s27 = scalar_lea.hbm %s1248_s3, %s687_s19 }
  0x1b   : > { %v1032_v2 = vunpack.c.l.bf16 %v736_v0  ;;  %v1034_v3 = vunpack.c.l.bf16 %v689_v1  ;;  %v1036_v4 = vunpack.c.h.bf16 %v736_v0  ;;  %v1038_v5 = vunpack.c.h.bf16 %v689_v1  ;;  %v738_v13 = vld [vmem:[%s249_s30 + $0x18] sm:$0xff]   ;;  %v705_v18 = vld [vmem:[%s259_s6] sm:$0xff]   ;;  %v739_v23 = vld [vmem:[%s259_s6 + $0x8] sm:$0xff]   ;;  %s870_s30 = sshll.u32 %s946_s29, 4  ;;  %s871_s30 = int_to_ptr.vmem [resolvable:$false] %s870_s30 }
  0x1c   : > { %v1048_v11 = vunpack.c.h.bf16 %v737_v6  ;;  %v1050_v12 = vunpack.c.l.bf16 %v737_v6  ;;  %v1060_v16 = vunpack.c.h.bf16 %v738_v13  ;;  %v1062_v17 = vunpack.c.l.bf16 %v738_v13  ;;  %v740_v28 = vld [vmem:[%s259_s6 + $0x10] sm:$0xff]   ;;  %v741_v33 = vld [vmem:[%s259_s6 + $0x18] sm:$0xff]   ;;  %v721_v38 = vld [vmem:[%s269_s9] sm:$0xff]   ;;  %s872_s4 = scalar_lea.vmem %s871_s30, 2048  ;;  %p873_p1 = scmp.lt.s32.totalorder %s1195_s21, %s871_s30 }
  0x1d   : > { %v290_v7 = vmul.f32 %v1032_v2, %v1032_v2  ;;  %v288_v8 = vmul.f32 %v1034_v3, %v1034_v3  ;;  %v291_v9 = vmul.f32 %v1036_v4, %v1036_v4  ;;  %v289_v10 = vmul.f32 %v1038_v5, %v1038_v5  ;;  %v742_v43 = vld [vmem:[%s269_s9 + $0x8] sm:$0xff]   ;;  %v743_v48 = vld [vmem:[%s269_s9 + $0x10] sm:$0xff]   ;;  %v744_v53 = vld [vmem:[%s269_s9 + $0x18] sm:$0xff]   ;;  %p874_p2 = scmp.lt.s32.totalorder %s872_s4, %s866_s28 }
  0x1e   : > { %v293_v14 = vmul.f32 %v1048_v11, %v1048_v11  ;;  %v292_v15 = vmul.f32 %v1050_v12, %v1050_v12  ;;  %v295_v19 = vmul.f32 %v1060_v16, %v1060_v16  ;;  %v294_v20 = vmul.f32 %v1062_v17, %v1062_v17 }
  0x1f   : > { %300 = vadd.xlane.f32.xlu1 %v290_v7  ;;  %296 = vadd.xlane.f32.xlu0 %v288_v8  ;;  %v1068_v21 = vunpack.c.h.bf16 %v705_v18  ;;  %v1070_v22 = vunpack.c.l.bf16 %v705_v18  ;;  %v1076_v26 = vunpack.c.h.bf16 %v739_v23  ;;  %v1078_v27 = vunpack.c.l.bf16 %v739_v23  ;;  %p875_p3 = por %p874_p2, %p873_p1 }
  0x20   : > { %v1084_v31 = vunpack.c.h.bf16 %v740_v28  ;;  %v1086_v32 = vunpack.c.l.bf16 %v740_v28  ;;  %v1096_v36 = vunpack.c.h.bf16 %v741_v33  ;;  %v1098_v37 = vunpack.c.l.bf16 %v741_v33 }
  0x21   : > { %v353_v24 = vmul.f32 %v1068_v21, %v1068_v21  ;;  %v352_v25 = vmul.f32 %v1070_v22, %v1070_v22  ;;  %v355_v29 = vmul.f32 %v1076_v26, %v1076_v26  ;;  %v354_v30 = vmul.f32 %v1078_v27, %v1078_v27  ;;  %p876_p5 = pnand %p875_p3, %p869_p0 }
  0x22   : > { %v357_v34 = vmul.f32 %v1084_v31, %v1084_v31  ;;  %v356_v35 = vmul.f32 %v1086_v32, %v1086_v32  ;;  %v359_v39 = vmul.f32 %v1096_v36, %v1096_v36  ;;  %v358_v40 = vmul.f32 %v1098_v37, %v1098_v37 }
  0x23   : > { %302 = vadd.xlane.f32.xlu1 %v291_v9  ;;  %298 = vadd.xlane.f32.xlu0 %v289_v10  ;;  %v1104_v41 = vunpack.c.h.bf16 %v721_v38  ;;  %v1106_v42 = vunpack.c.l.bf16 %v721_v38  ;;  %v1112_v46 = vunpack.c.h.bf16 %v742_v43  ;;  %v1114_v47 = vunpack.c.l.bf16 %v742_v43 }
  0x24   : > { %v1120_v51 = vunpack.c.h.bf16 %v743_v48  ;;  %v1122_v52 = vunpack.c.l.bf16 %v743_v48  ;;  %v1128_v56 = vunpack.c.h.bf16 %v744_v53  ;;  %v1130_v57 = vunpack.c.l.bf16 %v744_v53 }
  0x25   : > { %v425_v44 = vmul.f32 %v1104_v41, %v1104_v41  ;;  %v424_v45 = vmul.f32 %v1106_v42, %v1106_v42  ;;  %v427_v49 = vmul.f32 %v1112_v46, %v1112_v46  ;;  %v426_v50 = vmul.f32 %v1114_v47, %v1114_v47 }
  0x26   : > { %v429_v54 = vmul.f32 %v1120_v51, %v1120_v51  ;;  %v428_v55 = vmul.f32 %v1122_v52, %v1122_v52  ;;  %v431_v58 = vmul.f32 %v1128_v56, %v1128_v56  ;;  %v430_v59 = vmul.f32 %v1130_v57, %v1130_v57 }
  0x27   : > { %306 = vadd.xlane.f32.xlu1 %v293_v14  ;;  %304 = vadd.xlane.f32.xlu0 %v292_v15 }
  0x2b   : > { %310 = vadd.xlane.f32.xlu1 %v295_v19  ;;  %308 = vadd.xlane.f32.xlu0 %v294_v20 }
  0x2f   : > { %362 = vadd.xlane.f32.xlu1 %v353_v24  ;;  %360 = vadd.xlane.f32.xlu0 %v352_v25 }
  0x33   : > { %366 = vadd.xlane.f32.xlu1 %v355_v29  ;;  %364 = vadd.xlane.f32.xlu0 %v354_v30 }
  0x37   : > { %370 = vadd.xlane.f32.xlu1 %v357_v34  ;;  %368 = vadd.xlane.f32.xlu0 %v356_v35 }
  0x3b   : > { %374 = vadd.xlane.f32.xlu1 %v359_v39  ;;  %372 = vadd.xlane.f32.xlu0 %v358_v40 }
  0x3f   : > { %434 = vadd.xlane.f32.xlu1 %v425_v44  ;;  %432 = vadd.xlane.f32.xlu0 %v424_v45 }
  0x43   : > { %438 = vadd.xlane.f32.xlu1 %v427_v49  ;;  %436 = vadd.xlane.f32.xlu0 %v426_v50 }
  0x47   : > { %442 = vadd.xlane.f32.xlu1 %v429_v54  ;;  %440 = vadd.xlane.f32.xlu0 %v428_v55 }
  0x4b   : > { %446 = vadd.xlane.f32.xlu1 %v431_v58  ;;  %444 = vadd.xlane.f32.xlu0 %v430_v59 }
  0xac   : > { %v301_v60 = vpop.xlane.xlu1 %300  ;;  %v297_v61 = vpop.xlane.xlu0 %296 }
  0xad   : > { %v314_v10 = vmax.f32 %v301_v60, 1e-24  ;;  %v312_v13 = vmax.f32 %v297_v61, 1e-24 }
  0xaf   : > { %802 = vrsqrt.f32 %v314_v10 }
  0xb0   : > { %v303_v62 = vpop.xlane.xlu1 %302  ;;  %v299_v63 = vpop.xlane.xlu0 %298  ;;  %804 = vrsqrt.f32 %v312_v13 }
  0xb1   : > { %v315_v18 = vmax.f32 %v303_v62, 1e-24  ;;  %v313_v19 = vmax.f32 %v299_v63, 1e-24 }
  0xb3   : > { %806 = vrsqrt.f32 %v315_v18 }
  0xb4   : > { %v307_v0 = vpop.xlane.xlu1 %306  ;;  %v305_v1 = vpop.xlane.xlu0 %304  ;;  %808 = vrsqrt.f32 %v313_v19 }
  0xb5   : > { %v317_v20 = vmax.f32 %v307_v0, 1e-24  ;;  %v316_v23 = vmax.f32 %v305_v1, 1e-24 }
  0xb7   : > { %810 = vrsqrt.f32 %v317_v20 }
  0xb8   : > { %v311_v6 = vpop.xlane.xlu1 %310  ;;  %v309_v7 = vpop.xlane.xlu0 %308  ;;  %812 = vrsqrt.f32 %v316_v23 }
  0xb9   : > { %v319_v30 = vmax.f32 %v311_v6, 1e-24  ;;  %v318_v33 = vmax.f32 %v309_v7, 1e-24  ;;  %v803_v44 = vpop.eup %802 }
  0xba   : > { %v805_v50 = vpop.eup %804 }
  0xbc   : > { %v363_v8 = vpop.xlane.xlu1 %362  ;;  %v361_v9 = vpop.xlane.xlu0 %360 }
  0xbd   : > { %v377_v28 = vmax.f32 %v363_v8, 1e-24  ;;  %v376_v29 = vmax.f32 %v361_v9, 1e-24  ;;  %v807_v54 = vpop.eup %806 }
  0xbe   : > { %v809_v55 = vpop.eup %808 }
  0xbf   : > { %814 = vrsqrt.f32 %v377_v28  ;;  %v329_v28 = vmul.f32 %v809_v55, %v1038_v5 }
  0xc0   : > { %v367_v14 = vpop.xlane.xlu1 %366  ;;  %v365_v15 = vpop.xlane.xlu0 %364  ;;  %816 = vrsqrt.f32 %v376_v29 }
  0xc1   : > { %v379_v38 = vmax.f32 %v367_v14, 1e-24  ;;  %v378_v39 = vmax.f32 %v365_v15, 1e-24  ;;  %818 = vrsqrt.f32 %v319_v30  ;;  %v811_v60 = vpop.eup %810 }
  0xc2   : > { %820 = vrsqrt.f32 %v318_v33  ;;  %v813_v0 = vpop.eup %812 }
  0xc3   : > { %822 = vrsqrt.f32 %v379_v38 }
  0xc4   : > { %v371_v24 = vpop.xlane.xlu1 %370  ;;  %v369_v25 = vpop.xlane.xlu0 %368  ;;  %824 = vrsqrt.f32 %v378_v39 }
  0xc5   : > { %v381_v45 = vmax.f32 %v371_v24, 1e-24  ;;  %v380_v53 = vmax.f32 %v369_v25, 1e-24 }
  0xc8   : > { %v375_v34 = vpop.xlane.xlu1 %374  ;;  %v373_v35 = vpop.xlane.xlu0 %372 }
  0xc9   : > { %v383_v61 = vmax.f32 %v375_v34, 1e-24  ;;  %v382_v1 = vmax.f32 %v373_v35, 1e-24  ;;  %v815_v6 = vpop.eup %814  ;;  %v328_v34 = vmul.f32 %v805_v50, %v1034_v3 }
  0xca   : > { %v817_v7 = vpop.eup %816  ;;  %v393_v18 = vmul.f32 %v815_v6, %v1068_v21 }
  0xcb   : > { %v1136_v10 = vpop.eup %818  ;;  %v392_v20 = vmul.f32 %v817_v7, %v1070_v22 }
  0xcc   : > { %v435_v40 = vpop.xlane.xlu1 %434  ;;  %v433_v43 = vpop.xlane.xlu0 %432  ;;  %v401_v38 = vadd.f32 %v393_v18, %v329_v28 }
  0xcd   : > { %v449_v48 = vmax.f32 %v435_v40, 1e-24  ;;  %v448_v49 = vmax.f32 %v433_v43, 1e-24  ;;  %v1138_v15 = vpop.eup %820  ;;  %v400_v22 = vadd.f32 %v392_v20, %v328_v34 }
  0xce   : > { %v823_v19 = vpop.eup %822 }
  0xcf   : > { %826 = vrsqrt.f32 %v449_v48  ;;  %v825_v23 = vpop.eup %824  ;;  %v395_v21 = vmul.f32 %v823_v19, %v1076_v26 }
  0xd0   : > { %828 = vrsqrt.f32 %v448_v49  ;;  %v439_v58 = vpop.xlane.xlu1 %438  ;;  %v437_v59 = vpop.xlane.xlu0 %436  ;;  %v331_v49 = vmul.f32 %v807_v54, %v1036_v4 }
  0xd1   : > { %830 = vrsqrt.f32 %v381_v45  ;;  %v451_v62 = vmax.f32 %v439_v58, 1e-24  ;;  %v450_v63 = vmax.f32 %v437_v59, 1e-24  ;;  %v394_v45 = vmul.f32 %v825_v23, %v1078_v27 }
  0xd2   : > { %832 = vrsqrt.f32 %v380_v53  ;;  %v403_v55 = vadd.f32 %v395_v21, %v331_v49 }
  0xd3   : > { %834 = vrsqrt.f32 %v451_v62 }
  0xd4   : > { %836 = vrsqrt.f32 %v450_v63  ;;  %v443_v8 = vpop.xlane.xlu1 %442  ;;  %v441_v9 = vpop.xlane.xlu0 %440 }
  0xd5   : > { %838 = vrsqrt.f32 %v383_v61  ;;  %v453_v13 = vmax.f32 %v443_v8, 1e-24  ;;  %v452_v14 = vmax.f32 %v441_v9, 1e-24 }
  0xd6   : > { %840 = vrsqrt.f32 %v382_v1 }
  0xd7   : > { %842 = vrsqrt.f32 %v453_v13 }
  0xd8   : > { %844 = vrsqrt.f32 %v452_v14  ;;  %v447_v24 = vpop.xlane.xlu1 %446  ;;  %v445_v25 = vpop.xlane.xlu0 %444 }
  0xd9   : > { %v827_v29 = vpop.eup %826  ;;  %v455_v30 = vmax.f32 %v447_v24, 1e-24  ;;  %v454_v33 = vmax.f32 %v445_v25, 1e-24 }
  0xda   : > { %v829_v35 = vpop.eup %828  ;;  %v465_v39 = vmul.f32 %v827_v29, %v1104_v41  ;;  %v330_v41 = vmul.f32 %v803_v44, %v1032_v2  ;;  %v333_v44 = vmul.f32 %v811_v60, %v1048_v11 }
  0xdb   : > { %v831_v40 = vpop.eup %830  ;;  %846 = vrsqrt.f32 %v455_v30  ;;  %v464_v43 = vmul.f32 %v829_v35, %v1106_v42 }
  0xdc   : > { %v833_v48 = vpop.eup %832  ;;  %848 = vrsqrt.f32 %v454_v33  ;;  %v1148_v5 = vadd.f32 %v465_v39, %v401_v38  ;;  %v397_v27 = vmul.f32 %v831_v40, %v1084_v31  ;;  %v402_v61 = vadd.f32 %v394_v45, %v330_v41 }
  0xdd   : > { %v835_v3 = vpop.eup %834  ;;  %v1151_v50 = vadd.f32 %v464_v43, %v400_v22  ;;  %v396_v54 = vmul.f32 %v833_v48, %v1086_v32  ;;  %v332_v31 = vmul.f32 %v813_v0, %v1050_v12  ;;  %v335_v12 = vmul.f32 %v1136_v10, %v1060_v16 }
  0xde   : > { %v837_v53 = vpop.eup %836  ;;  %v481_v26 = vmul.f32 %v1148_v5, %v1148_v5  ;;  %v467_v42 = vmul.f32 %v835_v3, %v1112_v46  ;;  %v405_v7 = vadd.f32 %v397_v27, %v333_v44 }
  0xdf   : > { %v839_v58 = vpop.eup %838  ;;  %v480_v59 = vmul.f32 %v1151_v50, %v1151_v50  ;;  %v466_v4 = vmul.f32 %v837_v53, %v1114_v47  ;;  %v404_v9 = vadd.f32 %v396_v54, %v332_v31 }
  0xe0   : > { %v841_v62 = vpop.eup %840  ;;  %490 = vadd.xlane.f32.xlu1 %v481_v26  ;;  %v1162_v2 = vadd.f32 %v467_v42, %v403_v55  ;;  %v399_v32 = vmul.f32 %v839_v58, %v1096_v36 }
  0xe1   : > { %v843_v63 = vpop.eup %842  ;;  %488 = vadd.xlane.f32.xlu0 %v480_v59  ;;  %v1165_v46 = vadd.f32 %v466_v4, %v402_v61  ;;  %v398_v60 = vmul.f32 %v841_v62, %v1098_v37 }
  0xe2   : > { %v845_v1 = vpop.eup %844  ;;  %v483_v6 = vmul.f32 %v1162_v2, %v1162_v2  ;;  %v469_v47 = vmul.f32 %v843_v63, %v1120_v51  ;;  %v334_v51 = vmul.f32 %v1138_v15, %v1062_v17  ;;  %v407_v19 = vadd.f32 %v399_v32, %v335_v12 }
  0xe3   : > { %v482_v8 = vmul.f32 %v1165_v46, %v1165_v46  ;;  %v468_v11 = vmul.f32 %v845_v1, %v1122_v52 }
  0xe4   : > { %494 = vadd.xlane.f32.xlu1 %v483_v6  ;;  %v477_v13 = vadd.f32 %v469_v47, %v405_v7  ;;  %v406_v52 = vadd.f32 %v398_v60, %v334_v51 }
  0xe5   : > { %v847_v0 = vpop.eup %846  ;;  %492 = vadd.xlane.f32.xlu0 %v482_v8  ;;  %v476_v14 = vadd.f32 %v468_v11, %v404_v9 }
  0xe6   : > { %v849_v36 = vpop.eup %848  ;;  %v485_v18 = vmul.f32 %v477_v13, %v477_v13  ;;  %v471_v20 = vmul.f32 %v847_v0, %v1128_v56 }
  0xe7   : > { %v484_v23 = vmul.f32 %v476_v14, %v476_v14  ;;  %v470_v37 = vmul.f32 %v849_v36, %v1130_v57 }
  0xe8   : > { %498 = vadd.xlane.f32.xlu1 %v485_v18  ;;  %v479_v24 = vadd.f32 %v471_v20, %v407_v19 }
  0xe9   : > { %496 = vadd.xlane.f32.xlu0 %v484_v23  ;;  %v478_v16 = vadd.f32 %v470_v37, %v406_v52 }
  0xea   : > { %v487_v10 = vmul.f32 %v479_v24, %v479_v24 }
  0xeb   : > { %v486_v25 = vmul.f32 %v478_v16, %v478_v16 }
  0xec   : > { %502 = vadd.xlane.f32.xlu1 %v487_v10 }
  0xed   : > { %500 = vadd.xlane.f32.xlu0 %v486_v25 }
 0x16d   : > { %v491_v28 = vpop.xlane.xlu1 %490 }
 0x16e   : > { %v505_v17 = vmax.f32 %v491_v28, 1e-24  ;;  %v489_v15 = vpop.xlane.xlu0 %488 }
 0x16f   : > { %v504_v29 = vmax.f32 %v489_v15, 1e-24 }
 0x170   : > { %850 = vrsqrt.f32 %v505_v17 }
 0x171   : > { %852 = vrsqrt.f32 %v504_v29  ;;  %v495_v56 = vpop.xlane.xlu1 %494 }
 0x172   : > { %v507_v30 = vmax.f32 %v495_v56, 1e-24  ;;  %v493_v33 = vpop.xlane.xlu0 %492 }
 0x173   : > { %v506_v57 = vmax.f32 %v493_v33, 1e-24 }
 0x174   : > { %854 = vrsqrt.f32 %v507_v30 }
 0x175   : > { %856 = vrsqrt.f32 %v506_v57  ;;  %v499_v34 = vpop.xlane.xlu1 %498 }
 0x176   : > { %v509_v35 = vmax.f32 %v499_v34, 1e-24  ;;  %v497_v38 = vpop.xlane.xlu0 %496 }
 0x177   : > { %v508_v39 = vmax.f32 %v497_v38, 1e-24 }
 0x178   : > { %858 = vrsqrt.f32 %v509_v35 }
 0x179   : > { %860 = vrsqrt.f32 %v508_v39  ;;  %v503_v21 = vpop.xlane.xlu1 %502 }
 0x17a   : > { %v851_v40 = vpop.eup %850  ;;  %v511_v22 = vmax.f32 %v503_v21, 1e-24  ;;  %v501_v43 = vpop.xlane.xlu0 %500 }
 0x17b   : > { %v853_v45 = vpop.eup %852  ;;  %v521_v48 = vmul.f32 %v851_v40, %v1148_v5  ;;  %v510_v49 = vmax.f32 %v501_v43, 1e-24 }
 0x17c   : > { %v520_v3 = vmul.f32 %v853_v45, %v1151_v50  ;;  %862 = vrsqrt.f32 %v511_v22 }
 0x17d   : > { %529 = vst [vmem:[%s240_s18 + $0x8] sm:$0xff] %v521_v48  ;;  %864 = vrsqrt.f32 %v510_v49 }
 0x17e   : > { %v855_v41 = vpop.eup %854  ;;  %528 = vst [vmem:[%s240_s18] sm:$0xff] %v520_v3 }
 0x17f   : > { %v857_v53 = vpop.eup %856  ;;  %v523_v26 = vmul.f32 %v855_v41, %v1162_v2 }
 0x180   : > { %v522_v55 = vmul.f32 %v857_v53, %v1165_v46 }
 0x181   : > { %531 = vst [vmem:[%s240_s18 + $0x18] sm:$0xff] %v523_v26 }
 0x182   : > { %v859_v42 = vpop.eup %858  ;;  %530 = vst [vmem:[%s240_s18 + $0x10] sm:$0xff] %v522_v55 }
 0x183   : > { %v861_v5 = vpop.eup %860  ;;  %v525_v27 = vmul.f32 %v859_v42, %v477_v13 }
 0x184   : > { %v524_v58 = vmul.f32 %v861_v5, %v476_v14 }
 0x185   : > { %533 = vst [vmem:[%s240_s18 + $0x28] sm:$0xff] %v525_v27 }
 0x186   : > { %v863_v50 = vpop.eup %862  ;;  %532 = vst [vmem:[%s240_s18 + $0x20] sm:$0xff] %v524_v58 }
 0x187   : > { %v865_v59 = vpop.eup %864  ;;  %v527_v61 = vmul.f32 %v863_v50, %v479_v24 }
 0x188   : > { %v526_v4 = vmul.f32 %v865_v59, %v478_v16 }
 0x189   : > { %535 = vst [vmem:[%s240_s18 + $0x38] sm:$0xff] %v527_v61 }
 0x18a   : > { %534 = vst [vmem:[%s240_s18 + $0x30] sm:$0xff] %v526_v4 }
 0x18b   : > { %879 = shalt.err (!%p876_p5)
}
 0x18c   : > { %s880_s5 = scalar_lea.hbm %s1193_s27, 1024  ;;  %s884_s8 = scalar_lea.hbm %s1248_s3, 2048 }
 0x18d   : > { %p881_p6 = scmp.ne.s32.totalorder %s1193_s27, %s880_s5  ;;  %p885_p10 = scmp.lt.u32.totalorder %s1193_s27, %s1248_s3 }
 0x18e   : > { %p886_p11 = scmp.lt.u32.totalorder %s884_s8, %s880_s5  ;;  %p888_p13 = scmp.lt.u32.totalorder %s880_s5, %s1193_s27 }
 0x18f   : > { %p882_p7 = pnand %p881_p6, %p1009_p4 }
 0x190   : > { %p887_p12 = por %p886_p11, %p885_p10 }
 0x191   : > { %p883_p9 = pneg %p882_p7 }
 0x192   : > { %p889_p0 = por %p888_p13, %p887_p12 }
 0x194   : > { %p890_p1 = pnand %p889_p0, %p883_p9 }
 0x196   : > { %893 = shalt.err (!%p890_p1)
}
 0x197   : > { %s947_s11 = smov 128   ;;  %s948_s18 = smov 8  }
 0x198   : > { %745 = dma.vmem_to_hbm [thread:$0]  (%p1009_p4), %s1195_s21, 1024, %s1193_s27, %s1199_s15, %s947_s11, %s947_s11, %s948_s18  }
 0x199 PF: > { %p751_p2 = scmp.ge.s32.totalorder %s944_s17, 2  ;;  %s567_s19 = sand.u32 1, %s924_s12  }
 0x19a   : > { %s568_s23 = scalar_lea.sflag [#allocation3], %s567_s19 }
 0x19b   : > { %p748_p3 = pnand %p751_p2, %p1016_p8 }
 0x19d   : > { %919 = dma.done.wait (!%p748_p3), %s568_s23, 1024  }
 0x19e   : > { %921 = vsyncadd (!%p748_p3), %s568_s23, 4294966272  ;;  %s16_s17 = sadd.s32 1, %s944_s17   ;;  %s1251_s12 = smov %s928_s13 }
 0x19f   : > { %p13_p5 = scmp.ge.s32.totalorder %s16_s17, 4   ;;  %s1252_s13 = smov %s932_s14 }
 0x1a0   : > { %s1253_s14 = smov %s1022_s25  ;;  %s1254_s15 = smov %s940_s16 }
 0x1a1   : > { %s1255_s16 = smov %s1257_s20  ;;  %15 = sbr.rel (!%p13_p5) target bundleno = 4 (0x4), region = 73 }
 0x1a8   :  { %573 = vsyncpa [#allocation3], 1 }
 0x1a9   :  { %575 = vsyncpa [#allocation3 + $0x1], 1 }

// kernel: _lambda_.13
= control target key start
LH: loop header
LB: loop body
LE: loop exit
PB: predicated region body
PF: predicated region fallthrough
CT: control target
= control target key end

     0   :  { %s5040_s27 = smov 0   ;;  %s5042_s28 = smov 0   ;;  %s6028_s0 = inlined_call_operand.vmem [shape: bf16[2,8,8,128], index: 0, kind: input, shape index: {}]   ;;  %s6029_s1 = inlined_call_operand.vmem [shape: bf16[2,1,2,8,128], index: 1, kind: input, shape index: {}]   ;;  %s6030_s2 = inlined_call_operand.vmem [shape: bf16[128,256], index: 2, kind: input, shape index: {}]   ;;  %s6031_s3 = inlined_call_operand.vmem [shape: f32[1,256], index: 3, kind: input, shape index: {}]   ;;  %s6032_s4 = inlined_call_operand.vmem [shape: bf16[3,768,128], index: 4, kind: input, shape index: {}]   ;;  %s6033_s5 = inlined_call_operand.vmem [shape: f32[1,128], index: 5, kind: input, shape index: {}]   ;;  %s6034_s6 = inlined_call_operand.vmem [shape: bf16[128,128], index: 6, kind: input, shape index: {}]   ;;  %s6035_s7 = inlined_call_operand.vmem [shape: f32[1,128], index: 7, kind: input, shape index: {}]   ;;  %s6036_s8 = inlined_call_operand.vmem [shape: bf16[2,8,8,128], index: 8, kind: output, shape index: {}]  }
   0x1   :  { %s5044_s29 = smov 0  }
   0x2 LB: > { %s30_s30 = sadd.s32 1, %s4987_s28  ;;  %p3852_p0 = scmp.ge.s32.totalorder %s4991_s29, 1  ;;  %s4991_s29 = sphi %s5044_s29, %s18_s29   ;;  %s4987_s28 = sphi %s5042_s28, %s6040_s28   ;;  %s4983_s27 = sphi %s5040_s27, %s6039_s27  }
   0x3   : > { %p32_p1 = scmp.ge.s32.totalorder %s30_s30, 2  ;;  %p299_p2 = scmp.lt.s32.totalorder %s4991_s29, 3 }
   0x5   : > { %s6042_s30 = smov (%p32_p1, %s30_s30), 0  ;;  %p300_p3 = pnand %p3852_p0, %p299_p2 }
   0x6   : > { %v4788_v0 = vld [vmem:[%s6030_s2 + $0x4] ss:$8 sps:$4 sm:$0xff] (!%p300_p3)   ;;  %p351_p4 = scmp.lt.s32.totalorder (!%p300_p3), %s4983_s27, 1  ;;  %v4790_v1 = vld [vmem:[%s6030_s2] ss:$8 sps:$4 sm:$0xff] (!%p300_p3)   ;;  %v4993_v2 = vmov (!%p300_p3), 0   ;;  %v406_v36 = vlaneseq (!%p300_p3) }
   0x7   : > { %303 = sbr.rel (%p300_p3) target bundleno = 875 (0x36b), region = 52  ;;  %552 = vmatprep.mubr.bf16.mxu0 (!%p300_p3), %v4993_v2  ;;  %838 = vmatprep.mubr.bf16.mxu1 (!%p300_p3), %v4993_v2  ;;  %v4791_v3 = vld [vmem:[%s6030_s2 + $0x14] ss:$8 sps:$4 sm:$0xff] (!%p300_p3)   ;;  %v4793_v4 = vld [vmem:[%s6030_s2 + $0x10] ss:$8 sps:$4 sm:$0xff] (!%p300_p3)   ;;  %v4817_v17 = vld [vmem:[%s6032_s4 + $0x1c0] sm:$0xff] (!%p300_p3)  }
   0x8   : > { %520 = vmatprep.subr.bf16.mxu0 (!%p300_p3), %v4788_v0  ;;  %806 = vmatprep.subr.bf16.mxu1 (!%p300_p3), %v4788_v0  ;;  %v4794_v5 = vld [vmem:[%s6030_s2 + $0x24] ss:$8 sps:$4 sm:$0xff] (!%p300_p3)   ;;  %v4796_v6 = vld [vmem:[%s6030_s2 + $0x20] ss:$8 sps:$4 sm:$0xff] (!%p300_p3)   ;;  %v4797_v7 = vld [vmem:[%s6030_s2 + $0x34] ss:$8 sps:$4 sm:$0xff] (!%p300_p3)  }
   0x9   : > { %521 = vmatpush1.bf16.msra.mxu0 (!%p300_p3), %v4790_v1  ;;  %807 = vmatpush1.bf16.msra.mxu1 (!%p300_p3), %v4790_v1  ;;  %v4799_v8 = vld [vmem:[%s6030_s2 + $0x30] ss:$8 sps:$4 sm:$0xff] (!%p300_p3)   ;;  %v4800_v9 = vld [vmem:[%s6030_s2 + $0x44] ss:$8 sps:$4 sm:$0xff] (!%p300_p3)   ;;  %v4802_v10 = vld [vmem:[%s6030_s2 + $0x40] ss:$8 sps:$4 sm:$0xff] (!%p300_p3)  }
   0xa   : > { %522 = vmatprep.subr.bf16.mxu0 (!%p300_p3), %v4791_v3  ;;  %808 = vmatprep.subr.bf16.mxu1 (!%p300_p3), %v4791_v3  ;;  %v4803_v11 = vld [vmem:[%s6030_s2 + $0x54] ss:$8 sps:$4 sm:$0xff] (!%p300_p3)   ;;  %v4805_v12 = vld [vmem:[%s6030_s2 + $0x50] ss:$8 sps:$4 sm:$0xff] (!%p300_p3)   ;;  %v4806_v13 = vld [vmem:[%s6030_s2 + $0x64] ss:$8 sps:$4 sm:$0xff] (!%p300_p3)  }
   0xb   : > { %v4808_v14 = vld [vmem:[%s6030_s2 + $0x60] ss:$8 sps:$4 sm:$0xff] (!%p300_p3)   ;;  %v4809_v15 = vld [vmem:[%s6030_s2 + $0x74] ss:$8 sps:$4 sm:$0xff] (!%p300_p3)   ;;  %v4811_v16 = vld [vmem:[%s6030_s2 + $0x70] ss:$8 sps:$4 sm:$0xff] (!%p300_p3)  }
   0xc   : > { %v4823_v18 = vld [vmem:[%s6032_s4 + $0x240] sm:$0xff] (!%p300_p3)   ;;  %v4819_v22 = vld [vmem:[%s6032_s4 + $0x1c8] sm:$0xff] (!%p300_p3)   ;;  %v4821_v25 = vld [vmem:[%s6032_s4 + $0x1d0] sm:$0xff] (!%p300_p3)   ;;  %vm5181_vm0 = vcmp.lt.s32.totalorder (!%p300_p3), %v406_v36, 256  ;;  %v4994_v42 = vmov (!%p300_p3), 0.0   ;;  %v407_v59 = vshrl.u32 (!%p300_p3), %v406_v36, 7 }
   0xd   : > { %523 = vmatpush1.bf16.msra.mxu0 (!%p300_p3), %v4793_v4  ;;  %809 = vmatpush1.bf16.msra.mxu1 (!%p300_p3), %v4793_v4  ;;  %v4818_v21 = vld [vmem:[%s6032_s4 + $0x180] sm:$0xff] (!%p300_p3)   ;;  %v4820_v24 = vld [vmem:[%s6032_s4 + $0x188] sm:$0xff] (!%p300_p3)   ;;  %v4822_v27 = vld [vmem:[%s6032_s4 + $0x190] sm:$0xff] (!%p300_p3)   ;;  %893 = vst.msk [vmem:[#allocation2 + $0x20] ss:$8 sm:$0x3] (!%p300_p3), %vm5181_vm0, %v4994_v42 }
   0xe   : > { %s6044_s27 = smov (!%p351_p4, %s4983_s27), 1  ;;  %524 = vmatprep.subr.bf16.mxu0 %v4794_v5  ;;  %810 = vmatprep.subr.bf16.mxu1 %v4794_v5  ;;  %v4824_v23 = vld [vmem:[%s6032_s4 + $0x200] sm:$0xff]   ;;  %v4825_v30 = vld [vmem:[%s6032_s4 + $0x1d8] sm:$0xff]   ;;  %v4827_v31 = vld [vmem:[%s6032_s4 + $0x248] sm:$0xff]   ;;  %v408_v60 = vsub.s32 0, %v407_v59  ;;  %v412_v63 = vsub.s32 1, %v407_v59 }
   0xf   : > { %s4316_s19 = sshll.u32 %s6044_s27, 5  ;;  %s4317_s22 = sshll.u32 %s6044_s27, 3  ;;  %v4826_v32 = vld [vmem:[%s6032_s4 + $0x198] sm:$0xff]   ;;  %v4828_v33 = vld [vmem:[%s6032_s4 + $0x208] sm:$0xff]   ;;  %v4829_v34 = vld [vmem:[%s6032_s4 + $0x1e0] sm:$0xff]  }
  0x10   : > { %s5090_s9 = scalar_lea.vmem %s6028_s0, %s4316_s19  ;;  %s5095_s12 = scalar_lea.vmem %s6029_s1, %s4317_s22  ;;  %v4831_v35 = vld [vmem:[%s6032_s4 + $0x250] sm:$0xff]   ;;  %v4830_v37 = vld [vmem:[%s6032_s4 + $0x1a0] sm:$0xff]   ;;  %v4833_v40 = vld [vmem:[%s6032_s4 + $0x1e8] sm:$0xff]   ;;  %896 = vst.msk [vmem:[#allocation2 + $0x40] ss:$8 sm:$0x3] %vm5181_vm0, %v4994_v42 }
  0x11   : > { %525 = vmatpush1.bf16.msra.mxu0 %v4796_v6  ;;  %811 = vmatpush1.bf16.msra.mxu1 %v4796_v6  ;;  %v4812_v19 = vld [vmem:[%s5090_s9] sm:$0xff]   ;;  %v4814_v26 = vld [vmem:[%s5090_s9 + $0x8] sm:$0xff]   ;;  %v4815_v28 = vld [vmem:[%s5090_s9 + $0x10] sm:$0xff]   ;;  %923 = vst.msk [vmem:[#allocation2 + $0x31] ss:$8 sm:$0x3] %vm5181_vm0, %v4994_v42  ;;  %s377_s25 = scalar_lea.vmem %s6036_s8, %s4316_s19 }
  0x12   : > { %526 = vmatprep.subr.bf16.mxu0 %v4797_v7  ;;  %812 = vmatprep.subr.bf16.mxu1 %v4797_v7  ;;  %v4813_v20 = vld [vmem:[%s5095_s12] sm:$0xff]   ;;  %v4816_v29 = vld [vmem:[%s5090_s9 + $0x18] sm:$0xff]   ;;  %v4832_v38 = vld [vmem:[%s6032_s4 + $0x210] sm:$0xff]   ;;  %926 = vst.msk [vmem:[#allocation2 + $0x51] ss:$8 sm:$0x3] %vm5181_vm0, %v4994_v42 }
  0x13   : > { %v4835_v41 = vld [vmem:[%s6032_s4 + $0x258] sm:$0xff]   ;;  %890 = vst.msk [vmem:[#allocation2] ss:$8 sm:$0x3] %vm5181_vm0, %v4994_v42  ;;  %v4834_v43 = vld [vmem:[%s6032_s4 + $0x1a8] sm:$0xff]   ;;  %v4837_v45 = vld [vmem:[%s6032_s4 + $0x1f0] sm:$0xff]  }
  0x14   : > { %899 = vst.msk [vmem:[#allocation2 + $0x60] ss:$8 sm:$0x3] %vm5181_vm0, %v4994_v42  ;;  %902 = vst.msk [vmem:[#allocation2 + $0x80] ss:$8 sm:$0x3] %vm5181_vm0, %v4994_v42 }
  0x15   : > { %527 = vmatpush1.bf16.msra.mxu0 %v4799_v8  ;;  %813 = vmatpush1.bf16.msra.mxu1 %v4799_v8  ;;  %905 = vst.msk [vmem:[#allocation2 + $0xa0] ss:$8 sm:$0x3] %vm5181_vm0, %v4994_v42  ;;  %908 = vst.msk [vmem:[#allocation2 + $0xc0] ss:$8 sm:$0x3] %vm5181_vm0, %v4994_v42 }
  0x16   : > { %528 = vmatprep.subr.bf16.mxu0 %v4800_v9  ;;  %814 = vmatprep.subr.bf16.mxu1 %v4800_v9  ;;  %911 = vst.msk [vmem:[#allocation2 + $0xe0] ss:$8 sm:$0x3] %vm5181_vm0, %v4994_v42  ;;  %914 = vst.msk [vmem:[#allocation2 + $0x100] ss:$8 sm:$0x3] %vm5181_vm0, %v4994_v42 }
  0x17   : > { %917 = vst.msk [vmem:[#allocation2 + $0x120] ss:$8 sm:$0x3] %vm5181_vm0, %v4994_v42  ;;  %920 = vst.msk [vmem:[#allocation2 + $0x11] ss:$8 sm:$0x3] %vm5181_vm0, %v4994_v42 }
  0x18   : > { %929 = vst.msk [vmem:[#allocation2 + $0x71] ss:$8 sm:$0x3] %vm5181_vm0, %v4994_v42  ;;  %932 = vst.msk [vmem:[#allocation2 + $0x91] ss:$8 sm:$0x3] %vm5181_vm0, %v4994_v42 }
  0x19   : > { %529 = vmatpush1.bf16.msra.mxu0 %v4802_v10  ;;  %815 = vmatpush1.bf16.msra.mxu1 %v4802_v10  ;;  %935 = vst.msk [vmem:[#allocation2 + $0xb1] ss:$8 sm:$0x3] %vm5181_vm0, %v4994_v42  ;;  %938 = vst.msk [vmem:[#allocation2 + $0xd1] ss:$8 sm:$0x3] %vm5181_vm0, %v4994_v42 }
  0x1a   : > { %530 = vmatprep.subr.bf16.mxu0 %v4803_v11  ;;  %816 = vmatprep.subr.bf16.mxu1 %v4803_v11  ;;  %941 = vst.msk [vmem:[#allocation2 + $0xf1] ss:$8 sm:$0x3] %vm5181_vm0, %v4994_v42  ;;  %944 = vst.msk [vmem:[#allocation2 + $0x111] ss:$8 sm:$0x3] %vm5181_vm0, %v4994_v42 }
  0x1b   : > { %947 = vst.msk [vmem:[#allocation2 + $0x131] ss:$8 sm:$0x3] %vm5181_vm0, %v4994_v42  ;;  %v4836_v44 = vld [vmem:[%s6032_s4 + $0x218] sm:$0xff]   ;;  %v4839_v46 = vld [vmem:[%s6032_s4 + $0x260] sm:$0xff]   ;;  %v4838_v47 = vld [vmem:[%s6032_s4 + $0x1b0] sm:$0xff]  }
  0x1c   : > { %v4840_v48 = vld [vmem:[%s6032_s4 + $0x220] sm:$0xff]   ;;  %v4841_v49 = vld [vmem:[%s6032_s4 + $0x1f8] sm:$0xff]   ;;  %v4843_v50 = vld [vmem:[%s6032_s4 + $0x268] sm:$0xff]  }
  0x1d   : > { %531 = vmatpush1.bf16.msra.mxu0 %v4805_v12  ;;  %817 = vmatpush1.bf16.msra.mxu1 %v4805_v12  ;;  %v4842_v51 = vld [vmem:[%s6032_s4 + $0x1b8] sm:$0xff]   ;;  %v4844_v52 = vld [vmem:[%s6032_s4 + $0x228] sm:$0xff]   ;;  %v4845_v53 = vld [vmem:[%s6032_s4 + $0x2c0] sm:$0xff]  }
  0x1e   : > { %532 = vmatprep.subr.bf16.mxu0 %v4806_v13  ;;  %818 = vmatprep.subr.bf16.mxu1 %v4806_v13  ;;  %v4846_v54 = vld [vmem:[%s6032_s4 + $0x270] sm:$0xff]   ;;  %v4850_v56 = vld [vmem:[%s6032_s4 + $0x278] sm:$0xff]   ;;  %v4855_v58 = vld [vmem:[%s6032_s4 + $0x40] sm:$0xff]  }
  0x1f   : > { %v4848_v55 = vld [vmem:[%s6032_s4 + $0x230] sm:$0xff]   ;;  %v4852_v57 = vld [vmem:[%s6032_s4 + $0x238] sm:$0xff]   ;;  %v404_v61 = vld [vmem:[%s6031_s3] sm:$0x3] }
  0x20   : > { %v708_v62 = vld [vmem:[%s6031_s3] sm:$0x3]  ;;  %v5286_v0 = vrot.slane %v404_v61, %v408_v60 }
  0x21   : > { %533 = vmatpush1.bf16.msra.mxu0 %v4808_v14  ;;  %819 = vmatpush1.bf16.msra.mxu1 %v4808_v14  ;;  %v713_v1 = vrot.slane %v708_v62, %v408_v60  ;;  %v717_v3 = vrot.slane %v708_v62, %v412_v63 }
  0x22   : > { %534 = vmatprep.subr.bf16.mxu0 %v4809_v15  ;;  %820 = vmatprep.subr.bf16.mxu1 %v4809_v15 }
  0x25   : > { %535 = vmatpush1.bf16.msra.mxu0 %v4811_v16  ;;  %821 = vmatpush1.bf16.msra.mxu1 %v4811_v16 }
  0x26   : > { %4366 = vmatprep.subr.bf16.mxu0 %v4817_v17  ;;  %4406 = vmatprep.subr.bf16.mxu1 %v4823_v18 }
  0x28   : > { %553 = vmatmul.mubr.bf16.vlgmr.msra.gmra.mrb[0].mxu0 %v4812_v19  ;;  %839 = vmatmul.mubr.bf16.vlgmr.msra.gmra.mrb[0].mxu1 %v4813_v20 }
  0x29   : > { %562 = vmatprep.mubr.bf16.mxu0 %v4993_v2  ;;  %4367 = vmatpush3.bf16.msra.mxu0 %v4818_v21 }
  0x2a   : > { %4368 = vmatprep.subr.bf16.mxu0 %v4819_v22  ;;  %4407 = vmatpush3.bf16.msra.mxu1 %v4824_v23 }
  0x2b   : > { %4408 = vmatprep.subr.bf16.mxu1 %v4827_v31 }
  0x2d   : > { %4369 = vmatpush3.bf16.msra.mxu0 %v4820_v24 }
  0x2e   : > { %4370 = vmatprep.subr.bf16.mxu0 %v4821_v25  ;;  %4409 = vmatpush3.bf16.msra.mxu1 %v4828_v33 }
  0x2f   : > { %4410 = vmatprep.subr.bf16.mxu1 %v4831_v35 }
  0x30   : > { %563 = vmatmul.mubr.bf16.gmra.mrb[4].mxu0 %v4814_v26 }
  0x31   : > { %572 = vmatprep.mubr.bf16.mxu0 %v4993_v2  ;;  %4371 = vmatpush3.bf16.msra.mxu0 %v4822_v27 }
  0x32   : > { %4372 = vmatprep.subr.bf16.mxu0 %v4825_v30  ;;  %4411 = vmatpush3.bf16.msra.mxu1 %v4832_v38 }
  0x33   : > { %4412 = vmatprep.subr.bf16.mxu1 %v4835_v41 }
  0x35   : > { %4373 = vmatpush3.bf16.msra.mxu0 %v4826_v32 }
  0x36   : > { %4374 = vmatprep.subr.bf16.mxu0 %v4829_v34  ;;  %4413 = vmatpush3.bf16.msra.mxu1 %v4836_v44 }
  0x37   : > { %4414 = vmatprep.subr.bf16.mxu1 %v4839_v46 }
  0x38   : > { %573 = vmatmul.mubr.bf16.gmra.mrb[8].mxu0 %v4815_v28 }
  0x39   : > { %582 = vmatprep.mubr.bf16.mxu0 %v4993_v2  ;;  %4375 = vmatpush3.bf16.msra.mxu0 %v4830_v37  ;;  %v5288_v2 = vrot.slane %v404_v61, %v412_v63 }
  0x3a   : > { %4376 = vmatprep.subr.bf16.mxu0 %v4833_v40  ;;  %4415 = vmatpush3.bf16.msra.mxu1 %v4840_v48 }
  0x3b   : > { %4416 = vmatprep.subr.bf16.mxu1 %v4843_v50 }
  0x3d   : > { %4377 = vmatpush3.bf16.msra.mxu0 %v4834_v43 }
  0x3e   : > { %4378 = vmatprep.subr.bf16.mxu0 %v4837_v45  ;;  %4417 = vmatpush3.bf16.msra.mxu1 %v4844_v52 }
  0x3f   : > { %4418 = vmatprep.subr.bf16.mxu1 %v4846_v54 }
  0x40   : > { %583 = vmatmul.mubr.bf16.gmra.mrb[12].mxu0 %v4816_v29 }
  0x41   : > { %4379 = vmatpush3.bf16.msra.mxu0 %v4838_v47 }
  0x42   : > { %4380 = vmatprep.subr.bf16.mxu0 %v4841_v49  ;;  %4419 = vmatpush3.bf16.msra.mxu1 %v4848_v55 }
  0x43   : > { %4420 = vmatprep.subr.bf16.mxu1 %v4850_v56 }
  0x45   : > { %4381 = vmatpush3.bf16.msra.mxu0 %v4842_v51 }
  0x46   : > { %4446 = vmatprep.subr.bf16.mxu0 %v4845_v53  ;;  %4421 = vmatpush3.bf16.msra.mxu1 %v4852_v57 }
  0x47   : > { %4486 = vmatprep.subr.bf16.mxu1 %v4855_v58 }
  0xfb   : > { %v554_v4 = vpop.f32.mrb[0].mxu0  ;;  %v840_v5 = vpop.f32.mrb[0].mxu1 }
  0xfc   : > { %v555_v6 = vadd.f32 %v554_v4, %v5286_v0  ;;  %v841_v7 = vadd.f32 %v840_v5, %v713_v1  ;;  %v556_v8 = vpop.f32.mrb[1].mxu0  ;;  %v842_v9 = vpop.f32.mrb[1].mxu1 }
  0xfd   : > { %v557_v10 = vadd.f32 %v556_v8, %v5288_v2  ;;  %v843_v11 = vadd.f32 %v842_v9, %v717_v3  ;;  %v558_v12 = vpop.f32.mrb[2].mxu0  ;;  %v844_v13 = vpop.f32.mrb[2].mxu1 }
  0xfe   : > { %v593_v14 = vmax.f32 %v555_v6, 0.0  ;;  %v849_v15 = vmax.f32 %v841_v7, 0.0  ;;  %v559_v16 = vadd.f32 %v558_v12, %v5286_v0  ;;  %v560_v17 = vpop.f32.mrb[3].mxu0  ;;  %v845_v18 = vadd.f32 %v844_v13, %v713_v1  ;;  %v846_v19 = vpop.f32.mrb[3].mxu1  ;;  %v4847_v13 = vld [vmem:[%s6032_s4 + $0x280] sm:$0xff]  }
  0xff   : > { %v594_v20 = vmax.f32 %v557_v10, 0.0  ;;  %v850_v21 = vmax.f32 %v843_v11, 0.0  ;;  %v561_v22 = vadd.f32 %v560_v17, %v5288_v2  ;;  %v847_v23 = vadd.f32 %v846_v19, %v717_v3 }
 0x100   : > { %v625_v24 = vrot.slane %v593_v14, 7  ;;  %v860_v25 = vmul.f32 0.0, %v849_v15  ;;  %v595_v26 = vmax.f32 %v559_v16, 0.0  ;;  %v851_v27 = vmax.f32 %v845_v18, 0.0  ;;  %v4849_v18 = vld [vmem:[%s6032_s4 + $0x2c8] sm:$0xff]  }
 0x101   : > { %v626_v28 = vrot.slane %v594_v20, 7  ;;  %v861_v29 = vmul.f32 0.0, %v850_v21  ;;  %v596_v30 = vmax.f32 %v561_v22, 0.0  ;;  %v852_v31 = vmax.f32 %v847_v23, 0.0 }
 0x102   : > { %658 = vst [vmem:[#allocation2 + $0x20] sm:$0xfe] %v625_v24  ;;  %660 = vst [vmem:[#allocation2 + $0x30] sm:$0x1] %v625_v24  ;;  %v864_v32 = vrot.slane %v860_v25, 7  ;;  %v627_v33 = vrot.slane %v595_v26, 7 }
 0x103   : > { %v873_v34 = vmul.f32 0.0, %v851_v27  ;;  %659 = vst [vmem:[#allocation2 + $0x28] sm:$0xfe] %v626_v28  ;;  %661 = vst [vmem:[#allocation2 + $0x38] sm:$0x1] %v626_v28  ;;  %v865_v35 = vrot.slane %v861_v29, 7 }
 0x104   : > { %v628_v36 = vrot.slane %v596_v30, 7  ;;  %v564_v37 = vpop.f32.mrb[4].mxu0  ;;  %v874_v38 = vmul.f32 0.0, %v852_v31  ;;  %868 = vst [vmem:[#allocation2] sm:$0xfe] %v864_v32  ;;  %v4851_v27 = vld [vmem:[%s6032_s4 + $0x288] sm:$0xff]  }
 0x105   : > { %870 = vst [vmem:[#allocation2 + $0x10] sm:$0x1] %v864_v32  ;;  %662 = vst [vmem:[#allocation2 + $0x40] sm:$0xfe] %v627_v33  ;;  %v565_v39 = vadd.f32 %v564_v37, %v5286_v0  ;;  %v566_v40 = vpop.f32.mrb[5].mxu0  ;;  %v877_v41 = vrot.slane %v873_v34, 7 }
 0x106   : > { %664 = vst [vmem:[#allocation2 + $0x50] sm:$0x1] %v627_v33  ;;  %869 = vst [vmem:[#allocation2 + $0x8] sm:$0xfe] %v865_v35  ;;  %v567_v42 = vadd.f32 %v566_v40, %v5288_v2  ;;  %v568_v43 = vpop.f32.mrb[6].mxu0  ;;  %v878_v44 = vrot.slane %v874_v38, 7 }
 0x107   : > { %871 = vst [vmem:[#allocation2 + $0x18] sm:$0x1] %v865_v35  ;;  %663 = vst [vmem:[#allocation2 + $0x48] sm:$0xfe] %v628_v36  ;;  %v597_v45 = vmax.f32 %v565_v39, 0.0  ;;  %v569_v46 = vadd.f32 %v568_v43, %v5286_v0  ;;  %v570_v47 = vpop.f32.mrb[7].mxu0 }
 0x108   : > { %665 = vst [vmem:[#allocation2 + $0x58] sm:$0x1] %v628_v36  ;;  %882 = vst [vmem:[#allocation2 + $0x120] sm:$0xfe] %v877_v41  ;;  %v598_v48 = vmax.f32 %v567_v42, 0.0  ;;  %v571_v49 = vadd.f32 %v570_v47, %v5288_v2  ;;  %v4853_v39 = vld [vmem:[%s6032_s4 + $0x2d0] sm:$0xff]  }
 0x109   : > { %884 = vst [vmem:[#allocation2 + $0x130] sm:$0x1] %v877_v41  ;;  %883 = vst [vmem:[#allocation2 + $0x128] sm:$0xfe] %v878_v44  ;;  %v629_v50 = vrot.slane %v597_v45, 7  ;;  %v599_v51 = vmax.f32 %v569_v46, 0.0 }
 0x10a   : > { %885 = vst [vmem:[#allocation2 + $0x138] sm:$0x1] %v878_v44  ;;  %v630_v52 = vrot.slane %v598_v48, 7  ;;  %v600_v53 = vmax.f32 %v571_v49, 0.0  ;;  %v5298_v54 = vld [vmem:[#allocation2 + $0x20] sm:$0xff]  ;;  %v5300_v57 = vld [vmem:[#allocation2 + $0x28] sm:$0xff] }
 0x10b   : > { %v1287_v55 = vld [vmem:[#allocation2 + $0x30] sm:$0x3]  ;;  %666 = vst [vmem:[#allocation2 + $0x60] sm:$0xfe] %v629_v50  ;;  %668 = vst [vmem:[#allocation2 + $0x70] sm:$0x1] %v629_v50 }
 0x10c   : > { %v631_v56 = vrot.slane %v599_v51, 7  ;;  %v1288_v58 = vld [vmem:[#allocation2 + $0x38] sm:$0x3]  ;;  %v5303_v59 = vpack.c.bf16 %v1287_v55, %v5298_v54  ;;  %667 = vst [vmem:[#allocation2 + $0x68] sm:$0xfe] %v630_v52  ;;  %v632_v60 = vrot.slane %v600_v53, 7 }
 0x10d   : > { %669 = vst [vmem:[#allocation2 + $0x78] sm:$0x1] %v630_v52  ;;  %v574_v61 = vpop.f32.mrb[8].mxu0  ;;  %v5306_v62 = vpack.c.bf16 %v1288_v58, %v5300_v57  ;;  %v5308_v63 = vld [vmem:[#allocation2 + $0x40] sm:$0xff]  ;;  %v1291_v1 = vld [vmem:[#allocation2 + $0x50] sm:$0x3] }
 0x10e   : > { %670 = vst [vmem:[#allocation2 + $0x80] sm:$0xfe] %v631_v56  ;;  %672 = vst [vmem:[#allocation2 + $0x90] sm:$0x1] %v631_v56  ;;  %v575_v3 = vadd.f32 %v574_v61, %v5286_v0  ;;  %v576_v4 = vpop.f32.mrb[9].mxu0  ;;  %v5311_v5 = vld [vmem:[#allocation2 + $0x48] sm:$0xff]  ;;  %v5314_v7 = vpack.c.bf16 %v1291_v1, %v5308_v63  ;;  %v4319_v8 = vpack.c.bf16 %v5308_v63, %v5298_v54 }
 0x10f   : > { %v1292_v6 = vld [vmem:[#allocation2 + $0x58] sm:$0x3]  ;;  %671 = vst [vmem:[#allocation2 + $0x88] sm:$0xfe] %v632_v60  ;;  %673 = vst [vmem:[#allocation2 + $0x98] sm:$0x1] %v632_v60  ;;  %v577_v9 = vadd.f32 %v576_v4, %v5288_v2  ;;  %v4320_v12 = vpack.c.bf16 %v5311_v5, %v5300_v57 }
 0x110   : > { %v578_v10 = vpop.f32.mrb[10].mxu0  ;;  %v5320_v11 = vpack.c.bf16 %v1292_v6, %v5311_v5  ;;  %v1341_v14 = vshrl.u32 %v5306_v62, 16  ;;  %v601_v15 = vmax.f32 %v575_v3, 0.0  ;;  %v1343_v19 = vshll.u32 %v5306_v62, 16  ;;  %v4854_v1 = vld [vmem:[%s6032_s4 + $0x290] sm:$0xff]  }
 0x111   : > { %v579_v16 = vadd.f32 %v578_v10, %v5286_v0  ;;  %v580_v17 = vpop.f32.mrb[11].mxu0  ;;  %v1336_v20 = vshll.u32 %v5303_v59, 16  ;;  %v602_v21 = vmax.f32 %v577_v9, 0.0  ;;  %1990 = vmatprep.mubr.bf16.mxu0 %v4320_v12  ;;  %v1334_v40 = vshrl.u32 %v5303_v59, 16  ;;  %v4857_v12 = vld [vmem:[%s6032_s4 + $0x2d8] sm:$0xff]  }
 0x112   : > { %v581_v22 = vadd.f32 %v580_v17, %v5288_v2  ;;  %v1355_v23 = vshrl.u32 %v5320_v11, 16  ;;  %v1357_v24 = vshll.u32 %v5320_v11, 16  ;;  %v633_v25 = vrot.slane %v601_v15, 7  ;;  %1991 = vmatmul.mubr.bf16.vlgmr.msra.gmra.mrb[16].mxu0 %v4319_v8  ;;  %v5340_v33 = vld [vmem:[#allocation2 + $0x60] sm:$0xff]  ;;  %v1295_v34 = vld [vmem:[#allocation2 + $0x70] sm:$0x3] }
 0x113   : > { %v603_v26 = vmax.f32 %v579_v16, 0.0  ;;  %v1345_v28 = vrot.slane %v1343_v19, 1  ;;  %v1338_v29 = vrot.slane %v1336_v20, 1  ;;  %v634_v30 = vrot.slane %v602_v21, 7  ;;  %4447 = vmatpush3.bf16.msra.mxu0 %v4847_v13  ;;  %v5342_v36 = vld [vmem:[#allocation2 + $0x68] sm:$0xff]  ;;  %v584_v42 = vpop.f32.mrb[12].mxu0 }
 0x114   : > { %v604_v31 = vmax.f32 %v581_v22, 0.0  ;;  %v1359_v32 = vrot.slane %v1357_v24, 1  ;;  %674 = vst [vmem:[#allocation2 + $0xa0] sm:$0xfe] %v633_v25  ;;  %676 = vst [vmem:[#allocation2 + $0xb0] sm:$0x1] %v633_v25  ;;  %4448 = vmatprep.subr.bf16.mxu0 %v4849_v18  ;;  %v5354_v46 = vpack.c.bf16 %v1295_v34, %v5340_v33  ;;  %v585_v47 = vadd.f32 %v584_v42, %v5286_v0 }
 0x115   : > { %v635_v35 = vrot.slane %v603_v26, 7  ;;  %v1296_v37 = vld [vmem:[#allocation2 + $0x78] sm:$0x3]  ;;  %v1346_v38 = vor.u32 %v1345_v28, %v1341_v14  ;;  %675 = vst [vmem:[#allocation2 + $0xa8] sm:$0xfe] %v634_v30  ;;  %v5351_v45 = vld [vmem:[#allocation2 + $0x80] sm:$0xff]  ;;  %v1339_v51 = vor.u32 %v1338_v29, %v1334_v40 }
 0x116   : > { %677 = vst [vmem:[#allocation2 + $0xb8] sm:$0x1] %v634_v30  ;;  %v636_v41 = vrot.slane %v604_v31, 7  ;;  %v5349_v43 = vpack.c.bf16 %v1296_v37, %v5342_v36  ;;  %v1360_v44 = vor.u32 %v1359_v32, %v1355_v23  ;;  %v586_v48 = vpop.f32.mrb[13].mxu0  ;;  %v5357_v49 = vld [vmem:[#allocation2 + $0x88] sm:$0xff]  ;;  %v1348_v52 = vshrl.u32 %v5314_v7, 16 }
 0x117   : > { %678 = vst [vmem:[#allocation2 + $0xc0] sm:$0xfe] %v635_v35  ;;  %680 = vst [vmem:[#allocation2 + $0xd0] sm:$0x1] %v635_v35  ;;  %v1300_v50 = vld [vmem:[#allocation2 + $0x98] sm:$0x3]  ;;  %v587_v55 = vadd.f32 %v586_v48, %v5288_v2  ;;  %4449 = vmatpush3.bf16.msra.mxu0 %v4851_v27  ;;  %v4322_v60 = vpack.c.bf16 %v5357_v49, %v5342_v36  ;;  %v4321_v9 = vpack.c.bf16 %v5351_v45, %v5340_v33 }
 0x118   : > { %v1350_v53 = vshll.u32 %v5314_v7, 16  ;;  %679 = vst [vmem:[#allocation2 + $0xc8] sm:$0xfe] %v636_v41  ;;  %681 = vst [vmem:[#allocation2 + $0xd8] sm:$0x1] %v636_v41  ;;  %v588_v56 = vpop.f32.mrb[14].mxu0  ;;  %v5363_v58 = vpack.c.bf16 %v1300_v50, %v5357_v49  ;;  %v3995_v61 = vcombine.low %v1346_v38, %v1360_v44  ;;  %4450 = vmatprep.subr.bf16.mxu0 %v4853_v39 }
 0x119   : > { %v605_v3 = vmax.f32 %v585_v47, 0.0  ;;  %v589_v4 = vadd.f32 %v588_v56, %v5286_v0  ;;  %v590_v6 = vpop.f32.mrb[15].mxu0  ;;  %v1299_v8 = vld [vmem:[#allocation2 + $0x90] sm:$0x3]  ;;  %v606_v13 = vmax.f32 %v587_v55, 0.0  ;;  %1998 = vmatprep.mubr.bf16.mxu0 %v4322_v60  ;;  %v4856_v0 = vld [vmem:[%s6032_s4] sm:$0xff]  }
 0x11a   : > { %v1352_v10 = vrot.slane %v1350_v53, 1  ;;  %v591_v14 = vadd.f32 %v590_v6, %v5288_v2  ;;  %2055 = vmatprep.mubr.bf16.mxu1 %v3995_v61  ;;  %v1369_v15 = vshrl.u32 %v5349_v43, 16  ;;  %v1371_v16 = vshll.u32 %v5349_v43, 16  ;;  %1999 = vmatmul.mubr.bf16.gmra.mrb[20].mxu0 %v4321_v9  ;;  %v4858_v20 = vld [vmem:[%s6032_s4 + $0x298] sm:$0xff]   ;;  %v4859_v2 = vld [vmem:[%s6032_s4 + $0x48] sm:$0xff]   ;;  %v4861_v22 = vld [vmem:[%s6032_s4 + $0x2e0] sm:$0xff]  }
 0x11b   : > { %v637_v17 = vrot.slane %v605_v3, 7  ;;  %v607_v18 = vmax.f32 %v589_v4, 0.0  ;;  %v1385_v21 = vshll.u32 %v5363_v58, 16  ;;  %v638_v23 = vrot.slane %v606_v13, 7  ;;  %4451 = vmatpush3.bf16.msra.mxu0 %v4854_v1  ;;  %v5395_v27 = vld [vmem:[#allocation2 + $0xa0] sm:$0xff]  ;;  %v4863_v4 = vld [vmem:[%s6032_s4 + $0x50] sm:$0xff]  }
 0x11c   : > { %v1353_v19 = vor.u32 %v1352_v10, %v1348_v52  ;;  %v608_v24 = vmax.f32 %v591_v14, 0.0  ;;  %v5393_v25 = vpack.c.bf16 %v1299_v8, %v5351_v45  ;;  %v1373_v26 = vrot.slane %v1371_v16, 1  ;;  %v1303_v28 = vld [vmem:[#allocation2 + $0xb0] sm:$0x3]  ;;  %4452 = vmatprep.subr.bf16.mxu0 %v4857_v12  ;;  %v5397_v31 = vld [vmem:[#allocation2 + $0xa8] sm:$0xff]  ;;  %v4862_v60 = vld [vmem:[%s6032_s4 + $0x2a0] sm:$0xff]  }
 0x11d   : > { %682 = vst [vmem:[#allocation2 + $0xe0] sm:$0xfe] %v637_v17  ;;  %684 = vst [vmem:[#allocation2 + $0xf0] sm:$0x1] %v637_v17  ;;  %v639_v29 = vrot.slane %v607_v18, 7  ;;  %v1383_v34 = vshrl.u32 %v5363_v58, 16  ;;  %v5408_v48 = vpack.c.bf16 %v1303_v28, %v5395_v27 }
 0x11e   : > { %v3994_v30 = vcombine.low %v1339_v51, %v1353_v19  ;;  %v1304_v32 = vld [vmem:[#allocation2 + $0xb8] sm:$0x3]  ;;  %v1387_v35 = vrot.slane %v1385_v21, 1  ;;  %683 = vst [vmem:[#allocation2 + $0xe8] sm:$0xfe] %v638_v23  ;;  %v640_v37 = vrot.slane %v608_v24, 7  ;;  %v1374_v44 = vor.u32 %v1373_v26, %v1369_v15 }
 0x11f   : > { %685 = vst [vmem:[#allocation2 + $0xf8] sm:$0x1] %v638_v23  ;;  %v5401_v38 = vpack.c.bf16 %v1304_v32, %v5397_v31  ;;  %v5403_v39 = vld [vmem:[#allocation2 + $0xc0] sm:$0xff]  ;;  %v1307_v40 = vld [vmem:[#allocation2 + $0xd0] sm:$0x3]  ;;  %v5405_v41 = vld [vmem:[#allocation2 + $0xc8] sm:$0xff]  ;;  %4453 = vmatpush3.bf16.msra.mxu0 %v4858_v20 }
 0x120   : > { %686 = vst [vmem:[#allocation2 + $0x100] sm:$0xfe] %v639_v29  ;;  %688 = vst [vmem:[#allocation2 + $0x110] sm:$0x1] %v639_v29  ;;  %2056 = vmatmul.mubr.bf16.vlgmr.msra.gmra.mrb[4].mxu1 %v3994_v30  ;;  %v1308_v42 = vld [vmem:[#allocation2 + $0xd8] sm:$0x3]  ;;  %v1388_v47 = vor.u32 %v1387_v35, %v1383_v34  ;;  %v4324_v53 = vpack.c.bf16 %v5405_v41, %v5397_v31  ;;  %v5420_v55 = vpack.c.bf16 %v1307_v40, %v5403_v39 }
 0x121   : > { %v1364_v50 = vshll.u32 %v5354_v46, 16  ;;  %687 = vst [vmem:[#allocation2 + $0x108] sm:$0xfe] %v640_v37  ;;  %689 = vst [vmem:[#allocation2 + $0x118] sm:$0x1] %v640_v37  ;;  %4487 = vmatpush3.bf16.msra.mxu1 %v4856_v0  ;;  %v4860_v51 = vld [vmem:[%s6032_s4 + $0x8] sm:$0xff]   ;;  %v5415_v52 = vpack.c.bf16 %v1308_v42, %v5405_v41  ;;  %4454 = vmatprep.subr.bf16.mxu0 %v4861_v22  ;;  %v4323_v1 = vpack.c.bf16 %v5403_v39, %v5395_v27 }
 0x122   : > { %v1378_v56 = vshll.u32 %v5393_v25, 16  ;;  %4488 = vmatprep.subr.bf16.mxu1 %v4859_v2  ;;  %v4001_v61 = vcombine.low %v1374_v44, %v1388_v47  ;;  %v4865_v6 = vld [vmem:[%s6032_s4 + $0x2e8] sm:$0xff]   ;;  %v1399_v8 = vshll.u32 %v5401_v38, 16  ;;  %2006 = vmatprep.mubr.bf16.mxu0 %v4324_v53  ;;  %v1362_v9 = vshrl.u32 %v5354_v46, 16  ;;  %v4864_v14 = vld [vmem:[%s6032_s4 + $0x10] sm:$0xff]   ;;  %v4867_v34 = vld [vmem:[%s6032_s4 + $0x58] sm:$0xff]  }
 0x123   : > { %v1366_v3 = vrot.slane %v1364_v50, 1  ;;  %v1376_v10 = vshrl.u32 %v5393_v25, 16  ;;  %v1413_v13 = vshll.u32 %v5415_v52, 16  ;;  %2007 = vmatmul.mubr.bf16.gmra.mrb[24].mxu0 %v4323_v1  ;;  %v1397_v0 = vshrl.u32 %v5401_v38, 16  ;;  %v4866_v20 = vld [vmem:[%s6032_s4 + $0x2a8] sm:$0xff]   ;;  %v4869_v29 = vld [vmem:[%s6032_s4 + $0x2f0] sm:$0xff]  }
 0x124   : > { %v1380_v12 = vrot.slane %v1378_v56, 1  ;;  %2063 = vmatprep.mubr.bf16.mxu1 %v4001_v61  ;;  %v1401_v15 = vrot.slane %v1399_v8, 1  ;;  %v1411_v16 = vshrl.u32 %v5415_v52, 16  ;;  %v1392_v17 = vshll.u32 %v5408_v48, 16  ;;  %4455 = vmatpush3.bf16.msra.mxu0 %v4862_v60  ;;  %v5447_v21 = vld [vmem:[#allocation2 + $0xe0] sm:$0xff] }
 0x125   : > { %4489 = vmatpush3.bf16.msra.mxu1 %v4860_v51  ;;  %v1367_v18 = vor.u32 %v1366_v3, %v1362_v9  ;;  %v1415_v2 = vrot.slane %v1413_v13, 1  ;;  %v1311_v22 = vld [vmem:[#allocation2 + $0xf0] sm:$0x3]  ;;  %v1406_v23 = vshll.u32 %v5420_v55, 16  ;;  %4456 = vmatprep.subr.bf16.mxu0 %v4865_v6  ;;  %v5450_v24 = vld [vmem:[#allocation2 + $0xe8] sm:$0xff]  ;;  %v1464_v30 = vrot.slane %v5320_v11, 1 }
 0x126   : > { %v1381_v19 = vor.u32 %v1380_v12, %v1376_v10  ;;  %4490 = vmatprep.subr.bf16.mxu1 %v4863_v4  ;;  %v1312_v26 = vld [vmem:[#allocation2 + $0xf8] sm:$0x3]  ;;  %v1402_v28 = vor.u32 %v1401_v15, %v1397_v0  ;;  %v5463_v51 = vpack.c.bf16 %v1311_v22, %v5447_v21  ;;  %v1394_v11 = vrot.slane %v1392_v17, 1  ;;  %v4870_v3 = vld [vmem:[%s6032_s4 + $0x2b0] sm:$0xff]  }
 0x127   : > { %v5460_v35 = vpack.c.bf16 %v1312_v26, %v5450_v24  ;;  %v1416_v37 = vor.u32 %v1415_v2, %v1411_v16  ;;  %v1313_v40 = vld [vmem:[#allocation2 + $0x100] sm:$0xff]  ;;  %v1315_v42 = vld [vmem:[#allocation2 + $0x110] sm:$0x3]  ;;  %v1408_v44 = vrot.slane %v1406_v23, 1  ;;  %v1404_v56 = vshrl.u32 %v5420_v55, 16  ;;  %v4868_v6 = vld [vmem:[%s6032_s4 + $0x18] sm:$0xff]  }
 0x128   : > { %v4000_v32 = vcombine.low %v1367_v18, %v1381_v19  ;;  %v1314_v47 = vld [vmem:[#allocation2 + $0x108] sm:$0xff]  ;;  %v1316_v50 = vld [vmem:[#allocation2 + $0x118] sm:$0x3]  ;;  %v5465_v53 = vpack.c.bf16 %v1315_v42, %v1313_v40  ;;  %4457 = vmatpush3.bf16.msra.mxu0 %v4866_v20  ;;  %v1462_v4 = vrot.slane %v5306_v62, 1  ;;  %v4325_v8 = vpack.c.bf16 %v1313_v40, %v5447_v21  ;;  %v4871_v62 = vld [vmem:[%s6032_s4 + $0x60] sm:$0xff]  }
 0x129   : > { %v5468_v60 = vpack.c.bf16 %v1316_v50, %v1314_v47  ;;  %v4326_v61 = vpack.c.bf16 %v1314_v47, %v5450_v24  ;;  %v4007_v1 = vcombine.low %v1402_v28, %v1416_v37  ;;  %4491 = vmatpush3.bf16.msra.mxu1 %v4864_v14  ;;  %4458 = vmatprep.subr.bf16.mxu0 %v4869_v29  ;;  %v1390_v9 = vshrl.u32 %v5408_v48, 16  ;;  %v4873_v12 = vld [vmem:[%s6032_s4 + $0x2f8] sm:$0xff]   ;;  %v4872_v26 = vld [vmem:[%s6032_s4 + $0x20] sm:$0xff]  }
 0x12a   : > { %2064 = vmatmul.mubr.bf16.gmra.mrb[8].mxu1 %v4000_v32  ;;  %v1409_v10 = vor.u32 %v1408_v44, %v1404_v56  ;;  %v1427_v13 = vshll.u32 %v5460_v35, 16  ;;  %4492 = vmatprep.subr.bf16.mxu1 %v4867_v34  ;;  %v3997_v14 = vcombine.low %v1462_v4, %v1464_v30  ;;  %v1434_v15 = vshll.u32 %v5465_v53, 16  ;;  %v4874_v18 = vld [vmem:[%s6032_s4 + $0x2b8] sm:$0xff]   ;;  %v4877_v28 = vld [vmem:[%s6032_s4 + $0xc0] sm:$0xff]   ;;  %v4875_v30 = vld [vmem:[%s6032_s4 + $0x68] sm:$0xff]  }
 0x12b   : > { %2014 = vmatprep.mubr.bf16.mxu0 %v4326_v61  ;;  %v1441_v0 = vshll.u32 %v5468_v60, 16  ;;  %2071 = vmatprep.mubr.bf16.mxu1 %v4007_v1  ;;  %v1395_v16 = vor.u32 %v1394_v11, %v1390_v9  ;;  %v1425_v19 = vshrl.u32 %v5460_v35, 16  ;;  %v1439_v20 = vshrl.u32 %v5468_v60, 16  ;;  %v4876_v56 = vld [vmem:[%s6032_s4 + $0x28] sm:$0xff]   ;;  %v4880_v9 = vld [vmem:[%s6032_s4 + $0x30] sm:$0xff]  }
 0x12c   : > { %2015 = vmatmul.mubr.bf16.gmra.mrb[28].mxu0 %v4325_v8  ;;  %v1429_v17 = vrot.slane %v1427_v13, 1  ;;  %v1420_v22 = vshll.u32 %v5463_v51, 16  ;;  %v1463_v29 = vrot.slane %v5314_v7, 1  ;;  %v1436_v37 = vrot.slane %v1434_v15, 1  ;;  %v4879_v7 = vld [vmem:[%s6032_s4 + $0x80] sm:$0xff]   ;;  %v4883_v8 = vld [vmem:[%s6032_s4 + $0x88] sm:$0xff]  }
 0x12d   : > { %4459 = vmatpush3.bf16.msra.mxu0 %v4870_v3  ;;  %2120 = vmatprep.mubr.bf16.mxu0 %v3997_v14  ;;  %v1443_v2 = vrot.slane %v1441_v0, 1  ;;  %v4006_v23 = vcombine.low %v1395_v16, %v1409_v10  ;;  %v1468_v40 = vrot.slane %v5363_v58, 1  ;;  %v1461_v42 = vrot.slane %v5303_v59, 1  ;;  %v4881_v59 = vld [vmem:[%s6032_s4 + $0xc8] sm:$0xff]   ;;  %v4882_v13 = vld [vmem:[%s6032_s4 + $0x78] sm:$0xff]  }
 0x12e   : > { %4493 = vmatpush3.bf16.msra.mxu1 %v4868_v6  ;;  %4460 = vmatprep.subr.bf16.mxu0 %v4873_v12  ;;  %v1430_v32 = vor.u32 %v1429_v17, %v1425_v19  ;;  %v1422_v47 = vrot.slane %v1420_v22, 1  ;;  %v1432_v50 = vshrl.u32 %v5465_v53, 16  ;;  %v1466_v11 = vrot.slane %v5349_v43, 1  ;;  %v4878_v43 = vld [vmem:[%s6032_s4 + $0x70] sm:$0xff]   ;;  %v950_v6 = vld [vmem:[#allocation2 + $0x8] sm:$0xff]  ;;  %v949_v22 = vld [vmem:[#allocation2] sm:$0xff] }
 0x12f   : > { %4494 = vmatprep.subr.bf16.mxu1 %v4871_v62  ;;  %v1444_v34 = vor.u32 %v1443_v2, %v1439_v20  ;;  %v3996_v58 = vcombine.low %v1461_v42, %v1463_v29  ;;  %v1418_v61 = vshrl.u32 %v5463_v51, 16  ;;  %v1467_v10 = vrot.slane %v5393_v25, 1  ;;  %v4885_v62 = vld [vmem:[%s6032_s4 + $0xd0] sm:$0xff]   ;;  %v952_v0 = vld [vmem:[#allocation2 + $0x18] sm:$0x3] }
 0x130   : > { %v1437_v1 = vor.u32 %v1436_v37, %v1432_v50  ;;  %v4003_v3 = vcombine.low %v1466_v11, %v1468_v40  ;;  %v1472_v14 = vrot.slane %v5415_v52, 1  ;;  %v4328_v15 = vpack.c.bf16 %v5300_v57, %v950_v6  ;;  %v4886_v25 = vld [vmem:[%s6032_s4 + $0x90] sm:$0xff]   ;;  %v4884_v52 = vld [vmem:[%s6032_s4 + $0x38] sm:$0xff]   ;;  %v4894_v50 = vld [vmem:[%s6032_s4 + $0xa0] sm:$0xff]  }
 0x131   : > { %4461 = vmatpush3.bf16.msra.mxu0 %v4874_v18  ;;  %v4013_v44 = vcombine.low %v1430_v32, %v1444_v34  ;;  %v1423_v4 = vor.u32 %v1422_v47, %v1418_v61  ;;  %v1465_v16 = vrot.slane %v5354_v46, 1  ;;  %v1470_v17 = vrot.slane %v5401_v38, 1  ;;  %v956_v18 = vld [vmem:[#allocation2 + $0x38] sm:$0x3]  ;;  %v4887_v38 = vld [vmem:[%s6032_s4 + $0x140] sm:$0xff]  }
 0x132   : > { %2072 = vmatmul.mubr.bf16.gmra.mrb[12].mxu1 %v4006_v23  ;;  %4526 = vmatprep.subr.bf16.mxu0 %v4877_v28  ;;  %v4889_v46 = vld [vmem:[%s6032_s4 + $0xd8] sm:$0xff]   ;;  %v5548_v20 = vpack.c.bf16 %v952_v0, %v950_v6  ;;  %v5554_v23 = vpack.c.bf16 %v956_v18, %v5300_v57  ;;  %v4888_v28 = vld [vmem:[%s6032_s4 + $0x100] sm:$0xff]   ;;  %v1471_v29 = vrot.slane %v5420_v55, 1  ;;  %v4327_v32 = vpack.c.bf16 %v5298_v54, %v949_v22  ;;  %v4891_v57 = vld [vmem:[%s6032_s4 + $0x148] sm:$0xff]  }
 0x133   : > { %4495 = vmatpush3.bf16.msra.mxu1 %v4872_v26  ;;  %2079 = vmatprep.mubr.bf16.mxu1 %v4013_v44  ;;  %v4012_v12 = vcombine.low %v1423_v4, %v1437_v1  ;;  %v4002_v19 = vcombine.low %v1465_v16, %v1467_v10  ;;  %v4009_v2 = vcombine.low %v1470_v17, %v1472_v14  ;;  %v4890_v26 = vld [vmem:[%s6032_s4 + $0x98] sm:$0xff]   ;;  %v4893_v34 = vld [vmem:[%s6032_s4 + $0xe0] sm:$0xff]   ;;  %v1476_v37 = vrot.slane %v5468_v60, 1  ;;  %v955_v47 = vld [vmem:[#allocation2 + $0x30] sm:$0x3] }
 0x134   : > { %4496 = vmatprep.subr.bf16.mxu1 %v4875_v30  ;;  %2121 = vmatmul.mubr.bf16.vlgmr.msra.gmra.mrb[32].mxu0 %v3996_v58  ;;  %v951_v30 = vld [vmem:[#allocation2 + $0x10] sm:$0x3]  ;;  %v1007_v40 = vshll.u32 %v5548_v20, 16  ;;  %v964_v42 = vld [vmem:[#allocation2 + $0x78] sm:$0x3]  ;;  %v4330_v55 = vpack.c.bf16 %v5342_v36, %v5311_v5  ;;  %v1469_v44 = vrot.slane %v5408_v48, 1  ;;  %v5596_v4 = vpack.c.bf16 %v955_v47, %v5298_v54 }
 0x135   : > { %4527 = vmatpush3.bf16.msra.mxu0 %v4879_v7  ;;  %2128 = vmatprep.mubr.bf16.mxu0 %v4003_v3  ;;  %v1474_v7 = vrot.slane %v5460_v35, 1  ;;  %v1021_v11 = vshll.u32 %v5554_v23, 16  ;;  %v5580_v60 = vpack.c.bf16 %v951_v30, %v949_v22  ;;  %v4892_v48 = vld [vmem:[%s6032_s4 + $0x108] sm:$0xff]   ;;  %v5589_v61 = vpack.c.bf16 %v964_v42, %v5342_v36  ;;  %v4895_v35 = vld [vmem:[%s6032_s4 + $0x150] sm:$0xff]  }
 0x136   : > { %4528 = vmatprep.subr.bf16.mxu0 %v4881_v59  ;;  %v4008_v58 = vcombine.low %v1469_v44, %v1471_v29  ;;  %v4897_v59 = vld [vmem:[%s6032_s4 + $0xe8] sm:$0xff]   ;;  %v1009_v3 = vrot.slane %v1007_v40, 1  ;;  %v1475_v54 = vrot.slane %v5465_v53, 1  ;;  %v1019_v0 = vshrl.u32 %v5554_v23, 16  ;;  %v959_v18 = vld [vmem:[#allocation2 + $0x50] sm:$0x3] }
 0x137   : > { %4497 = vmatpush3.bf16.msra.mxu1 %v4876_v56  ;;  %v960_v56 = vld [vmem:[#allocation2 + $0x58] sm:$0x3]  ;;  %v4015_v1 = vcombine.low %v1474_v7, %v1476_v37  ;;  %v4898_v36 = vld [vmem:[%s6032_s4 + $0xa8] sm:$0xff]   ;;  %v1000_v10 = vshll.u32 %v5580_v60, 16  ;;  %v1049_v53 = vshll.u32 %v5589_v61, 16  ;;  %v4332_v16 = vpack.c.bf16 %v5397_v31, %v5357_v49 }
 0x138   : > { %4498 = vmatprep.subr.bf16.mxu1 %v4878_v43  ;;  %v1005_v43 = vshrl.u32 %v5548_v20, 16  ;;  %v5599_v6 = vpack.c.bf16 %v960_v56, %v5311_v5  ;;  %v4329_v5 = vpack.c.bf16 %v5340_v33, %v5308_v63  ;;  %v1014_v17 = vshll.u32 %v5596_v4, 16  ;;  %v4909_v56 = vld [vmem:[%s6032_s4 + $0x340] sm:$0xff]  }
 0x139   : > { %4529 = vmatpush3.bf16.msra.mxu0 %v4883_v8  ;;  %v1023_v8 = vrot.slane %v1021_v11, 1  ;;  %v1002_v29 = vrot.slane %v1000_v10, 1  ;;  %v1012_v47 = vshrl.u32 %v5596_v4, 16  ;;  %v4331_v7 = vpack.c.bf16 %v5395_v27, %v5351_v45  ;;  %v4907_v11 = vld [vmem:[%s6032_s4 + $0x168] sm:$0xff]  }
 0x13a   : > { %2080 = vmatmul.mubr.bf16.gmra.mrb[16].mxu1 %v4012_v12  ;;  %4530 = vmatprep.subr.bf16.mxu0 %v4885_v62  ;;  %v963_v12 = vld [vmem:[#allocation2 + $0x70] sm:$0x3]  ;;  %v1010_v14 = vor.u32 %v1009_v3, %v1005_v43  ;;  %v1016_v37 = vrot.slane %v1014_v17, 1 }
 0x13b   : > { %4499 = vmatpush3.bf16.msra.mxu1 %v4880_v9  ;;  %2521 = vmatprep.mubr.bf16.mxu1 %v4328_v15  ;;  %v4896_v9 = vld [vmem:[%s6032_s4 + $0x110] sm:$0xff]   ;;  %v972_v15 = vld [vmem:[#allocation2 + $0xb8] sm:$0x3] }
 0x13c   : > { %4500 = vmatprep.subr.bf16.mxu1 %v4882_v13  ;;  %2129 = vmatmul.mubr.bf16.gmra.mrb[36].mxu0 %v4002_v19  ;;  %v4899_v13 = vld [vmem:[%s6032_s4 + $0x158] sm:$0xff]   ;;  %v4901_v62 = vld [vmem:[%s6032_s4 + $0xf0] sm:$0xff]   ;;  %v1024_v19 = vor.u32 %v1023_v8, %v1019_v0  ;;  %v5638_v30 = vpack.c.bf16 %v972_v15, %v5397_v31  ;;  %v1017_v43 = vor.u32 %v1016_v37, %v1012_v47  ;;  %v4911_v8 = vld [vmem:[%s6032_s4 + $0x300] sm:$0xff]  }
 0x13d   : > { %4531 = vmatpush3.bf16.msra.mxu0 %v4886_v25  ;;  %2136 = vmatprep.mubr.bf16.mxu0 %v4009_v2  ;;  %v1473_v25 = vrot.slane %v5463_v51, 1  ;;  %v968_v2 = vld [vmem:[#allocation2 + $0x98] sm:$0x3] }
 0x13e   : > { %4532 = vmatprep.subr.bf16.mxu0 %v4889_v46  ;;  %v1035_v46 = vshll.u32 %v5599_v6, 16  ;;  %v4900_v51 = vld [vmem:[%s6032_s4 + $0x118] sm:$0xff]   ;;  %v5647_v40 = vpack.c.bf16 %v968_v2, %v5357_v49 }
 0x13f   : > { %4501 = vmatpush3.bf16.msra.mxu1 %v4884_v52  ;;  %v4902_v52 = vld [vmem:[%s6032_s4 + $0xb0] sm:$0xff]   ;;  %v4014_v22 = vcombine.low %v1473_v25, %v1475_v54  ;;  %v4906_v31 = vld [vmem:[%s6032_s4 + $0xb8] sm:$0xff]   ;;  %v1126_v25 = vrot.slane %v5548_v20, 1  ;;  %v1128_v20 = vrot.slane %v5554_v23, 1 }
 0x140   : > { %4566 = vmatprep.subr.bf16.mxu1 %v4887_v38  ;;  %v5628_v38 = vpack.c.bf16 %v963_v12, %v5340_v33  ;;  %v4903_v33 = vld [vmem:[%s6032_s4 + $0x160] sm:$0xff]   ;;  %v1037_v42 = vrot.slane %v1035_v46, 1  ;;  %v1063_v54 = vshll.u32 %v5647_v40, 16  ;;  %v976_v12 = vld [vmem:[#allocation2 + $0xd8] sm:$0x3]  ;;  %v1075_v46 = vshrl.u32 %v5638_v30, 16 }
 0x141   : > { %4533 = vmatpush3.bf16.msra.mxu0 %v4890_v26  ;;  %v4905_v26 = vld [vmem:[%s6032_s4 + $0xf8] sm:$0xff]   ;;  %v1061_v23 = vshrl.u32 %v5647_v40, 16 }
 0x142   : > { %2522 = vmatmul.mubr.bf16.vlgmr.msra.gmra.mrb[20].mxu1 %v4327_v32  ;;  %4534 = vmatprep.subr.bf16.mxu0 %v4893_v34  ;;  %v4067_v32 = vcombine.low %v1010_v14, %v1024_v19  ;;  %v5644_v34 = vpack.c.bf16 %v959_v18, %v5308_v63  ;;  %v4904_v63 = vld [vmem:[%s6032_s4 + $0x120] sm:$0xff]   ;;  %v1042_v49 = vshll.u32 %v5628_v38, 16  ;;  %v1040_v18 = vshrl.u32 %v5628_v38, 16 }
 0x143   : > { %2529 = vmatprep.mubr.bf16.mxu1 %v4330_v55  ;;  %4567 = vmatpush3.bf16.msra.mxu1 %v4888_v28  ;;  %v998_v28 = vshrl.u32 %v5580_v60, 16  ;;  %v1047_v55 = vshrl.u32 %v5589_v61, 16  ;;  %v1065_v19 = vrot.slane %v1063_v54, 1 }
 0x144   : > { %4568 = vmatprep.subr.bf16.mxu1 %v4891_v57  ;;  %2137 = vmatmul.mubr.bf16.gmra.mrb[40].mxu0 %v4008_v58  ;;  %v1051_v57 = vrot.slane %v1049_v53, 1  ;;  %v1028_v3 = vshll.u32 %v5644_v34, 16  ;;  %v1044_v14 = vrot.slane %v1042_v49, 1  ;;  %v4916_v49 = vld [vmem:[%s6032_s4 + $0x138] sm:$0xff]  }
 0x145   : > { %4535 = vmatpush3.bf16.msra.mxu0 %v4894_v50  ;;  %2144 = vmatprep.mubr.bf16.mxu0 %v4015_v1  ;;  %v1003_v44 = vor.u32 %v1002_v29, %v998_v28  ;;  %v971_v50 = vld [vmem:[#allocation2 + $0xb0] sm:$0x3]  ;;  %v4334_v1 = vpack.c.bf16 %v5450_v24, %v5405_v41  ;;  %v4914_v28 = vld [vmem:[%s6032_s4 + $0x178] sm:$0xff]  }
 0x146   : > { %4536 = vmatprep.subr.bf16.mxu0 %v4897_v59  ;;  %v1052_v58 = vor.u32 %v1051_v57, %v1047_v55  ;;  %v1077_v59 = vshll.u32 %v5638_v30, 16  ;;  %v5676_v10 = vpack.c.bf16 %v971_v50, %v5395_v27  ;;  %v4910_v27 = vld [vmem:[%s6032_s4 + $0x170] sm:$0xff]   ;;  %v1030_v17 = vrot.slane %v1028_v3, 1 }
 0x147   : > { %4569 = vmatpush3.bf16.msra.mxu1 %v4892_v48  ;;  %v1033_v48 = vshrl.u32 %v5599_v6, 16  ;;  %v1045_v2 = vor.u32 %v1044_v14, %v1040_v18  ;;  %v4917_v29 = vld [vmem:[%s6032_s4 + $0x350] sm:$0xff]   ;;  %v4069_v57 = vcombine.low %v1126_v25, %v1128_v20  ;;  %v1127_v3 = vrot.slane %v5596_v4, 1 }
 0x148   : > { %4570 = vmatprep.subr.bf16.mxu1 %v4895_v35  ;;  %v980_v35 = vld [vmem:[#allocation2 + $0xf8] sm:$0x3]  ;;  %v1079_v15 = vrot.slane %v1077_v59, 1  ;;  %v4918_v55 = vld [vmem:[%s6032_s4 + $0x310] sm:$0xff]  }
 0x149   : > { %4537 = vmatpush3.bf16.msra.mxu0 %v4898_v36  ;;  %v967_v36 = vld [vmem:[#allocation2 + $0x90] sm:$0x3]  ;;  %v5685_v0 = vpack.c.bf16 %v980_v35, %v5450_v24  ;;  %v5696_v24 = vpack.c.bf16 %v976_v12, %v5405_v41  ;;  %v1026_v41 = vshrl.u32 %v5644_v34, 16  ;;  %v1132_v35 = vrot.slane %v5589_v61, 1  ;;  %v4920_v61 = vld [vmem:[%s6032_s4 + $0x380] sm:$0xff]  }
 0x14a   : > { %2530 = vmatmul.mubr.bf16.gmra.mrb[24].mxu1 %v4329_v5  ;;  %4538 = vmatprep.subr.bf16.mxu0 %v4901_v62  ;;  %v4908_v5 = vld [vmem:[%s6032_s4 + $0x128] sm:$0xff]  }
 0x14b   : > { %2537 = vmatprep.mubr.bf16.mxu1 %v4332_v16  ;;  %4571 = vmatpush3.bf16.msra.mxu1 %v4896_v9  ;;  %v1038_v9 = vor.u32 %v1037_v42, %v1033_v48  ;;  %v4913_v62 = vld [vmem:[%s6032_s4 + $0x348] sm:$0xff]   ;;  %v5691_v16 = vpack.c.bf16 %v967_v36, %v5351_v45  ;;  %v4912_v45 = vld [vmem:[%s6032_s4 + $0x130] sm:$0xff]   ;;  %v1031_v37 = vor.u32 %v1030_v17, %v1026_v41  ;;  %v1136_v41 = vrot.slane %v5638_v30, 1 }
 0x14c   : > { %4572 = vmatprep.subr.bf16.mxu1 %v4899_v13  ;;  %2145 = vmatmul.mubr.bf16.gmra.mrb[44].mxu0 %v4014_v22  ;;  %v4066_v13 = vcombine.low %v1003_v44, %v1017_v43  ;;  %v979_v22 = vld [vmem:[#allocation2 + $0xf0] sm:$0x3]  ;;  %v1091_v44 = vshll.u32 %v5696_v24, 16  ;;  %v1068_v43 = vshrl.u32 %v5676_v10, 16  ;;  %v4924_v17 = vld [vmem:[%s6032_s4 + $0x388] sm:$0xff]  }
 0x14d   : > { %4539 = vmatpush3.bf16.msra.mxu0 %v4902_v52  ;;  %2586 = vmatprep.mubr.bf16.mxu0 %v4067_v32  ;;  %v4073_v53 = vcombine.low %v1038_v9, %v1052_v58  ;;  %v4915_v52 = vld [vmem:[%s6032_s4 + $0x308] sm:$0xff]   ;;  %v1105_v32 = vshll.u32 %v5685_v0, 16  ;;  %v975_v42 = vld [vmem:[#allocation2 + $0xd0] sm:$0x3]  ;;  %v5724_v47 = vpack.c.bf16 %v979_v22, %v5447_v21  ;;  %v4072_v50 = vcombine.low %v1031_v37, %v1045_v2 }
 0x14e   : > { %4540 = vmatprep.subr.bf16.mxu0 %v4905_v26  ;;  %v4333_v26 = vpack.c.bf16 %v5447_v21, %v5403_v39  ;;  %v4919_v21 = vld [vmem:[%s6032_s4 + $0x3c0] sm:$0xff]   ;;  %v5737_v59 = vpack.c.bf16 %v975_v42, %v5403_v39  ;;  %v1093_v36 = vrot.slane %v1091_v44, 1  ;;  %v1130_v39 = vrot.slane %v5599_v6, 1  ;;  %v4928_v30 = vld [vmem:[%s6032_s4 + $0x390] sm:$0xff]   ;;  %v2686_v37 = vld [vmem:[#allocation2 + $0x48] sm:$0xff] }
 0x14f   : > { %4573 = vmatpush3.bf16.msra.mxu1 %v4900_v51  ;;  %v1070_v51 = vshll.u32 %v5676_v10, 16  ;;  %v1107_v58 = vrot.slane %v1105_v32, 1  ;;  %v1054_v9 = vshrl.u32 %v5691_v16, 16  ;;  %v1098_v54 = vshll.u32 %v5724_v47, 16  ;;  %v4925_v6 = vld [vmem:[%s6032_s4 + $0x360] sm:$0xff]   ;;  %v4932_v44 = vld [vmem:[%s6032_s4 + $0x398] sm:$0xff]  }
 0x150   : > { %4574 = vmatprep.subr.bf16.mxu1 %v4903_v33  ;;  %v1080_v33 = vor.u32 %v1079_v15, %v1075_v46  ;;  %v4075_v14 = vcombine.low %v1130_v39, %v1132_v35  ;;  %v4926_v15 = vld [vmem:[%s6032_s4 + $0x320] sm:$0xff]   ;;  %v1131_v46 = vrot.slane %v5628_v38, 1  ;;  %v1129_v22 = vrot.slane %v5644_v34, 1  ;;  %v2690_v38 = vld [vmem:[#allocation2 + $0x68] sm:$0xff]  ;;  %v4931_v34 = vld [vmem:[%s6032_s4 + $0x3d8] sm:$0xff]  }
 0x151   : > { %4541 = vmatpush3.bf16.msra.mxu0 %v4906_v31  ;;  %v1056_v31 = vshll.u32 %v5691_v16, 16  ;;  %v2689_v35 = vld [vmem:[#allocation2 + $0x60] sm:$0xff] }
 0x152   : > { %2538 = vmatmul.mubr.bf16.gmra.mrb[28].mxu1 %v4331_v7  ;;  %4606 = vmatprep.subr.bf16.mxu0 %v4909_v56  ;;  %v4921_v7 = vld [vmem:[%s6032_s4 + $0x358] sm:$0xff]   ;;  %v1125_v56 = vrot.slane %v5580_v60, 1  ;;  %v4074_v32 = vcombine.low %v1129_v22, %v1131_v46  ;;  %v2685_v39 = vld [vmem:[#allocation2 + $0x40] sm:$0xff]  ;;  %v2699_v22 = vld [vmem:[#allocation2 + $0xb0] sm:$0x3] }
 0x153   : > { %2545 = vmatprep.mubr.bf16.mxu1 %v4334_v1  ;;  %4575 = vmatpush3.bf16.msra.mxu1 %v4904_v63  ;;  %v1066_v63 = vor.u32 %v1065_v19, %v1061_v23  ;;  %v1058_v1 = vrot.slane %v1056_v31, 1  ;;  %v4922_v60 = vld [vmem:[%s6032_s4 + $0x318] sm:$0xff]   ;;  %v1100_v19 = vrot.slane %v1098_v54, 1  ;;  %v1082_v23 = vshrl.u32 %v5737_v59, 16 }
 0x154   : > { %4576 = vmatprep.subr.bf16.mxu1 %v4907_v11  ;;  %2587 = vmatmul.mubr.bf16.vlgmr.msra.gmra.mrb[48].mxu0 %v4066_v13  ;;  %v1072_v11 = vrot.slane %v1070_v51, 1  ;;  %v4068_v12 = vcombine.low %v1125_v56, %v1127_v3  ;;  %v1089_v13 = vshrl.u32 %v5696_v24, 16  ;;  %v1096_v51 = vshrl.u32 %v5724_v47, 16  ;;  %v4935_v56 = vld [vmem:[%s6032_s4 + $0x3e0] sm:$0xff]  }
 0x155   : > { %4607 = vmatpush3.bf16.msra.mxu0 %v4911_v8  ;;  %2594 = vmatprep.mubr.bf16.mxu0 %v4073_v53  ;;  %v4079_v48 = vcombine.low %v1066_v63, %v1080_v33  ;;  %v1103_v8 = vshrl.u32 %v5685_v0, 16  ;;  %v1084_v53 = vshll.u32 %v5737_v59, 16  ;;  %v4934_v63 = vld [vmem:[%s6032_s4 + $0x330] sm:$0xff]   ;;  %v1133_v3 = vrot.slane %v5691_v16, 1 }
 0x156   : > { %4608 = vmatprep.subr.bf16.mxu0 %v4913_v62  ;;  %v1073_v4 = vor.u32 %v1072_v11, %v1068_v43  ;;  %v1094_v25 = vor.u32 %v1093_v36, %v1089_v13  ;;  %v1101_v33 = vor.u32 %v1100_v19, %v1096_v51  ;;  %v1135_v11 = vrot.slane %v5676_v10, 1  ;;  %v4938_v10 = vld [vmem:[%s6032_s4 + $0x338] sm:$0xff]   ;;  %v4942_v19 = vld [vmem:[%s6032_s4 + $0x3f0] sm:$0xff]   ;;  %v2697_v51 = vld [vmem:[#allocation2 + $0xa0] sm:$0xff] }
 0x157   : > { %4577 = vmatpush3.bf16.msra.mxu1 %v4908_v5  ;;  %v4923_v5 = vld [vmem:[%s6032_s4 + $0x3c8] sm:$0xff]   ;;  %v1108_v62 = vor.u32 %v1107_v58, %v1103_v8  ;;  %v1086_v2 = vrot.slane %v1084_v53, 1  ;;  %v4936_v58 = vld [vmem:[%s6032_s4 + $0x3a0] sm:$0xff]   ;;  %v2700_v36 = vld [vmem:[#allocation2 + $0xb8] sm:$0x3]  ;;  %v4335_v53 = vpack.c.bf16 %v2689_v35, %v2685_v39 }
 0x158   : > { %4578 = vmatprep.subr.bf16.mxu1 %v4910_v27  ;;  %v1059_v27 = vor.u32 %v1058_v1, %v1054_v9  ;;  %v2691_v1 = vld [vmem:[#allocation2 + $0x70] sm:$0x3]  ;;  %v4939_v8 = vld [vmem:[%s6032_s4 + $0x3e8] sm:$0xff]   ;;  %v4080_v9 = vcombine.low %v1133_v3, %v1135_v11 }
 0x159   : > { %4609 = vmatpush3.bf16.msra.mxu0 %v4915_v52  ;;  %v4929_v52 = vld [vmem:[%s6032_s4 + $0x368] sm:$0xff]   ;;  %v4085_v20 = vcombine.low %v1094_v25, %v1108_v62  ;;  %v1087_v42 = vor.u32 %v1086_v2, %v1082_v23  ;;  %v5824_v54 = vpack.c.bf16 %v2691_v1, %v2689_v35  ;;  %v4946_v23 = vld [vmem:[%s6032_s4 + $0x3f8] sm:$0xff]  }
 0x15a   : > { %2546 = vmatmul.mubr.bf16.gmra.mrb[32].mxu1 %v4333_v26  ;;  %4610 = vmatprep.subr.bf16.mxu0 %v4917_v29  ;;  %v4078_v18 = vcombine.low %v1059_v27, %v1073_v4  ;;  %v4930_v26 = vld [vmem:[%s6032_s4 + $0x328] sm:$0xff]   ;;  %v1134_v29 = vrot.slane %v5647_v40, 1  ;;  %v2688_v40 = vld [vmem:[#allocation2 + $0x58] sm:$0x3]  ;;  %v4941_v4 = vld [vmem:[%s6032_s4 + $0x440] sm:$0xff]  }
 0x15b   : > { %4579 = vmatpush3.bf16.msra.mxu1 %v4912_v45  ;;  %2651 = vmatprep.mubr.bf16.mxu1 %v4069_v57  ;;  %v4927_v45 = vld [vmem:[%s6032_s4 + $0x3d0] sm:$0xff]   ;;  %v4940_v27 = vld [vmem:[%s6032_s4 + $0x3a8] sm:$0xff]  }
 0x15c   : > { %4580 = vmatprep.subr.bf16.mxu1 %v4914_v28  ;;  %2595 = vmatmul.mubr.bf16.gmra.mrb[52].mxu0 %v4072_v50  ;;  %v2692_v28 = vld [vmem:[#allocation2 + $0x78] sm:$0x3]  ;;  %v4933_v57 = vld [vmem:[%s6032_s4 + $0x370] sm:$0xff]   ;;  %v4081_v31 = vcombine.low %v1134_v29, %v1136_v41  ;;  %v5798_v50 = vpack.c.bf16 %v2688_v40, %v2686_v37  ;;  %v2706_v29 = vld [vmem:[#allocation2 + $0xe8] sm:$0xff]  ;;  %v5864_v40 = vpack.c.bf16 %v2699_v22, %v2697_v51 }
 0x15d   : > { %4611 = vmatpush3.bf16.msra.mxu0 %v4918_v55  ;;  %2602 = vmatprep.mubr.bf16.mxu0 %v4079_v48  ;;  %v5790_v55 = vpack.c.bf16 %v2692_v28, %v2690_v38  ;;  %v1140_v48 = vrot.slane %v5685_v0, 1  ;;  %v1138_v0 = vrot.slane %v5696_v24, 1 }
 0x15e   : > { %4612 = vmatprep.subr.bf16.mxu0 %v4921_v7  ;;  %v4937_v7 = vld [vmem:[%s6032_s4 + $0x378] sm:$0xff]   ;;  %v2743_v16 = vshll.u32 %v5798_v50, 16  ;;  %v2741_v41 = vshrl.u32 %v5798_v50, 16 }
 0x15f   : > { %4581 = vmatpush3.bf16.msra.mxu1 %v4916_v49  ;;  %v4084_v49 = vcombine.low %v1087_v42, %v1101_v33  ;;  %v2757_v43 = vshll.u32 %v5790_v55, 16  ;;  %v4087_v24 = vcombine.low %v1138_v0, %v1140_v48  ;;  %v2693_v33 = vld [vmem:[#allocation2 + $0x80] sm:$0xff]  ;;  %v2702_v42 = vld [vmem:[#allocation2 + $0xc8] sm:$0xff]  ;;  %v4950_v48 = vld [vmem:[%s6032_s4 + $0x410] sm:$0xff]  }
 0x160   : > { %4646 = vmatprep.subr.bf16.mxu1 %v4919_v21  ;;  %v4336_v21 = vpack.c.bf16 %v2690_v38, %v2686_v37  ;;  %v2745_v25 = vrot.slane %v2743_v16, 1  ;;  %v4947_v38 = vld [vmem:[%s6032_s4 + $0x408] sm:$0xff]   ;;  %v4949_v37 = vld [vmem:[%s6032_s4 + $0x450] sm:$0xff]   ;;  %v4337_v35 = vpack.c.bf16 %v2697_v51, %v2693_v33  ;;  %v4340_v0 = vpack.c.bf16 %v2706_v29, %v2702_v42 }
 0x161   : > { %4613 = vmatpush3.bf16.msra.mxu0 %v4922_v60  ;;  %v2698_v60 = vld [vmem:[#allocation2 + $0xa8] sm:$0xff]  ;;  %v2759_v13 = vrot.slane %v2757_v43, 1 }
 0x162   : > { %2652 = vmatmul.mubr.bf16.vlgmr.msra.gmra.mrb[36].mxu1 %v4068_v12  ;;  %4614 = vmatprep.subr.bf16.mxu0 %v4925_v6  ;;  %v2694_v12 = vld [vmem:[#allocation2 + $0x88] sm:$0xff]  ;;  %v5826_v6 = vpack.c.bf16 %v2700_v36, %v2698_v60 }
 0x163   : > { %2659 = vmatprep.mubr.bf16.mxu1 %v4075_v14  ;;  %4647 = vmatpush3.bf16.msra.mxu1 %v4920_v61  ;;  %v2687_v61 = vld [vmem:[#allocation2 + $0x50] sm:$0x3]  ;;  %v4943_v14 = vld [vmem:[%s6032_s4 + $0x400] sm:$0xff]   ;;  %v4338_v46 = vpack.c.bf16 %v2698_v60, %v2694_v12 }
 0x164   : > { %4648 = vmatprep.subr.bf16.mxu1 %v4923_v5  ;;  %2603 = vmatmul.mubr.bf16.gmra.mrb[56].mxu0 %v4078_v18  ;;  %v2696_v5 = vld [vmem:[#allocation2 + $0x98] sm:$0x3]  ;;  %v5828_v62 = vpack.c.bf16 %v2687_v61, %v2685_v39  ;;  %v4945_v18 = vld [vmem:[%s6032_s4 + $0x448] sm:$0xff]   ;;  %v2783_v3 = vshrl.u32 %v5826_v6, 16  ;;  %v2778_v39 = vshll.u32 %v5864_v40, 16 }
 0x165   : > { %4615 = vmatpush3.bf16.msra.mxu0 %v4926_v15  ;;  %2610 = vmatprep.mubr.bf16.mxu0 %v4085_v20  ;;  %v5836_v15 = vpack.c.bf16 %v2696_v5, %v2694_v12  ;;  %v4944_v20 = vld [vmem:[%s6032_s4 + $0x3b0] sm:$0xff]   ;;  %v2710_v12 = vld [vmem:[#allocation2 + $0x108] sm:$0xff] }
 0x166   : > { %4616 = vmatprep.subr.bf16.mxu0 %v4929_v52  ;;  %v1139_v52 = vrot.slane %v5724_v47, 1  ;;  %v1137_v47 = vrot.slane %v5737_v59, 1  ;;  %v2736_v28 = vshll.u32 %v5828_v62, 16  ;;  %v2734_v60 = vshrl.u32 %v5828_v62, 16 }
 0x167   : > { %4649 = vmatpush3.bf16.msra.mxu1 %v4924_v17  ;;  %v2755_v17 = vshrl.u32 %v5790_v55, 16  ;;  %v2771_v59 = vshll.u32 %v5836_v15, 16  ;;  %v2769_v61 = vshrl.u32 %v5836_v15, 16 }
 0x168   : > { %4650 = vmatprep.subr.bf16.mxu1 %v4927_v45  ;;  %v2750_v45 = vshll.u32 %v5824_v54, 16 }
 0x169   : > { %4617 = vmatpush3.bf16.msra.mxu0 %v4930_v26  ;;  %v2760_v2 = vor.u32 %v2759_v13, %v2755_v17  ;;  %v2785_v26 = vshll.u32 %v5826_v6, 16  ;;  %v2773_v43 = vrot.slane %v2771_v59, 1  ;;  %v4953_v17 = vld [vmem:[%s6032_s4 + $0x460] sm:$0xff]  }
 0x16a   : > { %2660 = vmatmul.mubr.bf16.gmra.mrb[40].mxu1 %v4074_v32  ;;  %4618 = vmatprep.subr.bf16.mxu0 %v4933_v57  ;;  %v2695_v32 = vld [vmem:[#allocation2 + $0x90] sm:$0x3]  ;;  %v4086_v57 = vcombine.low %v1137_v47, %v1139_v52 }
 0x16b   : > { %2667 = vmatprep.mubr.bf16.mxu1 %v4081_v31  ;;  %4651 = vmatpush3.bf16.msra.mxu1 %v4928_v30  ;;  %v2708_v30 = vld [vmem:[#allocation2 + $0xf8] sm:$0x3]  ;;  %v2752_v31 = vrot.slane %v2750_v45, 1  ;;  %v5868_v11 = vpack.c.bf16 %v2695_v32, %v2693_v33  ;;  %v2703_v52 = vld [vmem:[#allocation2 + $0xd0] sm:$0x3] }
 0x16c   : > { %4652 = vmatprep.subr.bf16.mxu1 %v4931_v34  ;;  %2611 = vmatmul.mubr.bf16.gmra.mrb[60].mxu0 %v4084_v49  ;;  %v2746_v34 = vor.u32 %v2745_v25, %v2741_v41  ;;  %v5866_v49 = vpack.c.bf16 %v2708_v30, %v2706_v29  ;;  %v2774_v25 = vor.u32 %v2773_v43, %v2769_v61 }
 0x16d   : > { %4619 = vmatpush3.bf16.msra.mxu0 %v4934_v63  ;;  %3390 = vmatprep.mubr.bf16.mxu0 %v4336_v21  ;;  %v2704_v63 = vld [vmem:[#allocation2 + $0xd8] sm:$0x3]  ;;  %v2748_v21 = vshrl.u32 %v5824_v54, 16  ;;  %v2764_v13 = vshll.u32 %v5868_v11, 16  ;;  %v2762_v33 = vshrl.u32 %v5868_v11, 16 }
 0x16e   : > { %4620 = vmatprep.subr.bf16.mxu0 %v4937_v7  ;;  %v2787_v7 = vrot.slane %v2785_v26, 1  ;;  %v5877_v1 = vpack.c.bf16 %v2704_v63, %v2702_v42  ;;  %v2813_v5 = vshll.u32 %v5866_v49, 16 }
 0x16f   : > { %4653 = vmatpush3.bf16.msra.mxu1 %v4932_v44  ;;  %v4235_v44 = vcombine.low %v2746_v34, %v2760_v2  ;;  %v2753_v36 = vor.u32 %v2752_v31, %v2748_v21  ;;  %v2766_v47 = vrot.slane %v2764_v13, 1  ;;  %v2811_v34 = vshrl.u32 %v5866_v49, 16 }
 0x170   : > { %4654 = vmatprep.subr.bf16.mxu1 %v4935_v56  ;;  %v2738_v56 = vrot.slane %v2736_v28, 1  ;;  %v2788_v16 = vor.u32 %v2787_v7, %v2783_v3  ;;  %v2815_v22 = vrot.slane %v2813_v5, 1  ;;  %v4954_v28 = vld [vmem:[%s6032_s4 + $0x420] sm:$0xff]   ;;  %v2797_v42 = vshrl.u32 %v5877_v1, 16  ;;  %v2715_v7 = vld [vmem:[#allocation2 + $0x130] sm:$0x3] }
 0x171   : > { %4621 = vmatpush3.bf16.msra.mxu0 %v4938_v10  ;;  %v4951_v10 = vld [vmem:[%s6032_s4 + $0x458] sm:$0xff]   ;;  %v4957_v3 = vld [vmem:[%s6032_s4 + $0x470] sm:$0xff]  }
 0x172   : > { %2668 = vmatmul.mubr.bf16.gmra.mrb[44].mxu1 %v4080_v9  ;;  %4686 = vmatprep.subr.bf16.mxu0 %v4941_v4  ;;  %v2705_v9 = vld [vmem:[#allocation2 + $0xe0] sm:$0xff]  ;;  %v2707_v4 = vld [vmem:[#allocation2 + $0xf0] sm:$0x3]  ;;  %v4241_v41 = vcombine.low %v2774_v25, %v2788_v16  ;;  %v2816_v63 = vor.u32 %v2815_v22, %v2811_v34 }
 0x173   : > { %2675 = vmatprep.mubr.bf16.mxu1 %v4087_v24  ;;  %4655 = vmatpush3.bf16.msra.mxu1 %v4936_v58  ;;  %v4948_v58 = vld [vmem:[%s6032_s4 + $0x3b8] sm:$0xff]   ;;  %v2739_v24 = vor.u32 %v2738_v56, %v2734_v60  ;;  %v5895_v45 = vpack.c.bf16 %v2707_v4, %v2705_v9  ;;  %v4958_v5 = vld [vmem:[%s6032_s4 + $0x430] sm:$0xff]  }
 0x174   : > { %4656 = vmatprep.subr.bf16.mxu1 %v4939_v8  ;;  %3391 = vmatmul.mubr.bf16.vlgmr.msra.gmra.mrb[64].mxu0 %v4335_v53  ;;  %v4952_v8 = vld [vmem:[%s6032_s4 + $0x418] sm:$0xff]  }
 0x175   : > { %4687 = vmatpush3.bf16.msra.mxu0 %v4943_v14  ;;  %3398 = vmatprep.mubr.bf16.mxu0 %v4338_v46  ;;  %v2712_v14 = vld [vmem:[#allocation2 + $0x118] sm:$0x3]  ;;  %v4234_v46 = vcombine.low %v2739_v24, %v2753_v36  ;;  %v2806_v31 = vshll.u32 %v5895_v45, 16  ;;  %v2862_v24 = vrot.slane %v5798_v50, 1 }
 0x176   : > { %4688 = vmatprep.subr.bf16.mxu0 %v4945_v18  ;;  %v2716_v53 = vld [vmem:[#allocation2 + $0x138] sm:$0x3]  ;;  %v2701_v18 = vld [vmem:[#allocation2 + $0xc0] sm:$0xff]  ;;  %v5897_v2 = vpack.c.bf16 %v2712_v14, %v2710_v12 }
 0x177   : > { %4657 = vmatpush3.bf16.msra.mxu1 %v4940_v27  ;;  %v2714_v27 = vld [vmem:[#allocation2 + $0x128] sm:$0xff]  ;;  %v5901_v26 = vpack.c.bf16 %v2703_v52, %v2701_v18  ;;  %v4339_v29 = vpack.c.bf16 %v2705_v9, %v2701_v18 }
 0x178   : > { %4658 = vmatprep.subr.bf16.mxu1 %v4942_v19  ;;  %v2799_v19 = vshll.u32 %v5877_v1, 16  ;;  %v5899_v51 = vpack.c.bf16 %v2716_v53, %v2714_v27  ;;  %v4342_v59 = vpack.c.bf16 %v2714_v27, %v2710_v12  ;;  %v2827_v56 = vshll.u32 %v5897_v2, 16  ;;  %v4959_v27 = vld [vmem:[%s6032_s4 + $0x478] sm:$0xff]  }
 0x179   : > { %4689 = vmatpush3.bf16.msra.mxu0 %v4947_v38  ;;  %v2776_v38 = vshrl.u32 %v5864_v40, 16  ;;  %v2804_v12 = vshrl.u32 %v5895_v45, 16  ;;  %v2825_v14 = vshrl.u32 %v5897_v2, 16 }
 0x17a   : > { %2676 = vmatmul.mubr.bf16.gmra.mrb[48].mxu1 %v4086_v57  ;;  %4690 = vmatprep.subr.bf16.mxu0 %v4949_v37  ;;  %v2801_v30 = vrot.slane %v2799_v19, 1  ;;  %v2709_v57 = vld [vmem:[#allocation2 + $0x100] sm:$0xff]  ;;  %v2711_v37 = vld [vmem:[#allocation2 + $0x110] sm:$0x3]  ;;  %v2841_v21 = vshll.u32 %v5899_v51, 16  ;;  %v2829_v61 = vrot.slane %v2827_v56, 1 }
 0x17b   : > { %4659 = vmatpush3.bf16.msra.mxu1 %v4944_v20  ;;  %3455 = vmatprep.mubr.bf16.mxu1 %v4235_v44  ;;  %v2780_v20 = vrot.slane %v2778_v39, 1  ;;  %v2713_v44 = vld [vmem:[#allocation2 + $0x120] sm:$0xff]  ;;  %v2839_v16 = vshrl.u32 %v5899_v51, 16 }
 0x17c   : > { %4660 = vmatprep.subr.bf16.mxu1 %v4946_v23  ;;  %3399 = vmatmul.mubr.bf16.gmra.mrb[68].mxu0 %v4337_v35  ;;  %v4955_v23 = vld [vmem:[%s6032_s4 + $0x468] sm:$0xff]   ;;  %v2792_v35 = vshll.u32 %v5901_v26, 16  ;;  %v2802_v43 = vor.u32 %v2801_v30, %v2797_v42  ;;  %v5925_v36 = vpack.c.bf16 %v2715_v7, %v2713_v44  ;;  %v2843_v9 = vrot.slane %v2841_v21, 1 }
 0x17d   : > { %4691 = vmatpush3.bf16.msra.mxu0 %v4950_v48  ;;  %3406 = vmatprep.mubr.bf16.mxu0 %v4340_v0  ;;  %v2781_v32 = vor.u32 %v2780_v20, %v2776_v38  ;;  %v2767_v48 = vor.u32 %v2766_v47, %v2762_v33  ;;  %v2808_v0 = vrot.slane %v2806_v31, 1  ;;  %v4341_v13 = vpack.c.bf16 %v2713_v44, %v2709_v57 }
 0x17e   : > { %4692 = vmatprep.subr.bf16.mxu0 %v4951_v10  ;;  %v5923_v10 = vpack.c.bf16 %v2711_v37, %v2709_v57  ;;  %v4247_v39 = vcombine.low %v2802_v43, %v2816_v63  ;;  %v2794_v4 = vrot.slane %v2792_v35, 1  ;;  %v2834_v18 = vshll.u32 %v5925_v36, 16  ;;  %v4962_v35 = vld [vmem:[%s6034_s6 + $0x8] sm:$0xff]  }
 0x17f   : > { %4661 = vmatpush3.bf16.msra.mxu1 %v4948_v58  ;;  %v4956_v58 = vld [vmem:[%s6032_s4 + $0x428] sm:$0xff]   ;;  %v4240_v60 = vcombine.low %v2767_v48, %v2781_v32  ;;  %v2809_v53 = vor.u32 %v2808_v0, %v2804_v12  ;;  %v2830_v52 = vor.u32 %v2829_v61, %v2825_v14  ;;  %v2844_v50 = vor.u32 %v2843_v9, %v2839_v16  ;;  %v4965_v61 = vld [vmem:[%s6034_s6 + $0x20] sm:$0xff]  }
 0x180   : > { %v2832_v20 = vshrl.u32 %v5925_v36, 16  ;;  %v2836_v38 = vrot.slane %v2834_v18, 1  ;;  %v2861_v30 = vrot.slane %v5828_v62, 1  ;;  %v2818_v34 = vshrl.u32 %v5923_v10, 16 }
 0x181   : > { %4693 = vmatpush3.bf16.msra.mxu0 %v4952_v8  ;;  %v2864_v8 = vrot.slane %v5790_v55, 1  ;;  %v2790_v55 = vshrl.u32 %v5901_v26, 16  ;;  %v2865_v62 = vrot.slane %v5868_v11, 1  ;;  %v2870_v31 = vrot.slane %v5877_v1, 1 }
 0x182   : > { %3456 = vmatmul.mubr.bf16.vlgmr.msra.gmra.mrb[52].mxu1 %v4234_v46  ;;  %4694 = vmatprep.subr.bf16.mxu0 %v4953_v17  ;;  %v2820_v17 = vshll.u32 %v5923_v10, 16  ;;  %v4960_v46 = vld [vmem:[%s6032_s4 + $0x438] sm:$0xff]   ;;  %v2874_v44 = vrot.slane %v5897_v2, 1  ;;  %v2876_v7 = vrot.slane %v5899_v51, 1  ;;  %v2875_v11 = vrot.slane %v5925_v36, 1 }
 0x183   : > { %3463 = vmatprep.mubr.bf16.mxu1 %v4241_v41  ;;  %v4237_v25 = vcombine.low %v2862_v24, %v2864_v8  ;;  %v2795_v19 = vor.u32 %v2794_v4, %v2790_v55  ;;  %v2863_v41 = vrot.slane %v5824_v54, 1  ;;  %v2867_v54 = vrot.slane %v5864_v40, 1 }
 0x184   : > { %3407 = vmatmul.mubr.bf16.gmra.mrb[72].mxu0 %v4339_v29  ;;  %v2822_v47 = vrot.slane %v2820_v17, 1  ;;  %v4253_v29 = vcombine.low %v2830_v52, %v2844_v50  ;;  %v2869_v40 = vrot.slane %v5901_v26, 1  ;;  %v4255_v21 = vcombine.low %v2874_v44, %v2876_v7 }
 0x185   : > { %4695 = vmatpush3.bf16.msra.mxu0 %v4954_v28  ;;  %3414 = vmatprep.mubr.bf16.mxu0 %v4342_v59  ;;  %v4246_v22 = vcombine.low %v2795_v19, %v2809_v53  ;;  %v2868_v28 = vrot.slane %v5826_v6, 1  ;;  %v4236_v33 = vcombine.low %v2861_v30, %v2863_v41  ;;  %v2837_v59 = vor.u32 %v2836_v38, %v2832_v20  ;;  %v4967_v20 = vld [vmem:[%s6034_s6 + $0x30] sm:$0xff]  }
 0x186   : > { %4696 = vmatprep.subr.bf16.mxu0 %v4955_v23  ;;  %v2866_v23 = vrot.slane %v5836_v15, 1  ;;  %v2823_v32 = vor.u32 %v2822_v47, %v2818_v34  ;;  %v2872_v6 = vrot.slane %v5866_v49, 1  ;;  %v4242_v42 = vcombine.low %v2865_v62, %v2867_v54 }
 0x187   : > { %v2871_v15 = vrot.slane %v5895_v45, 1  ;;  %v2873_v49 = vrot.slane %v5923_v10, 1  ;;  %v4961_v45 = vld [vmem:[%s6034_s6] sm:$0xff]  }
 0x188   : > { %v4243_v57 = vcombine.low %v2866_v23, %v2868_v28  ;;  %v4252_v37 = vcombine.low %v2823_v32, %v2837_v59  ;;  %v4249_v63 = vcombine.low %v2870_v31, %v2872_v6  ;;  %4738 = vmatprep.subr.bf16.mxu1 %v4961_v45 }
 0x189   : > { %4697 = vmatpush3.bf16.msra.mxu0 %v4956_v58  ;;  %v4248_v56 = vcombine.low %v2869_v40, %v2871_v15  ;;  %v4254_v1 = vcombine.low %v2873_v49, %v2875_v11  ;;  %4739 = vmatpush3.bf16.msra.mxu1 %v4961_v45 }
 0x18a   : > { %3464 = vmatmul.mubr.bf16.gmra.mrb[56].mxu1 %v4240_v60  ;;  %4698 = vmatprep.subr.bf16.mxu0 %v4957_v3  ;;  %v4963_v3 = vld [vmem:[%s6034_s6 + $0x10] sm:$0xff]  }
 0x18b   : > { %3471 = vmatprep.mubr.bf16.mxu1 %v4247_v39  ;;  %4740 = vmatprep.subr.bf16.mxu1 %v4962_v35  ;;  %v4964_v39 = vld [vmem:[%s6034_s6 + $0x18] sm:$0xff]  }
 0x18c   : > { %3415 = vmatmul.mubr.bf16.gmra.mrb[76].mxu0 %v4341_v13 }
 0x18d   : > { %4699 = vmatpush3.bf16.msra.mxu0 %v4958_v5  ;;  %3520 = vmatprep.mubr.bf16.mxu0 %v4237_v25 }
 0x18e   : > { %4700 = vmatprep.subr.bf16.mxu0 %v4959_v27  ;;  %4741 = vmatpush3.bf16.msra.mxu1 %v4962_v35 }
 0x18f   : > { %4742 = vmatprep.subr.bf16.mxu1 %v4963_v3 }
 0x191   : > { %4701 = vmatpush3.bf16.msra.mxu0 %v4960_v46  ;;  %v4966_v46 = vld [vmem:[%s6034_s6 + $0x28] sm:$0xff]  }
 0x192   : > { %3472 = vmatmul.mubr.bf16.gmra.mrb[60].mxu1 %v4246_v22 }
 0x193   : > { %3479 = vmatprep.mubr.bf16.mxu1 %v4253_v29  ;;  %4743 = vmatpush3.bf16.msra.mxu1 %v4963_v3 }
 0x194   : > { %3521 = vmatmul.mubr.bf16.vlgmr.msra.gmra.mrb[80].mxu0 %v4236_v33  ;;  %4744 = vmatprep.subr.bf16.mxu1 %v4964_v39  ;;  %v4968_v33 = vld [vmem:[%s6034_s6 + $0x38] sm:$0xff]  }
 0x195   : > { %3528 = vmatprep.mubr.bf16.mxu0 %v4243_v57 }
 0x197   : > { %4745 = vmatpush3.bf16.msra.mxu1 %v4964_v39 }
 0x198   : > { %4746 = vmatprep.subr.bf16.mxu1 %v4965_v61 }
 0x19a   : > { %3480 = vmatmul.mubr.bf16.gmra.mrb[64].mxu1 %v4252_v37 }
 0x19b   : > { %4747 = vmatpush3.bf16.msra.mxu1 %v4965_v61 }
 0x19c   : > { %3529 = vmatmul.mubr.bf16.gmra.mrb[84].mxu0 %v4242_v42  ;;  %4748 = vmatprep.subr.bf16.mxu1 %v4966_v46 }
 0x19d   : > { %3536 = vmatprep.mubr.bf16.mxu0 %v4249_v63 }
 0x19f   : > { %4749 = vmatpush3.bf16.msra.mxu1 %v4966_v46 }
 0x1a0   : > { %4750 = vmatprep.subr.bf16.mxu1 %v4967_v20 }
 0x1a3   : > { %4751 = vmatpush3.bf16.msra.mxu1 %v4967_v20 }
 0x1a4   : > { %3537 = vmatmul.mubr.bf16.gmra.mrb[88].mxu0 %v4248_v56  ;;  %4752 = vmatprep.subr.bf16.mxu1 %v4968_v33 }
 0x1a5   : > { %3544 = vmatprep.mubr.bf16.mxu0 %v4255_v21 }
 0x1a7   : > { %4753 = vmatpush3.bf16.msra.mxu1 %v4968_v33 }
 0x1ac   : > { %3545 = vmatmul.mubr.bf16.gmra.mrb[92].mxu0 %v4254_v1 }
 0x1e5   : > { %v4382_v2 = vpop.f32.mrb[16].mxu0 }
 0x1e6   : > { %v4383_v51 = vpop.f32.mrb[17].mxu0 }
 0x1e7   : > { %v4384_v48 = vadd.f32 %v4383_v51, %v4382_v2  ;;  %v4385_v26 = vpop.f32.mrb[18].mxu0 }
 0x1e8   : > { %v4386_v58 = vpop.f32.mrb[19].mxu0 }
 0x1e9   : > { %v4387_v43 = vadd.f32 %v4386_v58, %v4385_v26 }
 0x1ed   : > { %v4388_v10 = vpop.f32.mrb[20].mxu0 }
 0x1ee   : > { %v4389_v60 = vpop.f32.mrb[21].mxu0 }
 0x1ef   : > { %v4390_v36 = vadd.f32 %v4389_v60, %v4388_v10  ;;  %v4391_v0 = vpop.f32.mrb[22].mxu0 }
 0x1f0   : > { %v4392_v8 = vpop.f32.mrb[23].mxu0 }
 0x1f1   : > { %v4393_v9 = vadd.f32 %v4392_v8, %v4391_v0 }
 0x1f3   : > { %v4422_v16 = vpop.f32.mrb[4].mxu1 }
 0x1f4   : > { %v4423_v4 = vpop.f32.mrb[5].mxu1 }
 0x1f5   : > { %v4424_v12 = vadd.f32 %v4423_v4, %v4422_v16  ;;  %v4425_v5 = vpop.f32.mrb[6].mxu1 }
 0x1f6   : > { %v4426_v24 = vpop.f32.mrb[7].mxu1  ;;  %v4394_v14 = vpop.f32.mrb[24].mxu0 }
 0x1f7   : > { %v2058_v13 = vadd.f32 %v4424_v12, %v4384_v48  ;;  %v4427_v55 = vadd.f32 %v4426_v24, %v4425_v5  ;;  %v4395_v27 = vpop.f32.mrb[25].mxu0 }
 0x1f8   : > { %v4396_v25 = vadd.f32 %v4395_v27, %v4394_v14  ;;  %v4397_v17 = vpop.f32.mrb[26].mxu0 }
 0x1f9   : > { %v2061_v53 = vadd.f32 %v4427_v55, %v4387_v43  ;;  %v4398_v18 = vpop.f32.mrb[27].mxu0 }
 0x1fa   : > { %v4399_v52 = vadd.f32 %v4398_v18, %v4397_v17 }
 0x1fd   : > { %v4428_v50 = vpop.f32.mrb[8].mxu1 }
 0x1fe   : > { %v4429_v19 = vpop.f32.mrb[9].mxu1 }
 0x1ff   : > { %v4430_v41 = vadd.f32 %v4429_v19, %v4428_v50  ;;  %v4431_v22 = vpop.f32.mrb[10].mxu1  ;;  %v4400_v38 = vpop.f32.mrb[28].mxu0 }
 0x200   : > { %v4432_v47 = vpop.f32.mrb[11].mxu1  ;;  %v4401_v30 = vpop.f32.mrb[29].mxu0 }
 0x201   : > { %v2066_v28 = vadd.f32 %v4430_v41, %v4390_v36  ;;  %v4433_v29 = vadd.f32 %v4432_v47, %v4431_v22  ;;  %v4402_v34 = vadd.f32 %v4401_v30, %v4400_v38  ;;  %v4403_v23 = vpop.f32.mrb[30].mxu0 }
 0x202   : > { %v4404_v59 = vpop.f32.mrb[31].mxu0 }
 0x203   : > { %v2069_v32 = vadd.f32 %v4433_v29, %v4393_v9  ;;  %v4405_v57 = vadd.f32 %v4404_v59, %v4403_v23 }
 0x205   : > { %v4434_v54 = vpop.f32.mrb[12].mxu1 }
 0x206   : > { %v4435_v37 = vpop.f32.mrb[13].mxu1 }
 0x207   : > { %v4436_v6 = vadd.f32 %v4435_v37, %v4434_v54  ;;  %v4437_v62 = vpop.f32.mrb[14].mxu1  ;;  %v4462_v42 = vpop.f32.mrb[32].mxu0 }
 0x208   : > { %v4438_v31 = vpop.f32.mrb[15].mxu1  ;;  %v4463_v44 = vpop.f32.mrb[33].mxu0 }
 0x209   : > { %v2074_v63 = vadd.f32 %v4436_v6, %v4396_v25  ;;  %v4439_v15 = vadd.f32 %v4438_v31, %v4437_v62  ;;  %v4464_v7 = vadd.f32 %v4463_v44, %v4462_v42  ;;  %v4465_v40 = vpop.f32.mrb[34].mxu0 }
 0x20a   : > { %v4466_v21 = vpop.f32.mrb[35].mxu0 }
 0x20b   : > { %v2077_v56 = vadd.f32 %v4439_v15, %v4399_v52  ;;  %v2123_v49 = vadd.f32 %v4464_v7, %v2058_v13  ;;  %v4467_v11 = vadd.f32 %v4466_v21, %v4465_v40 }
 0x20d   : > { %v4440_v1 = vpop.f32.mrb[16].mxu1  ;;  %v2126_v2 = vadd.f32 %v4467_v11, %v2061_v53 }
 0x20e   : > { %v4441_v45 = vpop.f32.mrb[17].mxu1 }
 0x20f   : > { %v4442_v51 = vadd.f32 %v4441_v45, %v4440_v1  ;;  %v4443_v48 = vpop.f32.mrb[18].mxu1  ;;  %v4468_v58 = vpop.f32.mrb[36].mxu0 }
 0x210   : > { %v4444_v26 = vpop.f32.mrb[19].mxu1  ;;  %v4469_v3 = vpop.f32.mrb[37].mxu0 }
 0x211   : > { %v2082_v35 = vadd.f32 %v4442_v51, %v4402_v34  ;;  %v4445_v43 = vadd.f32 %v4444_v26, %v4443_v48  ;;  %v4470_v10 = vadd.f32 %v4469_v3, %v4468_v58  ;;  %v4471_v60 = vpop.f32.mrb[38].mxu0 }
 0x212   : > { %v4472_v0 = vpop.f32.mrb[39].mxu0 }
 0x213   : > { %v2085_v36 = vadd.f32 %v4445_v43, %v4405_v57  ;;  %v2131_v8 = vadd.f32 %v4470_v10, %v2066_v28  ;;  %v4473_v39 = vadd.f32 %v4472_v0, %v4471_v60 }
 0x215   : > { %v4502_v61 = vpop.f32.mrb[20].mxu1  ;;  %v2134_v9 = vadd.f32 %v4473_v39, %v2069_v32 }
 0x216   : > { %v4503_v16 = vpop.f32.mrb[21].mxu1 }
 0x217   : > { %v4504_v4 = vadd.f32 %v4503_v16, %v4502_v61  ;;  %v4505_v12 = vpop.f32.mrb[22].mxu1  ;;  %v4474_v24 = vpop.f32.mrb[40].mxu0 }
 0x218   : > { %v4506_v5 = vpop.f32.mrb[23].mxu1  ;;  %v4475_v14 = vpop.f32.mrb[41].mxu0 }
 0x219   : > { %v2524_v13 = vadd.f32 %v4504_v4, %v2123_v49  ;;  %v4507_v55 = vadd.f32 %v4506_v5, %v4505_v12  ;;  %v4476_v27 = vadd.f32 %v4475_v14, %v4474_v24  ;;  %v4477_v53 = vpop.f32.mrb[42].mxu0 }
 0x21a   : > { %v4478_v17 = vpop.f32.mrb[43].mxu0 }
 0x21b   : > { %v2527_v25 = vadd.f32 %v4507_v55, %v2126_v2  ;;  %v2139_v18 = vadd.f32 %v4476_v27, %v2074_v63  ;;  %v4479_v52 = vadd.f32 %v4478_v17, %v4477_v53 }
 0x21d   : > { %v4508_v50 = vpop.f32.mrb[24].mxu1  ;;  %v2142_v46 = vadd.f32 %v4479_v52, %v2077_v56 }
 0x21e   : > { %v4509_v19 = vpop.f32.mrb[25].mxu1 }
 0x21f   : > { %v4510_v20 = vadd.f32 %v4509_v19, %v4508_v50  ;;  %v4511_v41 = vpop.f32.mrb[26].mxu1  ;;  %v4480_v47 = vpop.f32.mrb[44].mxu0 }
 0x220   : > { %v4512_v22 = vpop.f32.mrb[27].mxu1  ;;  %v4481_v29 = vpop.f32.mrb[45].mxu0 }
 0x221   : > { %v2532_v38 = vadd.f32 %v4510_v20, %v2131_v8  ;;  %v4513_v28 = vadd.f32 %v4512_v22, %v4511_v41  ;;  %v4482_v30 = vadd.f32 %v4481_v29, %v4480_v47  ;;  %v4483_v34 = vpop.f32.mrb[46].mxu0 }
 0x222   : > { %v4484_v33 = vpop.f32.mrb[47].mxu0 }
 0x223   : > { %v2535_v23 = vadd.f32 %v4513_v28, %v2134_v9  ;;  %v2147_v32 = vadd.f32 %v4482_v30, %v2082_v35  ;;  %v4485_v59 = vadd.f32 %v4484_v33, %v4483_v34 }
 0x225   : > { %v4514_v57 = vpop.f32.mrb[28].mxu1  ;;  %v2150_v37 = vadd.f32 %v4485_v59, %v2085_v36 }
 0x226   : > { %v4515_v54 = vpop.f32.mrb[29].mxu1 }
 0x227   : > { %v4516_v6 = vadd.f32 %v4515_v54, %v4514_v57  ;;  %v4517_v62 = vpop.f32.mrb[30].mxu1  ;;  %v4542_v42 = vpop.f32.mrb[48].mxu0 }
 0x228   : > { %v4518_v31 = vpop.f32.mrb[31].mxu1  ;;  %v4543_v44 = vpop.f32.mrb[49].mxu0 }
 0x229   : > { %v2540_v63 = vadd.f32 %v4516_v6, %v2139_v18  ;;  %v4519_v15 = vadd.f32 %v4518_v31, %v4517_v62  ;;  %v4544_v7 = vadd.f32 %v4543_v44, %v4542_v42  ;;  %v4545_v40 = vpop.f32.mrb[50].mxu0 }
 0x22a   : > { %v4546_v21 = vpop.f32.mrb[51].mxu0 }
 0x22b   : > { %v2543_v56 = vadd.f32 %v4519_v15, %v2142_v46  ;;  %v2589_v49 = vadd.f32 %v4544_v7, %v2524_v13  ;;  %v4547_v11 = vadd.f32 %v4546_v21, %v4545_v40 }
 0x22d   : > { %v4520_v1 = vpop.f32.mrb[32].mxu1  ;;  %v2592_v2 = vadd.f32 %v4547_v11, %v2527_v25 }
 0x22e   : > { %v4521_v45 = vpop.f32.mrb[33].mxu1 }
 0x22f   : > { %v4522_v51 = vadd.f32 %v4521_v45, %v4520_v1  ;;  %v4523_v48 = vpop.f32.mrb[34].mxu1  ;;  %v4548_v58 = vpop.f32.mrb[52].mxu0 }
 0x230   : > { %v4524_v26 = vpop.f32.mrb[35].mxu1  ;;  %v4549_v3 = vpop.f32.mrb[53].mxu0 }
 0x231   : > { %v2548_v35 = vadd.f32 %v4522_v51, %v2147_v32  ;;  %v4525_v43 = vadd.f32 %v4524_v26, %v4523_v48  ;;  %v4550_v10 = vadd.f32 %v4549_v3, %v4548_v58  ;;  %v4551_v60 = vpop.f32.mrb[54].mxu0 }
 0x232   : > { %v4552_v0 = vpop.f32.mrb[55].mxu0 }
 0x233   : > { %v2551_v36 = vadd.f32 %v4525_v43, %v2150_v37  ;;  %v2597_v8 = vadd.f32 %v4550_v10, %v2532_v38  ;;  %v4553_v39 = vadd.f32 %v4552_v0, %v4551_v60 }
 0x235   : > { %v4582_v61 = vpop.f32.mrb[36].mxu1  ;;  %v2600_v9 = vadd.f32 %v4553_v39, %v2535_v23 }
 0x236   : > { %v4583_v16 = vpop.f32.mrb[37].mxu1 }
 0x237   : > { %v4584_v4 = vadd.f32 %v4583_v16, %v4582_v61  ;;  %v4585_v12 = vpop.f32.mrb[38].mxu1  ;;  %v4554_v24 = vpop.f32.mrb[56].mxu0 }
 0x238   : > { %v4586_v5 = vpop.f32.mrb[39].mxu1  ;;  %v4555_v14 = vpop.f32.mrb[57].mxu0 }
 0x239   : > { %v5984_v13 = vadd.f32 %v4584_v4, %v2589_v49  ;;  %v4587_v55 = vadd.f32 %v4586_v5, %v4585_v12  ;;  %v4556_v27 = vadd.f32 %v4555_v14, %v4554_v24  ;;  %v4557_v53 = vpop.f32.mrb[58].mxu0 }
 0x23a   : > { %v4558_v17 = vpop.f32.mrb[59].mxu0 }
 0x23b   : > { %v5986_v25 = vadd.f32 %v4587_v55, %v2592_v2  ;;  %v2605_v18 = vadd.f32 %v4556_v27, %v2540_v63  ;;  %v4559_v52 = vadd.f32 %v4558_v17, %v4557_v53 }
 0x23d   : > { %v4588_v50 = vpop.f32.mrb[40].mxu1  ;;  %v2608_v46 = vadd.f32 %v4559_v52, %v2543_v56 }
 0x23e   : > { %v4589_v19 = vpop.f32.mrb[41].mxu1 }
 0x23f   : > { %v4590_v20 = vadd.f32 %v4589_v19, %v4588_v50  ;;  %v4591_v41 = vpop.f32.mrb[42].mxu1  ;;  %v4560_v47 = vpop.f32.mrb[60].mxu0 }
 0x240   : > { %v4592_v22 = vpop.f32.mrb[43].mxu1  ;;  %v4561_v29 = vpop.f32.mrb[61].mxu0 }
 0x241   : > { %v5988_v38 = vadd.f32 %v4590_v20, %v2597_v8  ;;  %v4593_v28 = vadd.f32 %v4592_v22, %v4591_v41  ;;  %v4562_v30 = vadd.f32 %v4561_v29, %v4560_v47  ;;  %v4563_v34 = vpop.f32.mrb[62].mxu0 }
 0x242   : > { %v4564_v33 = vpop.f32.mrb[63].mxu0 }
 0x243   : > { %v5990_v23 = vadd.f32 %v4593_v28, %v2600_v9  ;;  %v2613_v32 = vadd.f32 %v4562_v30, %v2548_v35  ;;  %v4565_v59 = vadd.f32 %v4564_v33, %v4563_v34 }
 0x245   : > { %v4594_v57 = vpop.f32.mrb[44].mxu1  ;;  %v2616_v37 = vadd.f32 %v4565_v59, %v2551_v36 }
 0x246   : > { %v4595_v54 = vpop.f32.mrb[45].mxu1 }
 0x247   : > { %v4596_v6 = vadd.f32 %v4595_v54, %v4594_v57  ;;  %v4597_v62 = vpop.f32.mrb[46].mxu1  ;;  %v4622_v42 = vpop.f32.mrb[64].mxu0 }
 0x248   : > { %v4598_v31 = vpop.f32.mrb[47].mxu1  ;;  %v4623_v44 = vpop.f32.mrb[65].mxu0 }
 0x249   : > { %v5992_v63 = vadd.f32 %v4596_v6, %v2605_v18  ;;  %v4599_v15 = vadd.f32 %v4598_v31, %v4597_v62  ;;  %v4624_v7 = vadd.f32 %v4623_v44, %v4622_v42  ;;  %v4625_v40 = vpop.f32.mrb[66].mxu0 }
 0x24a   : > { %v4626_v21 = vpop.f32.mrb[67].mxu0 }
 0x24b   : > { %v5994_v56 = vadd.f32 %v4599_v15, %v2608_v46  ;;  %v4627_v49 = vadd.f32 %v4626_v21, %v4625_v40 }
 0x24d   : > { %v4600_v11 = vpop.f32.mrb[48].mxu1 }
 0x24e   : > { %v4601_v1 = vpop.f32.mrb[49].mxu1 }
 0x24f   : > { %v4602_v45 = vadd.f32 %v4601_v1, %v4600_v11  ;;  %v4603_v2 = vpop.f32.mrb[50].mxu1  ;;  %v4628_v48 = vpop.f32.mrb[68].mxu0  ;;  %v4304_v11 = vld [vmem:[%s6033_s5] ss:$0 sm:$0xff] }
 0x250   : > { %v4604_v51 = vpop.f32.mrb[51].mxu1  ;;  %v4629_v35 = vpop.f32.mrb[69].mxu0 }
 0x251   : > { %v5996_v26 = vadd.f32 %v4602_v45, %v2613_v32  ;;  %v4605_v58 = vadd.f32 %v4604_v51, %v4603_v2  ;;  %v4630_v43 = vadd.f32 %v4629_v35, %v4628_v48  ;;  %v4631_v3 = vpop.f32.mrb[70].mxu0 }
 0x252   : > { %v4632_v60 = vpop.f32.mrb[71].mxu0 }
 0x253   : > { %v5998_v10 = vadd.f32 %v4605_v58, %v2616_v37  ;;  %v4633_v36 = vadd.f32 %v4632_v60, %v4631_v3 }
 0x255   : > { %v4662_v0 = vpop.f32.mrb[52].mxu1 }
 0x256   : > { %v4663_v8 = vpop.f32.mrb[53].mxu1 }
 0x257   : > { %v4664_v39 = vadd.f32 %v4663_v8, %v4662_v0  ;;  %v4665_v61 = vpop.f32.mrb[54].mxu1  ;;  %v4634_v9 = vpop.f32.mrb[72].mxu0 }
 0x258   : > { %v4666_v16 = vpop.f32.mrb[55].mxu1  ;;  %v4635_v5 = vpop.f32.mrb[73].mxu0 }
 0x259   : > { %v3458_v4 = vadd.f32 %v4664_v39, %v4624_v7  ;;  %v4667_v12 = vadd.f32 %v4666_v16, %v4665_v61  ;;  %v4636_v24 = vadd.f32 %v4635_v5, %v4634_v9  ;;  %v4637_v55 = vpop.f32.mrb[74].mxu0 }
 0x25a   : > { %v4638_v27 = vpop.f32.mrb[75].mxu0 }
 0x25b   : > { %v3461_v14 = vadd.f32 %v4667_v12, %v4627_v49  ;;  %v4639_v53 = vadd.f32 %v4638_v27, %v4637_v55 }
 0x25d   : > { %v4668_v17 = vpop.f32.mrb[56].mxu1 }
 0x25e   : > { %v4669_v18 = vpop.f32.mrb[57].mxu1 }
 0x25f   : > { %v4670_v52 = vadd.f32 %v4669_v18, %v4668_v17  ;;  %v4671_v50 = vpop.f32.mrb[58].mxu1  ;;  %v4640_v46 = vpop.f32.mrb[76].mxu0 }
 0x260   : > { %v4672_v19 = vpop.f32.mrb[59].mxu1  ;;  %v4641_v22 = vpop.f32.mrb[77].mxu0 }
 0x261   : > { %v3466_v20 = vadd.f32 %v4670_v52, %v4630_v43  ;;  %v4673_v41 = vadd.f32 %v4672_v19, %v4671_v50  ;;  %v4642_v47 = vadd.f32 %v4641_v22, %v4640_v46  ;;  %v4643_v28 = vpop.f32.mrb[78].mxu0 }
 0x262   : > { %v4644_v30 = vpop.f32.mrb[79].mxu0 }
 0x263   : > { %v3469_v29 = vadd.f32 %v4673_v41, %v4633_v36  ;;  %v4645_v34 = vadd.f32 %v4644_v30, %v4643_v28 }
 0x265   : > { %v4674_v33 = vpop.f32.mrb[60].mxu1 }
 0x266   : > { %v4675_v32 = vpop.f32.mrb[61].mxu1 }
 0x267   : > { %v4676_v59 = vadd.f32 %v4675_v32, %v4674_v33  ;;  %v4677_v57 = vpop.f32.mrb[62].mxu1  ;;  %v4702_v37 = vpop.f32.mrb[80].mxu0 }
 0x268   : > { %v4678_v54 = vpop.f32.mrb[63].mxu1  ;;  %v4703_v31 = vpop.f32.mrb[81].mxu0 }
 0x269   : > { %v3474_v6 = vadd.f32 %v4676_v59, %v4636_v24  ;;  %v4679_v62 = vadd.f32 %v4678_v54, %v4677_v57  ;;  %v4704_v42 = vadd.f32 %v4703_v31, %v4702_v37  ;;  %v4705_v15 = vpop.f32.mrb[82].mxu0 }
 0x26a   : > { %v4706_v7 = vpop.f32.mrb[83].mxu0 }
 0x26b   : > { %v3477_v44 = vadd.f32 %v4679_v62, %v4639_v53  ;;  %v3523_v40 = vadd.f32 %v4704_v42, %v3458_v4  ;;  %v4707_v21 = vadd.f32 %v4706_v7, %v4705_v15 }
 0x26d   : > { %v4680_v49 = vpop.f32.mrb[64].mxu1  ;;  %v3553_v45 = vadd.f32 %v3523_v40, %v5984_v13  ;;  %v3526_v2 = vadd.f32 %v4707_v21, %v3461_v14 }
 0x26e   : > { %v4681_v1 = vpop.f32.mrb[65].mxu1 }
 0x26f   : > { %v4682_v51 = vadd.f32 %v4681_v1, %v4680_v49  ;;  %v4683_v48 = vpop.f32.mrb[66].mxu1  ;;  %v3554_v35 = vadd.f32 %v3526_v2, %v5986_v25  ;;  %v4708_v43 = vpop.f32.mrb[84].mxu0  ;;  %v3568_v3 = vadd.f32 %v4304_v11, %v3553_v45  ;;  %v4305_v1 = vld [vmem:[%s6035_s7] ss:$0 sm:$0xff] }
 0x270   : > { %v4684_v58 = vpop.f32.mrb[67].mxu1  ;;  %v4709_v0 = vpop.f32.mrb[85].mxu0 }
 0x271   : > { %v3482_v60 = vadd.f32 %v4682_v51, %v4642_v47  ;;  %v4685_v36 = vadd.f32 %v4684_v58, %v4683_v48  ;;  %v4710_v8 = vadd.f32 %v4709_v0, %v4708_v43  ;;  %v4711_v39 = vpop.f32.mrb[86].mxu0  ;;  %v3569_v61 = vadd.f32 %v4304_v11, %v3554_v35 }
 0x272   : > { %v4712_v9 = vpop.f32.mrb[87].mxu0  ;;  %v3576_v5 = vmax.f32 %v3568_v3, 0.0 }
 0x273   : > { %v3485_v16 = vadd.f32 %v4685_v36, %v4645_v34  ;;  %v3531_v4 = vadd.f32 %v4710_v8, %v3466_v20  ;;  %v4713_v12 = vadd.f32 %v4712_v9, %v4711_v39  ;;  %v3577_v13 = vmax.f32 %v3569_v61, 0.0 }
 0x275   : > { %v3555_v24 = vadd.f32 %v3531_v4, %v5988_v38  ;;  %v3534_v55 = vadd.f32 %v4713_v12, %v3469_v29  ;;  %v3584_v14 = vpack.c.bf16 %v3577_v13, %v3576_v5 }
 0x277   : > { %v3570_v27 = vadd.f32 %v4304_v11, %v3555_v24  ;;  %v3556_v25 = vadd.f32 %v3534_v55, %v5990_v23  ;;  %v4714_v53 = vpop.f32.mrb[88].mxu0  ;;  %4754 = vmatprep.mubr.bf16.mxu1 %v3584_v14 }
 0x278   : > { %v4715_v17 = vpop.f32.mrb[89].mxu0 }
 0x279   : > { %v3571_v18 = vadd.f32 %v4304_v11, %v3556_v25  ;;  %v4716_v52 = vadd.f32 %v4715_v17, %v4714_v53  ;;  %v4717_v50 = vpop.f32.mrb[90].mxu0  ;;  %v3578_v46 = vmax.f32 %v3570_v27, 0.0 }
 0x27a   : > { %v4718_v19 = vpop.f32.mrb[91].mxu0 }
 0x27b   : > { %v3579_v41 = vmax.f32 %v3571_v18, 0.0  ;;  %v3539_v20 = vadd.f32 %v4716_v52, %v3474_v6  ;;  %v4719_v22 = vadd.f32 %v4718_v19, %v4717_v50 }
 0x27d   : > { %v3585_v47 = vpack.c.bf16 %v3579_v41, %v3578_v46  ;;  %v3557_v28 = vadd.f32 %v3539_v20, %v5992_v63  ;;  %v3542_v38 = vadd.f32 %v4719_v22, %v3477_v44 }
 0x27f   : > { %v3558_v29 = vadd.f32 %v3542_v38, %v5994_v56  ;;  %v4720_v30 = vpop.f32.mrb[92].mxu0  ;;  %4755 = vmatmul.mubr.bf16.vlgmr.msra.gmra.mrb[68].mxu1 %v3585_v47  ;;  %v3572_v23 = vadd.f32 %v4304_v11, %v3557_v28 }
 0x280   : > { %v4721_v34 = vpop.f32.mrb[93].mxu0 }
 0x281   : > { %v4722_v33 = vadd.f32 %v4721_v34, %v4720_v30  ;;  %v4723_v32 = vpop.f32.mrb[94].mxu0  ;;  %v3573_v59 = vadd.f32 %v4304_v11, %v3558_v29  ;;  %v3580_v62 = vmax.f32 %v3572_v23, 0.0 }
 0x282   : > { %v4724_v57 = vpop.f32.mrb[95].mxu0 }
 0x283   : > { %v3547_v54 = vadd.f32 %v4722_v33, %v3482_v60  ;;  %v4725_v37 = vadd.f32 %v4724_v57, %v4723_v32  ;;  %v3581_v31 = vmax.f32 %v3573_v59, 0.0 }
 0x285   : > { %v3559_v6 = vadd.f32 %v3547_v54, %v5996_v26  ;;  %v3550_v42 = vadd.f32 %v4725_v37, %v3485_v16  ;;  %v3586_v15 = vpack.c.bf16 %v3581_v31, %v3580_v62 }
 0x287   : > { %v3560_v63 = vadd.f32 %v3550_v42, %v5998_v10  ;;  %4758 = vmatprep.mubr.bf16.mxu1 %v3586_v15  ;;  %v3574_v56 = vadd.f32 %v4304_v11, %v3559_v6 }
 0x289   : > { %v3575_v44 = vadd.f32 %v4304_v11, %v3560_v63  ;;  %v3582_v7 = vmax.f32 %v3574_v56, 0.0 }
 0x28b   : > { %v3583_v40 = vmax.f32 %v3575_v44, 0.0 }
 0x28d   : > { %v3587_v21 = vpack.c.bf16 %v3583_v40, %v3582_v7 }
 0x28f   : > { %4759 = vmatmul.mubr.bf16.gmra.mrb[72].mxu1 %v3587_v21 }
 0x352   : > { %v4756_v49 = vpop.f32.mrb[68].mxu1 }
 0x353   : > { %v3693_v45 = vpop.f32.mrb[69].mxu1  ;;  %v3702_v26 = vadd.f32 %v4756_v49, %v4305_v1 }
 0x354   : > { %v4757_v2 = vpop.f32.mrb[70].mxu1  ;;  %v3694_v58 = vadd.f32 %v4305_v1, %v3693_v45 }
 0x355   : > { %v3705_v51 = vadd.f32 %v4757_v2, %v4305_v1  ;;  %v3696_v48 = vpop.f32.mrb[71].mxu1 }
 0x356   : > { %v3697_v10 = vadd.f32 %v4305_v1, %v3696_v48 }
 0x357   : > { %v4351_v11 = vpack.c.bf16 %v3705_v51, %v3702_v26 }
 0x358   : > { %v4346_v35 = vpack.c.bf16 %v3697_v10, %v3694_v58 }
 0x359   : > { %4363 = vst [vmem:[%s377_s25 + $0x8] sm:$0xff] %v4351_v11  }
 0x35a   : > { %4347 = vst [vmem:[%s377_s25] sm:$0xff] %v4346_v35  }
 0x362   : > { %v4760_v43 = vpop.f32.mrb[72].mxu1 }
 0x363   : > { %v3709_v3 = vpop.f32.mrb[73].mxu1  ;;  %v3718_v36 = vadd.f32 %v4760_v43, %v4305_v1 }
 0x364   : > { %v4761_v60 = vpop.f32.mrb[74].mxu1  ;;  %v3710_v39 = vadd.f32 %v4305_v1, %v3709_v3 }
 0x365   : > { %v3721_v0 = vadd.f32 %v4761_v60, %v4305_v1  ;;  %v3712_v8 = vpop.f32.mrb[75].mxu1 }
 0x366   : > { %v3713_v61 = vadd.f32 %v4305_v1, %v3712_v8 }
 0x367   : > { %v4361_v16 = vpack.c.bf16 %v3721_v0, %v3718_v36 }
 0x368   : > { %v4356_v9 = vpack.c.bf16 %v3713_v61, %v3710_v39 }
 0x369   : > { %4365 = vst [vmem:[%s377_s25 + $0x18] sm:$0xff] %v4361_v16  }
 0x36a   : > { %4364 = vst [vmem:[%s377_s25 + $0x10] sm:$0xff] %v4356_v9  }
 0x36b PF: > { %s18_s29 = sadd.s32 1, %s4991_s29   ;;  %s6039_s27 = smov %s4987_s28 }
 0x36c   : > { %p15_p5 = scmp.ge.s32.totalorder %s18_s29, 4   ;;  %s6040_s28 = smov %s6042_s30 }
 0x36e   :  { %17 = sbr.rel (!%p15_p5) target bundleno = 2 (0x2), region = 109 }

</bundles_post_ra>
